<compile_context>
chip_gen: v6e
topology: v6e:2x2x1
jax: 0.10.0
libtpu: 0.0.40
codegen_flags: <defaults>
</compile_context>

<pallas_src>
import jax
import jax.numpy as jnp
from jax.experimental import pallas as pl
from jax.experimental.pallas import tpu as pltpu

EPS = 1e-5  # nn.BatchNorm1d default eps


def _bn_relu(z):
    """BatchNorm1d(affine=False) in training mode (batch stats, biased var) + ReLU."""
    mean = jnp.mean(z, axis=0, keepdims=True)
    var = jnp.mean(jnp.square(z - mean), axis=0, keepdims=True)
    zn = (z - mean) * jax.lax.rsqrt(var + EPS)
    return jnp.maximum(zn, 0.0)


# ------------------------------------------------------------------
# Fused front-end kernel: img / embedding / text / meta paths + hc_MLP,
# all in one single-block pallas_call (everything stays in VMEM).
# ------------------------------------------------------------------

def _frontend_kernel(img_ref, texts_ref, meta_ref, cate_ref, lang_ref,
                     iw1, ib1, iw2, ib2, iw3, ib3,
                     cw1, cb1, cw2, cb2,
                     lw1, lb1, lw2, lb2,
                     ew1, eb1, ew2, eb2,
                     convw, convb,
                     tw1, tb1, tw2, tb2,
                     mw1, mb1, mw2, mb2,
                     hw1, hb1, hw2, hb2,
                     fv_ref, h0_ref):
    def mm(x, w_ref, b_ref):
        # cast activations to the (bf16) weight dtype; accumulate f32
        return jnp.dot(x.astype(w_ref.dtype), w_ref[...],
                       preferred_element_type=jnp.float32) + b_ref[...]

    # image path (resnet101 replaced by precomputed (B, 2048) features)
    img_f = mm(_bn_relu(mm(_bn_relu(mm(img_ref[...], iw1, ib1)),
                           iw2, ib2)), iw3, ib3)                        # (B,128)

    # embedding path
    cate_f = mm(_bn_relu(mm(cate_ref[...], cw1, cb1)), cw2, cb2)        # (B,128)
    lang_f = mm(_bn_relu(mm(lang_ref[...], lw1, lb1)), lw2, lb2)        # (B,128)
    emb_f = mm(_bn_relu(mm(cate_f * lang_f, ew1, eb1)), ew2, eb2)       # (B,128)

    # text path: 1x1 Conv2d(5 -> 1) = weighted sum over the 5 text channels.
    # texts_ref is (5, B, 768); convw is (5, 1, 1); convb is (1, 1).
    n_txt = texts_ref.shape[0]
    x = convb[...] + texts_ref[0] * convw[0]
    for c in range(1, n_txt):
        x = x + texts_ref[c] * convw[c]                                 # (B,768)
    text_f = mm(_bn_relu(mm(x, tw1, tb1)), tw2, tb2)                    # (B,128)

    # meta path
    meta_f = mm(_bn_relu(mm(meta_ref[...], mw1, mb1)), mw2, mb2)        # (B,128)

    fv = jnp.concatenate([img_f, emb_f, text_f, meta_f], axis=1)        # (B,512)
    # h = hc_MLP(fv); c = hc_MLP(fv): same module/input -> identical, emit once
    h0 = mm(_bn_relu(mm(fv, hw1, hb1)), hw2, hb2)                       # (B,128)

    fv_ref[...] = fv
    h0_ref[...] = h0


def frontend(img, texts, meta, cate_emb, lang_emb, p):
    B = img.shape[0]
    H = 128
    texts_t = jnp.transpose(texts, (1, 0, 2))          # (5, B, 768) lane-dense slabs
    return pl.pallas_call(
        _frontend_kernel,
        out_shape=(jax.ShapeDtypeStruct((B, 4 * H), jnp.float32),
                   jax.ShapeDtypeStruct((B, H), jnp.float32)),
        compiler_params=pltpu.CompilerParams(vmem_limit_bytes=32 * 1024 * 1024),
    )(img, texts_t, meta, cate_emb, lang_emb,
      *p['img_MLP'], *p['cate_MLP'], *p['lang_MLP'], *p['emb_MLP'],
      p['conv_w'], p['conv_b'], *p['text_MLP'], *p['meta_MLP'], *p['hc_MLP'])


# ------------------------------------------------------------------
# Recurrent kernel: x_MLP_list[i] -> LSTMCell_list[i] -> MLPo_list[i]
# grid = (seq_length,), h/c carried in VMEM scratch across grid steps.
# Large per-step weights streamed (bf16); tiny per-step tensors are
# resident full stacks indexed by pl.program_id(0).
# ------------------------------------------------------------------

def _seq_kernel(fv_ref, h0_ref,
                xw1_ref, xw2_ref, wcat_ref, ow1_ref, ow2_ref,
                xb1_ref, xb2_ref, blstm_ref, ob1_ref, ob2_ref, ow3_ref, ob3_ref,
                outf_ref,
                h_scr, c_scr):
    B = h_scr.shape[0]
    H = h_scr.shape[1]
    i = pl.program_id(0)

    @pl.when(i == 0)
    def _():
        h_scr[...] = h0_ref[...]
        c_scr[...] = h0_ref[...]          # c0 == h0 (same hc_MLP, same input)

    fv = fv_ref[...]                                           # (B, 4H) f32

    # x_MLP_list[i]: Linear(512,768)+BN+ReLU, Linear(768,128)  (bf16 weights)
    z = _bn_relu(jnp.dot(fv.astype(jnp.bfloat16), xw1_ref[0],
                         preferred_element_type=jnp.float32) + xb1_ref[i])
    x = jnp.dot(z.astype(jnp.bfloat16), xw2_ref[0],
                preferred_element_type=jnp.float32) + xb2_ref[i]     # (B, H)

    # LSTMCell_list[i]: fused gate matmul (PyTorch gate order i, f, g, o)
    h = h_scr[...]
    c = c_scr[...]
    xh = jnp.concatenate([x, h], axis=1).astype(jnp.bfloat16)        # (B, 2H)
    gates = (jnp.dot(xh, wcat_ref[0], preferred_element_type=jnp.float32)
             + blstm_ref[i])                                         # (B, 4H)
    i_g = jax.nn.sigmoid(gates[:, 0:H])
    f_g = jax.nn.sigmoid(gates[:, H:2 * H])
    g_g = jnp.tanh(gates[:, 2 * H:3 * H])
    o_g = jax.nn.sigmoid(gates[:, 3 * H:4 * H])
    c_new = f_g * c + i_g * g_g
    h_new = o_g * jnp.tanh(c_new)
    h_scr[...] = h_new
    c_scr[...] = c_new

    s = jnp.concatenate([h_new, c_new], axis=1)                      # (B, 2H)

    # MLPo_list[i]: Linear(256,128)+BN+ReLU, Linear(128,64)+BN+ReLU, Linear(64,1)
    z1 = _bn_relu(jnp.dot(s.astype(jnp.bfloat16), ow1_ref[0],
                          preferred_element_type=jnp.float32) + ob1_ref[i])
    z2 = _bn_relu(jnp.dot(z1.astype(jnp.bfloat16), ow2_ref[0],
                          preferred_element_type=jnp.float32) + ob2_ref[i])
    # ow3 stored pre-transposed as (1, H//2): last linear done as a lane reduce.
    o = jnp.sum(z2 * ow3_ref[i], axis=1, keepdims=True) + ob3_ref[i]  # (B, 1)

    # Lane-dense packed output: [h, c, o broadcast over H lanes] -> (B, 3H)
    outf_ref[0] = jnp.concatenate([s, jnp.broadcast_to(o, (B, H))], axis=1)


def seq_lstm(fv, h0, sp):
    B = fv.shape[0]
    S = sp['xw1'].shape[0]
    H = h0.shape[1]

    step = lambda i: (i, 0, 0)
    fixed2 = lambda i: (0, 0)
    fixed3 = lambda i: (0, 0, 0)

    grid_spec = pltpu.PrefetchScalarGridSpec(
        num_scalar_prefetch=0,
        grid=(S,),
        in_specs=[
            pl.BlockSpec((B, 4 * H), fixed2),          # feature_vector (resident)
            pl.BlockSpec((B, H), fixed2),              # h0 == c0 (resident)
            # large per-step streamed weights (bf16, double-buffered)
            pl.BlockSpec((1, 4 * H, 768), step),       # x_MLP w1
            pl.BlockSpec((1, 768, H), step),           # x_MLP w2
            pl.BlockSpec((1, 2 * H, 4 * H), step),     # fused lstm [w_ih; w_hh]
            pl.BlockSpec((1, 2 * H, H), step),         # MLPo w1
            pl.BlockSpec((1, H, H // 2), step),        # MLPo w2
            # small full-stack resident tensors (constant block index -> DMA'd once)
            pl.BlockSpec((S, 1, 768), fixed3),         # x_MLP b1
            pl.BlockSpec((S, 1, H), fixed3),           # x_MLP b2
            pl.BlockSpec((S, 1, 4 * H), fixed3),       # lstm b_ih + b_hh
            pl.BlockSpec((S, 1, H), fixed3),           # MLPo b1
            pl.BlockSpec((S, 1, H // 2), fixed3),      # MLPo b2
            pl.BlockSpec((S, 1, H // 2), fixed3),      # MLPo w3 (transposed)
            pl.BlockSpec((S, 1, 1), fixed3),           # MLPo b3
        ],
        out_specs=pl.BlockSpec((1, B, 3 * H), step),   # packed [h, c, o]
        scratch_shapes=[pltpu.VMEM((B, H), jnp.float32),
                        pltpu.VMEM((B, H), jnp.float32)],
    )

    return pl.pallas_call(
        _seq_kernel,
        grid_spec=grid_spec,
        out_shape=jax.ShapeDtypeStruct((S, B, 3 * H), jnp.float32),
        compiler_params=pltpu.CompilerParams(
            dimension_semantics=("arbitrary",),
            vmem_limit_bytes=32 * 1024 * 1024),
    )(fv, h0,
      sp['xw1'], sp['xw2'], sp['wcat'], sp['ow1'], sp['ow2'],
      sp['xb1'], sp['xb2'], sp['blstm'], sp['ob1'], sp['ob2'],
      sp['ow3'], sp['ob3'])


# ------------------------------------------------------------------
# Parameters (deterministic, shapes from youtube_lstm3.__init__)
# ------------------------------------------------------------------

def init_model_params(key, seq_length, vector_len=128):
    keys = iter(jax.random.split(key, 512))
    BF = jnp.bfloat16

    def lin(fan_in, fan_out, w_dtype=jnp.float32):
        kw, kb = jax.random.split(next(keys))
        bound = float(fan_in) ** -0.5
        w = jax.random.uniform(kw, (fan_in, fan_out), jnp.float32, -bound, bound)
        b = jax.random.uniform(kb, (1, fan_out), jnp.float32, -bound, bound)
        return w.astype(w_dtype), b

    H = vector_len
    p = {}
    # weights in bf16 (halves HBM weight traffic); biases stay f32
    p['img_MLP'] = (*lin(2048, 1024, BF), *lin(1024, 512, BF), *lin(512, 128, BF))
    p['cate_table'] = jax.random.normal(next(keys), (16, 128), jnp.float32)
    p['lang_table'] = jax.random.normal(next(keys), (7, 128), jnp.float32)
    p['cate_MLP'] = (*lin(128, 256, BF), *lin(256, 128, BF))
    p['lang_MLP'] = (*lin(128, 256, BF), *lin(256, 128, BF))
    p['emb_MLP'] = (*lin(128, 256, BF), *lin(256, 128, BF))
    p['text_MLP'] = (*lin(768, 512, BF), *lin(512, 128, BF))
    p['meta_MLP'] = (*lin(6, 128, BF), *lin(128, 128, BF))
    p['hc_MLP'] = (*lin(4 * H, 512, BF), *lin(512, H, BF))

    # Conv2d(5, 1, 1): weight ~ N(1/5, 0.01), bias ~ U(-1/sqrt(5), 1/sqrt(5))
    p['conv_w'] = 0.2 + 0.01 * jax.random.normal(next(keys), (5, 1, 1), jnp.float32)
    cb = float(5) ** -0.5
    p['conv_b'] = jax.random.uniform(next(keys), (1, 1), jnp.float32, -cb, cb)

    seq = {k: [] for k in ['xw1', 'xb1', 'xw2', 'xb2', 'wcat', 'blstm',
                           'ow1', 'ob1', 'ow2', 'ob2', 'ow3', 'ob3']}
    lb = float(H) ** -0.5
    for _ in range(seq_length):
        w1, b1 = lin(4 * H, 768, BF)
        w2, b2 = lin(768, H, BF)
        seq['xw1'].append(w1); seq['xb1'].append(b1)
        seq['xw2'].append(w2); seq['xb2'].append(b2)
        # LSTMCell params, init U(-1/sqrt(H), 1/sqrt(H)); stored transposed (in, 4H)
        wih = jax.random.uniform(next(keys), (H, 4 * H), jnp.float32, -lb, lb)
        whh = jax.random.uniform(next(keys), (H, 4 * H), jnp.float32, -lb, lb)
        bih = jax.random.uniform(next(keys), (1, 4 * H), jnp.float32, -lb, lb)
        bhh = jax.random.uniform(next(keys), (1, 4 * H), jnp.float32, -lb, lb)
        # fuse gate matmuls: concat([x, h]) @ [wih; whh] + (bih + bhh)
        seq['wcat'].append(jnp.concatenate([wih, whh], axis=0).astype(BF))
        seq['blstm'].append(bih + bhh)
        ow1, ob1 = lin(2 * H, H, BF)
        ow2, ob2 = lin(H, H // 2, BF)
        ow3, ob3 = lin(H // 2, 1)
        seq['ow1'].append(ow1); seq['ob1'].append(ob1)
        seq['ow2'].append(ow2); seq['ob2'].append(ob2)
        seq['ow3'].append(ow3.T)          # stored as (1, H//2), f32
        seq['ob3'].append(ob3)            # (1, 1)
    p['seq'] = {k: jnp.stack(v) for k, v in seq.items()}
    return p


# ------------------------------------------------------------------
# Forward pass
# ------------------------------------------------------------------

def forward(p, img_features, texts, meta, cate_ids, lang_ids):
    # embedding lookups (string vocab / langid lookups replaced by int ids)
    cate_emb = jnp.take(p['cate_table'], cate_ids, axis=0)    # (B, 128)
    lang_emb = jnp.take(p['lang_table'], lang_ids, axis=0)    # (B, 128)

    # fused front-end: all feature MLPs + hc_MLP in one kernel
    fv, h0 = frontend(img_features, texts, meta, cate_emb, lang_emb, p)

    packed = seq_lstm(fv, h0, p['seq'])           # (S, B, 3H)
    H = h0.shape[1]
    out_f = jnp.transpose(packed[:, :, :2 * H], (1, 0, 2))    # (B, S, 2H)
    out = packed[:, :, 2 * H].T                               # (B, S)
    return out, out_f


if __name__ == "__main__":
    B = 8           # batch_size
    S = 8           # seq_length
    VEC = 128       # vector_len

    key = jax.random.PRNGKey(0)
    kp, ki, kt, km, kc, kl = jax.random.split(key, 6)

    params = init_model_params(kp, S, VEC)

    img_features = jax.random.normal(ki, (B, 2048), jnp.float32)   # resnet101 output
    texts = jax.random.normal(kt, (B, 5, 768), jnp.float32)        # 5 BERT pooled outputs
    meta = jax.random.normal(km, (B, 6), jnp.float32)
    cate_ids = jax.random.randint(kc, (B,), 0, 16)
    lang_ids = jax.random.randint(kl, (B,), 0, 7)

    out, out_f = forward(params, img_features, texts, meta, cate_ids, lang_ids)
    out, out_f = jax.block_until_ready((out, out_f))

    assert out.shape == (B, S), out.shape
    assert out_f.shape == (B, S, 2 * VEC), out_f.shape
    assert bool(jnp.all(jnp.isfinite(out))) and bool(jnp.all(jnp.isfinite(out_f)))
    print("KERNEL_OK")
</pallas_src>

<mosaic_0001>
module attributes {stable_mosaic.version = 11 : i64} {
  func.func @_frontend_kernel(%arg0: memref<8x2048xf32, #tpu.memory_space<vmem>>, %arg1: memref<5x8x768xf32, #tpu.memory_space<vmem>>, %arg2: memref<8x6xf32, #tpu.memory_space<vmem>>, %arg3: memref<8x128xf32, #tpu.memory_space<vmem>>, %arg4: memref<8x128xf32, #tpu.memory_space<vmem>>, %arg5: memref<2048x1024xbf16, #tpu.memory_space<vmem>>, %arg6: memref<1x1024xf32, #tpu.memory_space<vmem>>, %arg7: memref<1024x512xbf16, #tpu.memory_space<vmem>>, %arg8: memref<1x512xf32, #tpu.memory_space<vmem>>, %arg9: memref<512x128xbf16, #tpu.memory_space<vmem>>, %arg10: memref<1x128xf32, #tpu.memory_space<vmem>>, %arg11: memref<128x256xbf16, #tpu.memory_space<vmem>>, %arg12: memref<1x256xf32, #tpu.memory_space<vmem>>, %arg13: memref<256x128xbf16, #tpu.memory_space<vmem>>, %arg14: memref<1x128xf32, #tpu.memory_space<vmem>>, %arg15: memref<128x256xbf16, #tpu.memory_space<vmem>>, %arg16: memref<1x256xf32, #tpu.memory_space<vmem>>, %arg17: memref<256x128xbf16, #tpu.memory_space<vmem>>, %arg18: memref<1x128xf32, #tpu.memory_space<vmem>>, %arg19: memref<128x256xbf16, #tpu.memory_space<vmem>>, %arg20: memref<1x256xf32, #tpu.memory_space<vmem>>, %arg21: memref<256x128xbf16, #tpu.memory_space<vmem>>, %arg22: memref<1x128xf32, #tpu.memory_space<vmem>>, %arg23: memref<5x1x1xf32, #tpu.memory_space<vmem>>, %arg24: memref<1x1xf32, #tpu.memory_space<vmem>>, %arg25: memref<768x512xbf16, #tpu.memory_space<vmem>>, %arg26: memref<1x512xf32, #tpu.memory_space<vmem>>, %arg27: memref<512x128xbf16, #tpu.memory_space<vmem>>, %arg28: memref<1x128xf32, #tpu.memory_space<vmem>>, %arg29: memref<6x128xbf16, #tpu.memory_space<vmem>>, %arg30: memref<1x128xf32, #tpu.memory_space<vmem>>, %arg31: memref<128x128xbf16, #tpu.memory_space<vmem>>, %arg32: memref<1x128xf32, #tpu.memory_space<vmem>>, %arg33: memref<512x512xbf16, #tpu.memory_space<vmem>>, %arg34: memref<1x512xf32, #tpu.memory_space<vmem>>, %arg35: memref<512x128xbf16, #tpu.memory_space<vmem>>, %arg36: memref<1x128xf32, #tpu.memory_space<vmem>>, %arg37: memref<8x512xf32, #tpu.memory_space<vmem>>, %arg38: memref<8x128xf32, #tpu.memory_space<vmem>>) attributes {dimension_semantics = [], scalar_prefetch = 0 : i64, scratch_operands = 0 : i64, tpu.core_type = #tpu.core_type<tc>} {
    %c0 = arith.constant 0 : index
    %c0_0 = arith.constant 0 : index
    %0 = vector.load %arg0[%c0, %c0_0] : memref<8x2048xf32, #tpu.memory_space<vmem>>, vector<8x2048xf32>
    %1 = arith.truncf %0 : vector<8x2048xf32> to vector<8x2048xbf16>
    %c0_1 = arith.constant 0 : index
    %c0_2 = arith.constant 0 : index
    %2 = vector.load %arg5[%c0_1, %c0_2] : memref<2048x1024xbf16, #tpu.memory_space<vmem>>, vector<2048x1024xbf16>
    %cst = arith.constant dense<0.000000e+00> : vector<8x1024xf32>
    %3 = tpu.matmul %1, %2, %cst {dimension_numbers = #tpu.dot_dimension_numbers<[1], [0], [0], [1], [0, 0, 1, 1], [], []>} : vector<8x2048xbf16>, vector<2048x1024xbf16>, vector<8x1024xf32> -> vector<8x1024xf32>
    %c0_3 = arith.constant 0 : index
    %c0_4 = arith.constant 0 : index
    %4 = vector.load %arg6[%c0_3, %c0_4] : memref<1x1024xf32, #tpu.memory_space<vmem>>, vector<1x1024xf32>
    %5 = vector.broadcast %4 : vector<1x1024xf32> to vector<8x1024xf32>
    %6 = arith.addf %3, %5 : vector<8x1024xf32>
    %cst_5 = arith.constant dense<0.000000e+00> : vector<1024xf32>
    %7 = vector.multi_reduction <add>, %6, %cst_5 [0] : vector<8x1024xf32> to vector<1024xf32>
    %8 = vector.shape_cast %7 : vector<1024xf32> to vector<1x1024xf32>
    %cst_6 = arith.constant 8.000000e+00 : f32
    %9 = vector.broadcast %cst_6 : f32 to vector<1x1024xf32>
    %10 = arith.divf %8, %9 : vector<1x1024xf32>
    %11 = vector.broadcast %10 : vector<1x1024xf32> to vector<8x1024xf32>
    %12 = arith.subf %6, %11 : vector<8x1024xf32>
    %13 = arith.mulf %12, %12 : vector<8x1024xf32>
    %cst_7 = arith.constant dense<0.000000e+00> : vector<1024xf32>
    %14 = vector.multi_reduction <add>, %13, %cst_7 [0] : vector<8x1024xf32> to vector<1024xf32>
    %15 = vector.shape_cast %14 : vector<1024xf32> to vector<1x1024xf32>
    %cst_8 = arith.constant 8.000000e+00 : f32
    %16 = vector.broadcast %cst_8 : f32 to vector<1x1024xf32>
    %17 = arith.divf %15, %16 : vector<1x1024xf32>
    %18 = vector.broadcast %10 : vector<1x1024xf32> to vector<8x1024xf32>
    %19 = arith.subf %6, %18 : vector<8x1024xf32>
    %cst_9 = arith.constant 9.99999974E-6 : f32
    %20 = vector.broadcast %cst_9 : f32 to vector<1x1024xf32>
    %21 = arith.addf %17, %20 : vector<1x1024xf32>
    %22 = math.rsqrt %21 : vector<1x1024xf32>
    %23 = vector.broadcast %22 : vector<1x1024xf32> to vector<8x1024xf32>
    %24 = arith.mulf %19, %23 : vector<8x1024xf32>
    %cst_10 = arith.constant 0.000000e+00 : f32
    %25 = vector.broadcast %cst_10 : f32 to vector<8x1024xf32>
    %26 = arith.maximumf %24, %25 : vector<8x1024xf32>
    %27 = arith.truncf %26 : vector<8x1024xf32> to vector<8x1024xbf16>
    %c0_11 = arith.constant 0 : index
    %c0_12 = arith.constant 0 : index
    %28 = vector.load %arg7[%c0_11, %c0_12] : memref<1024x512xbf16, #tpu.memory_space<vmem>>, vector<1024x512xbf16>
    %cst_13 = arith.constant dense<0.000000e+00> : vector<8x512xf32>
    %29 = tpu.matmul %27, %28, %cst_13 {dimension_numbers = #tpu.dot_dimension_numbers<[1], [0], [0], [1], [0, 0, 1, 1], [], []>} : vector<8x1024xbf16>, vector<1024x512xbf16>, vector<8x512xf32> -> vector<8x512xf32>
    %c0_14 = arith.constant 0 : index
    %c0_15 = arith.constant 0 : index
    %30 = vector.load %arg8[%c0_14, %c0_15] : memref<1x512xf32, #tpu.memory_space<vmem>>, vector<1x512xf32>
    %31 = vector.broadcast %30 : vector<1x512xf32> to vector<8x512xf32>
    %32 = arith.addf %29, %31 : vector<8x512xf32>
    %cst_16 = arith.constant dense<0.000000e+00> : vector<512xf32>
    %33 = vector.multi_reduction <add>, %32, %cst_16 [0] : vector<8x512xf32> to vector<512xf32>
    %34 = vector.shape_cast %33 : vector<512xf32> to vector<1x512xf32>
    %cst_17 = arith.constant 8.000000e+00 : f32
    %35 = vector.broadcast %cst_17 : f32 to vector<1x512xf32>
    %36 = arith.divf %34, %35 : vector<1x512xf32>
    %37 = vector.broadcast %36 : vector<1x512xf32> to vector<8x512xf32>
    %38 = arith.subf %32, %37 : vector<8x512xf32>
    %39 = arith.mulf %38, %38 : vector<8x512xf32>
    %cst_18 = arith.constant dense<0.000000e+00> : vector<512xf32>
    %40 = vector.multi_reduction <add>, %39, %cst_18 [0] : vector<8x512xf32> to vector<512xf32>
    %41 = vector.shape_cast %40 : vector<512xf32> to vector<1x512xf32>
    %cst_19 = arith.constant 8.000000e+00 : f32
    %42 = vector.broadcast %cst_19 : f32 to vector<1x512xf32>
    %43 = arith.divf %41, %42 : vector<1x512xf32>
    %44 = vector.broadcast %36 : vector<1x512xf32> to vector<8x512xf32>
    %45 = arith.subf %32, %44 : vector<8x512xf32>
    %cst_20 = arith.constant 9.99999974E-6 : f32
    %46 = vector.broadcast %cst_20 : f32 to vector<1x512xf32>
    %47 = arith.addf %43, %46 : vector<1x512xf32>
    %48 = math.rsqrt %47 : vector<1x512xf32>
    %49 = vector.broadcast %48 : vector<1x512xf32> to vector<8x512xf32>
    %50 = arith.mulf %45, %49 : vector<8x512xf32>
    %cst_21 = arith.constant 0.000000e+00 : f32
    %51 = vector.broadcast %cst_21 : f32 to vector<8x512xf32>
    %52 = arith.maximumf %50, %51 : vector<8x512xf32>
    %53 = arith.truncf %52 : vector<8x512xf32> to vector<8x512xbf16>
    %c0_22 = arith.constant 0 : index
    %c0_23 = arith.constant 0 : index
    %54 = vector.load %arg9[%c0_22, %c0_23] : memref<512x128xbf16, #tpu.memory_space<vmem>>, vector<512x128xbf16>
    %cst_24 = arith.constant dense<0.000000e+00> : vector<8x128xf32>
    %55 = tpu.matmul %53, %54, %cst_24 {dimension_numbers = #tpu.dot_dimension_numbers<[1], [0], [0], [1], [0, 0, 1, 1], [], []>} : vector<8x512xbf16>, vector<512x128xbf16>, vector<8x128xf32> -> vector<8x128xf32>
    %c0_25 = arith.constant 0 : index
    %c0_26 = arith.constant 0 : index
    %56 = vector.load %arg10[%c0_25, %c0_26] : memref<1x128xf32, #tpu.memory_space<vmem>>, vector<1x128xf32>
    %57 = vector.broadcast %56 : vector<1x128xf32> to vector<8x128xf32>
    %58 = arith.addf %55, %57 : vector<8x128xf32>
    %c0_27 = arith.constant 0 : index
    %c0_28 = arith.constant 0 : index
    %59 = vector.load %arg3[%c0_27, %c0_28] : memref<8x128xf32, #tpu.memory_space<vmem>>, vector<8x128xf32>
    %60 = arith.truncf %59 : vector<8x128xf32> to vector<8x128xbf16>
    %c0_29 = arith.constant 0 : index
    %c0_30 = arith.constant 0 : index
    %61 = vector.load %arg11[%c0_29, %c0_30] : memref<128x256xbf16, #tpu.memory_space<vmem>>, vector<128x256xbf16>
    %cst_31 = arith.constant dense<0.000000e+00> : vector<8x256xf32>
    %62 = tpu.matmul %60, %61, %cst_31 {dimension_numbers = #tpu.dot_dimension_numbers<[1], [0], [0], [1], [0, 0, 1, 1], [], []>} : vector<8x128xbf16>, vector<128x256xbf16>, vector<8x256xf32> -> vector<8x256xf32>
    %c0_32 = arith.constant 0 : index
    %c0_33 = arith.constant 0 : index
    %63 = vector.load %arg12[%c0_32, %c0_33] : memref<1x256xf32, #tpu.memory_space<vmem>>, vector<1x256xf32>
    %64 = vector.broadcast %63 : vector<1x256xf32> to vector<8x256xf32>
    %65 = arith.addf %62, %64 : vector<8x256xf32>
    %cst_34 = arith.constant dense<0.000000e+00> : vector<256xf32>
    %66 = vector.multi_reduction <add>, %65, %cst_34 [0] : vector<8x256xf32> to vector<256xf32>
    %67 = vector.shape_cast %66 : vector<256xf32> to vector<1x256xf32>
    %cst_35 = arith.constant 8.000000e+00 : f32
    %68 = vector.broadcast %cst_35 : f32 to vector<1x256xf32>
    %69 = arith.divf %67, %68 : vector<1x256xf32>
    %70 = vector.broadcast %69 : vector<1x256xf32> to vector<8x256xf32>
    %71 = arith.subf %65, %70 : vector<8x256xf32>
    %72 = arith.mulf %71, %71 : vector<8x256xf32>
    %cst_36 = arith.constant dense<0.000000e+00> : vector<256xf32>
    %73 = vector.multi_reduction <add>, %72, %cst_36 [0] : vector<8x256xf32> to vector<256xf32>
    %74 = vector.shape_cast %73 : vector<256xf32> to vector<1x256xf32>
    %cst_37 = arith.constant 8.000000e+00 : f32
    %75 = vector.broadcast %cst_37 : f32 to vector<1x256xf32>
    %76 = arith.divf %74, %75 : vector<1x256xf32>
    %77 = vector.broadcast %69 : vector<1x256xf32> to vector<8x256xf32>
    %78 = arith.subf %65, %77 : vector<8x256xf32>
    %cst_38 = arith.constant 9.99999974E-6 : f32
    %79 = vector.broadcast %cst_38 : f32 to vector<1x256xf32>
    %80 = arith.addf %76, %79 : vector<1x256xf32>
    %81 = math.rsqrt %80 : vector<1x256xf32>
    %82 = vector.broadcast %81 : vector<1x256xf32> to vector<8x256xf32>
    %83 = arith.mulf %78, %82 : vector<8x256xf32>
    %cst_39 = arith.constant 0.000000e+00 : f32
    %84 = vector.broadcast %cst_39 : f32 to vector<8x256xf32>
    %85 = arith.maximumf %83, %84 : vector<8x256xf32>
    %86 = arith.truncf %85 : vector<8x256xf32> to vector<8x256xbf16>
    %c0_40 = arith.constant 0 : index
    %c0_41 = arith.constant 0 : index
    %87 = vector.load %arg13[%c0_40, %c0_41] : memref<256x128xbf16, #tpu.memory_space<vmem>>, vector<256x128xbf16>
    %cst_42 = arith.constant dense<0.000000e+00> : vector<8x128xf32>
    %88 = tpu.matmul %86, %87, %cst_42 {dimension_numbers = #tpu.dot_dimension_numbers<[1], [0], [0], [1], [0, 0, 1, 1], [], []>} : vector<8x256xbf16>, vector<256x128xbf16>, vector<8x128xf32> -> vector<8x128xf32>
    %c0_43 = arith.constant 0 : index
    %c0_44 = arith.constant 0 : index
    %89 = vector.load %arg14[%c0_43, %c0_44] : memref<1x128xf32, #tpu.memory_space<vmem>>, vector<1x128xf32>
    %90 = vector.broadcast %89 : vector<1x128xf32> to vector<8x128xf32>
    %91 = arith.addf %88, %90 : vector<8x128xf32>
    %c0_45 = arith.constant 0 : index
    %c0_46 = arith.constant 0 : index
    %92 = vector.load %arg4[%c0_45, %c0_46] : memref<8x128xf32, #tpu.memory_space<vmem>>, vector<8x128xf32>
    %93 = arith.truncf %92 : vector<8x128xf32> to vector<8x128xbf16>
    %c0_47 = arith.constant 0 : index
    %c0_48 = arith.constant 0 : index
    %94 = vector.load %arg15[%c0_47, %c0_48] : memref<128x256xbf16, #tpu.memory_space<vmem>>, vector<128x256xbf16>
    %cst_49 = arith.constant dense<0.000000e+00> : vector<8x256xf32>
    %95 = tpu.matmul %93, %94, %cst_49 {dimension_numbers = #tpu.dot_dimension_numbers<[1], [0], [0], [1], [0, 0, 1, 1], [], []>} : vector<8x128xbf16>, vector<128x256xbf16>, vector<8x256xf32> -> vector<8x256xf32>
    %c0_50 = arith.constant 0 : index
    %c0_51 = arith.constant 0 : index
    %96 = vector.load %arg16[%c0_50, %c0_51] : memref<1x256xf32, #tpu.memory_space<vmem>>, vector<1x256xf32>
    %97 = vector.broadcast %96 : vector<1x256xf32> to vector<8x256xf32>
    %98 = arith.addf %95, %97 : vector<8x256xf32>
    %cst_52 = arith.constant dense<0.000000e+00> : vector<256xf32>
    %99 = vector.multi_reduction <add>, %98, %cst_52 [0] : vector<8x256xf32> to vector<256xf32>
    %100 = vector.shape_cast %99 : vector<256xf32> to vector<1x256xf32>
    %cst_53 = arith.constant 8.000000e+00 : f32
    %101 = vector.broadcast %cst_53 : f32 to vector<1x256xf32>
    %102 = arith.divf %100, %101 : vector<1x256xf32>
    %103 = vector.broadcast %102 : vector<1x256xf32> to vector<8x256xf32>
    %104 = arith.subf %98, %103 : vector<8x256xf32>
    %105 = arith.mulf %104, %104 : vector<8x256xf32>
    %cst_54 = arith.constant dense<0.000000e+00> : vector<256xf32>
    %106 = vector.multi_reduction <add>, %105, %cst_54 [0] : vector<8x256xf32> to vector<256xf32>
    %107 = vector.shape_cast %106 : vector<256xf32> to vector<1x256xf32>
    %cst_55 = arith.constant 8.000000e+00 : f32
    %108 = vector.broadcast %cst_55 : f32 to vector<1x256xf32>
    %109 = arith.divf %107, %108 : vector<1x256xf32>
    %110 = vector.broadcast %102 : vector<1x256xf32> to vector<8x256xf32>
    %111 = arith.subf %98, %110 : vector<8x256xf32>
    %cst_56 = arith.constant 9.99999974E-6 : f32
    %112 = vector.broadcast %cst_56 : f32 to vector<1x256xf32>
    %113 = arith.addf %109, %112 : vector<1x256xf32>
    %114 = math.rsqrt %113 : vector<1x256xf32>
    %115 = vector.broadcast %114 : vector<1x256xf32> to vector<8x256xf32>
    %116 = arith.mulf %111, %115 : vector<8x256xf32>
    %cst_57 = arith.constant 0.000000e+00 : f32
    %117 = vector.broadcast %cst_57 : f32 to vector<8x256xf32>
    %118 = arith.maximumf %116, %117 : vector<8x256xf32>
    %119 = arith.truncf %118 : vector<8x256xf32> to vector<8x256xbf16>
    %c0_58 = arith.constant 0 : index
    %c0_59 = arith.constant 0 : index
    %120 = vector.load %arg17[%c0_58, %c0_59] : memref<256x128xbf16, #tpu.memory_space<vmem>>, vector<256x128xbf16>
    %cst_60 = arith.constant dense<0.000000e+00> : vector<8x128xf32>
    %121 = tpu.matmul %119, %120, %cst_60 {dimension_numbers = #tpu.dot_dimension_numbers<[1], [0], [0], [1], [0, 0, 1, 1], [], []>} : vector<8x256xbf16>, vector<256x128xbf16>, vector<8x128xf32> -> vector<8x128xf32>
    %c0_61 = arith.constant 0 : index
    %c0_62 = arith.constant 0 : index
    %122 = vector.load %arg18[%c0_61, %c0_62] : memref<1x128xf32, #tpu.memory_space<vmem>>, vector<1x128xf32>
    %123 = vector.broadcast %122 : vector<1x128xf32> to vector<8x128xf32>
    %124 = arith.addf %121, %123 : vector<8x128xf32>
    %125 = arith.mulf %91, %124 : vector<8x128xf32>
    %126 = arith.truncf %125 : vector<8x128xf32> to vector<8x128xbf16>
    %c0_63 = arith.constant 0 : index
    %c0_64 = arith.constant 0 : index
    %127 = vector.load %arg19[%c0_63, %c0_64] : memref<128x256xbf16, #tpu.memory_space<vmem>>, vector<128x256xbf16>
    %cst_65 = arith.constant dense<0.000000e+00> : vector<8x256xf32>
    %128 = tpu.matmul %126, %127, %cst_65 {dimension_numbers = #tpu.dot_dimension_numbers<[1], [0], [0], [1], [0, 0, 1, 1], [], []>} : vector<8x128xbf16>, vector<128x256xbf16>, vector<8x256xf32> -> vector<8x256xf32>
    %c0_66 = arith.constant 0 : index
    %c0_67 = arith.constant 0 : index
    %129 = vector.load %arg20[%c0_66, %c0_67] : memref<1x256xf32, #tpu.memory_space<vmem>>, vector<1x256xf32>
    %130 = vector.broadcast %129 : vector<1x256xf32> to vector<8x256xf32>
    %131 = arith.addf %128, %130 : vector<8x256xf32>
    %cst_68 = arith.constant dense<0.000000e+00> : vector<256xf32>
    %132 = vector.multi_reduction <add>, %131, %cst_68 [0] : vector<8x256xf32> to vector<256xf32>
    %133 = vector.shape_cast %132 : vector<256xf32> to vector<1x256xf32>
    %cst_69 = arith.constant 8.000000e+00 : f32
    %134 = vector.broadcast %cst_69 : f32 to vector<1x256xf32>
    %135 = arith.divf %133, %134 : vector<1x256xf32>
    %136 = vector.broadcast %135 : vector<1x256xf32> to vector<8x256xf32>
    %137 = arith.subf %131, %136 : vector<8x256xf32>
    %138 = arith.mulf %137, %137 : vector<8x256xf32>
    %cst_70 = arith.constant dense<0.000000e+00> : vector<256xf32>
    %139 = vector.multi_reduction <add>, %138, %cst_70 [0] : vector<8x256xf32> to vector<256xf32>
    %140 = vector.shape_cast %139 : vector<256xf32> to vector<1x256xf32>
    %cst_71 = arith.constant 8.000000e+00 : f32
    %141 = vector.broadcast %cst_71 : f32 to vector<1x256xf32>
    %142 = arith.divf %140, %141 : vector<1x256xf32>
    %143 = vector.broadcast %135 : vector<1x256xf32> to vector<8x256xf32>
    %144 = arith.subf %131, %143 : vector<8x256xf32>
    %cst_72 = arith.constant 9.99999974E-6 : f32
    %145 = vector.broadcast %cst_72 : f32 to vector<1x256xf32>
    %146 = arith.addf %142, %145 : vector<1x256xf32>
    %147 = math.rsqrt %146 : vector<1x256xf32>
    %148 = vector.broadcast %147 : vector<1x256xf32> to vector<8x256xf32>
    %149 = arith.mulf %144, %148 : vector<8x256xf32>
    %cst_73 = arith.constant 0.000000e+00 : f32
    %150 = vector.broadcast %cst_73 : f32 to vector<8x256xf32>
    %151 = arith.maximumf %149, %150 : vector<8x256xf32>
    %152 = arith.truncf %151 : vector<8x256xf32> to vector<8x256xbf16>
    %c0_74 = arith.constant 0 : index
    %c0_75 = arith.constant 0 : index
    %153 = vector.load %arg21[%c0_74, %c0_75] : memref<256x128xbf16, #tpu.memory_space<vmem>>, vector<256x128xbf16>
    %cst_76 = arith.constant dense<0.000000e+00> : vector<8x128xf32>
    %154 = tpu.matmul %152, %153, %cst_76 {dimension_numbers = #tpu.dot_dimension_numbers<[1], [0], [0], [1], [0, 0, 1, 1], [], []>} : vector<8x256xbf16>, vector<256x128xbf16>, vector<8x128xf32> -> vector<8x128xf32>
    %c0_77 = arith.constant 0 : index
    %c0_78 = arith.constant 0 : index
    %155 = vector.load %arg22[%c0_77, %c0_78] : memref<1x128xf32, #tpu.memory_space<vmem>>, vector<1x128xf32>
    %156 = vector.broadcast %155 : vector<1x128xf32> to vector<8x128xf32>
    %157 = arith.addf %154, %156 : vector<8x128xf32>
    %c0_79 = arith.constant 0 : index
    %c0_80 = arith.constant 0 : index
    %158 = vector.load %arg24[%c0_79, %c0_80] : memref<1x1xf32, #tpu.memory_space<vmem>>, vector<1x1xf32>
    %c0_81 = arith.constant 0 : index
    %c0_82 = arith.constant 0 : index
    %c0_83 = arith.constant 0 : index
    %159 = vector.load %arg1[%c0_81, %c0_82, %c0_83] : memref<5x8x768xf32, #tpu.memory_space<vmem>>, vector<1x8x768xf32>
    %160 = vector.shape_cast %159 : vector<1x8x768xf32> to vector<8x768xf32>
    %c0_84 = arith.constant 0 : index
    %c0_85 = arith.constant 0 : index
    %c0_86 = arith.constant 0 : index
    %161 = vector.load %arg23[%c0_84, %c0_85, %c0_86] : memref<5x1x1xf32, #tpu.memory_space<vmem>>, vector<1x1x1xf32>
    %162 = vector.shape_cast %161 : vector<1x1x1xf32> to vector<1x1xf32>
    %163 = vector.broadcast %162 : vector<1x1xf32> to vector<8x768xf32>
    %164 = arith.mulf %160, %163 : vector<8x768xf32>
    %165 = vector.broadcast %158 : vector<1x1xf32> to vector<8x768xf32>
    %166 = arith.addf %165, %164 : vector<8x768xf32>
    %c1 = arith.constant 1 : index
    %c0_87 = arith.constant 0 : index
    %c0_88 = arith.constant 0 : index
    %167 = vector.load %arg1[%c1, %c0_87, %c0_88] : memref<5x8x768xf32, #tpu.memory_space<vmem>>, vector<1x8x768xf32>
    %168 = vector.shape_cast %167 : vector<1x8x768xf32> to vector<8x768xf32>
    %c1_89 = arith.constant 1 : index
    %c0_90 = arith.constant 0 : index
    %c0_91 = arith.constant 0 : index
    %169 = vector.load %arg23[%c1_89, %c0_90, %c0_91] : memref<5x1x1xf32, #tpu.memory_space<vmem>>, vector<1x1x1xf32>
    %170 = vector.shape_cast %169 : vector<1x1x1xf32> to vector<1x1xf32>
    %171 = vector.broadcast %170 : vector<1x1xf32> to vector<8x768xf32>
    %172 = arith.mulf %168, %171 : vector<8x768xf32>
    %173 = arith.addf %166, %172 : vector<8x768xf32>
    %c2 = arith.constant 2 : index
    %c0_92 = arith.constant 0 : index
    %c0_93 = arith.constant 0 : index
    %174 = vector.load %arg1[%c2, %c0_92, %c0_93] : memref<5x8x768xf32, #tpu.memory_space<vmem>>, vector<1x8x768xf32>
    %175 = vector.shape_cast %174 : vector<1x8x768xf32> to vector<8x768xf32>
    %c2_94 = arith.constant 2 : index
    %c0_95 = arith.constant 0 : index
    %c0_96 = arith.constant 0 : index
    %176 = vector.load %arg23[%c2_94, %c0_95, %c0_96] : memref<5x1x1xf32, #tpu.memory_space<vmem>>, vector<1x1x1xf32>
    %177 = vector.shape_cast %176 : vector<1x1x1xf32> to vector<1x1xf32>
    %178 = vector.broadcast %177 : vector<1x1xf32> to vector<8x768xf32>
    %179 = arith.mulf %175, %178 : vector<8x768xf32>
    %180 = arith.addf %173, %179 : vector<8x768xf32>
    %c3 = arith.constant 3 : index
    %c0_97 = arith.constant 0 : index
    %c0_98 = arith.constant 0 : index
    %181 = vector.load %arg1[%c3, %c0_97, %c0_98] : memref<5x8x768xf32, #tpu.memory_space<vmem>>, vector<1x8x768xf32>
    %182 = vector.shape_cast %181 : vector<1x8x768xf32> to vector<8x768xf32>
    %c3_99 = arith.constant 3 : index
    %c0_100 = arith.constant 0 : index
    %c0_101 = arith.constant 0 : index
    %183 = vector.load %arg23[%c3_99, %c0_100, %c0_101] : memref<5x1x1xf32, #tpu.memory_space<vmem>>, vector<1x1x1xf32>
    %184 = vector.shape_cast %183 : vector<1x1x1xf32> to vector<1x1xf32>
    %185 = vector.broadcast %184 : vector<1x1xf32> to vector<8x768xf32>
    %186 = arith.mulf %182, %185 : vector<8x768xf32>
    %187 = arith.addf %180, %186 : vector<8x768xf32>
    %c4 = arith.constant 4 : index
    %c0_102 = arith.constant 0 : index
    %c0_103 = arith.constant 0 : index
    %188 = vector.load %arg1[%c4, %c0_102, %c0_103] : memref<5x8x768xf32, #tpu.memory_space<vmem>>, vector<1x8x768xf32>
    %189 = vector.shape_cast %188 : vector<1x8x768xf32> to vector<8x768xf32>
    %c4_104 = arith.constant 4 : index
    %c0_105 = arith.constant 0 : index
    %c0_106 = arith.constant 0 : index
    %190 = vector.load %arg23[%c4_104, %c0_105, %c0_106] : memref<5x1x1xf32, #tpu.memory_space<vmem>>, vector<1x1x1xf32>
    %191 = vector.shape_cast %190 : vector<1x1x1xf32> to vector<1x1xf32>
    %192 = vector.broadcast %191 : vector<1x1xf32> to vector<8x768xf32>
    %193 = arith.mulf %189, %192 : vector<8x768xf32>
    %194 = arith.addf %187, %193 : vector<8x768xf32>
    %195 = arith.truncf %194 : vector<8x768xf32> to vector<8x768xbf16>
    %c0_107 = arith.constant 0 : index
    %c0_108 = arith.constant 0 : index
    %196 = vector.load %arg25[%c0_107, %c0_108] : memref<768x512xbf16, #tpu.memory_space<vmem>>, vector<768x512xbf16>
    %cst_109 = arith.constant dense<0.000000e+00> : vector<8x512xf32>
    %197 = tpu.matmul %195, %196, %cst_109 {dimension_numbers = #tpu.dot_dimension_numbers<[1], [0], [0], [1], [0, 0, 1, 1], [], []>} : vector<8x768xbf16>, vector<768x512xbf16>, vector<8x512xf32> -> vector<8x512xf32>
    %c0_110 = arith.constant 0 : index
    %c0_111 = arith.constant 0 : index
    %198 = vector.load %arg26[%c0_110, %c0_111] : memref<1x512xf32, #tpu.memory_space<vmem>>, vector<1x512xf32>
    %199 = vector.broadcast %198 : vector<1x512xf32> to vector<8x512xf32>
    %200 = arith.addf %197, %199 : vector<8x512xf32>
    %cst_112 = arith.constant dense<0.000000e+00> : vector<512xf32>
    %201 = vector.multi_reduction <add>, %200, %cst_112 [0] : vector<8x512xf32> to vector<512xf32>
    %202 = vector.shape_cast %201 : vector<512xf32> to vector<1x512xf32>
    %cst_113 = arith.constant 8.000000e+00 : f32
    %203 = vector.broadcast %cst_113 : f32 to vector<1x512xf32>
    %204 = arith.divf %202, %203 : vector<1x512xf32>
    %205 = vector.broadcast %204 : vector<1x512xf32> to vector<8x512xf32>
    %206 = arith.subf %200, %205 : vector<8x512xf32>
    %207 = arith.mulf %206, %206 : vector<8x512xf32>
    %cst_114 = arith.constant dense<0.000000e+00> : vector<512xf32>
    %208 = vector.multi_reduction <add>, %207, %cst_114 [0] : vector<8x512xf32> to vector<512xf32>
    %209 = vector.shape_cast %208 : vector<512xf32> to vector<1x512xf32>
    %cst_115 = arith.constant 8.000000e+00 : f32
    %210 = vector.broadcast %cst_115 : f32 to vector<1x512xf32>
    %211 = arith.divf %209, %210 : vector<1x512xf32>
    %212 = vector.broadcast %204 : vector<1x512xf32> to vector<8x512xf32>
    %213 = arith.subf %200, %212 : vector<8x512xf32>
    %cst_116 = arith.constant 9.99999974E-6 : f32
    %214 = vector.broadcast %cst_116 : f32 to vector<1x512xf32>
    %215 = arith.addf %211, %214 : vector<1x512xf32>
    %216 = math.rsqrt %215 : vector<1x512xf32>
    %217 = vector.broadcast %216 : vector<1x512xf32> to vector<8x512xf32>
    %218 = arith.mulf %213, %217 : vector<8x512xf32>
    %cst_117 = arith.constant 0.000000e+00 : f32
    %219 = vector.broadcast %cst_117 : f32 to vector<8x512xf32>
    %220 = arith.maximumf %218, %219 : vector<8x512xf32>
    %221 = arith.truncf %220 : vector<8x512xf32> to vector<8x512xbf16>
    %c0_118 = arith.constant 0 : index
    %c0_119 = arith.constant 0 : index
    %222 = vector.load %arg27[%c0_118, %c0_119] : memref<512x128xbf16, #tpu.memory_space<vmem>>, vector<512x128xbf16>
    %cst_120 = arith.constant dense<0.000000e+00> : vector<8x128xf32>
    %223 = tpu.matmul %221, %222, %cst_120 {dimension_numbers = #tpu.dot_dimension_numbers<[1], [0], [0], [1], [0, 0, 1, 1], [], []>} : vector<8x512xbf16>, vector<512x128xbf16>, vector<8x128xf32> -> vector<8x128xf32>
    %c0_121 = arith.constant 0 : index
    %c0_122 = arith.constant 0 : index
    %224 = vector.load %arg28[%c0_121, %c0_122] : memref<1x128xf32, #tpu.memory_space<vmem>>, vector<1x128xf32>
    %225 = vector.broadcast %224 : vector<1x128xf32> to vector<8x128xf32>
    %226 = arith.addf %223, %225 : vector<8x128xf32>
    %c0_123 = arith.constant 0 : index
    %c0_124 = arith.constant 0 : index
    %227 = vector.load %arg2[%c0_123, %c0_124] : memref<8x6xf32, #tpu.memory_space<vmem>>, vector<8x6xf32>
    %228 = arith.truncf %227 : vector<8x6xf32> to vector<8x6xbf16>
    %c0_125 = arith.constant 0 : index
    %c0_126 = arith.constant 0 : index
    %229 = vector.load %arg29[%c0_125, %c0_126] : memref<6x128xbf16, #tpu.memory_space<vmem>>, vector<6x128xbf16>
    %cst_127 = arith.constant dense<0.000000e+00> : vector<8x128xf32>
    %230 = tpu.matmul %228, %229, %cst_127 {dimension_numbers = #tpu.dot_dimension_numbers<[1], [0], [0], [1], [0, 0, 1, 1], [], []>} : vector<8x6xbf16>, vector<6x128xbf16>, vector<8x128xf32> -> vector<8x128xf32>
    %c0_128 = arith.constant 0 : index
    %c0_129 = arith.constant 0 : index
    %231 = vector.load %arg30[%c0_128, %c0_129] : memref<1x128xf32, #tpu.memory_space<vmem>>, vector<1x128xf32>
    %232 = vector.broadcast %231 : vector<1x128xf32> to vector<8x128xf32>
    %233 = arith.addf %230, %232 : vector<8x128xf32>
    %cst_130 = arith.constant dense<0.000000e+00> : vector<128xf32>
    %234 = vector.multi_reduction <add>, %233, %cst_130 [0] : vector<8x128xf32> to vector<128xf32>
    %235 = vector.shape_cast %234 : vector<128xf32> to vector<1x128xf32>
    %cst_131 = arith.constant 8.000000e+00 : f32
    %236 = vector.broadcast %cst_131 : f32 to vector<1x128xf32>
    %237 = arith.divf %235, %236 : vector<1x128xf32>
    %238 = vector.broadcast %237 : vector<1x128xf32> to vector<8x128xf32>
    %239 = arith.subf %233, %238 : vector<8x128xf32>
    %240 = arith.mulf %239, %239 : vector<8x128xf32>
    %cst_132 = arith.constant dense<0.000000e+00> : vector<128xf32>
    %241 = vector.multi_reduction <add>, %240, %cst_132 [0] : vector<8x128xf32> to vector<128xf32>
    %242 = vector.shape_cast %241 : vector<128xf32> to vector<1x128xf32>
    %cst_133 = arith.constant 8.000000e+00 : f32
    %243 = vector.broadcast %cst_133 : f32 to vector<1x128xf32>
    %244 = arith.divf %242, %243 : vector<1x128xf32>
    %245 = vector.broadcast %237 : vector<1x128xf32> to vector<8x128xf32>
    %246 = arith.subf %233, %245 : vector<8x128xf32>
    %cst_134 = arith.constant 9.99999974E-6 : f32
    %247 = vector.broadcast %cst_134 : f32 to vector<1x128xf32>
    %248 = arith.addf %244, %247 : vector<1x128xf32>
    %249 = math.rsqrt %248 : vector<1x128xf32>
    %250 = vector.broadcast %249 : vector<1x128xf32> to vector<8x128xf32>
    %251 = arith.mulf %246, %250 : vector<8x128xf32>
    %cst_135 = arith.constant 0.000000e+00 : f32
    %252 = vector.broadcast %cst_135 : f32 to vector<8x128xf32>
    %253 = arith.maximumf %251, %252 : vector<8x128xf32>
    %254 = arith.truncf %253 : vector<8x128xf32> to vector<8x128xbf16>
    %c0_136 = arith.constant 0 : index
    %c0_137 = arith.constant 0 : index
    %255 = vector.load %arg31[%c0_136, %c0_137] : memref<128x128xbf16, #tpu.memory_space<vmem>>, vector<128x128xbf16>
    %cst_138 = arith.constant dense<0.000000e+00> : vector<8x128xf32>
    %256 = tpu.matmul %254, %255, %cst_138 {dimension_numbers = #tpu.dot_dimension_numbers<[1], [0], [0], [1], [0, 0, 1, 1], [], []>} : vector<8x128xbf16>, vector<128x128xbf16>, vector<8x128xf32> -> vector<8x128xf32>
    %c0_139 = arith.constant 0 : index
    %c0_140 = arith.constant 0 : index
    %257 = vector.load %arg32[%c0_139, %c0_140] : memref<1x128xf32, #tpu.memory_space<vmem>>, vector<1x128xf32>
    %258 = vector.broadcast %257 : vector<1x128xf32> to vector<8x128xf32>
    %259 = arith.addf %256, %258 : vector<8x128xf32>
    %260 = tpu.concatenate %58, %157, %226, %259 in 1 : vector<8x128xf32>, vector<8x128xf32>, vector<8x128xf32>, vector<8x128xf32> -> vector<8x512xf32>
    %261 = arith.truncf %260 : vector<8x512xf32> to vector<8x512xbf16>
    %c0_141 = arith.constant 0 : index
    %c0_142 = arith.constant 0 : index
    %262 = vector.load %arg33[%c0_141, %c0_142] : memref<512x512xbf16, #tpu.memory_space<vmem>>, vector<512x512xbf16>
    %cst_143 = arith.constant dense<0.000000e+00> : vector<8x512xf32>
    %263 = tpu.matmul %261, %262, %cst_143 {dimension_numbers = #tpu.dot_dimension_numbers<[1], [0], [0], [1], [0, 0, 1, 1], [], []>} : vector<8x512xbf16>, vector<512x512xbf16>, vector<8x512xf32> -> vector<8x512xf32>
    %c0_144 = arith.constant 0 : index
    %c0_145 = arith.constant 0 : index
    %264 = vector.load %arg34[%c0_144, %c0_145] : memref<1x512xf32, #tpu.memory_space<vmem>>, vector<1x512xf32>
    %265 = vector.broadcast %264 : vector<1x512xf32> to vector<8x512xf32>
    %266 = arith.addf %263, %265 : vector<8x512xf32>
    %cst_146 = arith.constant dense<0.000000e+00> : vector<512xf32>
    %267 = vector.multi_reduction <add>, %266, %cst_146 [0] : vector<8x512xf32> to vector<512xf32>
    %268 = vector.shape_cast %267 : vector<512xf32> to vector<1x512xf32>
    %cst_147 = arith.constant 8.000000e+00 : f32
    %269 = vector.broadcast %cst_147 : f32 to vector<1x512xf32>
    %270 = arith.divf %268, %269 : vector<1x512xf32>
    %271 = vector.broadcast %270 : vector<1x512xf32> to vector<8x512xf32>
    %272 = arith.subf %266, %271 : vector<8x512xf32>
    %273 = arith.mulf %272, %272 : vector<8x512xf32>
    %cst_148 = arith.constant dense<0.000000e+00> : vector<512xf32>
    %274 = vector.multi_reduction <add>, %273, %cst_148 [0] : vector<8x512xf32> to vector<512xf32>
    %275 = vector.shape_cast %274 : vector<512xf32> to vector<1x512xf32>
    %cst_149 = arith.constant 8.000000e+00 : f32
    %276 = vector.broadcast %cst_149 : f32 to vector<1x512xf32>
    %277 = arith.divf %275, %276 : vector<1x512xf32>
    %278 = vector.broadcast %270 : vector<1x512xf32> to vector<8x512xf32>
    %279 = arith.subf %266, %278 : vector<8x512xf32>
    %cst_150 = arith.constant 9.99999974E-6 : f32
    %280 = vector.broadcast %cst_150 : f32 to vector<1x512xf32>
    %281 = arith.addf %277, %280 : vector<1x512xf32>
    %282 = math.rsqrt %281 : vector<1x512xf32>
    %283 = vector.broadcast %282 : vector<1x512xf32> to vector<8x512xf32>
    %284 = arith.mulf %279, %283 : vector<8x512xf32>
    %cst_151 = arith.constant 0.000000e+00 : f32
    %285 = vector.broadcast %cst_151 : f32 to vector<8x512xf32>
    %286 = arith.maximumf %284, %285 : vector<8x512xf32>
    %287 = arith.truncf %286 : vector<8x512xf32> to vector<8x512xbf16>
    %c0_152 = arith.constant 0 : index
    %c0_153 = arith.constant 0 : index
    %288 = vector.load %arg35[%c0_152, %c0_153] : memref<512x128xbf16, #tpu.memory_space<vmem>>, vector<512x128xbf16>
    %cst_154 = arith.constant dense<0.000000e+00> : vector<8x128xf32>
    %289 = tpu.matmul %287, %288, %cst_154 {dimension_numbers = #tpu.dot_dimension_numbers<[1], [0], [0], [1], [0, 0, 1, 1], [], []>} : vector<8x512xbf16>, vector<512x128xbf16>, vector<8x128xf32> -> vector<8x128xf32>
    %c0_155 = arith.constant 0 : index
    %c0_156 = arith.constant 0 : index
    %290 = vector.load %arg36[%c0_155, %c0_156] : memref<1x128xf32, #tpu.memory_space<vmem>>, vector<1x128xf32>
    %291 = vector.broadcast %290 : vector<1x128xf32> to vector<8x128xf32>
    %292 = arith.addf %289, %291 : vector<8x128xf32>
    %c0_157 = arith.constant 0 : index
    %c0_158 = arith.constant 0 : index
    %293 = vector.load %arg37[%c0_157, %c0_158] : memref<8x512xf32, #tpu.memory_space<vmem>>, vector<8x512xf32>
    tpu.vector_store %arg37[%c0_157, %c0_158], %260 {strides = array<i32>} : memref<8x512xf32, #tpu.memory_space<vmem>>, vector<8x512xf32>,
    %c0_159 = arith.constant 0 : index
    %c0_160 = arith.constant 0 : index
    %294 = vector.load %arg38[%c0_159, %c0_160] : memref<8x128xf32, #tpu.memory_space<vmem>>, vector<8x128xf32>
    tpu.vector_store %arg38[%c0_159, %c0_160], %292 {strides = array<i32>} : memref<8x128xf32, #tpu.memory_space<vmem>>, vector<8x128xf32>,
    return
  }
}

</mosaic_0001>

<bundles_post_ra>
// kernel: tpu_custom_call.1
= control target key start
LH: loop header
LB: loop body
LE: loop exit
PB: predicated region body
PF: predicated region fallthrough
CT: control target
= control target key end

     0   :  { %s19456_s6 = smov 1   ;;  %s19457_s10 = smov 2   ;;  %s20322_s0 = inlined_call_operand.smem [shape: u32[39], index: -1, kind: input, shape index: {}] }
   0x1   :  { %s19552_s5 = sld [smem:[%s20322_s0]]   ;;  %s19458_s14 = smov 3  }
   0x2   :  { %s19557_s9 = sld [smem:[%s20322_s0 + %s19456_s6]]   ;;  %s19459_s18 = smov 4  }
   0x3   :  { %s19562_s13 = sld [smem:[%s20322_s0 + %s19457_s10]]   ;;  %s19460_s22 = smov 5  }
   0x4   :  { %s19567_s17 = sld [smem:[%s20322_s0 + %s19458_s14]]   ;;  %s19461_s26 = smov 6  }
   0x5   :  { %s19572_s21 = sld [smem:[%s20322_s0 + %s19459_s18]]   ;;  %s19462_s30 = smov 7  }
   0x6   :  { %s19577_s25 = sld [smem:[%s20322_s0 + %s19460_s22]]   ;;  %s19463_s4 = smov 8  }
   0x7   :  { %20324 = sst [smem:[#allocation80_spill]] %s19552_s5  ;;  %s19464_s10 = smov 9  }
   0x8   :  { %s19582_s29 = sld [smem:[%s20322_s0 + %s19461_s26]]   ;;  %s19465_s15 = smov 10  }
   0x9   :  { %20325 = sst [smem:[#allocation81_spill]] %s19562_s13  ;;  %s19466_s20 = smov 11  }
   0xa   :  { %s19587_s3 = sld [smem:[%s20322_s0 + %s19462_s30]]   ;;  %s19467_s26 = smov 12  }
   0xb   :  { %20326 = sst [smem:[#allocation82_spill]] %s19572_s21  ;;  %s19468_s1 = smov 13  }
   0xc   :  { %s19592_s8 = sld [smem:[%s20322_s0 + %s19463_s4]]   ;;  %s19469_s7 = smov 14  }
   0xd   :  { %s19597_s14 = sld [smem:[%s20322_s0 + %s19464_s10]]   ;;  %s19471_s22 = smov 16  }
   0xe   :  { %20327 = sst [smem:[#allocation83_spill]] %s19582_s29  ;;  %s19472_s28 = smov 17  }
   0xf   :  { %s19602_s19 = sld [smem:[%s20322_s0 + %s19465_s15]]   ;;  %s19470_s15 = smov 15  }
  0x10   :  { %s19607_s24 = sld [smem:[%s20322_s0 + %s19466_s20]]   ;;  %s19481_s10 = smov 26  }
  0x11   :  { %s19612_s30 = sld [smem:[%s20322_s0 + %s19467_s26]]   ;;  %s19482_s16 = smov 27  }
  0x12   :  { %20328 = sst [smem:[#allocation84_spill]] %s19592_s8  ;;  %s19483_s23 = smov 28  }
  0x13   :  { %s19617_s6 = sld [smem:[%s20322_s0 + %s19468_s1]]   ;;  %s19480_s1 = smov 25  }
  0x14   :  { %s19622_s12 = sld [smem:[%s20322_s0 + %s19469_s7]]   ;;  %s19473_s7 = smov 18  }
  0x15   :  { %20329 = sst [smem:[#allocation85_spill]] %s19602_s19  ;;  %s19492_s5 = smov 37  }
  0x16   :  { %s19627_s20 = sld [smem:[%s20322_s0 + %s19470_s15]]   ;;  %s19474_s15 = smov 19  }
  0x17   :  { %20330 = sst [smem:[#allocation86_spill]] %s19612_s30 }
  0x18   :  { %s19632_s27 = sld [smem:[%s20322_s0 + %s19471_s22]]   ;;  %s19475_s22 = smov 20  }
  0x19   :  { %s19637_s4 = sld [smem:[%s20322_s0 + %s19472_s28]]   ;;  %s19476_s28 = smov 21  }
  0x1a   :  { %20331 = sst [smem:[#allocation87_spill]] %s19622_s12 }
  0x1b   :  { %s19642_s12 = sld [smem:[%s20322_s0 + %s19473_s7]]   ;;  %s19477_s7 = smov 22  }
  0x1c   :  { %s19647_s30 = sld [smem:[%s20322_s0 + %s19474_s15]]   ;;  %s19478_s15 = smov 23  }
  0x1d   :  { %s19657_s19 = sld [smem:[%s20322_s0 + %s19476_s28]]   ;;  %s19488_s28 = smov 33  }
  0x1e   :  { %20332 = sst [smem:[#allocation88_spill]] %s19632_s27 }
  0x1f   :  { %s19652_s27 = sld [smem:[%s20322_s0 + %s19475_s22]]   ;;  %s19479_s22 = smov 24  }
  0x20   :  { %s19667_s8 = sld [smem:[%s20322_s0 + %s19478_s15]]  }
  0x21   :  { %20333 = sst [smem:[#allocation89_spill]] %s19642_s12 }
  0x22   :  { %s19662_s12 = sld [smem:[%s20322_s0 + %s19477_s7]]  }
  0x23   :  { %s19675_s29 = sld [smem:[%s20322_s0 + %s19480_s1]]   ;;  %s19484_s1 = smov 29  }
  0x24   :  { %s19690_s21 = sld [smem:[%s20322_s0 + %s19483_s23]]   ;;  %s19487_s23 = smov 32  }
  0x25   :  { %20334 = sst [smem:[#allocation90_spill]] %s19652_s27 }
  0x26   :  { %20336 = sst [smem:[#allocation92_spill]] %s19667_s8 }
  0x27   :  { %s15371_s27 = sld [smem:[%s20322_s0 + %s19479_s22]]  }
  0x28   :  { %20335 = sst [smem:[#allocation91_spill]] %s19662_s12 }
  0x29   :  { %s19680_s12 = sld [smem:[%s20322_s0 + %s19481_s10]]   ;;  %s19485_s10 = smov 30  }
  0x2a   :  { %s19685_s8 = sld [smem:[%s20322_s0 + %s19482_s16]]   ;;  %s19486_s16 = smov 31  }
  0x2b   :  { %20338 = sst [smem:[#allocation94_spill]] %s19690_s21  ;;  %s19491_s21 = smov 36  }
  0x2c   :  { %s19695_s13 = sld [smem:[%s20322_s0 + %s19484_s1]]  }
  0x2d   :  { %v83_v0 = vstv %s15371_s27  ;;  %s19705_s22 = sld [smem:[%s20322_s0 + %s19486_s16]]   ;;  %s19489_s27 = smov 34  }
  0x2e   :  { %84 = vst [vmem:[#allocation2] sm:$0x1] %v83_v0  ;;  %s19710_s1 = sld [smem:[%s20322_s0 + %s19487_s23]]   ;;  %s19490_s16 = smov 35  }
  0x2f   :  { %20337 = sst [smem:[#allocation93_spill]] %s19680_s12 }
  0x30   :  { %s19700_s12 = sld [smem:[%s20322_s0 + %s19485_s10]]  }
  0x31   :  { %s19715_s10 = sld [smem:[%s20322_s0 + %s19488_s28]]  }
  0x32   :  { %s19720_s15 = sld [smem:[%s20322_s0 + %s19489_s27]]   ;;  %s19493_s27 = smov 38  }
  0x33   :  { %20340 = sst [smem:[#allocation96_spill]] %s19705_s22 }
  0x34   :  { %20341 = sst [smem:[#allocation97_spill]] %s19710_s1 }
  0x35   :  { %s19725_s22 = sld [smem:[%s20322_s0 + %s19490_s16]]  }
  0x36   :  { %20339 = sst [smem:[#allocation95_spill]] %s19700_s12 }
  0x37   :  { %20342 = sst [smem:[#allocation98_spill]] %s19715_s10 }
  0x38   :  { %20343 = sst [smem:[#allocation99_spill]] %s19720_s15 }
  0x39   :  { %s19730_s1 = sld [smem:[%s20322_s0 + %s19491_s21]]  }
  0x3a   :  { %s19735_s10 = sld [smem:[%s20322_s0 + %s19492_s5]]  }
  0x3b   :  { %s19740_s15 = sld [smem:[%s20322_s0 + %s19493_s27]]  }
  0x3c   :  { %85 = vsyncpa [#allocation4], 0 }
  0x3d   :  { %86 = vsyncpa [#allocation7], 0 }
  0x3e   :  { %87 = vsyncpa [#allocation10], 0 }
  0x3f   :  { %88 = vsyncpa [#allocation13], 0 }
  0x40   :  { %89 = vsyncpa [#allocation16], 0 }
  0x41   :  { %90 = vsyncpa [#allocation19], 0 }
  0x42   :  { %91 = vsyncpa [#allocation22], 0 }
  0x43   :  { %92 = vsyncpa [#allocation25], 0 }
  0x44   :  { %93 = vsyncpa [#allocation28], 0 }
  0x45   :  { %94 = vsyncpa [#allocation31], 0 }
  0x46   :  { %95 = vsyncpa [#allocation34], 0 }
  0x47   :  { %96 = vsyncpa [#allocation37], 0 }
  0x48   :  { %97 = vsyncpa [#allocation40], 0 }
  0x49   :  { %98 = vsyncpa [#allocation43], 0 }
  0x4a   :  { %99 = vsyncpa [#allocation46], 0 }
  0x4b   :  { %100 = vsyncpa [#allocation49], 0 }
  0x4c   :  { %101 = vsyncpa [#allocation52], 0 }
  0x4d   :  { %102 = vsyncpa [#allocation55], 0 }
  0x4e   :  { %103 = vsyncpa [#allocation5], 0 }
  0x4f   :  { %104 = vsyncpa [#allocation59], 0  ;;  %s19494_s0 = smov [#allocation6]  }
  0x50   :  { %s120_s12 = sshll.u32 %s19494_s0, 4  ;;  %s121_s12 = int_to_ptr.vmem [resolvable:$true] %s120_s12 }
  0x51   :  { %s18684_s16 = scalar_lea.vmem %s121_s12, 3840  ;;  %p18689_p1 = scmp.lt.s32.totalorder %s121_s12, %s121_s12 }
  0x52   :  { %p18685_p0 = scmp.ne.s32.totalorder %s121_s12, %s18684_s16  ;;  %p18690_p2 = scmp.lt.s32.totalorder %s18684_s16, %s18684_s16 }
  0x54   :  { %p18691_p3 = por %p18690_p2, %p18689_p1 }
  0x56   :  { %p18692_p4 = pnand %p18691_p3, %p18685_p0 }
  0x58   :  { %18695 = shalt.err (!%p18692_p4)
}
  0x59   :  { %s19495_s18 = smov 768   ;;  %s19496_s21 = smov 48  }
  0x5a   :  { %126 = dma.hbm_to_vmem [thread:$0]  %s19557_s9, 3840, %s121_s12, [#allocation7], %s19495_s18, %s19495_s18, %s19496_s21  }
  0x5b   :  { %s19497_s23 = smov [#allocation9]   ;;  %s19498_s5 = smov [#allocation12]  }
  0x5c   :  { %s143_s26 = sshll.u32 %s19497_s23, 4  ;;  %s162_s28 = sshll.u32 %s19498_s5, 4  ;;  %s144_s26 = int_to_ptr.vmem [resolvable:$true] %s143_s26  ;;  %s163_s28 = int_to_ptr.vmem [resolvable:$true] %s162_s28 }
  0x5d   :  { %s18704_s2 = scalar_lea.vmem %s144_s26, 128  ;;  %p18709_p6 = scmp.lt.s32.totalorder %s144_s26, %s144_s26 }
  0x5e   :  { %p18705_p5 = scmp.ne.s32.totalorder %s144_s26, %s18704_s2  ;;  %p18710_p7 = scmp.lt.s32.totalorder %s18704_s2, %s18704_s2 }
  0x60   :  { %p18711_p8 = por %p18710_p7, %p18709_p6 }
  0x62   :  { %p18712_p9 = pnand %p18711_p8, %p18705_p5 }
  0x64   :  { %18715 = shalt.err (!%p18712_p9)
}
  0x65   :  { %146 = dma.hbm_to_vmem [thread:$0]  %s19567_s17, 128, %s144_s26, [#allocation10]  }
  0x66   :  { %s18724_s27 = scalar_lea.vmem %s163_s28, 131072  ;;  %p18729_p11 = scmp.lt.s32.totalorder %s163_s28, %s163_s28 }
  0x67   :  { %p18725_p10 = scmp.ne.s32.totalorder %s163_s28, %s18724_s27  ;;  %p18730_p12 = scmp.lt.s32.totalorder %s18724_s27, %s18724_s27 }
  0x69   :  { %p18731_p13 = por %p18730_p12, %p18729_p11 }
  0x6b   :  { %p18732_p0 = pnand %p18731_p13, %p18725_p10 }
  0x6d   :  { %18735 = shalt.err (!%p18732_p0)
}
  0x6e   :  { %s19499_s9 = smov 512   ;;  %s19500_s7 = smov 32  }
  0x6f   :  { %168 = dma.hbm_to_vmem [thread:$0]  %s19577_s25, 131072, %s163_s28, [#allocation13], %s19499_s9, %s19499_s9, %s19500_s7  }
  0x70   :  { %s19501_s11 = smov [#allocation15]  }
  0x71   :  { %s184_s0 = sshll.u32 %s19501_s11, 4  ;;  %s185_s0 = int_to_ptr.vmem [resolvable:$true] %s184_s0 }
  0x72   :  { %s18744_s12 = scalar_lea.vmem %s185_s0, 32768  ;;  %p18749_p2 = scmp.lt.s32.totalorder %s185_s0, %s185_s0 }
  0x73   :  { %p18745_p1 = scmp.ne.s32.totalorder %s185_s0, %s18744_s12  ;;  %p18750_p3 = scmp.lt.s32.totalorder %s18744_s12, %s18744_s12 }
  0x75   :  { %p18751_p4 = por %p18750_p3, %p18749_p2 }
  0x77   :  { %p18752_p5 = pnand %p18751_p4, %p18745_p1 }
  0x79   :  { %18755 = shalt.err (!%p18752_p5)
}
  0x7a   :  { %s19502_s17 = smov 256   ;;  %s19503_s16 = smov 16  }
  0x7b   :  { %190 = dma.hbm_to_vmem [thread:$0]  %s19587_s3, 32768, %s185_s0, [#allocation16], %s19502_s17, %s19502_s17, %s19503_s16  }
  0x7c   :  { %s19504_s18 = smov [#allocation18]  }
  0x7d   :  { %s206_s21 = sshll.u32 %s19504_s18, 4  ;;  %s207_s21 = int_to_ptr.vmem [resolvable:$true] %s206_s21 }
  0x7e   :  { %s18764_s25 = scalar_lea.vmem %s207_s21, 4096  ;;  %p18769_p7 = scmp.lt.s32.totalorder %s207_s21, %s207_s21 }
  0x7f   :  { %p18765_p6 = scmp.ne.s32.totalorder %s207_s21, %s18764_s25  ;;  %p18770_p8 = scmp.lt.s32.totalorder %s18764_s25, %s18764_s25 }
  0x81   :  { %p18771_p9 = por %p18770_p8, %p18769_p7 }
  0x83   :  { %p18772_p10 = pnand %p18771_p9, %p18765_p6 }
  0x85   :  { %18775 = shalt.err (!%p18772_p10)
}
  0x86   :  { %s19505_s23 = smov 64   ;;  %s19506_s26 = smov 4  }
  0x87   :  { %212 = dma.hbm_to_vmem [thread:$0]  %s19597_s14, 4096, %s207_s21, [#allocation19], %s19505_s23, %s19505_s23, %s19506_s26  }
  0x88   :  { %s19507_s5 = smov [#allocation21]  }
  0x89   :  { %s228_s28 = sshll.u32 %s19507_s5, 4  ;;  %s229_s28 = int_to_ptr.vmem [resolvable:$true] %s228_s28 }
  0x8a   :  { %s18784_s3 = scalar_lea.vmem %s229_s28, 2048  ;;  %p18789_p12 = scmp.lt.s32.totalorder %s229_s28, %s229_s28 }
  0x8b   :  { %p18785_p11 = scmp.ne.s32.totalorder %s229_s28, %s18784_s3  ;;  %p18790_p13 = scmp.lt.s32.totalorder %s18784_s3, %s18784_s3 }
  0x8d   :  { %p18791_p0 = por %p18790_p13, %p18789_p12 }
  0x8f   :  { %p18792_p1 = pnand %p18791_p0, %p18785_p11 }
  0x91   :  { %18795 = shalt.err (!%p18792_p1)
}
  0x92   :  { %s19508_s2 = smov 128   ;;  %s19509_s27 = smov 8  }
  0x93   :  { %234 = dma.hbm_to_vmem [thread:$0]  %s19607_s24, 2048, %s229_s28, [#allocation22], %s19508_s2, %s19508_s2, %s19509_s27  }
  0x94   :  { %s19510_s9 = smov [#allocation24]   ;;  %s19511_s14 = smov [#allocation27]  }
  0x95   :  { %s250_s7 = sshll.u32 %s19510_s9, 4  ;;  %s272_s11 = sshll.u32 %s19511_s14, 4  ;;  %s251_s7 = int_to_ptr.vmem [resolvable:$true] %s250_s7  ;;  %s273_s11 = int_to_ptr.vmem [resolvable:$true] %s272_s11 }
  0x96   :  { %s18804_s0 = scalar_lea.vmem %s251_s7, 2048  ;;  %p18809_p3 = scmp.lt.s32.totalorder %s251_s7, %s251_s7 }
  0x97   :  { %p18805_p2 = scmp.ne.s32.totalorder %s251_s7, %s18804_s0  ;;  %p18810_p4 = scmp.lt.s32.totalorder %s18804_s0, %s18804_s0 }
  0x99   :  { %p18811_p5 = por %p18810_p4, %p18809_p3 }
  0x9b   :  { %p18812_p6 = pnand %p18811_p5, %p18805_p2 }
  0x9d   :  { %18815 = shalt.err (!%p18812_p6)
}
  0x9e   :  { %256 = dma.hbm_to_vmem [thread:$0]  %s19617_s6, 2048, %s251_s7, [#allocation25], %s19505_s23, %s19505_s23, %s19506_s26  }
  0x9f   :  { %s18824_s12 = scalar_lea.vmem %s273_s11, 2048  ;;  %p18829_p8 = scmp.lt.s32.totalorder %s273_s11, %s273_s11 }
  0xa0   :  { %p18825_p7 = scmp.ne.s32.totalorder %s273_s11, %s18824_s12  ;;  %p18830_p9 = scmp.lt.s32.totalorder %s18824_s12, %s18824_s12 }
  0xa2   :  { %p18831_p10 = por %p18830_p9, %p18829_p8 }
  0xa4   :  { %p18832_p11 = pnand %p18831_p10, %p18825_p7 }
  0xa6   :  { %18835 = shalt.err (!%p18832_p11)
}
  0xa7   :  { %278 = dma.hbm_to_vmem [thread:$0]  %s19627_s20, 2048, %s273_s11, [#allocation28], %s19508_s2, %s19508_s2, %s19509_s27  }
  0xa8   :  { %s19512_s24 = smov [#allocation30]   ;;  %s19513_s21 = smov [#allocation33]  }
  0xa9   :  { %s294_s18 = sshll.u32 %s19512_s24, 4  ;;  %s316_s25 = sshll.u32 %s19513_s21, 4  ;;  %s295_s18 = int_to_ptr.vmem [resolvable:$true] %s294_s18  ;;  %s317_s25 = int_to_ptr.vmem [resolvable:$true] %s316_s25 }
  0xaa   :  { %s18844_s5 = scalar_lea.vmem %s295_s18, 2048  ;;  %p18849_p13 = scmp.lt.s32.totalorder %s295_s18, %s295_s18 }
  0xab   :  { %p18845_p12 = scmp.ne.s32.totalorder %s295_s18, %s18844_s5  ;;  %p18850_p0 = scmp.lt.s32.totalorder %s18844_s5, %s18844_s5 }
  0xad   :  { %p18851_p1 = por %p18850_p0, %p18849_p13 }
  0xaf   :  { %p18852_p2 = pnand %p18851_p1, %p18845_p12 }
  0xb1   :  { %18855 = shalt.err (!%p18852_p2)
}
  0xb2   :  { %300 = dma.hbm_to_vmem [thread:$0]  %s19637_s4, 2048, %s295_s18, [#allocation31], %s19505_s23, %s19505_s23, %s19506_s26  }
  0xb3   :  { %s18864_s6 = scalar_lea.vmem %s317_s25, 2048  ;;  %p18869_p4 = scmp.lt.s32.totalorder %s317_s25, %s317_s25 }
  0xb4   :  { %p18865_p3 = scmp.ne.s32.totalorder %s317_s25, %s18864_s6  ;;  %p18870_p5 = scmp.lt.s32.totalorder %s18864_s6, %s18864_s6 }
  0xb6   :  { %p18871_p6 = por %p18870_p5, %p18869_p4 }
  0xb8   :  { %p18872_p7 = pnand %p18871_p6, %p18865_p3 }
  0xba   :  { %18875 = shalt.err (!%p18872_p7)
}
  0xbb   :  { %322 = dma.hbm_to_vmem [thread:$0]  %s19647_s30, 2048, %s317_s25, [#allocation34], %s19508_s2, %s19508_s2, %s19509_s27  }
  0xbc   :  { %s19514_s20 = smov [#allocation36]   ;;  %s19515_s3 = smov [#allocation39]  }
  0xbd   :  { %s338_s28 = sshll.u32 %s19514_s20, 4  ;;  %s364_s9 = sshll.u32 %s19515_s3, 4  ;;  %s339_s28 = int_to_ptr.vmem [resolvable:$true] %s338_s28  ;;  %s365_s9 = int_to_ptr.vmem [resolvable:$true] %s364_s9 }
  0xbe   :  { %s18884_s7 = scalar_lea.vmem %s339_s28, 2048  ;;  %p18889_p9 = scmp.lt.s32.totalorder %s339_s28, %s339_s28 }
  0xbf   :  { %p18885_p8 = scmp.ne.s32.totalorder %s339_s28, %s18884_s7  ;;  %p18890_p10 = scmp.lt.s32.totalorder %s18884_s7, %s18884_s7 }
  0xc1   :  { %p18891_p11 = por %p18890_p10, %p18889_p9 }
  0xc3   :  { %p18892_p12 = pnand %p18891_p11, %p18885_p8 }
  0xc5   :  { %18895 = shalt.err (!%p18892_p12)
}
  0xc6   :  { %344 = dma.hbm_to_vmem [thread:$0]  %s19657_s19, 2048, %s339_s28, [#allocation37], %s19505_s23, %s19505_s23, %s19506_s26  }
  0xc7   :  { %s18904_s4 = scalar_lea.vmem %s365_s9, 24576  ;;  %p18909_p0 = scmp.lt.s32.totalorder %s365_s9, %s365_s9 }
  0xc8   :  { %p18905_p13 = scmp.ne.s32.totalorder %s365_s9, %s18904_s4  ;;  %p18910_p1 = scmp.lt.s32.totalorder %s18904_s4, %s18904_s4 }
  0xca   :  { %p18911_p2 = por %p18910_p1, %p18909_p0 }
  0xcc   :  { %p18912_p3 = pnand %p18911_p2, %p18905_p13 }
  0xce   :  { %18915 = shalt.err (!%p18912_p3)
}
  0xcf   :  { %370 = dma.hbm_to_vmem [thread:$0]  %s19675_s29, 24576, %s365_s9, [#allocation40], %s19502_s17, %s19502_s17, %s19503_s16  }
  0xd0   :  { %s19516_s30 = smov [#allocation42]   ;;  %s19517_s27 = smov [#allocation45]  }
  0xd1   :  { %s386_s2 = sshll.u32 %s19516_s30, 4  ;;  %s409_s14 = sshll.u32 %s19517_s27, 4  ;;  %s387_s2 = int_to_ptr.vmem [resolvable:$true] %s386_s2  ;;  %s410_s14 = int_to_ptr.vmem [resolvable:$true] %s409_s14 }
  0xd2   :  { %s18924_s11 = scalar_lea.vmem %s387_s2, 4096  ;;  %p18929_p5 = scmp.lt.s32.totalorder %s387_s2, %s387_s2 }
  0xd3   :  { %p18925_p4 = scmp.ne.s32.totalorder %s387_s2, %s18924_s11  ;;  %p18930_p6 = scmp.lt.s32.totalorder %s18924_s11, %s18924_s11 }
  0xd5   :  { %p18931_p7 = por %p18930_p6, %p18929_p5 }
  0xd7   :  { %p18932_p8 = pnand %p18931_p7, %p18925_p4 }
  0xd9   :  { %18935 = shalt.err (!%p18932_p8)
}
  0xda   :  { %392 = dma.hbm_to_vmem [thread:$0]  %s19685_s8, 4096, %s387_s2, [#allocation43], %s19505_s23, %s19505_s23, %s19506_s26  }
  0xdb   :  { %s18944_s19 = scalar_lea.vmem %s410_s14, 64  ;;  %p18949_p10 = scmp.lt.s32.totalorder %s410_s14, %s410_s14 }
  0xdc   :  { %p18945_p9 = scmp.ne.s32.totalorder %s410_s14, %s18944_s19  ;;  %p18950_p11 = scmp.lt.s32.totalorder %s18944_s19, %s18944_s19 }
  0xde   :  { %p18951_p12 = por %p18950_p11, %p18949_p10 }
  0xe0   :  { %p18952_p13 = pnand %p18951_p12, %p18945_p9 }
  0xe2   :  { %18955 = shalt.err (!%p18952_p13)
}
  0xe3   :  { %412 = dma.hbm_to_vmem [thread:$0]  %s19695_s13, 64, %s410_s14, [#allocation46]  }
  0xe4   :  { %s19518_s29 = smov [#allocation48]   ;;  %s19519_s12 = smov [#allocation51]  }
  0xe5   :  { %s428_s0 = sshll.u32 %s19518_s29, 4  ;;  %s450_s24 = sshll.u32 %s19519_s12, 4  ;;  %s429_s0 = int_to_ptr.vmem [resolvable:$true] %s428_s0  ;;  %s451_s24 = int_to_ptr.vmem [resolvable:$true] %s450_s24 }
  0xe6   :  { %s18964_s18 = scalar_lea.vmem %s429_s0, 1024  ;;  %p18969_p1 = scmp.lt.s32.totalorder %s429_s0, %s429_s0 }
  0xe7   :  { %p18965_p0 = scmp.ne.s32.totalorder %s429_s0, %s18964_s18  ;;  %p18970_p2 = scmp.lt.s32.totalorder %s18964_s18, %s18964_s18 }
  0xe9   :  { %p18971_p3 = por %p18970_p2, %p18969_p1 }
  0xeb   :  { %p18972_p4 = pnand %p18971_p3, %p18965_p0 }
  0xed   :  { %18975 = shalt.err (!%p18972_p4)
}
  0xee   :  { %s20344_s8 = sld [smem:[#allocation96_spill]]  ;;  %s18984_s21 = scalar_lea.vmem %s451_s24, 16384 }
  0xef   :  { %p18985_p5 = scmp.ne.s32.totalorder %s451_s24, %s18984_s21  ;;  %p18989_p6 = scmp.lt.s32.totalorder %s451_s24, %s451_s24 }
  0xf0   :  { %p18990_p7 = scmp.lt.s32.totalorder %s18984_s21, %s18984_s21 }
  0xf2   :  { %p18991_p8 = por %p18990_p7, %p18989_p6 }
  0xf4   :  { %434 = dma.hbm_to_vmem [thread:$0]  %s20344_s8, 1024, %s429_s0, [#allocation49], %s19505_s23, %s19505_s23, %s19506_s26  }
  0xf5   :  { %p18992_p9 = pnand %p18991_p8, %p18985_p5 }
  0xf7   :  { %18995 = shalt.err (!%p18992_p9)
}
  0xf8   :  { %s20345_s13 = sld [smem:[#allocation98_spill]]  ;;  %s19520_s25 = smov [#allocation54]  }
  0xf9   :  { %s472_s5 = sshll.u32 %s19520_s25, 4  ;;  %s19521_s6 = smov [#allocation3]   ;;  %s473_s5 = int_to_ptr.vmem [resolvable:$true] %s472_s5 }
  0xfa   :  { %s111_s20 = sshll.u32 %s19521_s6, 4  ;;  %s19004_s28 = scalar_lea.vmem %s473_s5, 4096  ;;  %s112_s20 = int_to_ptr.vmem [resolvable:$true] %s111_s20 }
  0xfb   :  { %p19005_p10 = scmp.ne.s32.totalorder %s473_s5, %s19004_s28  ;;  %p19009_p11 = scmp.lt.s32.totalorder %s473_s5, %s473_s5 }
  0xfc   :  { %p19010_p12 = scmp.lt.s32.totalorder %s19004_s28, %s19004_s28 }
  0xfe   :  { %456 = dma.hbm_to_vmem [thread:$0]  %s20345_s13, 16384, %s451_s24, [#allocation52], %s19502_s17, %s19502_s17, %s19503_s16  }
  0xff   :  { %p19011_p13 = por %p19010_p12, %p19009_p11 }
 0x101   :  { %p19012_p0 = pnand %p19011_p13, %p19005_p10 }
 0x103   :  { %19015 = shalt.err (!%p19012_p0)
}
 0x104   :  { %478 = dma.hbm_to_vmem [thread:$0]  %s19725_s22, 4096, %s473_s5, [#allocation55], %s19505_s23, %s19505_s23, %s19506_s26  }
 0x105   :  { %s19024_s3 = scalar_lea.vmem %s112_s20, 2048  ;;  %p19029_p2 = scmp.lt.s32.totalorder %s112_s20, %s112_s20 }
 0x106   :  { %p19025_p1 = scmp.ne.s32.totalorder %s112_s20, %s19024_s3  ;;  %p19030_p3 = scmp.lt.s32.totalorder %s19024_s3, %s19024_s3 }
 0x108   :  { %p19031_p4 = por %p19030_p3, %p19029_p2 }
 0x10a   :  { %p19032_p5 = pnand %p19031_p4, %p19025_p1 }
 0x10c   :  { %19035 = shalt.err (!%p19032_p5)
}
 0x10d   :  { %s20346_s17 = sld [smem:[#allocation80_spill]]  ;;  %s19522_s16 = smov [#allocation8]  }
 0x10e   :  { %s133_s9 = sshll.u32 %s19522_s16, 4  ;;  %s19523_s7 = smov [#allocation11]   ;;  %s134_s9 = int_to_ptr.vmem [resolvable:$true] %s133_s9 }
 0x10f   :  { %s153_s4 = sshll.u32 %s19523_s7, 4  ;;  %s19044_s30 = scalar_lea.vmem %s134_s9, 128  ;;  %s154_s4 = int_to_ptr.vmem [resolvable:$true] %s153_s4 }
 0x110   :  { %p19045_p6 = scmp.ne.s32.totalorder %s134_s9, %s19044_s30  ;;  %p19049_p7 = scmp.lt.s32.totalorder %s134_s9, %s134_s9 }
 0x111   :  { %p19050_p8 = scmp.lt.s32.totalorder %s19044_s30, %s19044_s30 }
 0x113   :  { %114 = dma.hbm_to_vmem [thread:$0]  %s20346_s17, 2048, %s112_s20, [#allocation4]  }
 0x114   :  { %p19051_p9 = por %p19050_p8, %p19049_p7 }
 0x116   :  { %p19052_p10 = pnand %p19051_p9, %p19045_p6 }
 0x118   :  { %19055 = shalt.err (!%p19052_p10)
}
 0x119   :  { %s20347_s22 = sld [smem:[#allocation81_spill]]  ;;  %s19064_s23 = scalar_lea.vmem %s154_s4, 128 }
 0x11a   :  { %p19065_p11 = scmp.ne.s32.totalorder %s154_s4, %s19064_s23  ;;  %p19069_p12 = scmp.lt.s32.totalorder %s154_s4, %s154_s4 }
 0x11b   :  { %p19070_p13 = scmp.lt.s32.totalorder %s19064_s23, %s19064_s23 }
 0x11d   :  { %p19071_p0 = por %p19070_p13, %p19069_p12 }
 0x11f   :  { %136 = dma.hbm_to_vmem [thread:$0]  %s20347_s22, 128, %s134_s9, [#allocation7]  }
 0x120   :  { %p19072_p1 = pnand %p19071_p0, %p19065_p11 }
 0x122   :  { %19075 = shalt.err (!%p19072_p1)
}
 0x123   :  { %s20348_s26 = sld [smem:[#allocation82_spill]]  ;;  %s19524_s2 = smov [#allocation14]  }
 0x124   :  { %s175_s27 = sshll.u32 %s19524_s2, 4  ;;  %s19525_s14 = smov [#allocation17]   ;;  %s176_s27 = int_to_ptr.vmem [resolvable:$true] %s175_s27 }
 0x125   :  { %s197_s11 = sshll.u32 %s19525_s14, 4  ;;  %s19084_s19 = scalar_lea.vmem %s176_s27, 128  ;;  %s198_s11 = int_to_ptr.vmem [resolvable:$true] %s197_s11 }
 0x126   :  { %p19085_p2 = scmp.ne.s32.totalorder %s176_s27, %s19084_s19  ;;  %p19089_p3 = scmp.lt.s32.totalorder %s176_s27, %s176_s27 }
 0x127   :  { %p19090_p4 = scmp.lt.s32.totalorder %s19084_s19, %s19084_s19 }
 0x129   :  { %156 = dma.hbm_to_vmem [thread:$0]  %s20348_s26, 128, %s154_s4, [#allocation10]  }
 0x12a   :  { %p19091_p5 = por %p19090_p4, %p19089_p3 }
 0x12c   :  { %p19092_p6 = pnand %p19091_p5, %p19085_p2 }
 0x12e   :  { %19095 = shalt.err (!%p19092_p6)
}
 0x12f   :  { %s20349_s29 = sld [smem:[#allocation83_spill]]  ;;  %s19104_s0 = scalar_lea.vmem %s198_s11, 64 }
 0x130   :  { %p19105_p7 = scmp.ne.s32.totalorder %s198_s11, %s19104_s0  ;;  %p19109_p8 = scmp.lt.s32.totalorder %s198_s11, %s198_s11 }
 0x131   :  { %p19110_p9 = scmp.lt.s32.totalorder %s19104_s0, %s19104_s0 }
 0x133   :  { %p19111_p10 = por %p19110_p9, %p19109_p8 }
 0x135   :  { %178 = dma.hbm_to_vmem [thread:$0]  %s20349_s29, 128, %s176_s27, [#allocation13]  }
 0x136   :  { %p19112_p11 = pnand %p19111_p10, %p19105_p7 }
 0x138   :  { %19115 = shalt.err (!%p19112_p11)
}
 0x139   :  { %s20350_s12 = sld [smem:[#allocation84_spill]]  ;;  %s19526_s24 = smov [#allocation20]  }
 0x13a   :  { %s219_s18 = sshll.u32 %s19526_s24, 4  ;;  %s19527_s8 = smov [#allocation23]   ;;  %s220_s18 = int_to_ptr.vmem [resolvable:$true] %s219_s18 }
 0x13b   :  { %s241_s21 = sshll.u32 %s19527_s8, 4  ;;  %s19124_s13 = scalar_lea.vmem %s220_s18, 16  ;;  %s242_s21 = int_to_ptr.vmem [resolvable:$true] %s241_s21 }
 0x13c   :  { %p19125_p12 = scmp.ne.s32.totalorder %s220_s18, %s19124_s13  ;;  %s19128_s25 = scalar_lea.vmem %s220_s18, 32 }
 0x13d   :  { %p19129_p13 = scmp.lt.s32.totalorder %s220_s18, %s220_s18  ;;  %p19130_p0 = scmp.lt.s32.totalorder %s19128_s25, %s19124_s13 }
 0x13f   :  { %200 = dma.hbm_to_vmem [thread:$0]  %s20350_s12, 64, %s198_s11, [#allocation16]  }
 0x140   :  { %p19131_p1 = por %p19130_p0, %p19129_p13 }
 0x142   :  { %p19132_p2 = pnand %p19131_p1, %p19125_p12 }
 0x144   :  { %19135 = shalt.err (!%p19132_p2)
}
 0x145   :  { %s20351_s5 = sld [smem:[#allocation85_spill]]  ;;  %s19144_s6 = scalar_lea.vmem %s242_s21, 32 }
 0x146   :  { %p19145_p3 = scmp.ne.s32.totalorder %s242_s21, %s19144_s6  ;;  %p19149_p4 = scmp.lt.s32.totalorder %s242_s21, %s242_s21 }
 0x147   :  { %p19150_p5 = scmp.lt.s32.totalorder %s19144_s6, %s19144_s6 }
 0x149   :  { %p19151_p6 = por %p19150_p5, %p19149_p4 }
 0x14b   :  { %222 = dma.hbm_to_vmem [thread:$0]  %s20351_s5, 16, %s220_s18, [#allocation19]  }
 0x14c   :  { %p19152_p7 = pnand %p19151_p6, %p19145_p3 }
 0x14e   :  { %19155 = shalt.err (!%p19152_p7)
}
 0x14f   :  { %s20352_s20 = sld [smem:[#allocation86_spill]]  ;;  %s19528_s28 = smov [#allocation26]  }
 0x150   :  { %s263_s3 = sshll.u32 %s19528_s28, 4  ;;  %s19529_s17 = smov [#allocation29]   ;;  %s264_s3 = int_to_ptr.vmem [resolvable:$true] %s263_s3 }
 0x151   :  { %s285_s16 = sshll.u32 %s19529_s17, 4  ;;  %s19164_s9 = scalar_lea.vmem %s264_s3, 16  ;;  %s286_s16 = int_to_ptr.vmem [resolvable:$true] %s285_s16 }
 0x152   :  { %p19165_p8 = scmp.ne.s32.totalorder %s264_s3, %s19164_s9  ;;  %s19168_s7 = scalar_lea.vmem %s264_s3, 32 }
 0x153   :  { %p19169_p9 = scmp.lt.s32.totalorder %s264_s3, %s264_s3  ;;  %p19170_p10 = scmp.lt.s32.totalorder %s19168_s7, %s19164_s9 }
 0x155   :  { %244 = dma.hbm_to_vmem [thread:$0]  %s20352_s20, 32, %s242_s21, [#allocation22]  }
 0x156   :  { %p19171_p11 = por %p19170_p10, %p19169_p9 }
 0x158   :  { %p19172_p12 = pnand %p19171_p11, %p19165_p8 }
 0x15a   :  { %19175 = shalt.err (!%p19172_p12)
}
 0x15b   :  { %s20353_s4 = sld [smem:[#allocation87_spill]]  ;;  %s19184_s30 = scalar_lea.vmem %s286_s16, 32 }
 0x15c   :  { %p19185_p13 = scmp.ne.s32.totalorder %s286_s16, %s19184_s30  ;;  %p19189_p0 = scmp.lt.s32.totalorder %s286_s16, %s286_s16 }
 0x15d   :  { %p19190_p1 = scmp.lt.s32.totalorder %s19184_s30, %s19184_s30 }
 0x15f   :  { %p19191_p2 = por %p19190_p1, %p19189_p0 }
 0x161   :  { %266 = dma.hbm_to_vmem [thread:$0]  %s20353_s4, 16, %s264_s3, [#allocation25]  }
 0x162   :  { %p19192_p3 = pnand %p19191_p2, %p19185_p13 }
 0x164   :  { %19195 = shalt.err (!%p19192_p3)
}
 0x165   :  { %s20354_s22 = sld [smem:[#allocation88_spill]]  ;;  %s19530_s23 = smov [#allocation32]  }
 0x166   :  { %s307_s26 = sshll.u32 %s19530_s23, 4  ;;  %s19531_s2 = smov [#allocation35]   ;;  %s308_s26 = int_to_ptr.vmem [resolvable:$true] %s307_s26 }
 0x167   :  { %s329_s27 = sshll.u32 %s19531_s2, 4  ;;  %s19204_s14 = scalar_lea.vmem %s308_s26, 16  ;;  %s330_s27 = int_to_ptr.vmem [resolvable:$true] %s329_s27 }
 0x168   :  { %p19205_p4 = scmp.ne.s32.totalorder %s308_s26, %s19204_s14  ;;  %s19208_s11 = scalar_lea.vmem %s308_s26, 32 }
 0x169   :  { %p19209_p5 = scmp.lt.s32.totalorder %s308_s26, %s308_s26  ;;  %p19210_p6 = scmp.lt.s32.totalorder %s19208_s11, %s19204_s14 }
 0x16b   :  { %288 = dma.hbm_to_vmem [thread:$0]  %s20354_s22, 32, %s286_s16, [#allocation28]  }
 0x16c   :  { %p19211_p7 = por %p19210_p6, %p19209_p5 }
 0x16e   :  { %p19212_p8 = pnand %p19211_p7, %p19205_p4 }
 0x170   :  { %19215 = shalt.err (!%p19212_p8)
}
 0x171   :  { %s20355_s19 = sld [smem:[#allocation89_spill]]  ;;  %s19224_s29 = scalar_lea.vmem %s330_s27, 32 }
 0x172   :  { %p19225_p9 = scmp.ne.s32.totalorder %s330_s27, %s19224_s29  ;;  %p19229_p10 = scmp.lt.s32.totalorder %s330_s27, %s330_s27 }
 0x173   :  { %p19230_p11 = scmp.lt.s32.totalorder %s19224_s29, %s19224_s29 }
 0x175   :  { %p19231_p12 = por %p19230_p11, %p19229_p10 }
 0x177   :  { %310 = dma.hbm_to_vmem [thread:$0]  %s20355_s19, 16, %s308_s26, [#allocation31]  }
 0x178   :  { %p19232_p13 = pnand %p19231_p12, %p19225_p9 }
 0x17a   :  { %19235 = shalt.err (!%p19232_p13)
}
 0x17b   :  { %s20356_s0 = sld [smem:[#allocation90_spill]]  ;;  %s19532_s12 = smov [#allocation38]  }
 0x17c   :  { %s351_s24 = sshll.u32 %s19532_s12, 4  ;;  %s19533_s18 = smov [#allocation41]   ;;  %s352_s24 = int_to_ptr.vmem [resolvable:$true] %s351_s24 }
 0x17d   :  { %s377_s8 = sshll.u32 %s19533_s18, 4  ;;  %s19244_s21 = scalar_lea.vmem %s352_s24, 16  ;;  %s378_s8 = int_to_ptr.vmem [resolvable:$true] %s377_s8 }
 0x17e   :  { %p19245_p0 = scmp.ne.s32.totalorder %s352_s24, %s19244_s21  ;;  %s19248_s13 = scalar_lea.vmem %s352_s24, 32 }
 0x17f   :  { %p19249_p1 = scmp.lt.s32.totalorder %s352_s24, %s352_s24  ;;  %p19250_p2 = scmp.lt.s32.totalorder %s19248_s13, %s19244_s21 }
 0x181   :  { %332 = dma.hbm_to_vmem [thread:$0]  %s20356_s0, 32, %s330_s27, [#allocation34]  }
 0x182   :  { %p19251_p3 = por %p19250_p2, %p19249_p1 }
 0x184   :  { %p19252_p4 = pnand %p19251_p3, %p19245_p0 }
 0x186   :  { %19255 = shalt.err (!%p19252_p4)
}
 0x187   :  { %s20357_s25 = sld [smem:[#allocation91_spill]]  ;;  %s19264_s5 = scalar_lea.vmem %s378_s8, 64 }
 0x188   :  { %p19265_p5 = scmp.ne.s32.totalorder %s378_s8, %s19264_s5  ;;  %p19269_p6 = scmp.lt.s32.totalorder %s378_s8, %s378_s8 }
 0x189   :  { %p19270_p7 = scmp.lt.s32.totalorder %s19264_s5, %s19264_s5 }
 0x18b   :  { %p19271_p8 = por %p19270_p7, %p19269_p6 }
 0x18d   :  { %354 = dma.hbm_to_vmem [thread:$0]  %s20357_s25, 16, %s352_s24, [#allocation37]  }
 0x18e   :  { %p19272_p9 = pnand %p19271_p8, %p19265_p5 }
 0x190   :  { %19275 = shalt.err (!%p19272_p9)
}
 0x191   :  { %s20358_s6 = sld [smem:[#allocation93_spill]]  ;;  %s19534_s20 = smov [#allocation44]  }
 0x192   :  { %s399_s28 = sshll.u32 %s19534_s20, 4  ;;  %s19535_s3 = smov [#allocation47]   ;;  %s400_s28 = int_to_ptr.vmem [resolvable:$true] %s399_s28 }
 0x193   :  { %s419_s17 = sshll.u32 %s19535_s3, 4  ;;  %s19284_s16 = scalar_lea.vmem %s400_s28, 16  ;;  %s420_s17 = int_to_ptr.vmem [resolvable:$true] %s419_s17 }
 0x194   :  { %p19285_p10 = scmp.ne.s32.totalorder %s400_s28, %s19284_s16  ;;  %s19288_s9 = scalar_lea.vmem %s400_s28, 32 }
 0x195   :  { %p19289_p11 = scmp.lt.s32.totalorder %s400_s28, %s400_s28  ;;  %p19290_p12 = scmp.lt.s32.totalorder %s19288_s9, %s19284_s16 }
 0x197   :  { %380 = dma.hbm_to_vmem [thread:$0]  %s20358_s6, 64, %s378_s8, [#allocation40]  }
 0x198   :  { %p19291_p13 = por %p19290_p12, %p19289_p11 }
 0x19a   :  { %p19292_p0 = pnand %p19291_p13, %p19285_p10 }
 0x19c   :  { %19295 = shalt.err (!%p19292_p0)
}
 0x19d   :  { %s20359_s7 = sld [smem:[#allocation94_spill]]  ;;  %s19304_s4 = scalar_lea.vmem %s420_s17, 16 }
 0x19e   :  { %p19305_p1 = scmp.ne.s32.totalorder %s420_s17, %s19304_s4  ;;  %s19308_s30 = scalar_lea.vmem %s420_s17, 32 }
 0x19f   :  { %p19309_p2 = scmp.lt.s32.totalorder %s420_s17, %s420_s17  ;;  %p19310_p3 = scmp.lt.s32.totalorder %s19308_s30, %s19304_s4 }
 0x1a1   :  { %p19311_p4 = por %p19310_p3, %p19309_p2 }
 0x1a3   :  { %402 = dma.hbm_to_vmem [thread:$0]  %s20359_s7, 16, %s400_s28, [#allocation43]  }
 0x1a4   :  { %p19312_p5 = pnand %p19311_p4, %p19305_p1 }
 0x1a6   :  { %19315 = shalt.err (!%p19312_p5)
}
 0x1a7   :  { %s20360_s22 = sld [smem:[#allocation95_spill]]  ;;  %s19536_s23 = smov [#allocation50]  }
 0x1a8   :  { %s441_s26 = sshll.u32 %s19536_s23, 4  ;;  %s19537_s2 = smov [#allocation53]   ;;  %s442_s26 = int_to_ptr.vmem [resolvable:$true] %s441_s26 }
 0x1a9   :  { %s463_s27 = sshll.u32 %s19537_s2, 4  ;;  %s19324_s14 = scalar_lea.vmem %s442_s26, 16  ;;  %s464_s27 = int_to_ptr.vmem [resolvable:$true] %s463_s27 }
 0x1aa   :  { %p19325_p6 = scmp.ne.s32.totalorder %s442_s26, %s19324_s14  ;;  %s19328_s11 = scalar_lea.vmem %s442_s26, 32 }
 0x1ab   :  { %p19329_p7 = scmp.lt.s32.totalorder %s442_s26, %s442_s26  ;;  %p19330_p8 = scmp.lt.s32.totalorder %s19328_s11, %s19324_s14 }
 0x1ad   :  { %422 = dma.hbm_to_vmem [thread:$0]  %s20360_s22, 16, %s420_s17, [#allocation46]  }
 0x1ae   :  { %p19331_p9 = por %p19330_p8, %p19329_p7 }
 0x1b0   :  { %p19332_p10 = pnand %p19331_p9, %p19325_p6 }
 0x1b2   :  { %19335 = shalt.err (!%p19332_p10)
}
 0x1b3   :  { %s20361_s19 = sld [smem:[#allocation97_spill]]  ;;  %s19344_s29 = scalar_lea.vmem %s464_s27, 64 }
 0x1b4   :  { %p19345_p11 = scmp.ne.s32.totalorder %s464_s27, %s19344_s29  ;;  %p19349_p12 = scmp.lt.s32.totalorder %s464_s27, %s464_s27 }
 0x1b5   :  { %p19350_p13 = scmp.lt.s32.totalorder %s19344_s29, %s19344_s29 }
 0x1b7   :  { %p19351_p0 = por %p19350_p13, %p19349_p12 }
 0x1b9   :  { %444 = dma.hbm_to_vmem [thread:$0]  %s20361_s19, 16, %s442_s26, [#allocation49]  }
 0x1ba   :  { %p19352_p1 = pnand %p19351_p0, %p19345_p11 }
 0x1bc   :  { %19355 = shalt.err (!%p19352_p1)
}
 0x1bd   :  { %s20362_s0 = sld [smem:[#allocation99_spill]]  ;;  %s19538_s12 = smov [#allocation56]  }
 0x1be   :  { %s485_s24 = sshll.u32 %s19538_s12, 4  ;;  %s486_s24 = int_to_ptr.vmem [resolvable:$true] %s485_s24 }
 0x1bf   :  { %s19364_s18 = scalar_lea.vmem %s486_s24, 16  ;;  %s19368_s8 = scalar_lea.vmem %s486_s24, 32 }
 0x1c0   :  { %p19365_p2 = scmp.ne.s32.totalorder %s486_s24, %s19364_s18  ;;  %p19369_p3 = scmp.lt.s32.totalorder %s486_s24, %s486_s24 }
 0x1c1   :  { %p19370_p4 = scmp.lt.s32.totalorder %s19368_s8, %s19364_s18 }
 0x1c3   :  { %466 = dma.hbm_to_vmem [thread:$0]  %s20362_s0, 64, %s464_s27, [#allocation52]  }
 0x1c4   :  { %p19371_p5 = por %p19370_p4, %p19369_p3 }
 0x1c6   :  { %p19372_p6 = pnand %p19371_p5, %p19365_p2 }
 0x1c8   :  { %19375 = shalt.err (!%p19372_p6)
}
 0x1c9   :  { %488 = dma.hbm_to_vmem [thread:$0]  %s19730_s1, 16, %s486_s24, [#allocation55]  }
 0x1ca   :  { %19416 = dma.done.wait [#allocation4], 2048  }
 0x1cb   :  { %19417 = vsyncadd [#allocation4], 4294965248 }
 0x1cc   :  { %19418 = dma.done.wait [#allocation7], 3968  }
 0x1cd   :  { %19419 = vsyncadd [#allocation7], 4294963328 }
 0x1ce   :  { %19420 = dma.done.wait [#allocation10], 256  }
 0x1cf   :  { %19421 = vsyncadd [#allocation10], 4294967040 }
 0x1d0   :  { %19422 = dma.done.wait [#allocation13], 131200  }
 0x1d1   :  { %19423 = vsyncadd [#allocation13], 4294836096 }
 0x1d2   :  { %19424 = dma.done.wait [#allocation16], 32832  }
 0x1d3   :  { %19425 = vsyncadd [#allocation16], 4294934464 }
 0x1d4   :  { %19426 = dma.done.wait [#allocation19], 4112  }
 0x1d5   :  { %19427 = vsyncadd [#allocation19], 4294963184 }
 0x1d6   :  { %19428 = dma.done.wait [#allocation22], 2080  }
 0x1d7   :  { %19429 = vsyncadd [#allocation22], 4294965216 }
 0x1d8   :  { %19430 = dma.done.wait [#allocation25], 2064  }
 0x1d9   :  { %19431 = vsyncadd [#allocation25], 4294965232 }
 0x1da   :  { %19432 = dma.done.wait [#allocation28], 2080  }
 0x1db   :  { %19433 = vsyncadd [#allocation28], 4294965216 }
 0x1dc   :  { %19434 = dma.done.wait [#allocation31], 2064  }
 0x1dd   :  { %19435 = vsyncadd [#allocation31], 4294965232 }
 0x1de   :  { %19436 = dma.done.wait [#allocation34], 2080  }
 0x1df   :  { %19437 = vsyncadd [#allocation34], 4294965216 }
 0x1e0   :  { %19438 = dma.done.wait [#allocation37], 2064  }
 0x1e1   :  { %19439 = vsyncadd [#allocation37], 4294965232 }
 0x1e2   :  { %19440 = dma.done.wait [#allocation40], 24640  }
 0x1e3   :  { %19441 = vsyncadd [#allocation40], 4294942656 }
 0x1e4   :  { %19442 = dma.done.wait [#allocation43], 4112  }
 0x1e5   :  { %19443 = vsyncadd [#allocation43], 4294963184 }
 0x1e6   :  { %19444 = dma.done.wait [#allocation46], 80  }
 0x1e7   :  { %19445 = vsyncadd [#allocation46], 4294967216 }
 0x1e8   :  { %19446 = dma.done.wait [#allocation49], 1040  }
 0x1e9   :  { %19447 = vsyncadd [#allocation49], 4294966256 }
 0x1ea   :  { %19448 = dma.done.wait [#allocation52], 16448  }
 0x1eb   :  { %19449 = vsyncadd [#allocation52], 4294950848 }
 0x1ec   :  { %19450 = dma.done.wait [#allocation55], 4112  }
 0x1ed   :  { %19451 = vsyncadd [#allocation55], 4294963184  ;;  %v683_v1 = vld [vmem:[#allocation12 + $0x1c0] sm:$0xff]  ;;  %v598_v55 = vld [vmem:[#allocation3 + $0x18] sm:$0xff]  ;;  %s20363_s1 = sld [smem:[#allocation92_spill]]  ;;  %vm13736_vm0 = vcmask 1042432  }
 0x1ee   :  { %v687_v2 = vld [vmem:[#allocation12 + $0x1e0] sm:$0xff]  ;;  %v19818_v60 = vpack.c.bf16 %v598_v55, %v598_v55  ;;  %vm19541_vm1 = vmmov 0   ;;  %vm13732_vm2 = vcmask 48128   ;;  %s19542_s21 = smov [#allocation57]  }
 0x1ef   :  { %v811_v3 = vld [vmem:[#allocation12 + $0x5c0] sm:$0xff]  ;;  %v15443_v4 = vcombine.high %v683_v1, %v687_v2  ;;  %v15442_v6 = vcombine.low %v683_v1, %v687_v2  ;;  %s15308_s13 = sshll.u32 %s19542_s21, 4  ;;  %s15309_s13 = int_to_ptr.vmem [resolvable:$true] %s15308_s13 }
 0x1f0   :  { %v815_v5 = vld [vmem:[#allocation12 + $0x5e0] sm:$0xff]  ;;  %6886 = vmatprep.mubr.bf16.mxu1 %v19818_v60  ;;  %s19376_s25 = scalar_lea.vmem %s15309_s13, 512  ;;  %p19381_p8 = scmp.lt.s32.totalorder %s15309_s13, %s15309_s13 }
 0x1f1   :  { %v675_v7 = vld [vmem:[#allocation12 + $0x180] sm:$0xff]  ;;  %v15571_v9 = vcombine.high %v811_v3, %v815_v5  ;;  %v15570_v10 = vcombine.low %v811_v3, %v815_v5  ;;  %6813 = vmatprep.subr.bf16.mxu0 %v15443_v4  ;;  %p19377_p7 = scmp.ne.s32.totalorder %s15309_s13, %s19376_s25  ;;  %p19382_p9 = scmp.lt.s32.totalorder %s19376_s25, %s19376_s25 }
 0x1f2   :  { %v679_v8 = vld [vmem:[#allocation12 + $0x1a0] sm:$0xff]  ;;  %6814 = vmatpush1.bf16.msra.mxu0 %v15442_v6 }
 0x1f3   :  { %v15435_v11 = vcombine.high %v675_v7, %v679_v8  ;;  %v803_v12 = vld [vmem:[#allocation12 + $0x580] sm:$0xff]  ;;  %6854 = vmatprep.subr.bf16.mxu1 %v15571_v9  ;;  %v15434_v19 = vcombine.low %v675_v7, %v679_v8  ;;  %p19383_p10 = por %p19382_p9, %p19381_p8 }
 0x1f4   :  { %v807_v13 = vld [vmem:[#allocation12 + $0x5a0] sm:$0xff]  ;;  %6855 = vmatpush1.bf16.msra.mxu1 %v15570_v10 }
 0x1f5   :  { %v667_v14 = vld [vmem:[#allocation12 + $0x140] sm:$0xff]  ;;  %v15563_v15 = vcombine.high %v803_v12, %v807_v13  ;;  %6815 = vmatprep.subr.bf16.mxu0 %v15435_v11  ;;  %v15562_v20 = vcombine.low %v803_v12, %v807_v13  ;;  %p19384_p11 = pnand %p19383_p10, %p19377_p7 }
 0x1f6   :  { %v671_v16 = vld [vmem:[#allocation12 + $0x160] sm:$0xff]  ;;  %6816 = vmatpush1.bf16.msra.mxu0 %v15434_v19 }
 0x1f7   :  { %v795_v17 = vld [vmem:[#allocation12 + $0x540] sm:$0xff]  ;;  %v15427_v21 = vcombine.high %v667_v14, %v671_v16  ;;  %6856 = vmatprep.subr.bf16.mxu1 %v15563_v15  ;;  %v15426_v27 = vcombine.low %v667_v14, %v671_v16 }
 0x1f8   :  { %v799_v18 = vld [vmem:[#allocation12 + $0x560] sm:$0xff]  ;;  %6857 = vmatpush1.bf16.msra.mxu1 %v15562_v20 }
 0x1f9   :  { %v15555_v22 = vcombine.high %v795_v17, %v799_v18  ;;  %v659_v23 = vld [vmem:[#allocation12 + $0x100] sm:$0xff]  ;;  %6817 = vmatprep.subr.bf16.mxu0 %v15427_v21  ;;  %v15554_v28 = vcombine.low %v795_v17, %v799_v18 }
 0x1fa   :  { %v663_v24 = vld [vmem:[#allocation12 + $0x120] sm:$0xff]  ;;  %6818 = vmatpush1.bf16.msra.mxu0 %v15426_v27 }
 0x1fb   :  { %v787_v25 = vld [vmem:[#allocation12 + $0x500] sm:$0xff]  ;;  %v15419_v29 = vcombine.high %v659_v23, %v663_v24  ;;  %6858 = vmatprep.subr.bf16.mxu1 %v15555_v22  ;;  %v15418_v35 = vcombine.low %v659_v23, %v663_v24 }
 0x1fc   :  { %v791_v26 = vld [vmem:[#allocation12 + $0x520] sm:$0xff]  ;;  %6859 = vmatpush1.bf16.msra.mxu1 %v15554_v28 }
 0x1fd   :  { %v15547_v30 = vcombine.high %v787_v25, %v791_v26  ;;  %v651_v31 = vld [vmem:[#allocation12 + $0xc0] sm:$0xff]  ;;  %6819 = vmatprep.subr.bf16.mxu0 %v15419_v29  ;;  %v15546_v36 = vcombine.low %v787_v25, %v791_v26 }
 0x1fe   :  { %v655_v32 = vld [vmem:[#allocation12 + $0xe0] sm:$0xff]  ;;  %6820 = vmatpush1.bf16.msra.mxu0 %v15418_v35 }
 0x1ff   :  { %v779_v33 = vld [vmem:[#allocation12 + $0x4c0] sm:$0xff]  ;;  %v15411_v37 = vcombine.high %v651_v31, %v655_v32  ;;  %6860 = vmatprep.subr.bf16.mxu1 %v15547_v30  ;;  %v15410_v43 = vcombine.low %v651_v31, %v655_v32 }
 0x200   :  { %v783_v34 = vld [vmem:[#allocation12 + $0x4e0] sm:$0xff]  ;;  %6861 = vmatpush1.bf16.msra.mxu1 %v15546_v36 }
 0x201   :  { %v15539_v38 = vcombine.high %v779_v33, %v783_v34  ;;  %v643_v39 = vld [vmem:[#allocation12 + $0x80] sm:$0xff]  ;;  %6821 = vmatprep.subr.bf16.mxu0 %v15411_v37  ;;  %v15538_v44 = vcombine.low %v779_v33, %v783_v34 }
 0x202   :  { %v647_v40 = vld [vmem:[#allocation12 + $0xa0] sm:$0xff]  ;;  %6822 = vmatpush1.bf16.msra.mxu0 %v15410_v43 }
 0x203   :  { %v771_v41 = vld [vmem:[#allocation12 + $0x480] sm:$0xff]  ;;  %v15403_v45 = vcombine.high %v643_v39, %v647_v40  ;;  %6862 = vmatprep.subr.bf16.mxu1 %v15539_v38  ;;  %v15402_v51 = vcombine.low %v643_v39, %v647_v40 }
 0x204   :  { %v775_v42 = vld [vmem:[#allocation12 + $0x4a0] sm:$0xff]  ;;  %6863 = vmatpush1.bf16.msra.mxu1 %v15538_v44 }
 0x205   :  { %v15531_v46 = vcombine.high %v771_v41, %v775_v42  ;;  %v635_v47 = vld [vmem:[#allocation12 + $0x40] sm:$0xff]  ;;  %6823 = vmatprep.subr.bf16.mxu0 %v15403_v45  ;;  %v15530_v52 = vcombine.low %v771_v41, %v775_v42 }
 0x206   :  { %v639_v48 = vld [vmem:[#allocation12 + $0x60] sm:$0xff]  ;;  %6824 = vmatpush1.bf16.msra.mxu0 %v15402_v51 }
 0x207   :  { %v763_v49 = vld [vmem:[#allocation12 + $0x440] sm:$0xff]  ;;  %v15395_v53 = vcombine.high %v635_v47, %v639_v48  ;;  %6864 = vmatprep.subr.bf16.mxu1 %v15531_v46  ;;  %v15394_v63 = vcombine.low %v635_v47, %v639_v48 }
 0x208   :  { %v767_v50 = vld [vmem:[#allocation12 + $0x460] sm:$0xff]  ;;  %6865 = vmatpush1.bf16.msra.mxu1 %v15530_v52 }
 0x209   :  { %v596_v54 = vld [vmem:[#allocation3 + $0x8] sm:$0xff]  ;;  %v15523_v56 = vcombine.high %v763_v49, %v767_v50  ;;  %6825 = vmatprep.subr.bf16.mxu0 %v15395_v53  ;;  %v15522_v0 = vcombine.low %v763_v49, %v767_v50 }
 0x20a   :  { %v627_v57 = vld [vmem:[#allocation12] sm:$0xff]  ;;  %v19816_v59 = vpack.c.bf16 %v596_v54, %v596_v54  ;;  %6826 = vmatpush1.bf16.msra.mxu0 %v15394_v63 }
 0x20b   :  { %v631_v58 = vld [vmem:[#allocation12 + $0x20] sm:$0xff]  ;;  %6866 = vmatprep.subr.bf16.mxu1 %v15523_v56 }
 0x20c   :  { %v755_v61 = vld [vmem:[#allocation12 + $0x400] sm:$0xff]  ;;  %6845 = vmatprep.mubr.bf16.mxu0 %v19816_v59  ;;  %v15387_v1 = vcombine.high %v627_v57, %v631_v58  ;;  %v15386_v7 = vcombine.low %v627_v57, %v631_v58  ;;  %6867 = vmatpush1.bf16.msra.mxu1 %v15522_v0 }
 0x20d   :  { %v759_v62 = vld [vmem:[#allocation12 + $0x420] sm:$0xff] }
 0x20e   :  { %v15515_v2 = vcombine.high %v755_v61, %v759_v62  ;;  %v747_v3 = vld [vmem:[#allocation12 + $0x3c0] sm:$0xff]  ;;  %6827 = vmatprep.subr.bf16.mxu0 %v15387_v1  ;;  %v15514_v8 = vcombine.low %v755_v61, %v759_v62 }
 0x20f   :  { %v751_v4 = vld [vmem:[#allocation12 + $0x3e0] sm:$0xff]  ;;  %6828 = vmatpush1.bf16.msra.mxu0 %v15386_v7 }
 0x210   :  { %v875_v5 = vld [vmem:[#allocation12 + $0x7c0] sm:$0xff]  ;;  %v15507_v9 = vcombine.high %v747_v3, %v751_v4  ;;  %6868 = vmatprep.subr.bf16.mxu1 %v15515_v2  ;;  %v15506_v15 = vcombine.low %v747_v3, %v751_v4 }
 0x211   :  { %v879_v6 = vld [vmem:[#allocation12 + $0x7e0] sm:$0xff]  ;;  %6869 = vmatpush1.bf16.msra.mxu1 %v15514_v8 }
 0x212   :  { %v15635_v10 = vcombine.high %v875_v5, %v879_v6  ;;  %v739_v11 = vld [vmem:[#allocation12 + $0x380] sm:$0xff]  ;;  %6829 = vmatprep.subr.bf16.mxu0 %v15507_v9  ;;  %v15634_v16 = vcombine.low %v875_v5, %v879_v6 }
 0x213   :  { %v743_v12 = vld [vmem:[#allocation12 + $0x3a0] sm:$0xff]  ;;  %6830 = vmatpush2.bf16.msra.mxu0 %v15506_v15 }
 0x214   :  { %v867_v13 = vld [vmem:[#allocation12 + $0x780] sm:$0xff]  ;;  %v15499_v17 = vcombine.high %v739_v11, %v743_v12  ;;  %6870 = vmatprep.subr.bf16.mxu1 %v15635_v10  ;;  %v15498_v23 = vcombine.low %v739_v11, %v743_v12  ;;  %v595_v10 = vld [vmem:[#allocation3] sm:$0xff]  ;;  %v597_v12 = vld [vmem:[#allocation3 + $0x10] sm:$0xff] }
 0x215   :  { %v871_v14 = vld [vmem:[#allocation12 + $0x7a0] sm:$0xff]  ;;  %6871 = vmatpush2.bf16.msra.mxu1 %v15634_v16 }
 0x216   :  { %v15627_v18 = vcombine.high %v867_v13, %v871_v14  ;;  %v731_v19 = vld [vmem:[#allocation12 + $0x340] sm:$0xff]  ;;  %6831 = vmatprep.subr.bf16.mxu0 %v15499_v17  ;;  %v15626_v24 = vcombine.low %v867_v13, %v871_v14  ;;  %v19822_v17 = vpack.c.bf16 %v595_v10, %v595_v10 }
 0x217   :  { %v735_v20 = vld [vmem:[#allocation12 + $0x360] sm:$0xff]  ;;  %6832 = vmatpush2.bf16.msra.mxu0 %v15498_v23  ;;  %v602_v23 = vld [vmem:[#allocation3 + $0x38] sm:$0xff] }
 0x218   :  { %v859_v21 = vld [vmem:[#allocation12 + $0x740] sm:$0xff]  ;;  %v15491_v25 = vcombine.high %v731_v19, %v735_v20  ;;  %6872 = vmatprep.subr.bf16.mxu1 %v15627_v18  ;;  %v15490_v31 = vcombine.low %v731_v19, %v735_v20 }
 0x219   :  { %v863_v22 = vld [vmem:[#allocation12 + $0x760] sm:$0xff]  ;;  %6873 = vmatpush2.bf16.msra.mxu1 %v15626_v24 }
 0x21a   :  { %v15619_v26 = vcombine.high %v859_v21, %v863_v22  ;;  %v723_v27 = vld [vmem:[#allocation12 + $0x300] sm:$0xff]  ;;  %6833 = vmatprep.subr.bf16.mxu0 %v15491_v25  ;;  %v15618_v32 = vcombine.low %v859_v21, %v863_v22  ;;  %v19824_v21 = vpack.c.bf16 %v597_v12, %v597_v12 }
 0x21b   :  { %v727_v28 = vld [vmem:[#allocation12 + $0x320] sm:$0xff]  ;;  %6834 = vmatpush2.bf16.msra.mxu0 %v15490_v31 }
 0x21c   :  { %v851_v29 = vld [vmem:[#allocation12 + $0x700] sm:$0xff]  ;;  %v15483_v33 = vcombine.high %v723_v27, %v727_v28  ;;  %6874 = vmatprep.subr.bf16.mxu1 %v15619_v26  ;;  %v15482_v39 = vcombine.low %v723_v27, %v727_v28 }
 0x21d   :  { %v855_v30 = vld [vmem:[#allocation12 + $0x720] sm:$0xff]  ;;  %6875 = vmatpush2.bf16.msra.mxu1 %v15618_v32  ;;  %v19829_v32 = vpack.c.bf16 %v602_v23, %v602_v23 }
 0x21e   :  { %v15611_v34 = vcombine.high %v851_v29, %v855_v30  ;;  %v715_v35 = vld [vmem:[#allocation12 + $0x2c0] sm:$0xff]  ;;  %6835 = vmatprep.subr.bf16.mxu0 %v15483_v33  ;;  %v15610_v40 = vcombine.low %v851_v29, %v855_v30 }
 0x21f   :  { %v719_v36 = vld [vmem:[#allocation12 + $0x2e0] sm:$0xff]  ;;  %6836 = vmatpush2.bf16.msra.mxu0 %v15482_v39 }
 0x220   :  { %v843_v37 = vld [vmem:[#allocation12 + $0x6c0] sm:$0xff]  ;;  %v15475_v41 = vcombine.high %v715_v35, %v719_v36  ;;  %6876 = vmatprep.subr.bf16.mxu1 %v15611_v34  ;;  %v15474_v47 = vcombine.low %v715_v35, %v719_v36 }
 0x221   :  { %v847_v38 = vld [vmem:[#allocation12 + $0x6e0] sm:$0xff]  ;;  %6877 = vmatpush2.bf16.msra.mxu1 %v15610_v40 }
 0x222   :  { %v15603_v42 = vcombine.high %v843_v37, %v847_v38  ;;  %v707_v43 = vld [vmem:[#allocation12 + $0x280] sm:$0xff]  ;;  %6837 = vmatprep.subr.bf16.mxu0 %v15475_v41  ;;  %v15602_v48 = vcombine.low %v843_v37, %v847_v38 }
 0x223   :  { %v711_v44 = vld [vmem:[#allocation12 + $0x2a0] sm:$0xff]  ;;  %6838 = vmatpush2.bf16.msra.mxu0 %v15474_v47 }
 0x224   :  { %v835_v45 = vld [vmem:[#allocation12 + $0x680] sm:$0xff]  ;;  %v15467_v49 = vcombine.high %v707_v43, %v711_v44  ;;  %6878 = vmatprep.subr.bf16.mxu1 %v15603_v42  ;;  %v15466_v55 = vcombine.low %v707_v43, %v711_v44 }
 0x225   :  { %v839_v46 = vld [vmem:[#allocation12 + $0x6a0] sm:$0xff]  ;;  %6879 = vmatpush2.bf16.msra.mxu1 %v15602_v48 }
 0x226   :  { %v15595_v50 = vcombine.high %v835_v45, %v839_v46  ;;  %v699_v51 = vld [vmem:[#allocation12 + $0x240] sm:$0xff]  ;;  %6839 = vmatprep.subr.bf16.mxu0 %v15467_v49  ;;  %v15594_v56 = vcombine.low %v835_v45, %v839_v46 }
 0x227   :  { %v703_v52 = vld [vmem:[#allocation12 + $0x260] sm:$0xff]  ;;  %6840 = vmatpush2.bf16.msra.mxu0 %v15466_v55 }
 0x228   :  { %v827_v53 = vld [vmem:[#allocation12 + $0x640] sm:$0xff]  ;;  %v15459_v57 = vcombine.high %v699_v51, %v703_v52  ;;  %6880 = vmatprep.subr.bf16.mxu1 %v15595_v50  ;;  %v15458_v1 = vcombine.low %v699_v51, %v703_v52 }
 0x229   :  { %v831_v54 = vld [vmem:[#allocation12 + $0x660] sm:$0xff]  ;;  %6881 = vmatpush2.bf16.msra.mxu1 %v15594_v56 }
 0x22a   :  { %v15587_v58 = vcombine.high %v827_v53, %v831_v54  ;;  %v691_v61 = vld [vmem:[#allocation12 + $0x200] sm:$0xff]  ;;  %6841 = vmatprep.subr.bf16.mxu0 %v15459_v57  ;;  %v15586_v2 = vcombine.low %v827_v53, %v831_v54 }
 0x22b   :  { %v695_v62 = vld [vmem:[#allocation12 + $0x220] sm:$0xff]  ;;  %6842 = vmatpush2.bf16.msra.mxu0 %v15458_v1 }
 0x22c   :  { %v819_v63 = vld [vmem:[#allocation12 + $0x600] sm:$0xff]  ;;  %v15451_v3 = vcombine.high %v691_v61, %v695_v62  ;;  %6882 = vmatprep.subr.bf16.mxu1 %v15587_v58  ;;  %v15450_v9 = vcombine.low %v691_v61, %v695_v62 }
 0x22d   :  { %v823_v0 = vld [vmem:[#allocation12 + $0x620] sm:$0xff]  ;;  %6883 = vmatpush2.bf16.msra.mxu1 %v15586_v2 }
 0x22e   :  { %v15579_v4 = vcombine.high %v819_v63, %v823_v0  ;;  %v939_v5 = vld [vmem:[#allocation12 + $0x9c0] sm:$0xff]  ;;  %6843 = vmatprep.subr.bf16.mxu0 %v15451_v3  ;;  %v15578_v11 = vcombine.low %v819_v63, %v823_v0 }
 0x22f   :  { %v943_v6 = vld [vmem:[#allocation12 + $0x9e0] sm:$0xff]  ;;  %6844 = vmatpush2.bf16.msra.mxu0 %v15450_v9 }
 0x230   :  { %v1067_v7 = vld [vmem:[#allocation12 + $0xdc0] sm:$0xff]  ;;  %v15699_v13 = vcombine.high %v939_v5, %v943_v6  ;;  %6884 = vmatprep.subr.bf16.mxu1 %v15579_v4  ;;  %v15698_v22 = vcombine.low %v939_v5, %v943_v6 }
 0x231   :  { %v1071_v8 = vld [vmem:[#allocation12 + $0xde0] sm:$0xff]  ;;  %6885 = vmatpush2.bf16.msra.mxu1 %v15578_v11 }
 0x232   :  { %v15827_v14 = vcombine.high %v1067_v7, %v1071_v8  ;;  %v931_v15 = vld [vmem:[#allocation12 + $0x980] sm:$0xff]  ;;  %6895 = vmatprep.subr.bf16.mxu0 %v15699_v13  ;;  %v15826_v24 = vcombine.low %v1067_v7, %v1071_v8  ;;  %6846 = vmatmul.mubr.bf16.vlgmr.msra.gmra.mxu0 %v19822_v17 }
 0x233   :  { %v935_v16 = vld [vmem:[#allocation12 + $0x9a0] sm:$0xff]  ;;  %6896 = vmatpush1.bf16.msra.mxu0 %v15698_v22 }
 0x234   :  { %v1059_v18 = vld [vmem:[#allocation12 + $0xd80] sm:$0xff]  ;;  %v15691_v25 = vcombine.high %v931_v15, %v935_v16  ;;  %6936 = vmatprep.subr.bf16.mxu1 %v15827_v14  ;;  %6887 = vmatmul.mubr.bf16.vlgmr.msra.gmra.mxu1 %v19824_v21  ;;  %v15690_v33 = vcombine.low %v931_v15, %v935_v16 }
 0x235   :  { %v1063_v19 = vld [vmem:[#allocation12 + $0xda0] sm:$0xff]  ;;  %6937 = vmatpush1.bf16.msra.mxu1 %v15826_v24  ;;  %6968 = vmatprep.mubr.bf16.mxu1 %v19829_v32 }
 0x236   :  { %v600_v20 = vld [vmem:[#allocation3 + $0x28] sm:$0xff]  ;;  %v15819_v26 = vcombine.high %v1059_v18, %v1063_v19  ;;  %6897 = vmatprep.subr.bf16.mxu0 %v15691_v25  ;;  %v15818_v34 = vcombine.low %v1059_v18, %v1063_v19 }
 0x237   :  { %v923_v27 = vld [vmem:[#allocation12 + $0x940] sm:$0xff]  ;;  %v19826_v29 = vpack.c.bf16 %v600_v20, %v600_v20  ;;  %6898 = vmatpush1.bf16.msra.mxu0 %v15690_v33 }
 0x238   :  { %v927_v28 = vld [vmem:[#allocation12 + $0x960] sm:$0xff]  ;;  %6938 = vmatprep.subr.bf16.mxu1 %v15819_v26 }
 0x239   :  { %v1051_v30 = vld [vmem:[#allocation12 + $0xd40] sm:$0xff]  ;;  %v15683_v35 = vcombine.high %v923_v27, %v927_v28  ;;  %6927 = vmatprep.mubr.bf16.mxu0 %v19826_v29  ;;  %v15682_v41 = vcombine.low %v923_v27, %v927_v28  ;;  %6939 = vmatpush1.bf16.msra.mxu1 %v15818_v34 }
 0x23a   :  { %v1055_v31 = vld [vmem:[#allocation12 + $0xd60] sm:$0xff] }
 0x23b   :  { %v915_v36 = vld [vmem:[#allocation12 + $0x900] sm:$0xff]  ;;  %v15811_v38 = vcombine.high %v1051_v30, %v1055_v31  ;;  %6899 = vmatprep.subr.bf16.mxu0 %v15683_v35  ;;  %v15810_v42 = vcombine.low %v1051_v30, %v1055_v31 }
 0x23c   :  { %v919_v37 = vld [vmem:[#allocation12 + $0x920] sm:$0xff]  ;;  %6900 = vmatpush1.bf16.msra.mxu0 %v15682_v41 }
 0x23d   :  { %v1043_v39 = vld [vmem:[#allocation12 + $0xd00] sm:$0xff]  ;;  %v15675_v43 = vcombine.high %v915_v36, %v919_v37  ;;  %6940 = vmatprep.subr.bf16.mxu1 %v15811_v38  ;;  %v15674_v49 = vcombine.low %v915_v36, %v919_v37 }
 0x23e   :  { %v1047_v40 = vld [vmem:[#allocation12 + $0xd20] sm:$0xff]  ;;  %6941 = vmatpush1.bf16.msra.mxu1 %v15810_v42 }
 0x23f   :  { %v907_v44 = vld [vmem:[#allocation12 + $0x8c0] sm:$0xff]  ;;  %v15803_v47 = vcombine.high %v1043_v39, %v1047_v40  ;;  %6901 = vmatprep.subr.bf16.mxu0 %v15675_v43  ;;  %v15802_v50 = vcombine.low %v1043_v39, %v1047_v40 }
 0x240   :  { %v911_v45 = vld [vmem:[#allocation12 + $0x8e0] sm:$0xff]  ;;  %6902 = vmatpush1.bf16.msra.mxu0 %v15674_v49 }
 0x241   :  { %v1035_v46 = vld [vmem:[#allocation12 + $0xcc0] sm:$0xff]  ;;  %v15667_v51 = vcombine.high %v907_v44, %v911_v45  ;;  %6942 = vmatprep.subr.bf16.mxu1 %v15803_v47  ;;  %v15666_v57 = vcombine.low %v907_v44, %v911_v45 }
 0x242   :  { %v1039_v48 = vld [vmem:[#allocation12 + $0xce0] sm:$0xff]  ;;  %6943 = vmatpush1.bf16.msra.mxu1 %v15802_v50 }
 0x243   :  { %v899_v52 = vld [vmem:[#allocation12 + $0x880] sm:$0xff]  ;;  %v15795_v55 = vcombine.high %v1035_v46, %v1039_v48  ;;  %6903 = vmatprep.subr.bf16.mxu0 %v15667_v51  ;;  %v15794_v58 = vcombine.low %v1035_v46, %v1039_v48 }
 0x244   :  { %v903_v53 = vld [vmem:[#allocation12 + $0x8a0] sm:$0xff]  ;;  %6904 = vmatpush1.bf16.msra.mxu0 %v15666_v57 }
 0x245   :  { %v1027_v54 = vld [vmem:[#allocation12 + $0xc80] sm:$0xff]  ;;  %v15659_v61 = vcombine.high %v899_v52, %v903_v53  ;;  %6944 = vmatprep.subr.bf16.mxu1 %v15795_v55  ;;  %v15658_v3 = vcombine.low %v899_v52, %v903_v53 }
 0x246   :  { %v1031_v56 = vld [vmem:[#allocation12 + $0xca0] sm:$0xff]  ;;  %6945 = vmatpush1.bf16.msra.mxu1 %v15794_v58 }
 0x247   :  { %v891_v62 = vld [vmem:[#allocation12 + $0x840] sm:$0xff]  ;;  %v15787_v1 = vcombine.high %v1027_v54, %v1031_v56  ;;  %6905 = vmatprep.subr.bf16.mxu0 %v15659_v61  ;;  %v15786_v4 = vcombine.low %v1027_v54, %v1031_v56 }
 0x248   :  { %v895_v63 = vld [vmem:[#allocation12 + $0x860] sm:$0xff]  ;;  %6906 = vmatpush1.bf16.msra.mxu0 %v15658_v3 }
 0x249   :  { %v1019_v0 = vld [vmem:[#allocation12 + $0xc40] sm:$0xff]  ;;  %v15651_v5 = vcombine.high %v891_v62, %v895_v63  ;;  %6946 = vmatprep.subr.bf16.mxu1 %v15787_v1  ;;  %v15650_v11 = vcombine.low %v891_v62, %v895_v63 }
 0x24a   :  { %v1023_v2 = vld [vmem:[#allocation12 + $0xc60] sm:$0xff]  ;;  %6947 = vmatpush1.bf16.msra.mxu1 %v15786_v4 }
 0x24b   :  { %v883_v6 = vld [vmem:[#allocation12 + $0x800] sm:$0xff]  ;;  %v15779_v9 = vcombine.high %v1019_v0, %v1023_v2  ;;  %6907 = vmatprep.subr.bf16.mxu0 %v15651_v5  ;;  %v15778_v12 = vcombine.low %v1019_v0, %v1023_v2 }
 0x24c   :  { %v887_v7 = vld [vmem:[#allocation12 + $0x820] sm:$0xff]  ;;  %6908 = vmatpush1.bf16.msra.mxu0 %v15650_v11 }
 0x24d   :  { %v1011_v8 = vld [vmem:[#allocation12 + $0xc00] sm:$0xff]  ;;  %v15643_v13 = vcombine.high %v883_v6, %v887_v7  ;;  %6948 = vmatprep.subr.bf16.mxu1 %v15779_v9  ;;  %v15642_v20 = vcombine.low %v883_v6, %v887_v7 }
 0x24e   :  { %v1015_v10 = vld [vmem:[#allocation12 + $0xc20] sm:$0xff]  ;;  %6949 = vmatpush1.bf16.msra.mxu1 %v15778_v12 }
 0x24f   :  { %v1003_v14 = vld [vmem:[#allocation12 + $0xbc0] sm:$0xff]  ;;  %v15771_v18 = vcombine.high %v1011_v8, %v1015_v10  ;;  %6909 = vmatprep.subr.bf16.mxu0 %v15643_v13  ;;  %v15770_v22 = vcombine.low %v1011_v8, %v1015_v10 }
 0x250   :  { %v1007_v15 = vld [vmem:[#allocation12 + $0xbe0] sm:$0xff]  ;;  %6910 = vmatpush1.bf16.msra.mxu0 %v15642_v20 }
 0x251   :  { %v1131_v16 = vld [vmem:[#allocation12 + $0xfc0] sm:$0xff]  ;;  %v15763_v23 = vcombine.high %v1003_v14, %v1007_v15  ;;  %6950 = vmatprep.subr.bf16.mxu1 %v15771_v18  ;;  %v15762_v30 = vcombine.low %v1003_v14, %v1007_v15 }
 0x252   :  { %v1135_v19 = vld [vmem:[#allocation12 + $0xfe0] sm:$0xff]  ;;  %6951 = vmatpush1.bf16.msra.mxu1 %v15770_v22 }
 0x253   :  { %v995_v24 = vld [vmem:[#allocation12 + $0xb80] sm:$0xff]  ;;  %v15891_v27 = vcombine.high %v1131_v16, %v1135_v19  ;;  %6911 = vmatprep.subr.bf16.mxu0 %v15763_v23  ;;  %v15890_v31 = vcombine.low %v1131_v16, %v1135_v19 }
 0x254   :  { %v999_v25 = vld [vmem:[#allocation12 + $0xba0] sm:$0xff]  ;;  %6912 = vmatpush2.bf16.msra.mxu0 %v15762_v30 }
 0x255   :  { %v1123_v26 = vld [vmem:[#allocation12 + $0xf80] sm:$0xff]  ;;  %v15755_v33 = vcombine.high %v995_v24, %v999_v25  ;;  %6952 = vmatprep.subr.bf16.mxu1 %v15891_v27  ;;  %v15754_v39 = vcombine.low %v995_v24, %v999_v25 }
 0x256   :  { %v1127_v28 = vld [vmem:[#allocation12 + $0xfa0] sm:$0xff]  ;;  %6953 = vmatpush2.bf16.msra.mxu1 %v15890_v31 }
 0x257   :  { %v987_v34 = vld [vmem:[#allocation12 + $0xb40] sm:$0xff]  ;;  %v15883_v37 = vcombine.high %v1123_v26, %v1127_v28  ;;  %6913 = vmatprep.subr.bf16.mxu0 %v15755_v33  ;;  %v15882_v40 = vcombine.low %v1123_v26, %v1127_v28  ;;  %v599_v26 = vld [vmem:[#allocation3 + $0x20] sm:$0xff]  ;;  %v601_v28 = vld [vmem:[#allocation3 + $0x30] sm:$0xff] }
 0x258   :  { %v991_v35 = vld [vmem:[#allocation12 + $0xb60] sm:$0xff]  ;;  %6914 = vmatpush2.bf16.msra.mxu0 %v15754_v39 }
 0x259   :  { %v1115_v36 = vld [vmem:[#allocation12 + $0xf40] sm:$0xff]  ;;  %v15747_v41 = vcombine.high %v987_v34, %v991_v35  ;;  %6954 = vmatprep.subr.bf16.mxu1 %v15883_v37  ;;  %v15746_v47 = vcombine.low %v987_v34, %v991_v35 }
 0x25a   :  { %v1119_v38 = vld [vmem:[#allocation12 + $0xf60] sm:$0xff]  ;;  %6955 = vmatpush2.bf16.msra.mxu1 %v15882_v40  ;;  %v19834_v40 = vpack.c.bf16 %v599_v26, %v599_v26 }
 0x25b   :  { %v979_v42 = vld [vmem:[#allocation12 + $0xb00] sm:$0xff]  ;;  %v15875_v45 = vcombine.high %v1115_v36, %v1119_v38  ;;  %6915 = vmatprep.subr.bf16.mxu0 %v15747_v41  ;;  %v15874_v48 = vcombine.low %v1115_v36, %v1119_v38  ;;  %v19836_v41 = vpack.c.bf16 %v601_v28, %v601_v28 }
 0x25c   :  { %v983_v43 = vld [vmem:[#allocation12 + $0xb20] sm:$0xff]  ;;  %6916 = vmatpush2.bf16.msra.mxu0 %v15746_v47 }
 0x25d   :  { %v1107_v44 = vld [vmem:[#allocation12 + $0xf00] sm:$0xff]  ;;  %v15739_v49 = vcombine.high %v979_v42, %v983_v43  ;;  %6956 = vmatprep.subr.bf16.mxu1 %v15875_v45  ;;  %v15738_v55 = vcombine.low %v979_v42, %v983_v43  ;;  %v606_v43 = vld [vmem:[#allocation3 + $0x58] sm:$0xff] }
 0x25e   :  { %v1111_v46 = vld [vmem:[#allocation12 + $0xf20] sm:$0xff]  ;;  %6957 = vmatpush2.bf16.msra.mxu1 %v15874_v48 }
 0x25f   :  { %v971_v50 = vld [vmem:[#allocation12 + $0xac0] sm:$0xff]  ;;  %v15867_v53 = vcombine.high %v1107_v44, %v1111_v46  ;;  %6917 = vmatprep.subr.bf16.mxu0 %v15739_v49  ;;  %v15866_v56 = vcombine.low %v1107_v44, %v1111_v46 }
 0x260   :  { %v975_v51 = vld [vmem:[#allocation12 + $0xae0] sm:$0xff]  ;;  %6918 = vmatpush2.bf16.msra.mxu0 %v15738_v55 }
 0x261   :  { %v1099_v52 = vld [vmem:[#allocation12 + $0xec0] sm:$0xff]  ;;  %v15731_v57 = vcombine.high %v971_v50, %v975_v51  ;;  %6958 = vmatprep.subr.bf16.mxu1 %v15867_v53  ;;  %v15730_v1 = vcombine.low %v971_v50, %v975_v51 }
 0x262   :  { %v1103_v54 = vld [vmem:[#allocation12 + $0xee0] sm:$0xff]  ;;  %6959 = vmatpush2.bf16.msra.mxu1 %v15866_v56 }
 0x263   :  { %v963_v58 = vld [vmem:[#allocation12 + $0xa80] sm:$0xff]  ;;  %v15859_v63 = vcombine.high %v1099_v52, %v1103_v54  ;;  %6919 = vmatprep.subr.bf16.mxu0 %v15731_v57  ;;  %v15858_v2 = vcombine.low %v1099_v52, %v1103_v54  ;;  %v19841_v52 = vpack.c.bf16 %v606_v43, %v606_v43 }
 0x264   :  { %v967_v61 = vld [vmem:[#allocation12 + $0xaa0] sm:$0xff]  ;;  %6920 = vmatpush2.bf16.msra.mxu0 %v15730_v1 }
 0x265   :  { %v1091_v62 = vld [vmem:[#allocation12 + $0xe80] sm:$0xff]  ;;  %v15723_v3 = vcombine.high %v963_v58, %v967_v61  ;;  %6960 = vmatprep.subr.bf16.mxu1 %v15859_v63  ;;  %v15722_v9 = vcombine.low %v963_v58, %v967_v61 }
 0x266   :  { %v1095_v0 = vld [vmem:[#allocation12 + $0xea0] sm:$0xff]  ;;  %6961 = vmatpush2.bf16.msra.mxu1 %v15858_v2 }
 0x267   :  { %v955_v4 = vld [vmem:[#allocation12 + $0xa40] sm:$0xff]  ;;  %v15851_v7 = vcombine.high %v1091_v62, %v1095_v0  ;;  %6921 = vmatprep.subr.bf16.mxu0 %v15723_v3  ;;  %v15850_v10 = vcombine.low %v1091_v62, %v1095_v0 }
 0x268   :  { %v959_v5 = vld [vmem:[#allocation12 + $0xa60] sm:$0xff]  ;;  %6922 = vmatpush2.bf16.msra.mxu0 %v15722_v9 }
 0x269   :  { %v1083_v6 = vld [vmem:[#allocation12 + $0xe40] sm:$0xff]  ;;  %v15715_v11 = vcombine.high %v955_v4, %v959_v5  ;;  %6962 = vmatprep.subr.bf16.mxu1 %v15851_v7  ;;  %v15714_v18 = vcombine.low %v955_v4, %v959_v5 }
 0x26a   :  { %v1087_v8 = vld [vmem:[#allocation12 + $0xe60] sm:$0xff]  ;;  %6963 = vmatpush2.bf16.msra.mxu1 %v15850_v10 }
 0x26b   :  { %v947_v12 = vld [vmem:[#allocation12 + $0xa00] sm:$0xff]  ;;  %v15843_v15 = vcombine.high %v1083_v6, %v1087_v8  ;;  %6923 = vmatprep.subr.bf16.mxu0 %v15715_v11  ;;  %v15842_v19 = vcombine.low %v1083_v6, %v1087_v8 }
 0x26c   :  { %v951_v13 = vld [vmem:[#allocation12 + $0xa20] sm:$0xff]  ;;  %6924 = vmatpush2.bf16.msra.mxu0 %v15714_v18 }
 0x26d   :  { %v1075_v14 = vld [vmem:[#allocation12 + $0xe00] sm:$0xff]  ;;  %v15707_v20 = vcombine.high %v947_v12, %v951_v13  ;;  %6964 = vmatprep.subr.bf16.mxu1 %v15843_v15  ;;  %v15706_v30 = vcombine.low %v947_v12, %v951_v13 }
 0x26e   :  { %v1079_v16 = vld [vmem:[#allocation12 + $0xe20] sm:$0xff]  ;;  %6965 = vmatpush2.bf16.msra.mxu1 %v15842_v19 }
 0x26f   :  { %v1195_v22 = vld [vmem:[#allocation12 + $0x11c0] sm:$0xff]  ;;  %v15835_v25 = vcombine.high %v1075_v14, %v1079_v16  ;;  %6925 = vmatprep.subr.bf16.mxu0 %v15707_v20  ;;  %v15834_v33 = vcombine.low %v1075_v14, %v1079_v16 }
 0x270   :  { %v1199_v23 = vld [vmem:[#allocation12 + $0x11e0] sm:$0xff]  ;;  %6926 = vmatpush2.bf16.msra.mxu0 %v15706_v30 }
 0x271   :  { %v1323_v24 = vld [vmem:[#allocation12 + $0x15c0] sm:$0xff]  ;;  %v15955_v34 = vcombine.high %v1195_v22, %v1199_v23  ;;  %6966 = vmatprep.subr.bf16.mxu1 %v15835_v25  ;;  %v15954_v42 = vcombine.low %v1195_v22, %v1199_v23 }
 0x272   :  { %v1327_v27 = vld [vmem:[#allocation12 + $0x15e0] sm:$0xff]  ;;  %6967 = vmatpush2.bf16.msra.mxu1 %v15834_v33 }
 0x273   :  { %v1187_v31 = vld [vmem:[#allocation12 + $0x1180] sm:$0xff]  ;;  %v16083_v38 = vcombine.high %v1323_v24, %v1327_v27  ;;  %6977 = vmatprep.subr.bf16.mxu0 %v15955_v34  ;;  %v16082_v44 = vcombine.low %v1323_v24, %v1327_v27  ;;  %6928 = vmatmul.mubr.bf16.vlgmr.msra.gmra.mxu0 %v19834_v40 }
 0x274   :  { %v1191_v35 = vld [vmem:[#allocation12 + $0x11a0] sm:$0xff]  ;;  %6978 = vmatpush1.bf16.msra.mxu0 %v15954_v42 }
 0x275   :  { %v1315_v36 = vld [vmem:[#allocation12 + $0x1580] sm:$0xff]  ;;  %v15947_v45 = vcombine.high %v1187_v31, %v1191_v35  ;;  %7018 = vmatprep.subr.bf16.mxu1 %v16083_v38  ;;  %6969 = vmatmul.mubr.bf16.vlgmr.msra.gmra.mxu1 %v19836_v41  ;;  %v15946_v53 = vcombine.low %v1187_v31, %v1191_v35 }
 0x276   :  { %v1319_v37 = vld [vmem:[#allocation12 + $0x15a0] sm:$0xff]  ;;  %7019 = vmatpush1.bf16.msra.mxu1 %v16082_v44  ;;  %7050 = vmatprep.mubr.bf16.mxu1 %v19841_v52 }
 0x277   :  { %v604_v39 = vld [vmem:[#allocation3 + $0x48] sm:$0xff]  ;;  %v16075_v46 = vcombine.high %v1315_v36, %v1319_v37  ;;  %6979 = vmatprep.subr.bf16.mxu0 %v15947_v45  ;;  %v16074_v54 = vcombine.low %v1315_v36, %v1319_v37 }
 0x278   :  { %v1179_v47 = vld [vmem:[#allocation12 + $0x1140] sm:$0xff]  ;;  %v19838_v50 = vpack.c.bf16 %v604_v39, %v604_v39  ;;  %6980 = vmatpush1.bf16.msra.mxu0 %v15946_v53 }
 0x279   :  { %v1183_v48 = vld [vmem:[#allocation12 + $0x1160] sm:$0xff]  ;;  %7020 = vmatprep.subr.bf16.mxu1 %v16075_v46 }
 0x27a   :  { %v1307_v49 = vld [vmem:[#allocation12 + $0x1540] sm:$0xff]  ;;  %v15939_v55 = vcombine.high %v1179_v47, %v1183_v48  ;;  %7009 = vmatprep.mubr.bf16.mxu0 %v19838_v50  ;;  %v15938_v63 = vcombine.low %v1179_v47, %v1183_v48  ;;  %7021 = vmatpush1.bf16.msra.mxu1 %v16074_v54 }
 0x27b   :  { %v1311_v51 = vld [vmem:[#allocation12 + $0x1560] sm:$0xff] }
 0x27c   :  { %v1171_v56 = vld [vmem:[#allocation12 + $0x1100] sm:$0xff]  ;;  %v16067_v61 = vcombine.high %v1307_v49, %v1311_v51  ;;  %6981 = vmatprep.subr.bf16.mxu0 %v15939_v55  ;;  %v16066_v0 = vcombine.low %v1307_v49, %v1311_v51 }
 0x27d   :  { %v1175_v57 = vld [vmem:[#allocation12 + $0x1120] sm:$0xff]  ;;  %6982 = vmatpush1.bf16.msra.mxu0 %v15938_v63 }
 0x27e   :  { %v1299_v58 = vld [vmem:[#allocation12 + $0x1500] sm:$0xff]  ;;  %v15931_v1 = vcombine.high %v1171_v56, %v1175_v57  ;;  %7022 = vmatprep.subr.bf16.mxu1 %v16067_v61  ;;  %v15930_v7 = vcombine.low %v1171_v56, %v1175_v57 }
 0x27f   :  { %v1303_v62 = vld [vmem:[#allocation12 + $0x1520] sm:$0xff]  ;;  %7023 = vmatpush1.bf16.msra.mxu1 %v16066_v0 }
 0x280   :  { %v1163_v2 = vld [vmem:[#allocation12 + $0x10c0] sm:$0xff]  ;;  %v16059_v5 = vcombine.high %v1299_v58, %v1303_v62  ;;  %6983 = vmatprep.subr.bf16.mxu0 %v15931_v1  ;;  %v16058_v8 = vcombine.low %v1299_v58, %v1303_v62 }
 0x281   :  { %v1167_v3 = vld [vmem:[#allocation12 + $0x10e0] sm:$0xff]  ;;  %6984 = vmatpush1.bf16.msra.mxu0 %v15930_v7 }
 0x282   :  { %v1291_v4 = vld [vmem:[#allocation12 + $0x14c0] sm:$0xff]  ;;  %v15923_v9 = vcombine.high %v1163_v2, %v1167_v3  ;;  %7024 = vmatprep.subr.bf16.mxu1 %v16059_v5  ;;  %v15922_v15 = vcombine.low %v1163_v2, %v1167_v3 }
 0x283   :  { %v1295_v6 = vld [vmem:[#allocation12 + $0x14e0] sm:$0xff]  ;;  %7025 = vmatpush1.bf16.msra.mxu1 %v16058_v8 }
 0x284   :  { %v1155_v10 = vld [vmem:[#allocation12 + $0x1080] sm:$0xff]  ;;  %v16051_v13 = vcombine.high %v1291_v4, %v1295_v6  ;;  %6985 = vmatprep.subr.bf16.mxu0 %v15923_v9  ;;  %v16050_v16 = vcombine.low %v1291_v4, %v1295_v6 }
 0x285   :  { %v1159_v11 = vld [vmem:[#allocation12 + $0x10a0] sm:$0xff]  ;;  %6986 = vmatpush1.bf16.msra.mxu0 %v15922_v15 }
 0x286   :  { %v1283_v12 = vld [vmem:[#allocation12 + $0x1480] sm:$0xff]  ;;  %v15915_v18 = vcombine.high %v1155_v10, %v1159_v11  ;;  %7026 = vmatprep.subr.bf16.mxu1 %v16051_v13  ;;  %v15914_v25 = vcombine.low %v1155_v10, %v1159_v11 }
 0x287   :  { %v1287_v14 = vld [vmem:[#allocation12 + $0x14a0] sm:$0xff]  ;;  %7027 = vmatpush1.bf16.msra.mxu1 %v16050_v16 }
 0x288   :  { %v1147_v19 = vld [vmem:[#allocation12 + $0x1040] sm:$0xff]  ;;  %v16043_v23 = vcombine.high %v1283_v12, %v1287_v14  ;;  %6987 = vmatprep.subr.bf16.mxu0 %v15915_v18  ;;  %v16042_v26 = vcombine.low %v1283_v12, %v1287_v14 }
 0x289   :  { %v1151_v20 = vld [vmem:[#allocation12 + $0x1060] sm:$0xff]  ;;  %6988 = vmatpush1.bf16.msra.mxu0 %v15914_v25 }
 0x28a   :  { %v1275_v22 = vld [vmem:[#allocation12 + $0x1440] sm:$0xff]  ;;  %v15907_v27 = vcombine.high %v1147_v19, %v1151_v20  ;;  %7028 = vmatprep.subr.bf16.mxu1 %v16043_v23  ;;  %v15906_v35 = vcombine.low %v1147_v19, %v1151_v20 }
 0x28b   :  { %v1279_v24 = vld [vmem:[#allocation12 + $0x1460] sm:$0xff]  ;;  %7029 = vmatpush1.bf16.msra.mxu1 %v16042_v26 }
 0x28c   :  { %v1139_v28 = vld [vmem:[#allocation12 + $0x1000] sm:$0xff]  ;;  %v16035_v33 = vcombine.high %v1275_v22, %v1279_v24  ;;  %6989 = vmatprep.subr.bf16.mxu0 %v15907_v27  ;;  %v16034_v36 = vcombine.low %v1275_v22, %v1279_v24 }
 0x28d   :  { %v1143_v30 = vld [vmem:[#allocation12 + $0x1020] sm:$0xff]  ;;  %6990 = vmatpush1.bf16.msra.mxu0 %v15906_v35 }
 0x28e   :  { %v1267_v31 = vld [vmem:[#allocation12 + $0x1400] sm:$0xff]  ;;  %v15899_v37 = vcombine.high %v1139_v28, %v1143_v30  ;;  %7030 = vmatprep.subr.bf16.mxu1 %v16035_v33  ;;  %v15898_v45 = vcombine.low %v1139_v28, %v1143_v30 }
 0x28f   :  { %v1271_v34 = vld [vmem:[#allocation12 + $0x1420] sm:$0xff]  ;;  %7031 = vmatpush1.bf16.msra.mxu1 %v16034_v36 }
 0x290   :  { %v1259_v38 = vld [vmem:[#allocation12 + $0x13c0] sm:$0xff]  ;;  %v16027_v43 = vcombine.high %v1267_v31, %v1271_v34  ;;  %6991 = vmatprep.subr.bf16.mxu0 %v15899_v37  ;;  %v16026_v46 = vcombine.low %v1267_v31, %v1271_v34 }
 0x291   :  { %v1263_v39 = vld [vmem:[#allocation12 + $0x13e0] sm:$0xff]  ;;  %6992 = vmatpush1.bf16.msra.mxu0 %v15898_v45 }
 0x292   :  { %v1387_v42 = vld [vmem:[#allocation12 + $0x17c0] sm:$0xff]  ;;  %v16019_v47 = vcombine.high %v1259_v38, %v1263_v39  ;;  %7032 = vmatprep.subr.bf16.mxu1 %v16027_v43  ;;  %v16018_v55 = vcombine.low %v1259_v38, %v1263_v39 }
 0x293   :  { %v1391_v44 = vld [vmem:[#allocation12 + $0x17e0] sm:$0xff]  ;;  %7033 = vmatpush1.bf16.msra.mxu1 %v16026_v46 }
 0x294   :  { %v1251_v48 = vld [vmem:[#allocation12 + $0x1380] sm:$0xff]  ;;  %v16147_v53 = vcombine.high %v1387_v42, %v1391_v44  ;;  %6993 = vmatprep.subr.bf16.mxu0 %v16019_v47  ;;  %v16146_v56 = vcombine.low %v1387_v42, %v1391_v44 }
 0x295   :  { %v1255_v49 = vld [vmem:[#allocation12 + $0x13a0] sm:$0xff]  ;;  %6994 = vmatpush2.bf16.msra.mxu0 %v16018_v55 }
 0x296   :  { %v1379_v51 = vld [vmem:[#allocation12 + $0x1780] sm:$0xff]  ;;  %v16011_v57 = vcombine.high %v1251_v48, %v1255_v49  ;;  %7034 = vmatprep.subr.bf16.mxu1 %v16147_v53  ;;  %v16010_v1 = vcombine.low %v1251_v48, %v1255_v49 }
 0x297   :  { %v1383_v54 = vld [vmem:[#allocation12 + $0x17a0] sm:$0xff]  ;;  %7035 = vmatpush2.bf16.msra.mxu1 %v16146_v56  ;;  %v603_v56 = vld [vmem:[#allocation3 + $0x40] sm:$0xff] }
 0x298   :  { %v1243_v58 = vld [vmem:[#allocation12 + $0x1340] sm:$0xff]  ;;  %v16139_v63 = vcombine.high %v1379_v51, %v1383_v54  ;;  %6995 = vmatprep.subr.bf16.mxu0 %v16011_v57  ;;  %v16138_v2 = vcombine.low %v1379_v51, %v1383_v54 }
 0x299   :  { %v1247_v61 = vld [vmem:[#allocation12 + $0x1360] sm:$0xff]  ;;  %6996 = vmatpush2.bf16.msra.mxu0 %v16010_v1 }
 0x29a   :  { %v1371_v62 = vld [vmem:[#allocation12 + $0x1740] sm:$0xff]  ;;  %v16003_v3 = vcombine.high %v1243_v58, %v1247_v61  ;;  %7036 = vmatprep.subr.bf16.mxu1 %v16139_v63  ;;  %v16002_v9 = vcombine.low %v1243_v58, %v1247_v61  ;;  %v605_v58 = vld [vmem:[#allocation3 + $0x50] sm:$0xff] }
 0x29b   :  { %v1375_v0 = vld [vmem:[#allocation12 + $0x1760] sm:$0xff]  ;;  %7037 = vmatpush2.bf16.msra.mxu1 %v16138_v2 }
 0x29c   :  { %v1235_v4 = vld [vmem:[#allocation12 + $0x1300] sm:$0xff]  ;;  %v16131_v7 = vcombine.high %v1371_v62, %v1375_v0  ;;  %6997 = vmatprep.subr.bf16.mxu0 %v16003_v3  ;;  %v16130_v10 = vcombine.low %v1371_v62, %v1375_v0 }
 0x29d   :  { %v1239_v5 = vld [vmem:[#allocation12 + $0x1320] sm:$0xff]  ;;  %6998 = vmatpush2.bf16.msra.mxu0 %v16002_v9 }
 0x29e   :  { %v1363_v6 = vld [vmem:[#allocation12 + $0x1700] sm:$0xff]  ;;  %v15995_v11 = vcombine.high %v1235_v4, %v1239_v5  ;;  %7038 = vmatprep.subr.bf16.mxu1 %v16131_v7  ;;  %v15994_v18 = vcombine.low %v1235_v4, %v1239_v5  ;;  %v19846_v7 = vpack.c.bf16 %v603_v56, %v603_v56 }
 0x29f   :  { %v1367_v8 = vld [vmem:[#allocation12 + $0x1720] sm:$0xff]  ;;  %7039 = vmatpush2.bf16.msra.mxu1 %v16130_v10 }
 0x2a0   :  { %v1227_v12 = vld [vmem:[#allocation12 + $0x12c0] sm:$0xff]  ;;  %v16123_v15 = vcombine.high %v1363_v6, %v1367_v8  ;;  %6999 = vmatprep.subr.bf16.mxu0 %v15995_v11  ;;  %v16122_v19 = vcombine.low %v1363_v6, %v1367_v8  ;;  %v610_v6 = vld [vmem:[#allocation3 + $0x78] sm:$0xff]  ;;  %v19848_v8 = vpack.c.bf16 %v605_v58, %v605_v58 }
 0x2a1   :  { %v1231_v13 = vld [vmem:[#allocation12 + $0x12e0] sm:$0xff]  ;;  %7000 = vmatpush2.bf16.msra.mxu0 %v15994_v18 }
 0x2a2   :  { %v1355_v14 = vld [vmem:[#allocation12 + $0x16c0] sm:$0xff]  ;;  %v15987_v20 = vcombine.high %v1227_v12, %v1231_v13  ;;  %7040 = vmatprep.subr.bf16.mxu1 %v16123_v15  ;;  %v15986_v27 = vcombine.low %v1227_v12, %v1231_v13 }
 0x2a3   :  { %v1359_v16 = vld [vmem:[#allocation12 + $0x16e0] sm:$0xff]  ;;  %7041 = vmatpush2.bf16.msra.mxu1 %v16122_v19  ;;  %v19853_v19 = vpack.c.bf16 %v610_v6, %v610_v6 }
 0x2a4   :  { %v1219_v22 = vld [vmem:[#allocation12 + $0x1280] sm:$0xff]  ;;  %v16115_v25 = vcombine.high %v1355_v14, %v1359_v16  ;;  %7001 = vmatprep.subr.bf16.mxu0 %v15987_v20  ;;  %v16114_v28 = vcombine.low %v1355_v14, %v1359_v16 }
 0x2a5   :  { %v1223_v23 = vld [vmem:[#allocation12 + $0x12a0] sm:$0xff]  ;;  %7002 = vmatpush2.bf16.msra.mxu0 %v15986_v27 }
 0x2a6   :  { %v1347_v24 = vld [vmem:[#allocation12 + $0x1680] sm:$0xff]  ;;  %v15979_v30 = vcombine.high %v1219_v22, %v1223_v23  ;;  %7042 = vmatprep.subr.bf16.mxu1 %v16115_v25  ;;  %v15978_v37 = vcombine.low %v1219_v22, %v1223_v23 }
 0x2a7   :  { %v1351_v26 = vld [vmem:[#allocation12 + $0x16a0] sm:$0xff]  ;;  %7043 = vmatpush2.bf16.msra.mxu1 %v16114_v28 }
 0x2a8   :  { %v1211_v31 = vld [vmem:[#allocation12 + $0x1240] sm:$0xff]  ;;  %v16107_v35 = vcombine.high %v1347_v24, %v1351_v26  ;;  %7003 = vmatprep.subr.bf16.mxu0 %v15979_v30  ;;  %v16106_v38 = vcombine.low %v1347_v24, %v1351_v26 }
 0x2a9   :  { %v1215_v33 = vld [vmem:[#allocation12 + $0x1260] sm:$0xff]  ;;  %7004 = vmatpush2.bf16.msra.mxu0 %v15978_v37 }
 0x2aa   :  { %v1339_v34 = vld [vmem:[#allocation12 + $0x1640] sm:$0xff]  ;;  %v15971_v39 = vcombine.high %v1211_v31, %v1215_v33  ;;  %7044 = vmatprep.subr.bf16.mxu1 %v16107_v35  ;;  %v15970_v47 = vcombine.low %v1211_v31, %v1215_v33 }
 0x2ab   :  { %v1343_v36 = vld [vmem:[#allocation12 + $0x1660] sm:$0xff]  ;;  %7045 = vmatpush2.bf16.msra.mxu1 %v16106_v38 }
 0x2ac   :  { %v1203_v42 = vld [vmem:[#allocation12 + $0x1200] sm:$0xff]  ;;  %v16099_v45 = vcombine.high %v1339_v34, %v1343_v36  ;;  %7005 = vmatprep.subr.bf16.mxu0 %v15971_v39  ;;  %v16098_v48 = vcombine.low %v1339_v34, %v1343_v36 }
 0x2ad   :  { %v1207_v43 = vld [vmem:[#allocation12 + $0x1220] sm:$0xff]  ;;  %7006 = vmatpush2.bf16.msra.mxu0 %v15970_v47 }
 0x2ae   :  { %v1331_v44 = vld [vmem:[#allocation12 + $0x1600] sm:$0xff]  ;;  %v15963_v49 = vcombine.high %v1203_v42, %v1207_v43  ;;  %7046 = vmatprep.subr.bf16.mxu1 %v16099_v45  ;;  %v15962_v61 = vcombine.low %v1203_v42, %v1207_v43 }
 0x2af   :  { %v1335_v46 = vld [vmem:[#allocation12 + $0x1620] sm:$0xff]  ;;  %7047 = vmatpush2.bf16.msra.mxu1 %v16098_v48 }
 0x2b0   :  { %v1451_v51 = vld [vmem:[#allocation12 + $0x19c0] sm:$0xff]  ;;  %v16091_v55 = vcombine.high %v1331_v44, %v1335_v46  ;;  %7007 = vmatprep.subr.bf16.mxu0 %v15963_v49  ;;  %v16090_v0 = vcombine.low %v1331_v44, %v1335_v46 }
 0x2b1   :  { %v1455_v53 = vld [vmem:[#allocation12 + $0x19e0] sm:$0xff]  ;;  %7008 = vmatpush2.bf16.msra.mxu0 %v15962_v61 }
 0x2b2   :  { %v1579_v54 = vld [vmem:[#allocation12 + $0x1dc0] sm:$0xff]  ;;  %v16211_v1 = vcombine.high %v1451_v51, %v1455_v53  ;;  %7048 = vmatprep.subr.bf16.mxu1 %v16091_v55  ;;  %v16210_v9 = vcombine.low %v1451_v51, %v1455_v53 }
 0x2b3   :  { %v1583_v57 = vld [vmem:[#allocation12 + $0x1de0] sm:$0xff]  ;;  %7049 = vmatpush2.bf16.msra.mxu1 %v16090_v0 }
 0x2b4   :  { %v1443_v62 = vld [vmem:[#allocation12 + $0x1980] sm:$0xff]  ;;  %v16339_v5 = vcombine.high %v1579_v54, %v1583_v57  ;;  %7059 = vmatprep.subr.bf16.mxu0 %v16211_v1  ;;  %v16338_v10 = vcombine.low %v1579_v54, %v1583_v57  ;;  %7010 = vmatmul.mubr.bf16.vlgmr.msra.gmra.mxu0 %v19846_v7 }
 0x2b5   :  { %v1447_v63 = vld [vmem:[#allocation12 + $0x19a0] sm:$0xff]  ;;  %7060 = vmatpush1.bf16.msra.mxu0 %v16210_v9 }
 0x2b6   :  { %v1571_v2 = vld [vmem:[#allocation12 + $0x1d80] sm:$0xff]  ;;  %v16203_v11 = vcombine.high %v1443_v62, %v1447_v63  ;;  %7100 = vmatprep.subr.bf16.mxu1 %v16339_v5  ;;  %7051 = vmatmul.mubr.bf16.vlgmr.msra.gmra.mxu1 %v19848_v8  ;;  %v16202_v20 = vcombine.low %v1443_v62, %v1447_v63 }
 0x2b7   :  { %v1575_v3 = vld [vmem:[#allocation12 + $0x1da0] sm:$0xff]  ;;  %7101 = vmatpush1.bf16.msra.mxu1 %v16338_v10  ;;  %7132 = vmatprep.mubr.bf16.mxu1 %v19853_v19 }
 0x2b8   :  { %v608_v4 = vld [vmem:[#allocation3 + $0x68] sm:$0xff]  ;;  %v16331_v15 = vcombine.high %v1571_v2, %v1575_v3  ;;  %7061 = vmatprep.subr.bf16.mxu0 %v16203_v11  ;;  %v16330_v22 = vcombine.low %v1571_v2, %v1575_v3 }
 0x2b9   :  { %v1435_v12 = vld [vmem:[#allocation12 + $0x1940] sm:$0xff]  ;;  %v19850_v18 = vpack.c.bf16 %v608_v4, %v608_v4  ;;  %7062 = vmatpush1.bf16.msra.mxu0 %v16202_v20 }
 0x2ba   :  { %v1439_v13 = vld [vmem:[#allocation12 + $0x1960] sm:$0xff]  ;;  %7102 = vmatprep.subr.bf16.mxu1 %v16331_v15 }
 0x2bb   :  { %v1563_v14 = vld [vmem:[#allocation12 + $0x1d40] sm:$0xff]  ;;  %v16195_v23 = vcombine.high %v1435_v12, %v1439_v13  ;;  %7091 = vmatprep.mubr.bf16.mxu0 %v19850_v18  ;;  %v16194_v30 = vcombine.low %v1435_v12, %v1439_v13  ;;  %7103 = vmatpush1.bf16.msra.mxu1 %v16330_v22 }
 0x2bc   :  { %v1567_v16 = vld [vmem:[#allocation12 + $0x1d60] sm:$0xff] }
 0x2bd   :  { %v1427_v24 = vld [vmem:[#allocation12 + $0x1900] sm:$0xff]  ;;  %v16323_v27 = vcombine.high %v1563_v14, %v1567_v16  ;;  %7063 = vmatprep.subr.bf16.mxu0 %v16195_v23  ;;  %v16322_v31 = vcombine.low %v1563_v14, %v1567_v16 }
 0x2be   :  { %v1431_v25 = vld [vmem:[#allocation12 + $0x1920] sm:$0xff]  ;;  %7064 = vmatpush1.bf16.msra.mxu0 %v16194_v30 }
 0x2bf   :  { %v1555_v26 = vld [vmem:[#allocation12 + $0x1d00] sm:$0xff]  ;;  %v16187_v33 = vcombine.high %v1427_v24, %v1431_v25  ;;  %7104 = vmatprep.subr.bf16.mxu1 %v16323_v27  ;;  %v16186_v39 = vcombine.low %v1427_v24, %v1431_v25 }
 0x2c0   :  { %v1559_v28 = vld [vmem:[#allocation12 + $0x1d20] sm:$0xff]  ;;  %7105 = vmatpush1.bf16.msra.mxu1 %v16322_v31 }
 0x2c1   :  { %v1419_v34 = vld [vmem:[#allocation12 + $0x18c0] sm:$0xff]  ;;  %v16315_v37 = vcombine.high %v1555_v26, %v1559_v28  ;;  %7065 = vmatprep.subr.bf16.mxu0 %v16187_v33  ;;  %v16314_v42 = vcombine.low %v1555_v26, %v1559_v28 }
 0x2c2   :  { %v1423_v35 = vld [vmem:[#allocation12 + $0x18e0] sm:$0xff]  ;;  %7066 = vmatpush1.bf16.msra.mxu0 %v16186_v39 }
 0x2c3   :  { %v1547_v36 = vld [vmem:[#allocation12 + $0x1cc0] sm:$0xff]  ;;  %v16179_v43 = vcombine.high %v1419_v34, %v1423_v35  ;;  %7106 = vmatprep.subr.bf16.mxu1 %v16315_v37  ;;  %v16178_v49 = vcombine.low %v1419_v34, %v1423_v35 }
 0x2c4   :  { %v1551_v38 = vld [vmem:[#allocation12 + $0x1ce0] sm:$0xff]  ;;  %7107 = vmatpush1.bf16.msra.mxu1 %v16314_v42 }
 0x2c5   :  { %v1411_v44 = vld [vmem:[#allocation12 + $0x1880] sm:$0xff]  ;;  %v16307_v47 = vcombine.high %v1547_v36, %v1551_v38  ;;  %7067 = vmatprep.subr.bf16.mxu0 %v16179_v43  ;;  %v16306_v51 = vcombine.low %v1547_v36, %v1551_v38 }
 0x2c6   :  { %v1415_v45 = vld [vmem:[#allocation12 + $0x18a0] sm:$0xff]  ;;  %7068 = vmatpush1.bf16.msra.mxu0 %v16178_v49 }
 0x2c7   :  { %v1539_v46 = vld [vmem:[#allocation12 + $0x1c80] sm:$0xff]  ;;  %v16171_v53 = vcombine.high %v1411_v44, %v1415_v45  ;;  %7108 = vmatprep.subr.bf16.mxu1 %v16307_v47  ;;  %v16170_v61 = vcombine.low %v1411_v44, %v1415_v45 }
 0x2c8   :  { %v1543_v48 = vld [vmem:[#allocation12 + $0x1ca0] sm:$0xff]  ;;  %7109 = vmatpush1.bf16.msra.mxu1 %v16306_v51 }
 0x2c9   :  { %v1403_v54 = vld [vmem:[#allocation12 + $0x1840] sm:$0xff]  ;;  %v16299_v57 = vcombine.high %v1539_v46, %v1543_v48  ;;  %7069 = vmatprep.subr.bf16.mxu0 %v16171_v53  ;;  %v16298_v62 = vcombine.low %v1539_v46, %v1543_v48 }
 0x2ca   :  { %v1407_v55 = vld [vmem:[#allocation12 + $0x1860] sm:$0xff]  ;;  %7070 = vmatpush1.bf16.msra.mxu0 %v16170_v61 }
 0x2cb   :  { %v1531_v56 = vld [vmem:[#allocation12 + $0x1c40] sm:$0xff]  ;;  %v16163_v63 = vcombine.high %v1403_v54, %v1407_v55  ;;  %7110 = vmatprep.subr.bf16.mxu1 %v16299_v57  ;;  %v16162_v5 = vcombine.low %v1403_v54, %v1407_v55 }
 0x2cc   :  { %v1535_v58 = vld [vmem:[#allocation12 + $0x1c60] sm:$0xff]  ;;  %7111 = vmatpush1.bf16.msra.mxu1 %v16298_v62 }
 0x2cd   :  { %v1395_v0 = vld [vmem:[#allocation12 + $0x1800] sm:$0xff]  ;;  %v16291_v3 = vcombine.high %v1531_v56, %v1535_v58  ;;  %7071 = vmatprep.subr.bf16.mxu0 %v16163_v63  ;;  %v16290_v6 = vcombine.low %v1531_v56, %v1535_v58 }
 0x2ce   :  { %v1399_v1 = vld [vmem:[#allocation12 + $0x1820] sm:$0xff]  ;;  %7072 = vmatpush1.bf16.msra.mxu0 %v16162_v5 }
 0x2cf   :  { %v1523_v2 = vld [vmem:[#allocation12 + $0x1c00] sm:$0xff]  ;;  %v16155_v9 = vcombine.high %v1395_v0, %v1399_v1  ;;  %7112 = vmatprep.subr.bf16.mxu1 %v16291_v3  ;;  %v16154_v15 = vcombine.low %v1395_v0, %v1399_v1 }
 0x2d0   :  { %v1527_v4 = vld [vmem:[#allocation12 + $0x1c20] sm:$0xff]  ;;  %7113 = vmatpush1.bf16.msra.mxu1 %v16290_v6 }
 0x2d1   :  { %v1515_v10 = vld [vmem:[#allocation12 + $0x1bc0] sm:$0xff]  ;;  %v16283_v13 = vcombine.high %v1523_v2, %v1527_v4  ;;  %7073 = vmatprep.subr.bf16.mxu0 %v16155_v9  ;;  %v16282_v16 = vcombine.low %v1523_v2, %v1527_v4 }
 0x2d2   :  { %v1519_v11 = vld [vmem:[#allocation12 + $0x1be0] sm:$0xff]  ;;  %7074 = vmatpush1.bf16.msra.mxu0 %v16154_v15 }
 0x2d3   :  { %v1643_v12 = vld [vmem:[#allocation12 + $0x1fc0] sm:$0xff]  ;;  %v16275_v20 = vcombine.high %v1515_v10, %v1519_v11  ;;  %7114 = vmatprep.subr.bf16.mxu1 %v16283_v13  ;;  %v16274_v27 = vcombine.low %v1515_v10, %v1519_v11  ;;  %v1653_v13 = vlaneseq }
 0x2d4   :  { %v1647_v14 = vld [vmem:[#allocation12 + $0x1fe0] sm:$0xff]  ;;  %7115 = vmatpush1.bf16.msra.mxu1 %v16282_v16 }
 0x2d5   :  { %v1507_v22 = vld [vmem:[#allocation12 + $0x1b80] sm:$0xff]  ;;  %v16403_v25 = vcombine.high %v1643_v12, %v1647_v14  ;;  %7075 = vmatprep.subr.bf16.mxu0 %v16275_v20  ;;  %v16402_v28 = vcombine.low %v1643_v12, %v1647_v14 }
 0x2d6   :  { %v1511_v23 = vld [vmem:[#allocation12 + $0x1ba0] sm:$0xff]  ;;  %7076 = vmatpush2.bf16.msra.mxu0 %v16274_v27 }
 0x2d7   :  { %v1635_v24 = vld [vmem:[#allocation12 + $0x1f80] sm:$0xff]  ;;  %v16267_v30 = vcombine.high %v1507_v22, %v1511_v23  ;;  %7116 = vmatprep.subr.bf16.mxu1 %v16403_v25  ;;  %v16266_v37 = vcombine.low %v1507_v22, %v1511_v23 }
 0x2d8   :  { %v1639_v26 = vld [vmem:[#allocation12 + $0x1fa0] sm:$0xff]  ;;  %7117 = vmatpush2.bf16.msra.mxu1 %v16402_v28 }
 0x2d9   :  { %v1499_v31 = vld [vmem:[#allocation12 + $0x1b40] sm:$0xff]  ;;  %v16395_v35 = vcombine.high %v1635_v24, %v1639_v26  ;;  %7077 = vmatprep.subr.bf16.mxu0 %v16267_v30  ;;  %v16394_v38 = vcombine.low %v1635_v24, %v1639_v26  ;;  %v19858_v26 = vshrl.u32 %v1653_v13, 7  ;;  %v660_v13 = vld [vmem:[#allocation12 + $0x108] sm:$0xff] }
 0x2da   :  { %v1503_v33 = vld [vmem:[#allocation12 + $0x1b60] sm:$0xff]  ;;  %7078 = vmatpush2.bf16.msra.mxu0 %v16266_v37  ;;  %v607_v37 = vld [vmem:[#allocation3 + $0x60] sm:$0xff] }
 0x2db   :  { %v1627_v34 = vld [vmem:[#allocation12 + $0x1f40] sm:$0xff]  ;;  %v16259_v39 = vcombine.high %v1499_v31, %v1503_v33  ;;  %7118 = vmatprep.subr.bf16.mxu1 %v16395_v35  ;;  %v16258_v47 = vcombine.low %v1499_v31, %v1503_v33  ;;  %v684_v31 = vld [vmem:[#allocation12 + $0x1c8] sm:$0xff] }
 0x2dc   :  { %v1631_v36 = vld [vmem:[#allocation12 + $0x1f60] sm:$0xff]  ;;  %7119 = vmatpush2.bf16.msra.mxu1 %v16394_v38  ;;  %v688_v33 = vld [vmem:[#allocation12 + $0x1e8] sm:$0xff] }
 0x2dd   :  { %v1491_v42 = vld [vmem:[#allocation12 + $0x1b00] sm:$0xff]  ;;  %v16387_v45 = vcombine.high %v1627_v34, %v1631_v36  ;;  %7079 = vmatprep.subr.bf16.mxu0 %v16259_v39  ;;  %v16386_v48 = vcombine.low %v1627_v34, %v1631_v36  ;;  %v812_v34 = vld [vmem:[#allocation12 + $0x5c8] sm:$0xff]  ;;  %v19861_v36 = vsub.s32 0, %v19858_v26 }
 0x2de   :  { %v1495_v43 = vld [vmem:[#allocation12 + $0x1b20] sm:$0xff]  ;;  %7080 = vmatpush2.bf16.msra.mxu0 %v16258_v47  ;;  %v816_v38 = vld [vmem:[#allocation12 + $0x5e8] sm:$0xff] }
 0x2df   :  { %v1619_v44 = vld [vmem:[#allocation12 + $0x1f00] sm:$0xff]  ;;  %v16251_v49 = vcombine.high %v1491_v42, %v1495_v43  ;;  %7120 = vmatprep.subr.bf16.mxu1 %v16387_v45  ;;  %v16250_v57 = vcombine.low %v1491_v42, %v1495_v43  ;;  %v609_v42 = vld [vmem:[#allocation3 + $0x70] sm:$0xff]  ;;  %v15445_v45 = vcombine.high %v684_v31, %v688_v33 }
 0x2e0   :  { %v1623_v46 = vld [vmem:[#allocation12 + $0x1f20] sm:$0xff]  ;;  %7121 = vmatpush2.bf16.msra.mxu1 %v16386_v48  ;;  %v680_v47 = vld [vmem:[#allocation12 + $0x1a8] sm:$0xff] }
 0x2e1   :  { %v1483_v51 = vld [vmem:[#allocation12 + $0x1ac0] sm:$0xff]  ;;  %v16379_v55 = vcombine.high %v1619_v44, %v1623_v46  ;;  %7081 = vmatprep.subr.bf16.mxu0 %v16251_v49  ;;  %v16378_v58 = vcombine.low %v1619_v44, %v1623_v46  ;;  %v676_v46 = vld [vmem:[#allocation12 + $0x188] sm:$0xff]  ;;  %v15573_v49 = vcombine.high %v812_v34, %v816_v38 }
 0x2e2   :  { %v1487_v53 = vld [vmem:[#allocation12 + $0x1ae0] sm:$0xff]  ;;  %7082 = vmatpush2.bf16.msra.mxu0 %v16250_v57  ;;  %v804_v48 = vld [vmem:[#allocation12 + $0x588] sm:$0xff]  ;;  %v15444_v57 = vcombine.low %v684_v31, %v688_v33 }
 0x2e3   :  { %v1611_v54 = vld [vmem:[#allocation12 + $0x1ec0] sm:$0xff]  ;;  %v16243_v61 = vcombine.high %v1483_v51, %v1487_v53  ;;  %7122 = vmatprep.subr.bf16.mxu1 %v16379_v55  ;;  %v16242_v3 = vcombine.low %v1483_v51, %v1487_v53  ;;  %v19864_v51 = vsub.s32 1, %v19858_v26  ;;  %v808_v53 = vld [vmem:[#allocation12 + $0x5a8] sm:$0xff] }
 0x2e4   :  { %v1615_v56 = vld [vmem:[#allocation12 + $0x1ee0] sm:$0xff]  ;;  %7123 = vmatpush2.bf16.msra.mxu1 %v16378_v58  ;;  %v15572_v58 = vcombine.low %v812_v34, %v816_v38  ;;  %v780_v38 = vld [vmem:[#allocation12 + $0x4c8] sm:$0xff] }
 0x2e5   :  { %v1475_v62 = vld [vmem:[#allocation12 + $0x1a80] sm:$0xff]  ;;  %v16371_v1 = vcombine.high %v1611_v54, %v1615_v56  ;;  %7083 = vmatprep.subr.bf16.mxu0 %v16243_v61  ;;  %v16370_v4 = vcombine.low %v1611_v54, %v1615_v56  ;;  %v19866_v54 = vpack.c.bf16 %v607_v37, %v607_v37  ;;  %v19869_v56 = vpack.c.bf16 %v609_v42, %v609_v42  ;;  %v656_v37 = vld [vmem:[#allocation12 + $0xe8] sm:$0xff] }
 0x2e6   :  { %v1479_v63 = vld [vmem:[#allocation12 + $0x1aa0] sm:$0xff]  ;;  %7084 = vmatpush2.bf16.msra.mxu0 %v16242_v3  ;;  %v15437_v61 = vcombine.high %v676_v46, %v680_v47  ;;  %v800_v3 = vld [vmem:[#allocation12 + $0x568] sm:$0xff] }
 0x2e7   :  { %v1603_v0 = vld [vmem:[#allocation12 + $0x1e80] sm:$0xff]  ;;  %v16235_v5 = vcombine.high %v1475_v62, %v1479_v63  ;;  %7124 = vmatprep.subr.bf16.mxu1 %v16371_v1  ;;  %v16234_v14 = vcombine.low %v1475_v62, %v1479_v63  ;;  %v668_v62 = vld [vmem:[#allocation12 + $0x148] sm:$0xff] }
 0x2e8   :  { %v1607_v2 = vld [vmem:[#allocation12 + $0x1ea0] sm:$0xff]  ;;  %7125 = vmatpush2.bf16.msra.mxu1 %v16370_v4  ;;  %v672_v63 = vld [vmem:[#allocation12 + $0x168] sm:$0xff] }
 0x2e9   :  { %v1467_v6 = vld [vmem:[#allocation12 + $0x1a40] sm:$0xff]  ;;  %v16363_v11 = vcombine.high %v1603_v0, %v1607_v2  ;;  %7085 = vmatprep.subr.bf16.mxu0 %v16235_v5  ;;  %v16362_v15 = vcombine.low %v1603_v0, %v1607_v2  ;;  %v796_v0 = vld [vmem:[#allocation12 + $0x548] sm:$0xff]  ;;  %v15565_v2 = vcombine.high %v804_v48, %v808_v53 }
 0x2ea   :  { %v1471_v9 = vld [vmem:[#allocation12 + $0x1a60] sm:$0xff]  ;;  %7086 = vmatpush2.bf16.msra.mxu0 %v16234_v14  ;;  %v664_v14 = vld [vmem:[#allocation12 + $0x128] sm:$0xff]  ;;  %v15556_v33 = vcombine.low %v796_v0, %v800_v3 }
 0x2eb   :  { %v1595_v10 = vld [vmem:[#allocation12 + $0x1e40] sm:$0xff]  ;;  %v16227_v16 = vcombine.high %v1467_v6, %v1471_v9  ;;  %7126 = vmatprep.subr.bf16.mxu1 %v16363_v11  ;;  %v16226_v27 = vcombine.low %v1467_v6, %v1471_v9  ;;  %v15436_v9 = vcombine.low %v676_v46, %v680_v47  ;;  %v15564_v11 = vcombine.low %v804_v48, %v808_v53  ;;  %v644_v47 = vld [vmem:[#allocation12 + $0x88] sm:$0xff] }
 0x2ec   :  { %v1599_v12 = vld [vmem:[#allocation12 + $0x1e60] sm:$0xff]  ;;  %7127 = vmatpush2.bf16.msra.mxu1 %v16362_v15  ;;  %v788_v15 = vld [vmem:[#allocation12 + $0x508] sm:$0xff]  ;;  %v15421_v34 = vcombine.high %v660_v13, %v664_v14 }
 0x2ed   :  { %v1459_v20 = vld [vmem:[#allocation12 + $0x1a00] sm:$0xff]  ;;  %v16355_v24 = vcombine.high %v1595_v10, %v1599_v12  ;;  %7087 = vmatprep.subr.bf16.mxu0 %v16227_v16  ;;  %v16354_v28 = vcombine.low %v1595_v10, %v1599_v12  ;;  %v15429_v12 = vcombine.high %v668_v62, %v672_v63  ;;  %v648_v48 = vld [vmem:[#allocation12 + $0xa8] sm:$0xff] }
 0x2ee   :  { %v1463_v22 = vld [vmem:[#allocation12 + $0x1a20] sm:$0xff]  ;;  %7088 = vmatpush2.bf16.msra.mxu0 %v16226_v27 }
 0x2ef   :  { %v1587_v23 = vld [vmem:[#allocation12 + $0x1e00] sm:$0xff]  ;;  %v16219_v30 = vcombine.high %v1459_v20, %v1463_v22  ;;  %7128 = vmatprep.subr.bf16.mxu1 %v16355_v24  ;;  %v16218_v43 = vcombine.low %v1459_v20, %v1463_v22  ;;  %v792_v24 = vld [vmem:[#allocation12 + $0x528] sm:$0xff] }
 0x2f0   :  { %v1591_v25 = vld [vmem:[#allocation12 + $0x1e20] sm:$0xff]  ;;  %7129 = vmatpush2.bf16.msra.mxu1 %v16354_v28  ;;  %v15549_v42 = vcombine.high %v788_v15, %v792_v24 }
 0x2f1   :  { %v16347_v35 = vcombine.high %v1587_v23, %v1591_v25  ;;  %v1651_v39 = vld [vmem:[#allocation14] sm:$0xff]  ;;  %7089 = vmatprep.subr.bf16.mxu0 %v16219_v30  ;;  %v16346_v44 = vcombine.low %v1587_v23, %v1591_v25  ;;  %v15557_v23 = vcombine.high %v796_v0, %v800_v3  ;;  %v15428_v30 = vcombine.low %v668_v62, %v672_v63  ;;  %v636_v62 = vld [vmem:[#allocation12 + $0x48] sm:$0xff] }
 0x2f2   :  { %7090 = vmatpush2.bf16.msra.mxu0 %v16218_v43  ;;  %v1656_v55 = vrot.slane %v1651_v39, %v19861_v36  ;;  %v1660_v1 = vrot.slane %v1651_v39, %v19864_v51  ;;  %v6847_v4 = vpop.f32.mrf.mxu0  ;;  %v784_v43 = vld [vmem:[#allocation12 + $0x4e8] sm:$0xff]  ;;  %v15404_v3 = vcombine.low %v644_v47, %v648_v48 }
 0x2f3   :  { %7130 = vmatprep.subr.bf16.mxu1 %v16347_v35  ;;  %7141 = vmatprep.subr.bf16.mxu0 %v15445_v45  ;;  %v652_v35 = vld [vmem:[#allocation12 + $0xc8] sm:$0xff]  ;;  %v15548_v45 = vcombine.low %v788_v15, %v792_v24  ;;  %v15541_v53 = vcombine.high %v780_v38, %v784_v43 }
 0x2f4   :  { %7131 = vmatpush2.bf16.msra.mxu1 %v16346_v44  ;;  %v6848_v5 = vadd.f32 %v6847_v4, %v1656_v55  ;;  %v6888_v6 = vpop.f32.mrf.mxu1  ;;  %v6849_v10 = vpop.f32.mrf.mxu0  ;;  %v15420_v44 = vcombine.low %v660_v13, %v664_v14  ;;  %v15413_v46 = vcombine.high %v652_v35, %v656_v37  ;;  %v776_v55 = vld [vmem:[#allocation12 + $0x4a8] sm:$0xff] }
 0x2f5   :  { %7182 = vmatprep.subr.bf16.mxu1 %v15573_v49  ;;  %7092 = vmatmul.mubr.bf16.vlgmr.msra.gmra.mxu0 %v19866_v54  ;;  %v6850_v20 = vadd.f32 %v6849_v10, %v1660_v1  ;;  %v772_v49 = vld [vmem:[#allocation12 + $0x488] sm:$0xff] }
 0x2f6   :  { %7142 = vmatpush1.bf16.msra.mxu0 %v15444_v57  ;;  %v19874_v16 = vadd.f32 %v6888_v6, %v6848_v5  ;;  %v6890_v22 = vpop.f32.mrf.mxu1  ;;  %7173 = vmatprep.mubr.bf16.mxu0 %v19816_v59  ;;  %v6851_v25 = vpop.f32.mrf.mxu0  ;;  %v15412_v57 = vcombine.low %v652_v35, %v656_v37  ;;  %v640_v63 = vld [vmem:[#allocation12 + $0x68] sm:$0xff]  ;;  %v15533_v1 = vcombine.high %v772_v49, %v776_v55 }
 0x2f7   :  { %7133 = vmatmul.mubr.bf16.vlgmr.msra.gmra.mxu1 %v19869_v56  ;;  %7143 = vmatprep.subr.bf16.mxu0 %v15437_v61  ;;  %v19878_v27 = vadd.f32 %v6890_v22, %v6850_v20  ;;  %v15405_v61 = vcombine.high %v644_v47, %v648_v48  ;;  %v764_v0 = vld [vmem:[#allocation12 + $0x448] sm:$0xff]  ;;  %v15532_v4 = vcombine.low %v772_v49, %v776_v55 }
 0x2f8   :  { %7183 = vmatpush1.bf16.msra.mxu1 %v15572_v58  ;;  %7214 = vmatprep.mubr.bf16.mxu1 %v19818_v60  ;;  %v6892_v28 = vpop.f32.mrf.mxu1  ;;  %v6852_v31 = vpop.f32.mrf.mxu0  ;;  %v15540_v58 = vcombine.low %v780_v38, %v784_v43  ;;  %v15397_v5 = vcombine.high %v636_v62, %v640_v63  ;;  %v628_v6 = vld [vmem:[#allocation12 + $0x8] sm:$0xff]  ;;  %v15396_v13 = vcombine.low %v636_v62, %v640_v63 }
 0x2f9   :  { %7184 = vmatprep.subr.bf16.mxu1 %v15565_v2  ;;  %v768_v2 = vld [vmem:[#allocation12 + $0x468] sm:$0xff] }
 0x2fa   :  { %7144 = vmatpush1.bf16.msra.mxu0 %v15436_v9  ;;  %v6893_v39 = vpop.f32.mrf.mxu1  ;;  %v632_v9 = vld [vmem:[#allocation12 + $0x28] sm:$0xff]  ;;  %v15524_v14 = vcombine.low %v764_v0, %v768_v2 }
 0x2fb   :  { %7145 = vmatprep.subr.bf16.mxu0 %v15429_v12  ;;  %v756_v10 = vld [vmem:[#allocation12 + $0x408] sm:$0xff]  ;;  %v15389_v15 = vcombine.high %v628_v6, %v632_v9  ;;  %v15388_v28 = vcombine.low %v628_v6, %v632_v9 }
 0x2fc   :  { %7185 = vmatpush1.bf16.msra.mxu1 %v15564_v11  ;;  %v15525_v11 = vcombine.high %v764_v0, %v768_v2  ;;  %v760_v12 = vld [vmem:[#allocation12 + $0x428] sm:$0xff] }
 0x2fd   :  { %7186 = vmatprep.subr.bf16.mxu1 %v15557_v23  ;;  %v748_v20 = vld [vmem:[#allocation12 + $0x3c8] sm:$0xff]  ;;  %v15517_v24 = vcombine.high %v756_v10, %v760_v12 }
 0x2fe   :  { %7146 = vmatpush1.bf16.msra.mxu0 %v15428_v30  ;;  %v752_v22 = vld [vmem:[#allocation12 + $0x3e8] sm:$0xff]  ;;  %v15516_v30 = vcombine.low %v756_v10, %v760_v12 }
 0x2ff   :  { %7147 = vmatprep.subr.bf16.mxu0 %v15421_v34  ;;  %v876_v23 = vld [vmem:[#allocation12 + $0x7c8] sm:$0xff]  ;;  %v15509_v31 = vcombine.high %v748_v20, %v752_v22  ;;  %v15508_v39 = vcombine.low %v748_v20, %v752_v22 }
 0x300   :  { %7187 = vmatpush1.bf16.msra.mxu1 %v15556_v33  ;;  %v880_v25 = vld [vmem:[#allocation12 + $0x7e8] sm:$0xff] }
 0x301   :  { %7188 = vmatprep.subr.bf16.mxu1 %v15549_v42  ;;  %v740_v33 = vld [vmem:[#allocation12 + $0x388] sm:$0xff]  ;;  %v15637_v37 = vcombine.high %v876_v23, %v880_v25  ;;  %v15636_v42 = vcombine.low %v876_v23, %v880_v25 }
 0x302   :  { %7148 = vmatpush1.bf16.msra.mxu0 %v15420_v44  ;;  %v744_v34 = vld [vmem:[#allocation12 + $0x3a8] sm:$0xff] }
 0x303   :  { %7149 = vmatprep.subr.bf16.mxu0 %v15413_v46  ;;  %v868_v35 = vld [vmem:[#allocation12 + $0x788] sm:$0xff]  ;;  %v15501_v43 = vcombine.high %v740_v33, %v744_v34  ;;  %v15500_v49 = vcombine.low %v740_v33, %v744_v34 }
 0x304   :  { %7189 = vmatpush1.bf16.msra.mxu1 %v15548_v45  ;;  %v872_v38 = vld [vmem:[#allocation12 + $0x7a8] sm:$0xff] }
 0x305   :  { %7190 = vmatprep.subr.bf16.mxu1 %v15541_v53  ;;  %v732_v44 = vld [vmem:[#allocation12 + $0x348] sm:$0xff]  ;;  %v15629_v47 = vcombine.high %v868_v35, %v872_v38  ;;  %v15628_v53 = vcombine.low %v868_v35, %v872_v38 }
 0x306   :  { %7150 = vmatpush1.bf16.msra.mxu0 %v15412_v57  ;;  %v736_v45 = vld [vmem:[#allocation12 + $0x368] sm:$0xff] }
 0x307   :  { %7151 = vmatprep.subr.bf16.mxu0 %v15405_v61  ;;  %v860_v46 = vld [vmem:[#allocation12 + $0x748] sm:$0xff]  ;;  %v15493_v55 = vcombine.high %v732_v44, %v736_v45  ;;  %v15492_v0 = vcombine.low %v732_v44, %v736_v45 }
 0x308   :  { %7191 = vmatpush1.bf16.msra.mxu1 %v15540_v58  ;;  %v864_v48 = vld [vmem:[#allocation12 + $0x768] sm:$0xff] }
 0x309   :  { %7192 = vmatprep.subr.bf16.mxu1 %v15533_v1  ;;  %v724_v57 = vld [vmem:[#allocation12 + $0x308] sm:$0xff]  ;;  %v15621_v62 = vcombine.high %v860_v46, %v864_v48  ;;  %v15620_v1 = vcombine.low %v860_v46, %v864_v48 }
 0x30a   :  { %7152 = vmatpush1.bf16.msra.mxu0 %v15404_v3  ;;  %v728_v58 = vld [vmem:[#allocation12 + $0x328] sm:$0xff] }
 0x30b   :  { %7153 = vmatprep.subr.bf16.mxu0 %v15397_v5  ;;  %v852_v61 = vld [vmem:[#allocation12 + $0x708] sm:$0xff]  ;;  %v15485_v2 = vcombine.high %v724_v57, %v728_v58  ;;  %v15484_v10 = vcombine.low %v724_v57, %v728_v58 }
 0x30c   :  { %7193 = vmatpush1.bf16.msra.mxu1 %v15532_v4  ;;  %v856_v63 = vld [vmem:[#allocation12 + $0x728] sm:$0xff] }
 0x30d   :  { %7194 = vmatprep.subr.bf16.mxu1 %v15525_v11  ;;  %v716_v3 = vld [vmem:[#allocation12 + $0x2c8] sm:$0xff]  ;;  %v15613_v6 = vcombine.high %v852_v61, %v856_v63  ;;  %v15612_v11 = vcombine.low %v852_v61, %v856_v63 }
 0x30e   :  { %7154 = vmatpush1.bf16.msra.mxu0 %v15396_v13  ;;  %v720_v4 = vld [vmem:[#allocation12 + $0x2e8] sm:$0xff] }
 0x30f   :  { %7155 = vmatprep.subr.bf16.mxu0 %v15389_v15  ;;  %v844_v5 = vld [vmem:[#allocation12 + $0x6c8] sm:$0xff]  ;;  %v15477_v12 = vcombine.high %v716_v3, %v720_v4  ;;  %v15476_v23 = vcombine.low %v716_v3, %v720_v4 }
 0x310   :  { %7195 = vmatpush1.bf16.msra.mxu1 %v15524_v14  ;;  %v848_v9 = vld [vmem:[#allocation12 + $0x6e8] sm:$0xff] }
 0x311   :  { %7196 = vmatprep.subr.bf16.mxu1 %v15517_v24  ;;  %v708_v13 = vld [vmem:[#allocation12 + $0x288] sm:$0xff]  ;;  %v15605_v20 = vcombine.high %v844_v5, %v848_v9  ;;  %v15604_v24 = vcombine.low %v844_v5, %v848_v9 }
 0x312   :  { %7156 = vmatpush1.bf16.msra.mxu0 %v15388_v28  ;;  %v712_v14 = vld [vmem:[#allocation12 + $0x2a8] sm:$0xff] }
 0x313   :  { %7157 = vmatprep.subr.bf16.mxu0 %v15509_v31  ;;  %v836_v15 = vld [vmem:[#allocation12 + $0x688] sm:$0xff]  ;;  %v15469_v25 = vcombine.high %v708_v13, %v712_v14  ;;  %v15468_v35 = vcombine.low %v708_v13, %v712_v14 }
 0x314   :  { %7197 = vmatpush1.bf16.msra.mxu1 %v15516_v30  ;;  %v840_v22 = vld [vmem:[#allocation12 + $0x6a8] sm:$0xff] }
 0x315   :  { %7198 = vmatprep.subr.bf16.mxu1 %v15637_v37  ;;  %v700_v28 = vld [vmem:[#allocation12 + $0x248] sm:$0xff]  ;;  %v15597_v33 = vcombine.high %v836_v15, %v840_v22  ;;  %v15596_v37 = vcombine.low %v836_v15, %v840_v22 }
 0x316   :  { %7158 = vmatpush2.bf16.msra.mxu0 %v15508_v39  ;;  %v704_v30 = vld [vmem:[#allocation12 + $0x268] sm:$0xff] }
 0x317   :  { %7159 = vmatprep.subr.bf16.mxu0 %v15501_v43  ;;  %v828_v31 = vld [vmem:[#allocation12 + $0x648] sm:$0xff]  ;;  %v15461_v38 = vcombine.high %v700_v28, %v704_v30  ;;  %v15460_v46 = vcombine.low %v700_v28, %v704_v30 }
 0x318   :  { %7199 = vmatpush2.bf16.msra.mxu1 %v15636_v42  ;;  %v832_v34 = vld [vmem:[#allocation12 + $0x668] sm:$0xff] }
 0x319   :  { %7200 = vmatprep.subr.bf16.mxu1 %v15629_v47  ;;  %v692_v39 = vld [vmem:[#allocation12 + $0x208] sm:$0xff]  ;;  %v15589_v44 = vcombine.high %v828_v31, %v832_v34  ;;  %v15588_v47 = vcombine.low %v828_v31, %v832_v34 }
 0x31a   :  { %7160 = vmatpush2.bf16.msra.mxu0 %v15500_v49  ;;  %v696_v42 = vld [vmem:[#allocation12 + $0x228] sm:$0xff] }
 0x31b   :  { %7161 = vmatprep.subr.bf16.mxu0 %v15493_v55  ;;  %v820_v43 = vld [vmem:[#allocation12 + $0x608] sm:$0xff]  ;;  %v15453_v48 = vcombine.high %v692_v39, %v696_v42  ;;  %v15452_v61 = vcombine.low %v692_v39, %v696_v42 }
 0x31c   :  { %7201 = vmatpush2.bf16.msra.mxu1 %v15628_v53  ;;  %v824_v45 = vld [vmem:[#allocation12 + $0x628] sm:$0xff] }
 0x31d   :  { %7202 = vmatprep.subr.bf16.mxu1 %v15621_v62  ;;  %v940_v49 = vld [vmem:[#allocation12 + $0x9c8] sm:$0xff]  ;;  %v15581_v57 = vcombine.high %v820_v43, %v824_v45  ;;  %v15580_v62 = vcombine.low %v820_v43, %v824_v45 }
 0x31e   :  { %7162 = vmatpush2.bf16.msra.mxu0 %v15492_v0  ;;  %v944_v53 = vld [vmem:[#allocation12 + $0x9e8] sm:$0xff] }
 0x31f   :  { %7163 = vmatprep.subr.bf16.mxu0 %v15485_v2  ;;  %v1068_v55 = vld [vmem:[#allocation12 + $0xdc8] sm:$0xff]  ;;  %v15701_v63 = vcombine.high %v940_v49, %v944_v53  ;;  %v15700_v5 = vcombine.low %v940_v49, %v944_v53 }
 0x320   :  { %7203 = vmatpush2.bf16.msra.mxu1 %v15620_v1  ;;  %v1072_v58 = vld [vmem:[#allocation12 + $0xde8] sm:$0xff] }
 0x321   :  { %7204 = vmatprep.subr.bf16.mxu1 %v15613_v6  ;;  %v932_v0 = vld [vmem:[#allocation12 + $0x988] sm:$0xff]  ;;  %v15829_v3 = vcombine.high %v1068_v55, %v1072_v58  ;;  %v15828_v6 = vcombine.low %v1068_v55, %v1072_v58 }
 0x322   :  { %7164 = vmatpush2.bf16.msra.mxu0 %v15484_v10  ;;  %v936_v1 = vld [vmem:[#allocation12 + $0x9a8] sm:$0xff] }
 0x323   :  { %7165 = vmatprep.subr.bf16.mxu0 %v15477_v12  ;;  %v1060_v2 = vld [vmem:[#allocation12 + $0xd88] sm:$0xff]  ;;  %v15693_v9 = vcombine.high %v932_v0, %v936_v1 }
 0x324   :  { %7205 = vmatpush2.bf16.msra.mxu1 %v15612_v11  ;;  %v1064_v4 = vld [vmem:[#allocation12 + $0xda8] sm:$0xff] }
 0x325   :  { %7206 = vmatprep.subr.bf16.mxu1 %v15605_v20  ;;  %v924_v10 = vld [vmem:[#allocation12 + $0x948] sm:$0xff]  ;;  %v15821_v13 = vcombine.high %v1060_v2, %v1064_v4 }
 0x326   :  { %7166 = vmatpush2.bf16.msra.mxu0 %v15476_v23  ;;  %v928_v11 = vld [vmem:[#allocation12 + $0x968] sm:$0xff]  ;;  %v15692_v23 = vcombine.low %v932_v0, %v936_v1 }
 0x327   :  { %7167 = vmatprep.subr.bf16.mxu0 %v15469_v25  ;;  %v1052_v12 = vld [vmem:[#allocation12 + $0xd48] sm:$0xff]  ;;  %v15820_v25 = vcombine.low %v1060_v2, %v1064_v4  ;;  %v15685_v28 = vcombine.high %v924_v10, %v928_v11 }
 0x328   :  { %7207 = vmatpush2.bf16.msra.mxu1 %v15604_v24  ;;  %v1056_v14 = vld [vmem:[#allocation12 + $0xd68] sm:$0xff] }
 0x329   :  { %7208 = vmatprep.subr.bf16.mxu1 %v15597_v33  ;;  %v916_v30 = vld [vmem:[#allocation12 + $0x908] sm:$0xff] }
 0x32a   :  { %7168 = vmatpush2.bf16.msra.mxu0 %v15468_v35  ;;  %v920_v31 = vld [vmem:[#allocation12 + $0x928] sm:$0xff] }
 0x32b   :  { %7169 = vmatprep.subr.bf16.mxu0 %v15461_v38  ;;  %v1044_v33 = vld [vmem:[#allocation12 + $0xd08] sm:$0xff]  ;;  %v15676_v58 = vcombine.low %v916_v30, %v920_v31 }
 0x32c   :  { %7209 = vmatpush2.bf16.msra.mxu1 %v15596_v37  ;;  %v1048_v38 = vld [vmem:[#allocation12 + $0xd28] sm:$0xff] }
 0x32d   :  { %7210 = vmatprep.subr.bf16.mxu1 %v15589_v44  ;;  %v15684_v44 = vcombine.low %v924_v10, %v928_v11  ;;  %v1036_v49 = vld [vmem:[#allocation12 + $0xcc8] sm:$0xff]  ;;  %v15805_v55 = vcombine.high %v1044_v33, %v1048_v38 }
 0x32e   :  { %7170 = vmatpush2.bf16.msra.mxu0 %v15460_v46  ;;  %v15812_v46 = vcombine.low %v1052_v12, %v1056_v14  ;;  %v904_v0 = vld [vmem:[#allocation12 + $0x8a8] sm:$0xff] }
 0x32f   :  { %7171 = vmatprep.subr.bf16.mxu0 %v15453_v48  ;;  %v912_v48 = vld [vmem:[#allocation12 + $0x8e8] sm:$0xff] }
 0x330   :  { %7211 = vmatpush2.bf16.msra.mxu1 %v15588_v47  ;;  %v15677_v47 = vcombine.high %v916_v30, %v920_v31  ;;  %v1028_v1 = vld [vmem:[#allocation12 + $0xc88] sm:$0xff] }
 0x331   :  { %7212 = vmatprep.subr.bf16.mxu1 %v15581_v57  ;;  %v1040_v57 = vld [vmem:[#allocation12 + $0xce8] sm:$0xff] }
 0x332   :  { %7172 = vmatpush2.bf16.msra.mxu0 %v15452_v61  ;;  %v15804_v61 = vcombine.low %v1044_v33, %v1048_v38  ;;  %v15797_v2 = vcombine.high %v1036_v49, %v1040_v57  ;;  %v896_v10 = vld [vmem:[#allocation12 + $0x868] sm:$0xff] }
 0x333   :  { %7223 = vmatprep.subr.bf16.mxu0 %v15701_v63  ;;  %v6929_v15 = vpop.f32.mrf.mxu0  ;;  %v900_v63 = vld [vmem:[#allocation12 + $0x888] sm:$0xff] }
 0x334   :  { %7213 = vmatpush2.bf16.msra.mxu1 %v15580_v62  ;;  %v6930_v20 = vadd.f32 %v6929_v15, %v19874_v16  ;;  %v15813_v16 = vcombine.high %v1052_v12, %v1056_v14  ;;  %v1020_v11 = vld [vmem:[#allocation12 + $0xc48] sm:$0xff]  ;;  %v15660_v14 = vcombine.low %v900_v63, %v904_v0 }
 0x335   :  { %7264 = vmatprep.subr.bf16.mxu1 %v15829_v3  ;;  %7174 = vmatmul.mubr.bf16.vlgmr.msra.gmra.mxu0 %v19822_v17  ;;  %v6970_v22 = vpop.f32.mrf.mxu1  ;;  %v6931_v24 = vpop.f32.mrf.mxu0  ;;  %v1032_v3 = vld [vmem:[#allocation12 + $0xca8] sm:$0xff] }
 0x336   :  { %7224 = vmatpush1.bf16.msra.mxu0 %v15700_v5  ;;  %v19883_v34 = vadd.f32 %v6970_v22, %v6930_v20  ;;  %v6932_v35 = vadd.f32 %v6931_v24, %v19878_v27  ;;  %7255 = vmatprep.mubr.bf16.mxu0 %v19826_v29  ;;  %v908_v27 = vld [vmem:[#allocation12 + $0x8c8] sm:$0xff]  ;;  %v15796_v5 = vcombine.low %v1036_v49, %v1040_v57 }
 0x337   :  { %7215 = vmatmul.mubr.bf16.vlgmr.msra.gmra.mxu1 %v19824_v21  ;;  %7225 = vmatprep.subr.bf16.mxu0 %v15693_v9  ;;  %v6972_v37 = vpop.f32.mrf.mxu1  ;;  %v6933_v39 = vpop.f32.mrf.mxu0  ;;  %v15669_v62 = vcombine.high %v908_v27, %v912_v48  ;;  %v15668_v4 = vcombine.low %v908_v27, %v912_v48  ;;  %v892_v9 = vld [vmem:[#allocation12 + $0x848] sm:$0xff]  ;;  %v15789_v12 = vcombine.high %v1028_v1, %v1032_v3 }
 0x338   :  { %7265 = vmatpush1.bf16.msra.mxu1 %v15828_v6  ;;  %7296 = vmatprep.mubr.bf16.mxu1 %v19829_v32  ;;  %v19888_v42 = vadd.f32 %v6972_v37, %v6932_v35  ;;  %v15661_v6 = vcombine.high %v900_v63, %v904_v0  ;;  %v15788_v15 = vcombine.low %v1028_v1, %v1032_v3  ;;  %v884_v22 = vld [vmem:[#allocation12 + $0x808] sm:$0xff] }
 0x339   :  { %7266 = vmatprep.subr.bf16.mxu1 %v15821_v13  ;;  %v6974_v43 = vpop.f32.mrf.mxu1  ;;  %v6934_v45 = vpop.f32.mrf.mxu0  ;;  %v1024_v13 = vld [vmem:[#allocation12 + $0xc68] sm:$0xff]  ;;  %v15653_v20 = vcombine.high %v892_v9, %v896_v10  ;;  %v15652_v30 = vcombine.low %v892_v9, %v896_v10 }
 0x33a   :  { %7226 = vmatpush1.bf16.msra.mxu0 %v15692_v23  ;;  %v888_v23 = vld [vmem:[#allocation12 + $0x828] sm:$0xff]  ;;  %v15780_v31 = vcombine.low %v1020_v11, %v1024_v13 }
 0x33b   :  { %7227 = vmatprep.subr.bf16.mxu0 %v15685_v28  ;;  %v6975_v53 = vpop.f32.mrf.mxu1  ;;  %v1012_v24 = vld [vmem:[#allocation12 + $0xc08] sm:$0xff]  ;;  %v15645_v33 = vcombine.high %v884_v22, %v888_v23  ;;  %v15644_v43 = vcombine.low %v884_v22, %v888_v23 }
 0x33c   :  { %7267 = vmatpush1.bf16.msra.mxu1 %v15820_v25  ;;  %v15781_v25 = vcombine.high %v1020_v11, %v1024_v13  ;;  %v1016_v28 = vld [vmem:[#allocation12 + $0xc28] sm:$0xff] }
 0x33d   :  { %7268 = vmatprep.subr.bf16.mxu1 %v15813_v16  ;;  %v1004_v35 = vld [vmem:[#allocation12 + $0xbc8] sm:$0xff]  ;;  %v15773_v38 = vcombine.high %v1012_v24, %v1016_v28 }
 0x33e   :  { %7228 = vmatpush1.bf16.msra.mxu0 %v15684_v44  ;;  %v1008_v37 = vld [vmem:[#allocation12 + $0xbe8] sm:$0xff]  ;;  %v15772_v44 = vcombine.low %v1012_v24, %v1016_v28 }
 0x33f   :  { %7229 = vmatprep.subr.bf16.mxu0 %v15677_v47  ;;  %v1132_v16 = vld [vmem:[#allocation12 + $0xfc8] sm:$0xff]  ;;  %v15765_v45 = vcombine.high %v1004_v35, %v1008_v37  ;;  %v15764_v53 = vcombine.low %v1004_v35, %v1008_v37 }
 0x340   :  { %7269 = vmatpush1.bf16.msra.mxu1 %v15812_v46  ;;  %v1136_v39 = vld [vmem:[#allocation12 + $0xfe8] sm:$0xff] }
 0x341   :  { %7270 = vmatprep.subr.bf16.mxu1 %v15805_v55  ;;  %v996_v46 = vld [vmem:[#allocation12 + $0xb88] sm:$0xff]  ;;  %v15893_v48 = vcombine.high %v1132_v16, %v1136_v39  ;;  %v15892_v55 = vcombine.low %v1132_v16, %v1136_v39 }
 0x342   :  { %7230 = vmatpush1.bf16.msra.mxu0 %v15676_v58  ;;  %v1000_v47 = vld [vmem:[#allocation12 + $0xba8] sm:$0xff] }
 0x343   :  { %7231 = vmatprep.subr.bf16.mxu0 %v15669_v62  ;;  %v1124_v27 = vld [vmem:[#allocation12 + $0xf88] sm:$0xff]  ;;  %v15757_v57 = vcombine.high %v996_v46, %v1000_v47  ;;  %v15756_v1 = vcombine.low %v996_v46, %v1000_v47 }
 0x344   :  { %7271 = vmatpush1.bf16.msra.mxu1 %v15804_v61  ;;  %v1128_v49 = vld [vmem:[#allocation12 + $0xfa8] sm:$0xff] }
 0x345   :  { %7272 = vmatprep.subr.bf16.mxu1 %v15797_v2  ;;  %v988_v58 = vld [vmem:[#allocation12 + $0xb48] sm:$0xff]  ;;  %v15885_v63 = vcombine.high %v1124_v27, %v1128_v49  ;;  %v15884_v2 = vcombine.low %v1124_v27, %v1128_v49 }
 0x346   :  { %7232 = vmatpush1.bf16.msra.mxu0 %v15668_v4  ;;  %v992_v61 = vld [vmem:[#allocation12 + $0xb68] sm:$0xff] }
 0x347   :  { %7233 = vmatprep.subr.bf16.mxu0 %v15661_v6  ;;  %v1116_v62 = vld [vmem:[#allocation12 + $0xf48] sm:$0xff]  ;;  %v15749_v3 = vcombine.high %v988_v58, %v992_v61  ;;  %v15748_v11 = vcombine.low %v988_v58, %v992_v61 }
 0x348   :  { %7273 = vmatpush1.bf16.msra.mxu1 %v15796_v5  ;;  %v1120_v0 = vld [vmem:[#allocation12 + $0xf68] sm:$0xff] }
 0x349   :  { %7274 = vmatprep.subr.bf16.mxu1 %v15789_v12  ;;  %v980_v4 = vld [vmem:[#allocation12 + $0xb08] sm:$0xff]  ;;  %v15877_v9 = vcombine.high %v1116_v62, %v1120_v0  ;;  %v15876_v12 = vcombine.low %v1116_v62, %v1120_v0 }
 0x34a   :  { %7234 = vmatpush1.bf16.msra.mxu0 %v15660_v14  ;;  %v984_v5 = vld [vmem:[#allocation12 + $0xb28] sm:$0xff] }
 0x34b   :  { %7235 = vmatprep.subr.bf16.mxu0 %v15653_v20  ;;  %v1108_v6 = vld [vmem:[#allocation12 + $0xf08] sm:$0xff]  ;;  %v15741_v13 = vcombine.high %v980_v4, %v984_v5  ;;  %v15740_v24 = vcombine.low %v980_v4, %v984_v5 }
 0x34c   :  { %7275 = vmatpush1.bf16.msra.mxu1 %v15788_v15  ;;  %v1112_v10 = vld [vmem:[#allocation12 + $0xf28] sm:$0xff] }
 0x34d   :  { %7276 = vmatprep.subr.bf16.mxu1 %v15781_v25  ;;  %v972_v14 = vld [vmem:[#allocation12 + $0xac8] sm:$0xff]  ;;  %v15869_v22 = vcombine.high %v1108_v6, %v1112_v10  ;;  %v15868_v25 = vcombine.low %v1108_v6, %v1112_v10 }
 0x34e   :  { %7236 = vmatpush1.bf16.msra.mxu0 %v15652_v30  ;;  %v976_v15 = vld [vmem:[#allocation12 + $0xae8] sm:$0xff] }
 0x34f   :  { %7237 = vmatprep.subr.bf16.mxu0 %v15645_v33  ;;  %v1100_v20 = vld [vmem:[#allocation12 + $0xec8] sm:$0xff]  ;;  %v15733_v28 = vcombine.high %v972_v14, %v976_v15  ;;  %v15732_v16 = vcombine.low %v972_v14, %v976_v15 }
 0x350   :  { %7277 = vmatpush1.bf16.msra.mxu1 %v15780_v31  ;;  %v1104_v23 = vld [vmem:[#allocation12 + $0xee8] sm:$0xff] }
 0x351   :  { %7278 = vmatprep.subr.bf16.mxu1 %v15773_v38  ;;  %v964_v30 = vld [vmem:[#allocation12 + $0xa88] sm:$0xff]  ;;  %v15861_v35 = vcombine.high %v1100_v20, %v1104_v23  ;;  %v15860_v38 = vcombine.low %v1100_v20, %v1104_v23 }
 0x352   :  { %7238 = vmatpush1.bf16.msra.mxu0 %v15644_v43  ;;  %v968_v31 = vld [vmem:[#allocation12 + $0xaa8] sm:$0xff] }
 0x353   :  { %7239 = vmatprep.subr.bf16.mxu0 %v15765_v45  ;;  %v1092_v33 = vld [vmem:[#allocation12 + $0xe88] sm:$0xff]  ;;  %v15725_v39 = vcombine.high %v964_v30, %v968_v31  ;;  %v15724_v27 = vcombine.low %v964_v30, %v968_v31 }
 0x354   :  { %7279 = vmatpush1.bf16.msra.mxu1 %v15772_v44  ;;  %v1096_v37 = vld [vmem:[#allocation12 + $0xea8] sm:$0xff] }
 0x355   :  { %7280 = vmatprep.subr.bf16.mxu1 %v15893_v48  ;;  %v956_v43 = vld [vmem:[#allocation12 + $0xa48] sm:$0xff]  ;;  %v15853_v46 = vcombine.high %v1092_v33, %v1096_v37  ;;  %v15852_v48 = vcombine.low %v1092_v33, %v1096_v37 }
 0x356   :  { %7240 = vmatpush2.bf16.msra.mxu0 %v15764_v53  ;;  %v960_v44 = vld [vmem:[#allocation12 + $0xa68] sm:$0xff] }
 0x357   :  { %7241 = vmatprep.subr.bf16.mxu0 %v15757_v57  ;;  %v1084_v45 = vld [vmem:[#allocation12 + $0xe48] sm:$0xff]  ;;  %v15717_v49 = vcombine.high %v956_v43, %v960_v44  ;;  %v15716_v62 = vcombine.low %v956_v43, %v960_v44 }
 0x358   :  { %7281 = vmatpush2.bf16.msra.mxu1 %v15892_v55  ;;  %v1088_v47 = vld [vmem:[#allocation12 + $0xe68] sm:$0xff] }
 0x359   :  { %7282 = vmatprep.subr.bf16.mxu1 %v15885_v63  ;;  %v948_v53 = vld [vmem:[#allocation12 + $0xa08] sm:$0xff]  ;;  %v15845_v58 = vcombine.high %v1084_v45, %v1088_v47  ;;  %v15844_v63 = vcombine.low %v1084_v45, %v1088_v47 }
 0x35a   :  { %7242 = vmatpush2.bf16.msra.mxu0 %v15756_v1  ;;  %v952_v55 = vld [vmem:[#allocation12 + $0xa28] sm:$0xff] }
 0x35b   :  { %7243 = vmatprep.subr.bf16.mxu0 %v15749_v3  ;;  %v1076_v57 = vld [vmem:[#allocation12 + $0xe08] sm:$0xff]  ;;  %v15709_v0 = vcombine.high %v948_v53, %v952_v55  ;;  %v15708_v6 = vcombine.low %v948_v53, %v952_v55 }
 0x35c   :  { %7283 = vmatpush2.bf16.msra.mxu1 %v15884_v2  ;;  %v1080_v61 = vld [vmem:[#allocation12 + $0xe28] sm:$0xff] }
 0x35d   :  { %7284 = vmatprep.subr.bf16.mxu1 %v15877_v9  ;;  %v1196_v1 = vld [vmem:[#allocation12 + $0x11c8] sm:$0xff]  ;;  %v15837_v4 = vcombine.high %v1076_v57, %v1080_v61  ;;  %v15836_v9 = vcombine.low %v1076_v57, %v1080_v61 }
 0x35e   :  { %7244 = vmatpush2.bf16.msra.mxu0 %v15748_v11  ;;  %v1200_v2 = vld [vmem:[#allocation12 + $0x11e8] sm:$0xff] }
 0x35f   :  { %7245 = vmatprep.subr.bf16.mxu0 %v15741_v13  ;;  %v1324_v3 = vld [vmem:[#allocation12 + $0x15c8] sm:$0xff]  ;;  %v15957_v10 = vcombine.high %v1196_v1, %v1200_v2  ;;  %v15956_v20 = vcombine.low %v1196_v1, %v1200_v2 }
 0x360   :  { %7285 = vmatpush2.bf16.msra.mxu1 %v15876_v12  ;;  %v1328_v5 = vld [vmem:[#allocation12 + $0x15e8] sm:$0xff] }
 0x361   :  { %7286 = vmatprep.subr.bf16.mxu1 %v15869_v22  ;;  %v1188_v11 = vld [vmem:[#allocation12 + $0x1188] sm:$0xff]  ;;  %v16085_v14 = vcombine.high %v1324_v3, %v1328_v5  ;;  %v16084_v22 = vcombine.low %v1324_v3, %v1328_v5 }
 0x362   :  { %7246 = vmatpush2.bf16.msra.mxu0 %v15740_v24  ;;  %v1192_v12 = vld [vmem:[#allocation12 + $0x11a8] sm:$0xff] }
 0x363   :  { %7247 = vmatprep.subr.bf16.mxu0 %v15733_v28  ;;  %v1316_v13 = vld [vmem:[#allocation12 + $0x1588] sm:$0xff]  ;;  %v15949_v23 = vcombine.high %v1188_v11, %v1192_v12 }
 0x364   :  { %7287 = vmatpush2.bf16.msra.mxu1 %v15868_v25  ;;  %v1320_v15 = vld [vmem:[#allocation12 + $0x15a8] sm:$0xff] }
 0x365   :  { %7288 = vmatprep.subr.bf16.mxu1 %v15861_v35  ;;  %v1180_v24 = vld [vmem:[#allocation12 + $0x1148] sm:$0xff]  ;;  %v16077_v30 = vcombine.high %v1316_v13, %v1320_v15 }
 0x366   :  { %7248 = vmatpush2.bf16.msra.mxu0 %v15732_v16  ;;  %v1184_v25 = vld [vmem:[#allocation12 + $0x1168] sm:$0xff]  ;;  %v15948_v16 = vcombine.low %v1188_v11, %v1192_v12 }
 0x367   :  { %7249 = vmatprep.subr.bf16.mxu0 %v15725_v39  ;;  %v1308_v28 = vld [vmem:[#allocation12 + $0x1548] sm:$0xff]  ;;  %v16076_v39 = vcombine.low %v1316_v13, %v1320_v15  ;;  %v15941_v43 = vcombine.high %v1180_v24, %v1184_v25 }
 0x368   :  { %7289 = vmatpush2.bf16.msra.mxu1 %v15860_v38  ;;  %v1312_v31 = vld [vmem:[#allocation12 + $0x1568] sm:$0xff] }
 0x369   :  { %7290 = vmatprep.subr.bf16.mxu1 %v15853_v46  ;;  %v1172_v44 = vld [vmem:[#allocation12 + $0x1108] sm:$0xff] }
 0x36a   :  { %7250 = vmatpush2.bf16.msra.mxu0 %v15724_v27  ;;  %v1176_v45 = vld [vmem:[#allocation12 + $0x1128] sm:$0xff] }
 0x36b   :  { %7251 = vmatprep.subr.bf16.mxu0 %v15717_v49  ;;  %v1300_v46 = vld [vmem:[#allocation12 + $0x1508] sm:$0xff]  ;;  %v15932_v5 = vcombine.low %v1172_v44, %v1176_v45 }
 0x36c   :  { %7291 = vmatpush2.bf16.msra.mxu1 %v15852_v48  ;;  %v1304_v49 = vld [vmem:[#allocation12 + $0x1528] sm:$0xff] }
 0x36d   :  { %7292 = vmatprep.subr.bf16.mxu1 %v15845_v58  ;;  %v15940_v58 = vcombine.low %v1180_v24, %v1184_v25  ;;  %v1292_v1 = vld [vmem:[#allocation12 + $0x14c8] sm:$0xff]  ;;  %v16061_v3 = vcombine.high %v1300_v46, %v1304_v49 }
 0x36e   :  { %7252 = vmatpush2.bf16.msra.mxu0 %v15716_v62  ;;  %v16068_v62 = vcombine.low %v1308_v28, %v1312_v31  ;;  %v1160_v11 = vld [vmem:[#allocation12 + $0x10a8] sm:$0xff] }
 0x36f   :  { %7253 = vmatprep.subr.bf16.mxu0 %v15709_v0  ;;  %v1168_v0 = vld [vmem:[#allocation12 + $0x10e8] sm:$0xff] }
 0x370   :  { %7293 = vmatpush2.bf16.msra.mxu1 %v15844_v63  ;;  %v15933_v63 = vcombine.high %v1172_v44, %v1176_v45  ;;  %v1284_v12 = vld [vmem:[#allocation12 + $0x1488] sm:$0xff] }
 0x371   :  { %7294 = vmatprep.subr.bf16.mxu1 %v15837_v4  ;;  %v1296_v4 = vld [vmem:[#allocation12 + $0x14e8] sm:$0xff] }
 0x372   :  { %7254 = vmatpush2.bf16.msra.mxu0 %v15708_v6  ;;  %v16060_v6 = vcombine.low %v1300_v46, %v1304_v49  ;;  %v16053_v13 = vcombine.high %v1292_v1, %v1296_v4  ;;  %v1152_v24 = vld [vmem:[#allocation12 + $0x1068] sm:$0xff] }
 0x373   :  { %7305 = vmatprep.subr.bf16.mxu0 %v15957_v10  ;;  %v1156_v10 = vld [vmem:[#allocation12 + $0x1088] sm:$0xff] }
 0x374   :  { %7295 = vmatpush2.bf16.msra.mxu1 %v15836_v9  ;;  %v7011_v33 = vpop.f32.mrf.mxu0  ;;  %v1276_v25 = vld [vmem:[#allocation12 + $0x1448] sm:$0xff] }
 0x375   :  { %7346 = vmatprep.subr.bf16.mxu1 %v16085_v14  ;;  %7256 = vmatmul.mubr.bf16.vlgmr.msra.gmra.mxu0 %v19834_v40  ;;  %v7012_v35 = vadd.f32 %v7011_v33, %v19883_v34  ;;  %v16069_v34 = vcombine.high %v1308_v28, %v1312_v31  ;;  %v1288_v14 = vld [vmem:[#allocation12 + $0x14a8] sm:$0xff]  ;;  %v15916_v31 = vcombine.low %v1156_v10, %v1160_v11 }
 0x376   :  { %v7052_v37 = vpop.f32.mrf.mxu1  ;;  %7306 = vmatpush1.bf16.msra.mxu0 %v15956_v20  ;;  %v7013_v38 = vpop.f32.mrf.mxu0  ;;  %7337 = vmatprep.mubr.bf16.mxu0 %v19838_v50  ;;  %v16052_v20 = vcombine.low %v1292_v1, %v1296_v4  ;;  %v16045_v28 = vcombine.high %v1284_v12, %v1288_v14  ;;  %v16044_v33 = vcombine.low %v1284_v12, %v1288_v14  ;;  %v1384_v1 = vld [vmem:[#allocation12 + $0x17a8] sm:$0xff] }
 0x377   :  { %7297 = vmatmul.mubr.bf16.vlgmr.msra.gmra.mxu1 %v19836_v41  ;;  %7307 = vmatprep.subr.bf16.mxu0 %v15949_v23  ;;  %v19893_v47 = vadd.f32 %v7052_v37, %v7012_v35  ;;  %v7014_v27 = vadd.f32 %v7013_v38, %v19888_v42  ;;  %v1164_v42 = vld [vmem:[#allocation12 + $0x10c8] sm:$0xff] }
 0x378   :  { %7347 = vmatpush1.bf16.msra.mxu1 %v16084_v22  ;;  %v7054_v48 = vpop.f32.mrf.mxu1  ;;  %v7015_v53 = vpop.f32.mrf.mxu0  ;;  %7378 = vmatprep.mubr.bf16.mxu1 %v19841_v52  ;;  %v15925_v9 = vcombine.high %v1164_v42, %v1168_v0  ;;  %v15924_v15 = vcombine.low %v1164_v42, %v1168_v0  ;;  %v15917_v22 = vcombine.high %v1156_v10, %v1160_v11  ;;  %v1148_v23 = vld [vmem:[#allocation12 + $0x1048] sm:$0xff] }
 0x379   :  { %7348 = vmatprep.subr.bf16.mxu1 %v16077_v30  ;;  %v19898_v55 = vadd.f32 %v7054_v48, %v7014_v27  ;;  %v1280_v30 = vld [vmem:[#allocation12 + $0x1468] sm:$0xff]  ;;  %v15909_v35 = vcombine.high %v1148_v23, %v1152_v24  ;;  %v15908_v44 = vcombine.low %v1148_v23, %v1152_v24 }
 0x37a   :  { %v7056_v57 = vpop.f32.mrf.mxu1  ;;  %7308 = vmatpush1.bf16.msra.mxu0 %v15948_v16  ;;  %v7016_v61 = vpop.f32.mrf.mxu0  ;;  %v1140_v37 = vld [vmem:[#allocation12 + $0x1008] sm:$0xff]  ;;  %v16036_v45 = vcombine.low %v1276_v25, %v1280_v30 }
 0x37b   :  { %7309 = vmatprep.subr.bf16.mxu0 %v15941_v43  ;;  %v1144_v16 = vld [vmem:[#allocation12 + $0x1028] sm:$0xff] }
 0x37c   :  { %7349 = vmatpush1.bf16.msra.mxu1 %v16076_v39  ;;  %v7057_v2 = vpop.f32.mrf.mxu1  ;;  %v1268_v38 = vld [vmem:[#allocation12 + $0x1408] sm:$0xff]  ;;  %v16037_v39 = vcombine.high %v1276_v25, %v1280_v30  ;;  %v15901_v46 = vcombine.high %v1140_v37, %v1144_v16  ;;  %v15900_v57 = vcombine.low %v1140_v37, %v1144_v16 }
 0x37d   :  { %7350 = vmatprep.subr.bf16.mxu1 %v16069_v34  ;;  %v1272_v43 = vld [vmem:[#allocation12 + $0x1428] sm:$0xff] }
 0x37e   :  { %7310 = vmatpush1.bf16.msra.mxu0 %v15940_v58  ;;  %v1260_v27 = vld [vmem:[#allocation12 + $0x13c8] sm:$0xff]  ;;  %v16029_v49 = vcombine.high %v1268_v38, %v1272_v43  ;;  %v16028_v58 = vcombine.low %v1268_v38, %v1272_v43 }
 0x37f   :  { %7311 = vmatprep.subr.bf16.mxu0 %v15933_v63  ;;  %v1264_v48 = vld [vmem:[#allocation12 + $0x13e8] sm:$0xff] }
 0x380   :  { %7351 = vmatpush1.bf16.msra.mxu1 %v16068_v62  ;;  %v1388_v34 = vld [vmem:[#allocation12 + $0x17c8] sm:$0xff]  ;;  %v16021_v61 = vcombine.high %v1260_v27, %v1264_v48  ;;  %v16020_v2 = vcombine.low %v1260_v27, %v1264_v48 }
 0x381   :  { %7352 = vmatprep.subr.bf16.mxu1 %v16061_v3  ;;  %v1392_v53 = vld [vmem:[#allocation12 + $0x17e8] sm:$0xff] }
 0x382   :  { %7312 = vmatpush1.bf16.msra.mxu0 %v15932_v5  ;;  %v1252_v62 = vld [vmem:[#allocation12 + $0x1388] sm:$0xff]  ;;  %v16149_v0 = vcombine.high %v1388_v34, %v1392_v53  ;;  %v16148_v3 = vcombine.low %v1388_v34, %v1392_v53 }
 0x383   :  { %7313 = vmatprep.subr.bf16.mxu0 %v15925_v9  ;;  %v1256_v63 = vld [vmem:[#allocation12 + $0x13a8] sm:$0xff] }
 0x384   :  { %7353 = vmatpush1.bf16.msra.mxu1 %v16060_v6  ;;  %v1380_v42 = vld [vmem:[#allocation12 + $0x1788] sm:$0xff]  ;;  %v16013_v4 = vcombine.high %v1252_v62, %v1256_v63  ;;  %v16012_v12 = vcombine.low %v1252_v62, %v1256_v63 }
 0x385   :  { %7354 = vmatprep.subr.bf16.mxu1 %v16053_v13  ;;  %v1244_v5 = vld [vmem:[#allocation12 + $0x1348] sm:$0xff]  ;;  %v16141_v10 = vcombine.high %v1380_v42, %v1384_v1  ;;  %v16140_v13 = vcombine.low %v1380_v42, %v1384_v1 }
 0x386   :  { %7314 = vmatpush1.bf16.msra.mxu0 %v15924_v15  ;;  %v1248_v6 = vld [vmem:[#allocation12 + $0x1368] sm:$0xff] }
 0x387   :  { %7315 = vmatprep.subr.bf16.mxu0 %v15917_v22  ;;  %v1372_v9 = vld [vmem:[#allocation12 + $0x1748] sm:$0xff]  ;;  %v16005_v14 = vcombine.high %v1244_v5, %v1248_v6  ;;  %v16004_v25 = vcombine.low %v1244_v5, %v1248_v6 }
 0x388   :  { %7355 = vmatpush1.bf16.msra.mxu1 %v16052_v20  ;;  %v1376_v11 = vld [vmem:[#allocation12 + $0x1768] sm:$0xff] }
 0x389   :  { %7356 = vmatprep.subr.bf16.mxu1 %v16045_v28  ;;  %v1236_v15 = vld [vmem:[#allocation12 + $0x1308] sm:$0xff]  ;;  %v16133_v23 = vcombine.high %v1372_v9, %v1376_v11  ;;  %v16132_v28 = vcombine.low %v1372_v9, %v1376_v11 }
 0x38a   :  { %7316 = vmatpush1.bf16.msra.mxu0 %v15916_v31  ;;  %v1240_v20 = vld [vmem:[#allocation12 + $0x1328] sm:$0xff] }
 0x38b   :  { %7317 = vmatprep.subr.bf16.mxu0 %v15909_v35  ;;  %v1364_v22 = vld [vmem:[#allocation12 + $0x1708] sm:$0xff]  ;;  %v15997_v30 = vcombine.high %v1236_v15, %v1240_v20  ;;  %v15996_v38 = vcombine.low %v1236_v15, %v1240_v20 }
 0x38c   :  { %7357 = vmatpush1.bf16.msra.mxu1 %v16044_v33  ;;  %v1368_v24 = vld [vmem:[#allocation12 + $0x1728] sm:$0xff] }
 0x38d   :  { %7358 = vmatprep.subr.bf16.mxu1 %v16037_v39  ;;  %v1228_v31 = vld [vmem:[#allocation12 + $0x12c8] sm:$0xff]  ;;  %v16125_v37 = vcombine.high %v1364_v22, %v1368_v24  ;;  %v16124_v39 = vcombine.low %v1364_v22, %v1368_v24 }
 0x38e   :  { %7318 = vmatpush1.bf16.msra.mxu0 %v15908_v44  ;;  %v1232_v33 = vld [vmem:[#allocation12 + $0x12e8] sm:$0xff] }
 0x38f   :  { %7319 = vmatprep.subr.bf16.mxu0 %v15901_v46  ;;  %v1356_v35 = vld [vmem:[#allocation12 + $0x16c8] sm:$0xff]  ;;  %v15989_v43 = vcombine.high %v1228_v31, %v1232_v33  ;;  %v15988_v34 = vcombine.low %v1228_v31, %v1232_v33 }
 0x390   :  { %7359 = vmatpush1.bf16.msra.mxu1 %v16036_v45  ;;  %v1360_v16 = vld [vmem:[#allocation12 + $0x16e8] sm:$0xff] }
 0x391   :  { %7360 = vmatprep.subr.bf16.mxu1 %v16029_v49  ;;  %v1220_v44 = vld [vmem:[#allocation12 + $0x1288] sm:$0xff]  ;;  %v16117_v27 = vcombine.high %v1356_v35, %v1360_v16  ;;  %v16116_v49 = vcombine.low %v1356_v35, %v1360_v16 }
 0x392   :  { %7320 = vmatpush1.bf16.msra.mxu0 %v15900_v57  ;;  %v1224_v45 = vld [vmem:[#allocation12 + $0x12a8] sm:$0xff] }
 0x393   :  { %7321 = vmatprep.subr.bf16.mxu0 %v16021_v61  ;;  %v1348_v46 = vld [vmem:[#allocation12 + $0x1688] sm:$0xff]  ;;  %v15981_v53 = vcombine.high %v1220_v44, %v1224_v45  ;;  %v15980_v42 = vcombine.low %v1220_v44, %v1224_v45 }
 0x394   :  { %7361 = vmatpush1.bf16.msra.mxu1 %v16028_v58  ;;  %v1352_v48 = vld [vmem:[#allocation12 + $0x16a8] sm:$0xff] }
 0x395   :  { %7362 = vmatprep.subr.bf16.mxu1 %v16149_v0  ;;  %v1212_v57 = vld [vmem:[#allocation12 + $0x1248] sm:$0xff]  ;;  %v16109_v62 = vcombine.high %v1348_v46, %v1352_v48  ;;  %v16108_v0 = vcombine.low %v1348_v46, %v1352_v48 }
 0x396   :  { %7322 = vmatpush2.bf16.msra.mxu0 %v16020_v2  ;;  %v1216_v58 = vld [vmem:[#allocation12 + $0x1268] sm:$0xff] }
 0x397   :  { %7323 = vmatprep.subr.bf16.mxu0 %v16013_v4  ;;  %v1340_v61 = vld [vmem:[#allocation12 + $0x1648] sm:$0xff]  ;;  %v15973_v1 = vcombine.high %v1212_v57, %v1216_v58  ;;  %v15972_v9 = vcombine.low %v1212_v57, %v1216_v58 }
 0x398   :  { %7363 = vmatpush2.bf16.msra.mxu1 %v16148_v3  ;;  %v1344_v63 = vld [vmem:[#allocation12 + $0x1668] sm:$0xff] }
 0x399   :  { %7364 = vmatprep.subr.bf16.mxu1 %v16141_v10  ;;  %v1204_v2 = vld [vmem:[#allocation12 + $0x1208] sm:$0xff]  ;;  %v16101_v5 = vcombine.high %v1340_v61, %v1344_v63  ;;  %v16100_v10 = vcombine.low %v1340_v61, %v1344_v63 }
 0x39a   :  { %7324 = vmatpush2.bf16.msra.mxu0 %v16012_v12  ;;  %v1208_v3 = vld [vmem:[#allocation12 + $0x1228] sm:$0xff] }
 0x39b   :  { %7325 = vmatprep.subr.bf16.mxu0 %v16005_v14  ;;  %v1332_v4 = vld [vmem:[#allocation12 + $0x1608] sm:$0xff]  ;;  %v15965_v11 = vcombine.high %v1204_v2, %v1208_v3  ;;  %v15964_v22 = vcombine.low %v1204_v2, %v1208_v3 }
 0x39c   :  { %7365 = vmatpush2.bf16.msra.mxu1 %v16140_v13  ;;  %v1336_v6 = vld [vmem:[#allocation12 + $0x1628] sm:$0xff] }
 0x39d   :  { %7366 = vmatprep.subr.bf16.mxu1 %v16133_v23  ;;  %v1452_v12 = vld [vmem:[#allocation12 + $0x19c8] sm:$0xff]  ;;  %v16093_v15 = vcombine.high %v1332_v4, %v1336_v6  ;;  %v16092_v23 = vcombine.low %v1332_v4, %v1336_v6 }
 0x39e   :  { %7326 = vmatpush2.bf16.msra.mxu0 %v16004_v25  ;;  %v1456_v13 = vld [vmem:[#allocation12 + $0x19e8] sm:$0xff] }
 0x39f   :  { %7327 = vmatprep.subr.bf16.mxu0 %v15997_v30  ;;  %v1580_v14 = vld [vmem:[#allocation12 + $0x1dc8] sm:$0xff]  ;;  %v16213_v24 = vcombine.high %v1452_v12, %v1456_v13  ;;  %v16212_v35 = vcombine.low %v1452_v12, %v1456_v13 }
 0x3a0   :  { %7367 = vmatpush2.bf16.msra.mxu1 %v16132_v28  ;;  %v1584_v20 = vld [vmem:[#allocation12 + $0x1de8] sm:$0xff] }
 0x3a1   :  { %7368 = vmatprep.subr.bf16.mxu1 %v16125_v37  ;;  %v1444_v25 = vld [vmem:[#allocation12 + $0x1988] sm:$0xff]  ;;  %v16341_v31 = vcombine.high %v1580_v14, %v1584_v20  ;;  %v16340_v37 = vcombine.low %v1580_v14, %v1584_v20 }
 0x3a2   :  { %7328 = vmatpush2.bf16.msra.mxu0 %v15996_v38  ;;  %v1448_v28 = vld [vmem:[#allocation12 + $0x19a8] sm:$0xff] }
 0x3a3   :  { %7329 = vmatprep.subr.bf16.mxu0 %v15989_v43  ;;  %v1572_v30 = vld [vmem:[#allocation12 + $0x1d88] sm:$0xff]  ;;  %v16205_v16 = vcombine.high %v1444_v25, %v1448_v28 }
 0x3a4   :  { %7369 = vmatpush2.bf16.msra.mxu1 %v16124_v39  ;;  %v1576_v33 = vld [vmem:[#allocation12 + $0x1da8] sm:$0xff] }
 0x3a5   :  { %7370 = vmatprep.subr.bf16.mxu1 %v16117_v27  ;;  %v1436_v38 = vld [vmem:[#allocation12 + $0x1948] sm:$0xff]  ;;  %v16333_v44 = vcombine.high %v1572_v30, %v1576_v33 }
 0x3a6   :  { %7330 = vmatpush2.bf16.msra.mxu0 %v15988_v34  ;;  %v1440_v39 = vld [vmem:[#allocation12 + $0x1968] sm:$0xff]  ;;  %v16204_v34 = vcombine.low %v1444_v25, %v1448_v28 }
 0x3a7   :  { %7331 = vmatprep.subr.bf16.mxu0 %v15981_v53  ;;  %v1564_v43 = vld [vmem:[#allocation12 + $0x1d48] sm:$0xff]  ;;  %v16332_v53 = vcombine.low %v1572_v30, %v1576_v33  ;;  %v16197_v57 = vcombine.high %v1436_v38, %v1440_v39 }
 0x3a8   :  { %7371 = vmatpush2.bf16.msra.mxu1 %v16116_v49  ;;  %v1568_v45 = vld [vmem:[#allocation12 + $0x1d68] sm:$0xff] }
 0x3a9   :  { %7372 = vmatprep.subr.bf16.mxu1 %v16109_v62  ;;  %v1428_v58 = vld [vmem:[#allocation12 + $0x1908] sm:$0xff] }
 0x3aa   :  { %7332 = vmatpush2.bf16.msra.mxu0 %v15980_v42  ;;  %v1432_v61 = vld [vmem:[#allocation12 + $0x1928] sm:$0xff] }
 0x3ab   :  { %7333 = vmatprep.subr.bf16.mxu0 %v15973_v1  ;;  %v1556_v62 = vld [vmem:[#allocation12 + $0x1d08] sm:$0xff]  ;;  %v16188_v20 = vcombine.low %v1428_v58, %v1432_v61 }
 0x3ac   :  { %7373 = vmatpush2.bf16.msra.mxu1 %v16108_v0  ;;  %v1560_v1 = vld [vmem:[#allocation12 + $0x1d28] sm:$0xff] }
 0x3ad   :  { %7374 = vmatprep.subr.bf16.mxu1 %v16101_v5  ;;  %v16196_v5 = vcombine.low %v1436_v38, %v1440_v39  ;;  %v1548_v12 = vld [vmem:[#allocation12 + $0x1cc8] sm:$0xff]  ;;  %v16317_v14 = vcombine.high %v1556_v62, %v1560_v1 }
 0x3ae   :  { %7334 = vmatpush2.bf16.msra.mxu0 %v15972_v9  ;;  %v16324_v9 = vcombine.low %v1564_v43, %v1568_v45  ;;  %v1416_v25 = vld [vmem:[#allocation12 + $0x18a8] sm:$0xff] }
 0x3af   :  { %7335 = vmatprep.subr.bf16.mxu0 %v15965_v11  ;;  %v1424_v11 = vld [vmem:[#allocation12 + $0x18e8] sm:$0xff] }
 0x3b0   :  { %7375 = vmatpush2.bf16.msra.mxu1 %v16100_v10  ;;  %v16189_v10 = vcombine.high %v1428_v58, %v1432_v61  ;;  %v1540_v28 = vld [vmem:[#allocation12 + $0x1c88] sm:$0xff] }
 0x3b1   :  { %7376 = vmatprep.subr.bf16.mxu1 %v16093_v15  ;;  %v1552_v15 = vld [vmem:[#allocation12 + $0x1ce8] sm:$0xff] }
 0x3b2   :  { %7336 = vmatpush2.bf16.msra.mxu0 %v15964_v22  ;;  %v16316_v22 = vcombine.low %v1556_v62, %v1560_v1  ;;  %v16309_v30 = vcombine.high %v1548_v12, %v1552_v15  ;;  %v1408_v38 = vld [vmem:[#allocation12 + $0x1868] sm:$0xff] }
 0x3b3   :  { %7387 = vmatprep.subr.bf16.mxu0 %v16213_v24  ;;  %v1412_v24 = vld [vmem:[#allocation12 + $0x1888] sm:$0xff] }
 0x3b4   :  { %7377 = vmatpush2.bf16.msra.mxu1 %v16092_v23  ;;  %v1532_v39 = vld [vmem:[#allocation12 + $0x1c48] sm:$0xff] }
 0x3b5   :  { %7428 = vmatprep.subr.bf16.mxu1 %v16341_v31  ;;  %v7093_v46 = vpop.f32.mrf.mxu0  ;;  %7338 = vmatmul.mubr.bf16.vlgmr.msra.gmra.mxu0 %v19846_v7  ;;  %v1544_v31 = vld [vmem:[#allocation12 + $0x1ca8] sm:$0xff] }
 0x3b6   :  { %v7094_v27 = vadd.f32 %v7093_v46, %v19893_v47  ;;  %7388 = vmatpush1.bf16.msra.mxu0 %v16212_v35  ;;  %v16325_v47 = vcombine.high %v1564_v43, %v1568_v45  ;;  %7419 = vmatprep.mubr.bf16.mxu0 %v19850_v18  ;;  %v16308_v35 = vcombine.low %v1548_v12, %v1552_v15  ;;  %v1640_v12 = vld [vmem:[#allocation12 + $0x1fa8] sm:$0xff] }
 0x3b7   :  { %v7134_v48 = vpop.f32.mrf.mxu1  ;;  %7379 = vmatmul.mubr.bf16.vlgmr.msra.gmra.mxu1 %v19848_v8  ;;  %v7095_v49 = vpop.f32.mrf.mxu0  ;;  %7389 = vmatprep.subr.bf16.mxu0 %v16205_v16  ;;  %v1404_v16 = vld [vmem:[#allocation12 + $0x1848] sm:$0xff]  ;;  %v16301_v43 = vcombine.high %v1540_v28, %v1544_v31  ;;  %v16172_v45 = vcombine.low %v1412_v24, %v1416_v25  ;;  %v16300_v46 = vcombine.low %v1540_v28, %v1544_v31 }
 0x3b8   :  { %7429 = vmatpush1.bf16.msra.mxu1 %v16340_v37  ;;  %v19903_v63 = vadd.f32 %v7134_v48, %v7094_v27  ;;  %v7096_v42 = vadd.f32 %v7095_v49, %v19898_v55  ;;  %7460 = vmatprep.mubr.bf16.mxu1 %v19853_v19  ;;  %v1420_v55 = vld [vmem:[#allocation12 + $0x18c8] sm:$0xff]  ;;  %v16173_v37 = vcombine.high %v1412_v24, %v1416_v25 }
 0x3b9   :  { %v7136_v0 = vpop.f32.mrf.mxu1  ;;  %7430 = vmatprep.subr.bf16.mxu1 %v16333_v44  ;;  %v7097_v2 = vpop.f32.mrf.mxu0  ;;  %v16181_v23 = vcombine.high %v1420_v55, %v1424_v11  ;;  %v16180_v33 = vcombine.low %v1420_v55, %v1424_v11  ;;  %v1536_v44 = vld [vmem:[#allocation12 + $0x1c68] sm:$0xff]  ;;  %v16165_v27 = vcombine.high %v1404_v16, %v1408_v38  ;;  %v16164_v58 = vcombine.low %v1404_v16, %v1408_v38 }
 0x3ba   :  { %v19908_v3 = vadd.f32 %v7136_v0, %v7096_v42  ;;  %7390 = vmatpush1.bf16.msra.mxu0 %v16204_v34  ;;  %v1396_v48 = vld [vmem:[#allocation12 + $0x1808] sm:$0xff]  ;;  %v16292_v61 = vcombine.low %v1532_v39, %v1536_v44 }
 0x3bb   :  { %v7138_v4 = vpop.f32.mrf.mxu1  ;;  %v7098_v6 = vpop.f32.mrf.mxu0  ;;  %7391 = vmatprep.subr.bf16.mxu0 %v16197_v57  ;;  %v1400_v34 = vld [vmem:[#allocation12 + $0x1828] sm:$0xff] }
 0x3bc   :  { %7431 = vmatpush1.bf16.msra.mxu1 %v16332_v53  ;;  %v1524_v49 = vld [vmem:[#allocation12 + $0x1c08] sm:$0xff]  ;;  %v16293_v53 = vcombine.high %v1532_v39, %v1536_v44  ;;  %v16157_v62 = vcombine.high %v1396_v48, %v1400_v34  ;;  %v16156_v4 = vcombine.low %v1396_v48, %v1400_v34 }
 0x3bd   :  { %v7139_v13 = vpop.f32.mrf.mxu1  ;;  %7432 = vmatprep.subr.bf16.mxu1 %v16325_v47  ;;  %v1528_v57 = vld [vmem:[#allocation12 + $0x1c28] sm:$0xff] }
 0x3be   :  { %7392 = vmatpush1.bf16.msra.mxu0 %v16196_v5  ;;  %v1516_v42 = vld [vmem:[#allocation12 + $0x1bc8] sm:$0xff]  ;;  %v16285_v1 = vcombine.high %v1524_v49, %v1528_v57  ;;  %v16284_v5 = vcombine.low %v1524_v49, %v1528_v57 }
 0x3bf   :  { %7393 = vmatprep.subr.bf16.mxu0 %v16189_v10  ;;  %v1520_v0 = vld [vmem:[#allocation12 + $0x1be8] sm:$0xff] }
 0x3c0   :  { %7433 = vmatpush1.bf16.msra.mxu1 %v16324_v9  ;;  %v1644_v47 = vld [vmem:[#allocation12 + $0x1fc8] sm:$0xff]  ;;  %v16277_v6 = vcombine.high %v1516_v42, %v1520_v0  ;;  %v16276_v13 = vcombine.low %v1516_v42, %v1520_v0 }
 0x3c1   :  { %7434 = vmatprep.subr.bf16.mxu1 %v16317_v14  ;;  %v1648_v2 = vld [vmem:[#allocation12 + $0x1fe8] sm:$0xff] }
 0x3c2   :  { %7394 = vmatpush1.bf16.msra.mxu0 %v16188_v20  ;;  %v1508_v9 = vld [vmem:[#allocation12 + $0x1b88] sm:$0xff]  ;;  %v16405_v11 = vcombine.high %v1644_v47, %v1648_v2  ;;  %v16404_v14 = vcombine.low %v1644_v47, %v1648_v2 }
 0x3c3   :  { %7395 = vmatprep.subr.bf16.mxu0 %v16181_v23  ;;  %v1512_v10 = vld [vmem:[#allocation12 + $0x1ba8] sm:$0xff] }
 0x3c4   :  { %7435 = vmatpush1.bf16.msra.mxu1 %v16316_v22  ;;  %v1636_v55 = vld [vmem:[#allocation12 + $0x1f88] sm:$0xff]  ;;  %v16269_v15 = vcombine.high %v1508_v9, %v1512_v10  ;;  %v16268_v28 = vcombine.low %v1508_v9, %v1512_v10 }
 0x3c5   :  { %7436 = vmatprep.subr.bf16.mxu1 %v16309_v30  ;;  %v1500_v20 = vld [vmem:[#allocation12 + $0x1b48] sm:$0xff]  ;;  %v16397_v24 = vcombine.high %v1636_v55, %v1640_v12  ;;  %v16396_v30 = vcombine.low %v1636_v55, %v1640_v12 }
 0x3c6   :  { %7396 = vmatpush1.bf16.msra.mxu0 %v16180_v33  ;;  %v1504_v22 = vld [vmem:[#allocation12 + $0x1b68] sm:$0xff] }
 0x3c7   :  { %7397 = vmatprep.subr.bf16.mxu0 %v16173_v37  ;;  %v1628_v23 = vld [vmem:[#allocation12 + $0x1f48] sm:$0xff]  ;;  %v16261_v31 = vcombine.high %v1500_v20, %v1504_v22  ;;  %v16260_v39 = vcombine.low %v1500_v20, %v1504_v22 }
 0x3c8   :  { %7437 = vmatpush1.bf16.msra.mxu1 %v16308_v35  ;;  %v1632_v25 = vld [vmem:[#allocation12 + $0x1f68] sm:$0xff] }
 0x3c9   :  { %7438 = vmatprep.subr.bf16.mxu1 %v16301_v43  ;;  %v1492_v33 = vld [vmem:[#allocation12 + $0x1b08] sm:$0xff]  ;;  %v16389_v16 = vcombine.high %v1628_v23, %v1632_v25  ;;  %v16388_v43 = vcombine.low %v1628_v23, %v1632_v25 }
 0x3ca   :  { %7398 = vmatpush1.bf16.msra.mxu0 %v16172_v45  ;;  %v1496_v35 = vld [vmem:[#allocation12 + $0x1b28] sm:$0xff] }
 0x3cb   :  { %7399 = vmatprep.subr.bf16.mxu0 %v16165_v27  ;;  %v1620_v37 = vld [vmem:[#allocation12 + $0x1f08] sm:$0xff]  ;;  %v16253_v44 = vcombine.high %v1492_v33, %v1496_v35  ;;  %v16252_v49 = vcombine.low %v1492_v33, %v1496_v35  ;;  %v817_v35 = vld [vmem:[#allocation12 + $0x5f0] sm:$0xff] }
 0x3cc   :  { %7439 = vmatpush1.bf16.msra.mxu1 %v16300_v46  ;;  %v1624_v38 = vld [vmem:[#allocation12 + $0x1f28] sm:$0xff] }
 0x3cd   :  { %7440 = vmatprep.subr.bf16.mxu1 %v16293_v53  ;;  %v1484_v45 = vld [vmem:[#allocation12 + $0x1ac8] sm:$0xff]  ;;  %v16381_v48 = vcombine.high %v1620_v37, %v1624_v38  ;;  %v16380_v53 = vcombine.low %v1620_v37, %v1624_v38 }
 0x3ce   :  { %7400 = vmatpush1.bf16.msra.mxu0 %v16164_v58  ;;  %v1488_v46 = vld [vmem:[#allocation12 + $0x1ae8] sm:$0xff] }
 0x3cf   :  { %7401 = vmatprep.subr.bf16.mxu0 %v16157_v62  ;;  %v1612_v27 = vld [vmem:[#allocation12 + $0x1ec8] sm:$0xff]  ;;  %v16245_v57 = vcombine.high %v1484_v45, %v1488_v46  ;;  %v16244_v47 = vcombine.low %v1484_v45, %v1488_v46  ;;  %v805_v45 = vld [vmem:[#allocation12 + $0x590] sm:$0xff] }
 0x3d0   :  { %7441 = vmatpush1.bf16.msra.mxu1 %v16292_v61  ;;  %v1616_v34 = vld [vmem:[#allocation12 + $0x1ee8] sm:$0xff] }
 0x3d1   :  { %7442 = vmatprep.subr.bf16.mxu1 %v16285_v1  ;;  %v1476_v58 = vld [vmem:[#allocation12 + $0x1a88] sm:$0xff]  ;;  %v16373_v42 = vcombine.high %v1612_v27, %v1616_v34  ;;  %v16372_v1 = vcombine.low %v1612_v27, %v1616_v34  ;;  %v19914_v27 = vsub.s32 3, %v19858_v26  ;;  %v18672_v34 = vld [vmem:[#allocation14] sm:$0xff] }
 0x3d2   :  { %7402 = vmatpush1.bf16.msra.mxu0 %v16156_v4  ;;  %v1480_v61 = vld [vmem:[#allocation12 + $0x1aa8] sm:$0xff] }
 0x3d3   :  { %7403 = vmatprep.subr.bf16.mxu0 %v16277_v6  ;;  %v1604_v62 = vld [vmem:[#allocation12 + $0x1e88] sm:$0xff]  ;;  %v16237_v2 = vcombine.high %v1476_v58, %v1480_v61  ;;  %v16236_v55 = vcombine.low %v1476_v58, %v1480_v61  ;;  %v669_v61 = vld [vmem:[#allocation12 + $0x150] sm:$0xff] }
 0x3d4   :  { %7443 = vmatpush1.bf16.msra.mxu1 %v16284_v5  ;;  %v1608_v0 = vld [vmem:[#allocation12 + $0x1ea8] sm:$0xff] }
 0x3d5   :  { %7444 = vmatprep.subr.bf16.mxu1 %v16405_v11  ;;  %v1468_v4 = vld [vmem:[#allocation12 + $0x1a48] sm:$0xff]  ;;  %v16365_v9 = vcombine.high %v1604_v62, %v1608_v0  ;;  %v16364_v11 = vcombine.low %v1604_v62, %v1608_v0  ;;  %v673_v62 = vld [vmem:[#allocation12 + $0x170] sm:$0xff]  ;;  %v1668_v0 = vrot.slane %v18672_v34, %v19914_v27 }
 0x3d6   :  { %7404 = vmatpush2.bf16.msra.mxu0 %v16276_v13  ;;  %v1472_v5 = vld [vmem:[#allocation12 + $0x1a68] sm:$0xff] }
 0x3d7   :  { %7405 = vmatprep.subr.bf16.mxu0 %v16269_v15  ;;  %v1596_v6 = vld [vmem:[#allocation12 + $0x1e48] sm:$0xff]  ;;  %v16229_v12 = vcombine.high %v1468_v4, %v1472_v5  ;;  %v16228_v23 = vcombine.low %v1468_v4, %v1472_v5 }
 0x3d8   :  { %7445 = vmatpush2.bf16.msra.mxu1 %v16404_v14  ;;  %v1600_v10 = vld [vmem:[#allocation12 + $0x1e68] sm:$0xff] }
 0x3d9   :  { %7446 = vmatprep.subr.bf16.mxu1 %v16397_v24  ;;  %v1460_v13 = vld [vmem:[#allocation12 + $0x1a08] sm:$0xff]  ;;  %v16357_v20 = vcombine.high %v1596_v6, %v1600_v10  ;;  %v16356_v24 = vcombine.low %v1596_v6, %v1600_v10 }
 0x3da   :  { %7406 = vmatpush2.bf16.msra.mxu0 %v16268_v28  ;;  %v1464_v14 = vld [vmem:[#allocation12 + $0x1a28] sm:$0xff]  ;;  %v685_v28 = vld [vmem:[#allocation12 + $0x1d0] sm:$0xff] }
 0x3db   :  { %7407 = vmatprep.subr.bf16.mxu0 %v16261_v31  ;;  %v1588_v15 = vld [vmem:[#allocation12 + $0x1e08] sm:$0xff]  ;;  %v16221_v25 = vcombine.high %v1460_v13, %v1464_v14  ;;  %v813_v31 = vld [vmem:[#allocation12 + $0x5d0] sm:$0xff]  ;;  %v16220_v37 = vcombine.low %v1460_v13, %v1464_v14 }
 0x3dc   :  { %7447 = vmatpush2.bf16.msra.mxu1 %v16396_v30  ;;  %v1592_v22 = vld [vmem:[#allocation12 + $0x1e28] sm:$0xff]  ;;  %v689_v30 = vld [vmem:[#allocation12 + $0x1f0] sm:$0xff]  ;;  %v15575_v46 = vcombine.high %v813_v31, %v817_v35 }
 0x3dd   :  { %7448 = vmatprep.subr.bf16.mxu1 %v16389_v16  ;;  %v16349_v33 = vcombine.high %v1588_v15, %v1592_v22  ;;  %v19911_v16 = vsub.s32 2, %v19858_v26  ;;  %v16348_v38 = vcombine.low %v1588_v15, %v1592_v22  ;;  %v789_v13 = vld [vmem:[#allocation12 + $0x510] sm:$0xff] }
 0x3de   :  { %7408 = vmatpush2.bf16.msra.mxu0 %v16260_v39  ;;  %v15447_v39 = vcombine.high %v685_v28, %v689_v30 }
 0x3df   :  { %7409 = vmatprep.subr.bf16.mxu0 %v16253_v44  ;;  %v681_v44 = vld [vmem:[#allocation12 + $0x1b0] sm:$0xff] }
 0x3e0   :  { %7449 = vmatpush2.bf16.msra.mxu1 %v16388_v43  ;;  %v677_v43 = vld [vmem:[#allocation12 + $0x190] sm:$0xff] }
 0x3e1   :  { %7450 = vmatprep.subr.bf16.mxu1 %v16381_v48  ;;  %v809_v48 = vld [vmem:[#allocation12 + $0x5b0] sm:$0xff]  ;;  %v15439_v58 = vcombine.high %v677_v43, %v681_v44  ;;  %v15438_v6 = vcombine.low %v677_v43, %v681_v44 }
 0x3e2   :  { %7410 = vmatpush2.bf16.msra.mxu0 %v16252_v49  ;;  %v1664_v49 = vrot.slane %v18672_v34, %v19911_v16  ;;  %v15566_v10 = vcombine.low %v805_v45, %v809_v48 }
 0x3e3   :  { %7411 = vmatprep.subr.bf16.mxu0 %v16245_v57  ;;  %v15574_v57 = vcombine.low %v813_v31, %v817_v35 }
 0x3e4   :  { %7451 = vmatpush2.bf16.msra.mxu1 %v16380_v53  ;;  %v15446_v53 = vcombine.low %v685_v28, %v689_v30  ;;  %v15430_v30 = vcombine.low %v669_v61, %v673_v62 }
 0x3e5   :  { %7452 = vmatprep.subr.bf16.mxu1 %v16373_v42  ;;  %v797_v42 = vld [vmem:[#allocation12 + $0x550] sm:$0xff] }
 0x3e6   :  { %7412 = vmatpush2.bf16.msra.mxu0 %v16244_v47  ;;  %v15567_v47 = vcombine.high %v805_v45, %v809_v48  ;;  %v785_v45 = vld [vmem:[#allocation12 + $0x4f0] sm:$0xff] }
 0x3e7   :  { %7413 = vmatprep.subr.bf16.mxu0 %v16237_v2 }
 0x3e8   :  { %7453 = vmatpush2.bf16.msra.mxu1 %v16372_v1  ;;  %v801_v1 = vld [vmem:[#allocation12 + $0x570] sm:$0xff] }
 0x3e9   :  { %7454 = vmatprep.subr.bf16.mxu1 %v16365_v9  ;;  %v15559_v22 = vcombine.high %v797_v42, %v801_v1 }
 0x3ea   :  { %7414 = vmatpush2.bf16.msra.mxu0 %v16236_v55  ;;  %v15431_v55 = vcombine.high %v669_v61, %v673_v62  ;;  %v777_v61 = vld [vmem:[#allocation12 + $0x4b0] sm:$0xff] }
 0x3eb   :  { %7415 = vmatprep.subr.bf16.mxu0 %v16229_v12  ;;  %v665_v12 = vld [vmem:[#allocation12 + $0x130] sm:$0xff] }
 0x3ec   :  { %7455 = vmatpush2.bf16.msra.mxu1 %v16364_v11  ;;  %v661_v11 = vld [vmem:[#allocation12 + $0x110] sm:$0xff] }
 0x3ed   :  { %7456 = vmatprep.subr.bf16.mxu1 %v16357_v20  ;;  %v15423_v35 = vcombine.high %v661_v11, %v665_v12 }
 0x3ee   :  { %7416 = vmatpush2.bf16.msra.mxu0 %v16228_v23  ;;  %v793_v23 = vld [vmem:[#allocation12 + $0x530] sm:$0xff] }
 0x3ef   :  { %7417 = vmatprep.subr.bf16.mxu0 %v16221_v25  ;;  %v15551_v44 = vcombine.high %v789_v13, %v793_v23  ;;  %v15550_v48 = vcombine.low %v789_v13, %v793_v23 }
 0x3f0   :  { %7457 = vmatpush2.bf16.msra.mxu1 %v16356_v24 }
 0x3f1   :  { %7458 = vmatprep.subr.bf16.mxu1 %v16349_v33  ;;  %v15558_v33 = vcombine.low %v797_v42, %v801_v1  ;;  %v641_v1 = vld [vmem:[#allocation12 + $0x70] sm:$0xff] }
 0x3f2   :  { %7418 = vmatpush2.bf16.msra.mxu0 %v16220_v37  ;;  %v653_v37 = vld [vmem:[#allocation12 + $0xd0] sm:$0xff] }
 0x3f3   :  { %7469 = vmatprep.subr.bf16.mxu0 %v15447_v39  ;;  %v781_v39 = vld [vmem:[#allocation12 + $0x4d0] sm:$0xff] }
 0x3f4   :  { %7459 = vmatpush2.bf16.msra.mxu1 %v16348_v38  ;;  %v657_v38 = vld [vmem:[#allocation12 + $0xf0] sm:$0xff]  ;;  %v15542_v42 = vcombine.low %v781_v39, %v785_v45 }
 0x3f5   :  { %7510 = vmatprep.subr.bf16.mxu1 %v15575_v46  ;;  %v7175_v2 = vpop.f32.mrf.mxu0  ;;  %7420 = vmatmul.mubr.bf16.vlgmr.msra.gmra.mxu0 %v19866_v54  ;;  %v15422_v46 = vcombine.low %v661_v11, %v665_v12  ;;  %v15415_v34 = vcombine.high %v653_v37, %v657_v38  ;;  %v15414_v62 = vcombine.low %v653_v37, %v657_v38  ;;  %v633_v11 = vld [vmem:[#allocation12 + $0x30] sm:$0xff] }
 0x3f6   :  { %v7176_v4 = vadd.f32 %v7175_v2, %v1664_v49  ;;  %7470 = vmatpush1.bf16.msra.mxu0 %v15446_v53  ;;  %7501 = vmatprep.mubr.bf16.mxu0 %v19816_v59  ;;  %v645_v49 = vld [vmem:[#allocation12 + $0x90] sm:$0xff] }
 0x3f7   :  { %v7216_v5 = vpop.f32.mrf.mxu1  ;;  %7461 = vmatmul.mubr.bf16.vlgmr.msra.gmra.mxu1 %v19869_v56  ;;  %v7177_v9 = vpop.f32.mrf.mxu0  ;;  %7471 = vmatprep.subr.bf16.mxu0 %v15439_v58  ;;  %v649_v53 = vld [vmem:[#allocation12 + $0xb0] sm:$0xff]  ;;  %v15543_v58 = vcombine.high %v781_v39, %v785_v45 }
 0x3f8   :  { %7511 = vmatpush1.bf16.msra.mxu1 %v15574_v57  ;;  %v19920_v14 = vadd.f32 %v7216_v5, %v7176_v4  ;;  %v7178_v15 = vadd.f32 %v7177_v9, %v1668_v0  ;;  %7542 = vmatprep.mubr.bf16.mxu1 %v19818_v60  ;;  %v773_v57 = vld [vmem:[#allocation12 + $0x490] sm:$0xff]  ;;  %v15407_v0 = vcombine.high %v645_v49, %v649_v53 }
 0x3f9   :  { %v7218_v20 = vpop.f32.mrf.mxu1  ;;  %7512 = vmatprep.subr.bf16.mxu1 %v15567_v47  ;;  %v7179_v24 = vpop.f32.mrf.mxu0  ;;  %v637_v47 = vld [vmem:[#allocation12 + $0x50] sm:$0xff]  ;;  %v15535_v4 = vcombine.high %v773_v57, %v777_v61  ;;  %v15534_v9 = vcombine.low %v773_v57, %v777_v61 }
 0x3fa   :  { %v19924_v25 = vadd.f32 %v7218_v20, %v7178_v15  ;;  %7472 = vmatpush1.bf16.msra.mxu0 %v15438_v6  ;;  %v765_v2 = vld [vmem:[#allocation12 + $0x450] sm:$0xff]  ;;  %v15406_v6 = vcombine.low %v645_v49, %v649_v53  ;;  %v15398_v20 = vcombine.low %v637_v47, %v641_v1 }
 0x3fb   :  { %v7220_v28 = vpop.f32.mrf.mxu1  ;;  %v7180_v31 = vpop.f32.mrf.mxu0  ;;  %7473 = vmatprep.subr.bf16.mxu0 %v15431_v55  ;;  %v769_v5 = vld [vmem:[#allocation12 + $0x470] sm:$0xff] }
 0x3fc   :  { %7513 = vmatpush1.bf16.msra.mxu1 %v15566_v10  ;;  %v15399_v10 = vcombine.high %v637_v47, %v641_v1  ;;  %v629_v55 = vld [vmem:[#allocation12 + $0x10] sm:$0xff]  ;;  %v15527_v13 = vcombine.high %v765_v2, %v769_v5 }
 0x3fd   :  { %v7221_v43 = vpop.f32.mrf.mxu1  ;;  %7514 = vmatprep.subr.bf16.mxu1 %v15559_v22  ;;  %v757_v12 = vld [vmem:[#allocation12 + $0x410] sm:$0xff]  ;;  %v15526_v22 = vcombine.low %v765_v2, %v769_v5  ;;  %v15391_v23 = vcombine.high %v629_v55, %v633_v11 }
 0x3fe   :  { %7474 = vmatpush1.bf16.msra.mxu0 %v15430_v30  ;;  %v761_v15 = vld [vmem:[#allocation12 + $0x430] sm:$0xff] }
 0x3ff   :  { %7475 = vmatprep.subr.bf16.mxu0 %v15423_v35  ;;  %v15519_v24 = vcombine.high %v757_v12, %v761_v15  ;;  %v749_v28 = vld [vmem:[#allocation12 + $0x3d0] sm:$0xff]  ;;  %v15390_v35 = vcombine.low %v629_v55, %v633_v11  ;;  %v15518_v37 = vcombine.low %v757_v12, %v761_v15 }
 0x400   :  { %7515 = vmatpush1.bf16.msra.mxu1 %v15558_v33  ;;  %v753_v30 = vld [vmem:[#allocation12 + $0x3f0] sm:$0xff] }
 0x401   :  { %7516 = vmatprep.subr.bf16.mxu1 %v15551_v44  ;;  %v877_v31 = vld [vmem:[#allocation12 + $0x7d0] sm:$0xff]  ;;  %v15511_v38 = vcombine.high %v749_v28, %v753_v30 }
 0x402   :  { %7476 = vmatpush1.bf16.msra.mxu0 %v15422_v46  ;;  %v881_v33 = vld [vmem:[#allocation12 + $0x7f0] sm:$0xff] }
 0x403   :  { %7477 = vmatprep.subr.bf16.mxu0 %v15415_v34  ;;  %v15639_v39 = vcombine.high %v877_v31, %v881_v33  ;;  %v741_v43 = vld [vmem:[#allocation12 + $0x390] sm:$0xff]  ;;  %v15638_v34 = vcombine.low %v877_v31, %v881_v33 }
 0x404   :  { %7517 = vmatpush1.bf16.msra.mxu1 %v15550_v48  ;;  %v745_v44 = vld [vmem:[#allocation12 + $0x3b0] sm:$0xff]  ;;  %v15510_v48 = vcombine.low %v749_v28, %v753_v30 }
 0x405   :  { %7518 = vmatprep.subr.bf16.mxu1 %v15543_v58  ;;  %v869_v45 = vld [vmem:[#allocation12 + $0x790] sm:$0xff]  ;;  %v15503_v49 = vcombine.high %v741_v43, %v745_v44 }
 0x406   :  { %7478 = vmatpush1.bf16.msra.mxu0 %v15414_v62  ;;  %v873_v46 = vld [vmem:[#allocation12 + $0x7b0] sm:$0xff] }
 0x407   :  { %7479 = vmatprep.subr.bf16.mxu0 %v15407_v0  ;;  %v15631_v53 = vcombine.high %v869_v45, %v873_v46  ;;  %v733_v57 = vld [vmem:[#allocation12 + $0x350] sm:$0xff]  ;;  %v15630_v0 = vcombine.low %v869_v45, %v873_v46 }
 0x408   :  { %7519 = vmatpush1.bf16.msra.mxu1 %v15542_v42  ;;  %v737_v58 = vld [vmem:[#allocation12 + $0x370] sm:$0xff]  ;;  %v15502_v42 = vcombine.low %v741_v43, %v745_v44 }
 0x409   :  { %7520 = vmatprep.subr.bf16.mxu1 %v15535_v4  ;;  %v861_v61 = vld [vmem:[#allocation12 + $0x750] sm:$0xff]  ;;  %v15495_v47 = vcombine.high %v733_v57, %v737_v58 }
 0x40a   :  { %7480 = vmatpush1.bf16.msra.mxu0 %v15406_v6  ;;  %v865_v62 = vld [vmem:[#allocation12 + $0x770] sm:$0xff] }
 0x40b   :  { %7481 = vmatprep.subr.bf16.mxu0 %v15399_v10  ;;  %v15623_v1 = vcombine.high %v861_v61, %v865_v62  ;;  %v725_v2 = vld [vmem:[#allocation12 + $0x310] sm:$0xff]  ;;  %v15622_v10 = vcombine.low %v861_v61, %v865_v62 }
 0x40c   :  { %7521 = vmatpush1.bf16.msra.mxu1 %v15534_v9  ;;  %v729_v4 = vld [vmem:[#allocation12 + $0x330] sm:$0xff]  ;;  %v15494_v9 = vcombine.low %v733_v57, %v737_v58 }
 0x40d   :  { %7522 = vmatprep.subr.bf16.mxu1 %v15527_v13  ;;  %v853_v5 = vld [vmem:[#allocation12 + $0x710] sm:$0xff]  ;;  %v15487_v55 = vcombine.high %v725_v2, %v729_v4 }
 0x40e   :  { %7482 = vmatpush1.bf16.msra.mxu0 %v15398_v20  ;;  %v857_v6 = vld [vmem:[#allocation12 + $0x730] sm:$0xff] }
 0x40f   :  { %7483 = vmatprep.subr.bf16.mxu0 %v15391_v23  ;;  %v15615_v11 = vcombine.high %v853_v5, %v857_v6  ;;  %v717_v12 = vld [vmem:[#allocation12 + $0x2d0] sm:$0xff]  ;;  %v15614_v23 = vcombine.low %v853_v5, %v857_v6 }
 0x410   :  { %7523 = vmatpush1.bf16.msra.mxu1 %v15526_v22  ;;  %v721_v13 = vld [vmem:[#allocation12 + $0x2f0] sm:$0xff]  ;;  %v15486_v22 = vcombine.low %v725_v2, %v729_v4 }
 0x411   :  { %7524 = vmatprep.subr.bf16.mxu1 %v15519_v24  ;;  %v845_v15 = vld [vmem:[#allocation12 + $0x6d0] sm:$0xff]  ;;  %v15479_v24 = vcombine.high %v717_v12, %v721_v13 }
 0x412   :  { %7484 = vmatpush1.bf16.msra.mxu0 %v15390_v35  ;;  %v849_v20 = vld [vmem:[#allocation12 + $0x6f0] sm:$0xff] }
 0x413   :  { %7485 = vmatprep.subr.bf16.mxu0 %v15511_v38  ;;  %v15607_v28 = vcombine.high %v845_v15, %v849_v20  ;;  %v709_v30 = vld [vmem:[#allocation12 + $0x290] sm:$0xff]  ;;  %v15606_v38 = vcombine.low %v845_v15, %v849_v20 }
 0x414   :  { %7525 = vmatpush1.bf16.msra.mxu1 %v15518_v37  ;;  %v713_v31 = vld [vmem:[#allocation12 + $0x2b0] sm:$0xff]  ;;  %v15478_v37 = vcombine.low %v717_v12, %v721_v13 }
 0x415   :  { %7526 = vmatprep.subr.bf16.mxu1 %v15639_v39  ;;  %v837_v33 = vld [vmem:[#allocation12 + $0x690] sm:$0xff]  ;;  %v15471_v39 = vcombine.high %v709_v30, %v713_v31 }
 0x416   :  { %7486 = vmatpush2.bf16.msra.mxu0 %v15510_v48  ;;  %v841_v35 = vld [vmem:[#allocation12 + $0x6b0] sm:$0xff] }
 0x417   :  { %7487 = vmatprep.subr.bf16.mxu0 %v15503_v49  ;;  %v15599_v43 = vcombine.high %v837_v33, %v841_v35  ;;  %v701_v44 = vld [vmem:[#allocation12 + $0x250] sm:$0xff]  ;;  %v15598_v49 = vcombine.low %v837_v33, %v841_v35 }
 0x418   :  { %7527 = vmatpush2.bf16.msra.mxu1 %v15638_v34  ;;  %v705_v45 = vld [vmem:[#allocation12 + $0x270] sm:$0xff]  ;;  %v15470_v34 = vcombine.low %v709_v30, %v713_v31 }
 0x419   :  { %7528 = vmatprep.subr.bf16.mxu1 %v15631_v53  ;;  %v829_v46 = vld [vmem:[#allocation12 + $0x650] sm:$0xff]  ;;  %v15463_v53 = vcombine.high %v701_v44, %v705_v45 }
 0x41a   :  { %7488 = vmatpush2.bf16.msra.mxu0 %v15502_v42  ;;  %v833_v48 = vld [vmem:[#allocation12 + $0x670] sm:$0xff] }
 0x41b   :  { %7489 = vmatprep.subr.bf16.mxu0 %v15495_v47  ;;  %v15591_v57 = vcombine.high %v829_v46, %v833_v48  ;;  %v693_v58 = vld [vmem:[#allocation12 + $0x210] sm:$0xff]  ;;  %v15590_v47 = vcombine.low %v829_v46, %v833_v48 }
 0x41c   :  { %7529 = vmatpush2.bf16.msra.mxu1 %v15630_v0  ;;  %v697_v61 = vld [vmem:[#allocation12 + $0x230] sm:$0xff]  ;;  %v15462_v0 = vcombine.low %v701_v44, %v705_v45 }
 0x41d   :  { %7530 = vmatprep.subr.bf16.mxu1 %v15623_v1  ;;  %v821_v62 = vld [vmem:[#allocation12 + $0x610] sm:$0xff]  ;;  %v15455_v1 = vcombine.high %v693_v58, %v697_v61 }
 0x41e   :  { %7490 = vmatpush2.bf16.msra.mxu0 %v15494_v9  ;;  %v825_v42 = vld [vmem:[#allocation12 + $0x630] sm:$0xff] }
 0x41f   :  { %7491 = vmatprep.subr.bf16.mxu0 %v15487_v55  ;;  %v15583_v2 = vcombine.high %v821_v62, %v825_v42  ;;  %v941_v4 = vld [vmem:[#allocation12 + $0x9d0] sm:$0xff]  ;;  %v15582_v55 = vcombine.low %v821_v62, %v825_v42 }
 0x420   :  { %7531 = vmatpush2.bf16.msra.mxu1 %v15622_v10  ;;  %v945_v5 = vld [vmem:[#allocation12 + $0x9f0] sm:$0xff]  ;;  %v15454_v10 = vcombine.low %v693_v58, %v697_v61 }
 0x421   :  { %7532 = vmatprep.subr.bf16.mxu1 %v15615_v11  ;;  %v1069_v6 = vld [vmem:[#allocation12 + $0xdd0] sm:$0xff]  ;;  %v15703_v11 = vcombine.high %v941_v4, %v945_v5 }
 0x422   :  { %7492 = vmatpush2.bf16.msra.mxu0 %v15486_v22  ;;  %v1073_v9 = vld [vmem:[#allocation12 + $0xdf0] sm:$0xff] }
 0x423   :  { %7493 = vmatprep.subr.bf16.mxu0 %v15479_v24  ;;  %v15831_v12 = vcombine.high %v1069_v6, %v1073_v9  ;;  %v933_v13 = vld [vmem:[#allocation12 + $0x990] sm:$0xff]  ;;  %v15830_v24 = vcombine.low %v1069_v6, %v1073_v9 }
 0x424   :  { %7533 = vmatpush2.bf16.msra.mxu1 %v15614_v23  ;;  %v937_v15 = vld [vmem:[#allocation12 + $0x9b0] sm:$0xff]  ;;  %v15702_v23 = vcombine.low %v941_v4, %v945_v5 }
 0x425   :  { %7534 = vmatprep.subr.bf16.mxu1 %v15607_v28  ;;  %v1061_v20 = vld [vmem:[#allocation12 + $0xd90] sm:$0xff]  ;;  %v15695_v28 = vcombine.high %v933_v13, %v937_v15  ;;  %v15694_v44 = vcombine.low %v933_v13, %v937_v15 }
 0x426   :  { %7494 = vmatpush2.bf16.msra.mxu0 %v15478_v37  ;;  %v1065_v22 = vld [vmem:[#allocation12 + $0xdb0] sm:$0xff] }
 0x427   :  { %7495 = vmatprep.subr.bf16.mxu0 %v15471_v39  ;;  %v15823_v30 = vcombine.high %v1061_v20, %v1065_v22  ;;  %v925_v31 = vld [vmem:[#allocation12 + $0x950] sm:$0xff]  ;;  %v15822_v46 = vcombine.low %v1061_v20, %v1065_v22 }
 0x428   :  { %7535 = vmatpush2.bf16.msra.mxu1 %v15606_v38  ;;  %v929_v33 = vld [vmem:[#allocation12 + $0x970] sm:$0xff] }
 0x429   :  { %7536 = vmatprep.subr.bf16.mxu1 %v15599_v43  ;;  %v1053_v37 = vld [vmem:[#allocation12 + $0xd50] sm:$0xff]  ;;  %v15687_v48 = vcombine.high %v925_v31, %v929_v33 }
 0x42a   :  { %7496 = vmatpush2.bf16.msra.mxu0 %v15470_v34  ;;  %v1057_v38 = vld [vmem:[#allocation12 + $0xd70] sm:$0xff] }
 0x42b   :  { %7497 = vmatprep.subr.bf16.mxu0 %v15463_v53  ;;  %v917_v58 = vld [vmem:[#allocation12 + $0x910] sm:$0xff] }
 0x42c   :  { %7537 = vmatpush2.bf16.msra.mxu1 %v15598_v49  ;;  %v921_v61 = vld [vmem:[#allocation12 + $0x930] sm:$0xff] }
 0x42d   :  { %7538 = vmatprep.subr.bf16.mxu1 %v15591_v57  ;;  %v15815_v57 = vcombine.high %v1053_v37, %v1057_v38  ;;  %v1045_v62 = vld [vmem:[#allocation12 + $0xd10] sm:$0xff]  ;;  %v15679_v4 = vcombine.high %v917_v58, %v921_v61 }
 0x42e   :  { %7498 = vmatpush2.bf16.msra.mxu0 %v15462_v0  ;;  %v1049_v42 = vld [vmem:[#allocation12 + $0xd30] sm:$0xff] }
 0x42f   :  { %7499 = vmatprep.subr.bf16.mxu0 %v15455_v1  ;;  %v15686_v1 = vcombine.low %v925_v31, %v929_v33  ;;  %v15807_v6 = vcombine.high %v1045_v62, %v1049_v42  ;;  %v909_v9 = vld [vmem:[#allocation12 + $0x8d0] sm:$0xff]  ;;  %v15806_v13 = vcombine.low %v1045_v62, %v1049_v42 }
 0x430   :  { %7539 = vmatpush2.bf16.msra.mxu1 %v15590_v47  ;;  %v901_v22 = vld [vmem:[#allocation12 + $0x890] sm:$0xff] }
 0x431   :  { %7540 = vmatprep.subr.bf16.mxu1 %v15583_v2 }
 0x432   :  { %7500 = vmatpush2.bf16.msra.mxu0 %v15454_v10  ;;  %v913_v10 = vld [vmem:[#allocation12 + $0x8f0] sm:$0xff] }
 0x433   :  { %7551 = vmatprep.subr.bf16.mxu0 %v15703_v11  ;;  %v1041_v11 = vld [vmem:[#allocation12 + $0xcf0] sm:$0xff]  ;;  %v15671_v15 = vcombine.high %v909_v9, %v913_v10 }
 0x434   :  { %7541 = vmatpush2.bf16.msra.mxu1 %v15582_v55  ;;  %v1037_v55 = vld [vmem:[#allocation12 + $0xcd0] sm:$0xff] }
 0x435   :  { %7592 = vmatprep.subr.bf16.mxu1 %v15831_v12  ;;  %v7257_v35 = vpop.f32.mrf.mxu0  ;;  %7502 = vmatmul.mubr.bf16.vlgmr.msra.gmra.mxu0 %v19822_v17  ;;  %v15678_v12 = vcombine.low %v917_v58, %v921_v61  ;;  %v15799_v20 = vcombine.high %v1037_v55, %v1041_v11  ;;  %v15798_v31 = vcombine.low %v1037_v55, %v1041_v11  ;;  %v1017_v58 = vld [vmem:[#allocation12 + $0xc30] sm:$0xff] }
 0x436   :  { %v7258_v39 = vadd.f32 %v7257_v35, %v19920_v14  ;;  %7552 = vmatpush1.bf16.msra.mxu0 %v15702_v23  ;;  %7583 = vmatprep.mubr.bf16.mxu0 %v19826_v29  ;;  %v905_v23 = vld [vmem:[#allocation12 + $0x8b0] sm:$0xff] }
 0x437   :  { %v7298_v43 = vpop.f32.mrf.mxu1  ;;  %7543 = vmatmul.mubr.bf16.vlgmr.msra.gmra.mxu1 %v19824_v21  ;;  %v7259_v45 = vpop.f32.mrf.mxu0  ;;  %7553 = vmatprep.subr.bf16.mxu0 %v15695_v28  ;;  %v1033_v28 = vld [vmem:[#allocation12 + $0xcb0] sm:$0xff]  ;;  %v15663_v33 = vcombine.high %v901_v22, %v905_v23 }
 0x438   :  { %7593 = vmatpush1.bf16.msra.mxu1 %v15830_v24  ;;  %v19929_v34 = vadd.f32 %v7298_v43, %v7258_v39  ;;  %v7260_v49 = vadd.f32 %v7259_v45, %v19924_v25  ;;  %7624 = vmatprep.mubr.bf16.mxu1 %v19829_v32  ;;  %v15814_v25 = vcombine.low %v1053_v37, %v1057_v38  ;;  %v1029_v24 = vld [vmem:[#allocation12 + $0xc90] sm:$0xff] }
 0x439   :  { %v7300_v53 = vpop.f32.mrf.mxu1  ;;  %7594 = vmatprep.subr.bf16.mxu1 %v15823_v30  ;;  %v7261_v14 = vpop.f32.mrf.mxu0  ;;  %v15670_v30 = vcombine.low %v909_v9, %v913_v10  ;;  %v15791_v35 = vcombine.high %v1029_v24, %v1033_v28  ;;  %v893_v37 = vld [vmem:[#allocation12 + $0x850] sm:$0xff]  ;;  %v15790_v45 = vcombine.low %v1029_v24, %v1033_v28 }
 0x43a   :  { %v19934_v0 = vadd.f32 %v7300_v53, %v7260_v49  ;;  %7554 = vmatpush1.bf16.msra.mxu0 %v15694_v44  ;;  %v897_v38 = vld [vmem:[#allocation12 + $0x870] sm:$0xff]  ;;  %v15662_v44 = vcombine.low %v901_v22, %v905_v23 }
 0x43b   :  { %v7302_v47 = vpop.f32.mrf.mxu1  ;;  %v7262_v2 = vpop.f32.mrf.mxu0  ;;  %7555 = vmatprep.subr.bf16.mxu0 %v15687_v48  ;;  %v1021_v39 = vld [vmem:[#allocation12 + $0xc50] sm:$0xff]  ;;  %v15654_v61 = vcombine.low %v893_v37, %v897_v38 }
 0x43c   :  { %7595 = vmatpush1.bf16.msra.mxu1 %v15822_v46  ;;  %v1025_v43 = vld [vmem:[#allocation12 + $0xc70] sm:$0xff]  ;;  %v15655_v46 = vcombine.high %v893_v37, %v897_v38 }
 0x43d   :  { %v7303_v5 = vpop.f32.mrf.mxu1  ;;  %7596 = vmatprep.subr.bf16.mxu1 %v15815_v57  ;;  %v15783_v48 = vcombine.high %v1021_v39, %v1025_v43  ;;  %v885_v49 = vld [vmem:[#allocation12 + $0x810] sm:$0xff]  ;;  %v15782_v14 = vcombine.low %v1021_v39, %v1025_v43 }
 0x43e   :  { %7556 = vmatpush1.bf16.msra.mxu0 %v15686_v1  ;;  %v889_v53 = vld [vmem:[#allocation12 + $0x830] sm:$0xff] }
 0x43f   :  { %7557 = vmatprep.subr.bf16.mxu0 %v15679_v4  ;;  %v1013_v57 = vld [vmem:[#allocation12 + $0xc10] sm:$0xff]  ;;  %v15647_v62 = vcombine.high %v885_v49, %v889_v53  ;;  %v15646_v4 = vcombine.low %v885_v49, %v889_v53 }
 0x440   :  { %7597 = vmatpush1.bf16.msra.mxu1 %v15814_v25  ;;  %v15775_v42 = vcombine.high %v1013_v57, %v1017_v58  ;;  %v1005_v47 = vld [vmem:[#allocation12 + $0xbd0] sm:$0xff]  ;;  %v15774_v5 = vcombine.low %v1013_v57, %v1017_v58 }
 0x441   :  { %7598 = vmatprep.subr.bf16.mxu1 %v15807_v6  ;;  %v1009_v1 = vld [vmem:[#allocation12 + $0xbf0] sm:$0xff] }
 0x442   :  { %7558 = vmatpush1.bf16.msra.mxu0 %v15678_v12  ;;  %v1133_v2 = vld [vmem:[#allocation12 + $0xfd0] sm:$0xff]  ;;  %v15767_v6 = vcombine.high %v1005_v47, %v1009_v1 }
 0x443   :  { %7559 = vmatprep.subr.bf16.mxu0 %v15671_v15  ;;  %v1137_v25 = vld [vmem:[#allocation12 + $0xff0] sm:$0xff] }
 0x444   :  { %7599 = vmatpush1.bf16.msra.mxu1 %v15806_v13  ;;  %v15895_v9 = vcombine.high %v1133_v2, %v1137_v25  ;;  %v997_v10 = vld [vmem:[#allocation12 + $0xb90] sm:$0xff]  ;;  %v15766_v13 = vcombine.low %v1005_v47, %v1009_v1  ;;  %v15894_v15 = vcombine.low %v1133_v2, %v1137_v25 }
 0x445   :  { %7600 = vmatprep.subr.bf16.mxu1 %v15799_v20  ;;  %v1001_v55 = vld [vmem:[#allocation12 + $0xbb0] sm:$0xff] }
 0x446   :  { %7560 = vmatpush1.bf16.msra.mxu0 %v15670_v30  ;;  %v1125_v11 = vld [vmem:[#allocation12 + $0xf90] sm:$0xff]  ;;  %v15759_v20 = vcombine.high %v997_v10, %v1001_v55 }
 0x447   :  { %7561 = vmatprep.subr.bf16.mxu0 %v15663_v33  ;;  %v1129_v12 = vld [vmem:[#allocation12 + $0xfb0] sm:$0xff] }
 0x448   :  { %7601 = vmatpush1.bf16.msra.mxu1 %v15798_v31  ;;  %v15887_v22 = vcombine.high %v1125_v11, %v1129_v12  ;;  %v989_v23 = vld [vmem:[#allocation12 + $0xb50] sm:$0xff]  ;;  %v15758_v31 = vcombine.low %v997_v10, %v1001_v55  ;;  %v15886_v33 = vcombine.low %v1125_v11, %v1129_v12 }
 0x449   :  { %7602 = vmatprep.subr.bf16.mxu1 %v15791_v35  ;;  %v993_v24 = vld [vmem:[#allocation12 + $0xb70] sm:$0xff] }
 0x44a   :  { %7562 = vmatpush1.bf16.msra.mxu0 %v15662_v44  ;;  %v1117_v28 = vld [vmem:[#allocation12 + $0xf50] sm:$0xff]  ;;  %v15751_v35 = vcombine.high %v989_v23, %v993_v24 }
 0x44b   :  { %7563 = vmatprep.subr.bf16.mxu0 %v15655_v46  ;;  %v1121_v30 = vld [vmem:[#allocation12 + $0xf70] sm:$0xff] }
 0x44c   :  { %7603 = vmatpush1.bf16.msra.mxu1 %v15790_v45  ;;  %v15879_v37 = vcombine.high %v1117_v28, %v1121_v30  ;;  %v981_v38 = vld [vmem:[#allocation12 + $0xb10] sm:$0xff]  ;;  %v15750_v45 = vcombine.low %v989_v23, %v993_v24  ;;  %v15878_v46 = vcombine.low %v1117_v28, %v1121_v30 }
 0x44d   :  { %7604 = vmatprep.subr.bf16.mxu1 %v15783_v48  ;;  %v985_v39 = vld [vmem:[#allocation12 + $0xb30] sm:$0xff] }
 0x44e   :  { %7564 = vmatpush1.bf16.msra.mxu0 %v15654_v61  ;;  %v1109_v43 = vld [vmem:[#allocation12 + $0xf10] sm:$0xff]  ;;  %v15743_v48 = vcombine.high %v981_v38, %v985_v39 }
 0x44f   :  { %7565 = vmatprep.subr.bf16.mxu0 %v15647_v62  ;;  %v1113_v44 = vld [vmem:[#allocation12 + $0xf30] sm:$0xff] }
 0x450   :  { %7605 = vmatpush1.bf16.msra.mxu1 %v15782_v14  ;;  %v15871_v49 = vcombine.high %v1109_v43, %v1113_v44  ;;  %v973_v53 = vld [vmem:[#allocation12 + $0xad0] sm:$0xff]  ;;  %v15742_v14 = vcombine.low %v981_v38, %v985_v39  ;;  %v15870_v62 = vcombine.low %v1109_v43, %v1113_v44 }
 0x451   :  { %7606 = vmatprep.subr.bf16.mxu1 %v15775_v42  ;;  %v977_v57 = vld [vmem:[#allocation12 + $0xaf0] sm:$0xff] }
 0x452   :  { %7566 = vmatpush1.bf16.msra.mxu0 %v15646_v4  ;;  %v1101_v58 = vld [vmem:[#allocation12 + $0xed0] sm:$0xff]  ;;  %v15735_v42 = vcombine.high %v973_v53, %v977_v57 }
 0x453   :  { %7567 = vmatprep.subr.bf16.mxu0 %v15767_v6  ;;  %v1105_v61 = vld [vmem:[#allocation12 + $0xef0] sm:$0xff] }
 0x454   :  { %7607 = vmatpush1.bf16.msra.mxu1 %v15774_v5  ;;  %v15863_v47 = vcombine.high %v1101_v58, %v1105_v61  ;;  %v965_v1 = vld [vmem:[#allocation12 + $0xa90] sm:$0xff]  ;;  %v15734_v5 = vcombine.low %v973_v53, %v977_v57  ;;  %v15862_v6 = vcombine.low %v1101_v58, %v1105_v61 }
 0x455   :  { %7608 = vmatprep.subr.bf16.mxu1 %v15895_v9  ;;  %v969_v2 = vld [vmem:[#allocation12 + $0xab0] sm:$0xff] }
 0x456   :  { %7568 = vmatpush2.bf16.msra.mxu0 %v15766_v13  ;;  %v1093_v25 = vld [vmem:[#allocation12 + $0xe90] sm:$0xff]  ;;  %v15727_v9 = vcombine.high %v965_v1, %v969_v2 }
 0x457   :  { %7569 = vmatprep.subr.bf16.mxu0 %v15759_v20  ;;  %v1097_v4 = vld [vmem:[#allocation12 + $0xeb0] sm:$0xff] }
 0x458   :  { %7609 = vmatpush2.bf16.msra.mxu1 %v15894_v15  ;;  %v15855_v10 = vcombine.high %v1093_v25, %v1097_v4  ;;  %v957_v55 = vld [vmem:[#allocation12 + $0xa50] sm:$0xff]  ;;  %v15726_v15 = vcombine.low %v965_v1, %v969_v2  ;;  %v15854_v20 = vcombine.low %v1093_v25, %v1097_v4 }
 0x459   :  { %7610 = vmatprep.subr.bf16.mxu1 %v15887_v22  ;;  %v961_v11 = vld [vmem:[#allocation12 + $0xa70] sm:$0xff] }
 0x45a   :  { %7570 = vmatpush2.bf16.msra.mxu0 %v15758_v31  ;;  %v1085_v12 = vld [vmem:[#allocation12 + $0xe50] sm:$0xff]  ;;  %v15719_v22 = vcombine.high %v957_v55, %v961_v11 }
 0x45b   :  { %7571 = vmatprep.subr.bf16.mxu0 %v15751_v35  ;;  %v1089_v13 = vld [vmem:[#allocation12 + $0xe70] sm:$0xff] }
 0x45c   :  { %7611 = vmatpush2.bf16.msra.mxu1 %v15886_v33  ;;  %v15847_v23 = vcombine.high %v1085_v12, %v1089_v13  ;;  %v949_v24 = vld [vmem:[#allocation12 + $0xa10] sm:$0xff]  ;;  %v15718_v33 = vcombine.low %v957_v55, %v961_v11  ;;  %v15846_v35 = vcombine.low %v1085_v12, %v1089_v13 }
 0x45d   :  { %7612 = vmatprep.subr.bf16.mxu1 %v15879_v37  ;;  %v953_v28 = vld [vmem:[#allocation12 + $0xa30] sm:$0xff] }
 0x45e   :  { %7572 = vmatpush2.bf16.msra.mxu0 %v15750_v45  ;;  %v1077_v30 = vld [vmem:[#allocation12 + $0xe10] sm:$0xff]  ;;  %v15711_v37 = vcombine.high %v949_v24, %v953_v28 }
 0x45f   :  { %7573 = vmatprep.subr.bf16.mxu0 %v15743_v48  ;;  %v1081_v31 = vld [vmem:[#allocation12 + $0xe30] sm:$0xff] }
 0x460   :  { %7613 = vmatpush2.bf16.msra.mxu1 %v15878_v46  ;;  %v15839_v38 = vcombine.high %v1077_v30, %v1081_v31  ;;  %v1197_v39 = vld [vmem:[#allocation12 + $0x11d0] sm:$0xff]  ;;  %v15710_v46 = vcombine.low %v949_v24, %v953_v28  ;;  %v15838_v48 = vcombine.low %v1077_v30, %v1081_v31 }
 0x461   :  { %7614 = vmatprep.subr.bf16.mxu1 %v15871_v49  ;;  %v1201_v43 = vld [vmem:[#allocation12 + $0x11f0] sm:$0xff] }
 0x462   :  { %7574 = vmatpush2.bf16.msra.mxu0 %v15742_v14  ;;  %v1325_v44 = vld [vmem:[#allocation12 + $0x15d0] sm:$0xff]  ;;  %v15959_v49 = vcombine.high %v1197_v39, %v1201_v43 }
 0x463   :  { %7575 = vmatprep.subr.bf16.mxu0 %v15735_v42  ;;  %v1329_v45 = vld [vmem:[#allocation12 + $0x15f0] sm:$0xff] }
 0x464   :  { %7615 = vmatpush2.bf16.msra.mxu1 %v15870_v62  ;;  %v16087_v53 = vcombine.high %v1325_v44, %v1329_v45  ;;  %v1189_v57 = vld [vmem:[#allocation12 + $0x1190] sm:$0xff]  ;;  %v15958_v62 = vcombine.low %v1197_v39, %v1201_v43  ;;  %v16086_v42 = vcombine.low %v1325_v44, %v1329_v45 }
 0x465   :  { %7616 = vmatprep.subr.bf16.mxu1 %v15863_v47  ;;  %v1193_v58 = vld [vmem:[#allocation12 + $0x11b0] sm:$0xff] }
 0x466   :  { %7576 = vmatpush2.bf16.msra.mxu0 %v15734_v5  ;;  %v1317_v61 = vld [vmem:[#allocation12 + $0x1590] sm:$0xff]  ;;  %v15951_v47 = vcombine.high %v1189_v57, %v1193_v58  ;;  %v15950_v55 = vcombine.low %v1189_v57, %v1193_v58 }
 0x467   :  { %7577 = vmatprep.subr.bf16.mxu0 %v15727_v9  ;;  %v1321_v14 = vld [vmem:[#allocation12 + $0x15b0] sm:$0xff] }
 0x468   :  { %7617 = vmatpush2.bf16.msra.mxu1 %v15862_v6  ;;  %v16079_v1 = vcombine.high %v1317_v61, %v1321_v14  ;;  %v1181_v2 = vld [vmem:[#allocation12 + $0x1150] sm:$0xff]  ;;  %v16078_v12 = vcombine.low %v1317_v61, %v1321_v14 }
 0x469   :  { %7618 = vmatprep.subr.bf16.mxu1 %v15855_v10  ;;  %v1185_v25 = vld [vmem:[#allocation12 + $0x1170] sm:$0xff] }
 0x46a   :  { %7578 = vmatpush2.bf16.msra.mxu0 %v15726_v15  ;;  %v1309_v5 = vld [vmem:[#allocation12 + $0x1550] sm:$0xff]  ;;  %v15943_v13 = vcombine.high %v1181_v2, %v1185_v25 }
 0x46b   :  { %7579 = vmatprep.subr.bf16.mxu0 %v15719_v22  ;;  %v1313_v6 = vld [vmem:[#allocation12 + $0x1570] sm:$0xff] }
 0x46c   :  { %7619 = vmatpush2.bf16.msra.mxu1 %v15854_v20  ;;  %v1173_v24 = vld [vmem:[#allocation12 + $0x1110] sm:$0xff] }
 0x46d   :  { %7620 = vmatprep.subr.bf16.mxu1 %v15847_v23  ;;  %v16071_v23 = vcombine.high %v1309_v5, %v1313_v6  ;;  %v1177_v28 = vld [vmem:[#allocation12 + $0x1130] sm:$0xff] }
 0x46e   :  { %7580 = vmatpush2.bf16.msra.mxu0 %v15718_v33  ;;  %v1301_v30 = vld [vmem:[#allocation12 + $0x1510] sm:$0xff]  ;;  %v15935_v39 = vcombine.high %v1173_v24, %v1177_v28 }
 0x46f   :  { %7581 = vmatprep.subr.bf16.mxu0 %v15711_v37  ;;  %v1305_v31 = vld [vmem:[#allocation12 + $0x1530] sm:$0xff]  ;;  %v15942_v37 = vcombine.low %v1181_v2, %v1185_v25 }
 0x470   :  { %7621 = vmatpush2.bf16.msra.mxu1 %v15846_v35  ;;  %v16063_v44 = vcombine.high %v1301_v30, %v1305_v31  ;;  %v1165_v45 = vld [vmem:[#allocation12 + $0x10d0] sm:$0xff]  ;;  %v16062_v57 = vcombine.low %v1301_v30, %v1305_v31 }
 0x471   :  { %7622 = vmatprep.subr.bf16.mxu1 %v15839_v38  ;;  %v1157_v14 = vld [vmem:[#allocation12 + $0x1090] sm:$0xff] }
 0x472   :  { %7582 = vmatpush2.bf16.msra.mxu0 %v15710_v46  ;;  %v1169_v46 = vld [vmem:[#allocation12 + $0x10f0] sm:$0xff] }
 0x473   :  { %7633 = vmatprep.subr.bf16.mxu0 %v15959_v49  ;;  %v1297_v49 = vld [vmem:[#allocation12 + $0x14f0] sm:$0xff]  ;;  %v15927_v58 = vcombine.high %v1165_v45, %v1169_v46 }
 0x474   :  { %7623 = vmatpush2.bf16.msra.mxu1 %v15838_v48  ;;  %v1293_v48 = vld [vmem:[#allocation12 + $0x14d0] sm:$0xff] }
 0x475   :  { %7674 = vmatprep.subr.bf16.mxu1 %v16087_v53  ;;  %v7339_v4 = vpop.f32.mrf.mxu0  ;;  %7584 = vmatmul.mubr.bf16.vlgmr.msra.gmra.mxu0 %v19834_v40  ;;  %v15934_v53 = vcombine.low %v1173_v24, %v1177_v28  ;;  %v16055_v61 = vcombine.high %v1293_v48, %v1297_v49  ;;  %v16054_v2 = vcombine.low %v1293_v48, %v1297_v49  ;;  %v1273_v24 = vld [vmem:[#allocation12 + $0x1430] sm:$0xff] }
 0x476   :  { %v7340_v9 = vadd.f32 %v7339_v4, %v19929_v34  ;;  %7634 = vmatpush1.bf16.msra.mxu0 %v15958_v62  ;;  %7665 = vmatprep.mubr.bf16.mxu0 %v19838_v50  ;;  %v1161_v62 = vld [vmem:[#allocation12 + $0x10b0] sm:$0xff] }
 0x477   :  { %v7380_v10 = vpop.f32.mrf.mxu1  ;;  %7625 = vmatmul.mubr.bf16.vlgmr.msra.gmra.mxu1 %v19836_v41  ;;  %v7341_v11 = vpop.f32.mrf.mxu0  ;;  %7635 = vmatprep.subr.bf16.mxu0 %v15951_v47  ;;  %v1289_v47 = vld [vmem:[#allocation12 + $0x14b0] sm:$0xff]  ;;  %v15919_v25 = vcombine.high %v1157_v14, %v1161_v62 }
 0x478   :  { %7675 = vmatpush1.bf16.msra.mxu1 %v16086_v42  ;;  %v19939_v15 = vadd.f32 %v7380_v10, %v7340_v9  ;;  %v7342_v20 = vadd.f32 %v7341_v11, %v19934_v0  ;;  %7706 = vmatprep.mubr.bf16.mxu1 %v19841_v52  ;;  %v16070_v0 = vcombine.low %v1309_v5, %v1313_v6  ;;  %v1285_v42 = vld [vmem:[#allocation12 + $0x1490] sm:$0xff] }
 0x479   :  { %v7382_v22 = vpop.f32.mrf.mxu1  ;;  %7676 = vmatprep.subr.bf16.mxu1 %v16079_v1  ;;  %v7343_v34 = vpop.f32.mrf.mxu0  ;;  %v15926_v1 = vcombine.low %v1165_v45, %v1169_v46  ;;  %v16047_v4 = vcombine.high %v1285_v42, %v1289_v47  ;;  %v1149_v5 = vld [vmem:[#allocation12 + $0x1050] sm:$0xff]  ;;  %v16046_v11 = vcombine.low %v1285_v42, %v1289_v47 }
 0x47a   :  { %v19944_v33 = vadd.f32 %v7382_v22, %v7342_v20  ;;  %7636 = vmatpush1.bf16.msra.mxu0 %v15950_v55  ;;  %v1153_v6 = vld [vmem:[#allocation12 + $0x1070] sm:$0xff]  ;;  %v15918_v55 = vcombine.low %v1157_v14, %v1161_v62 }
 0x47b   :  { %v7384_v35 = vpop.f32.mrf.mxu1  ;;  %v7344_v38 = vpop.f32.mrf.mxu0  ;;  %7637 = vmatprep.subr.bf16.mxu0 %v15943_v13  ;;  %v1277_v9 = vld [vmem:[#allocation12 + $0x1450] sm:$0xff]  ;;  %v15910_v28 = vcombine.low %v1149_v5, %v1153_v6 }
 0x47c   :  { %7677 = vmatpush1.bf16.msra.mxu1 %v16078_v12  ;;  %v1281_v10 = vld [vmem:[#allocation12 + $0x1470] sm:$0xff]  ;;  %v15911_v12 = vcombine.high %v1149_v5, %v1153_v6 }
 0x47d   :  { %v7385_v43 = vpop.f32.mrf.mxu1  ;;  %7678 = vmatprep.subr.bf16.mxu1 %v16071_v23  ;;  %v16039_v13 = vcombine.high %v1277_v9, %v1281_v10  ;;  %v1141_v20 = vld [vmem:[#allocation12 + $0x1010] sm:$0xff]  ;;  %v16038_v34 = vcombine.low %v1277_v9, %v1281_v10 }
 0x47e   :  { %7638 = vmatpush1.bf16.msra.mxu0 %v15942_v37  ;;  %v1145_v22 = vld [vmem:[#allocation12 + $0x1030] sm:$0xff] }
 0x47f   :  { %7639 = vmatprep.subr.bf16.mxu0 %v15935_v39  ;;  %v1269_v23 = vld [vmem:[#allocation12 + $0x1410] sm:$0xff]  ;;  %v15903_v30 = vcombine.high %v1141_v20, %v1145_v22  ;;  %v15902_v39 = vcombine.low %v1141_v20, %v1145_v22 }
 0x480   :  { %7679 = vmatpush1.bf16.msra.mxu1 %v16070_v0  ;;  %v16031_v31 = vcombine.high %v1269_v23, %v1273_v24  ;;  %v1261_v35 = vld [vmem:[#allocation12 + $0x13d0] sm:$0xff]  ;;  %v16030_v43 = vcombine.low %v1269_v23, %v1273_v24 }
 0x481   :  { %7680 = vmatprep.subr.bf16.mxu1 %v16063_v44  ;;  %v1265_v37 = vld [vmem:[#allocation12 + $0x13f0] sm:$0xff] }
 0x482   :  { %7640 = vmatpush1.bf16.msra.mxu0 %v15934_v53  ;;  %v1389_v38 = vld [vmem:[#allocation12 + $0x17d0] sm:$0xff]  ;;  %v16023_v44 = vcombine.high %v1261_v35, %v1265_v37 }
 0x483   :  { %7641 = vmatprep.subr.bf16.mxu0 %v15927_v58  ;;  %v1393_v0 = vld [vmem:[#allocation12 + $0x17f0] sm:$0xff] }
 0x484   :  { %7681 = vmatpush1.bf16.msra.mxu1 %v16062_v57  ;;  %v16151_v45 = vcombine.high %v1389_v38, %v1393_v0  ;;  %v1253_v46 = vld [vmem:[#allocation12 + $0x1390] sm:$0xff]  ;;  %v16022_v57 = vcombine.low %v1261_v35, %v1265_v37  ;;  %v16150_v58 = vcombine.low %v1389_v38, %v1393_v0 }
 0x485   :  { %7682 = vmatprep.subr.bf16.mxu1 %v16055_v61  ;;  %v1257_v48 = vld [vmem:[#allocation12 + $0x13b0] sm:$0xff] }
 0x486   :  { %7642 = vmatpush1.bf16.msra.mxu0 %v15926_v1  ;;  %v1381_v49 = vld [vmem:[#allocation12 + $0x1790] sm:$0xff]  ;;  %v16015_v61 = vcombine.high %v1253_v46, %v1257_v48 }
 0x487   :  { %7643 = vmatprep.subr.bf16.mxu0 %v15919_v25  ;;  %v1385_v53 = vld [vmem:[#allocation12 + $0x17b0] sm:$0xff] }
 0x488   :  { %7683 = vmatpush1.bf16.msra.mxu1 %v16054_v2  ;;  %v16143_v14 = vcombine.high %v1381_v49, %v1385_v53  ;;  %v1245_v62 = vld [vmem:[#allocation12 + $0x1350] sm:$0xff]  ;;  %v16014_v2 = vcombine.low %v1253_v46, %v1257_v48  ;;  %v16142_v25 = vcombine.low %v1381_v49, %v1385_v53 }
 0x489   :  { %7684 = vmatprep.subr.bf16.mxu1 %v16047_v4  ;;  %v1249_v42 = vld [vmem:[#allocation12 + $0x1370] sm:$0xff] }
 0x48a   :  { %7644 = vmatpush1.bf16.msra.mxu0 %v15918_v55  ;;  %v1373_v47 = vld [vmem:[#allocation12 + $0x1750] sm:$0xff]  ;;  %v16007_v4 = vcombine.high %v1245_v62, %v1249_v42 }
 0x48b   :  { %7645 = vmatprep.subr.bf16.mxu0 %v15911_v12  ;;  %v1377_v1 = vld [vmem:[#allocation12 + $0x1770] sm:$0xff] }
 0x48c   :  { %7685 = vmatpush1.bf16.msra.mxu1 %v16046_v11  ;;  %v16135_v5 = vcombine.high %v1373_v47, %v1377_v1  ;;  %v1237_v6 = vld [vmem:[#allocation12 + $0x1310] sm:$0xff]  ;;  %v16006_v11 = vcombine.low %v1245_v62, %v1249_v42  ;;  %v16134_v12 = vcombine.low %v1373_v47, %v1377_v1 }
 0x48d   :  { %7686 = vmatprep.subr.bf16.mxu1 %v16039_v13  ;;  %v1241_v9 = vld [vmem:[#allocation12 + $0x1330] sm:$0xff] }
 0x48e   :  { %7646 = vmatpush1.bf16.msra.mxu0 %v15910_v28  ;;  %v1365_v10 = vld [vmem:[#allocation12 + $0x1710] sm:$0xff]  ;;  %v15999_v13 = vcombine.high %v1237_v6, %v1241_v9 }
 0x48f   :  { %7647 = vmatprep.subr.bf16.mxu0 %v15903_v30  ;;  %v1369_v55 = vld [vmem:[#allocation12 + $0x1730] sm:$0xff] }
 0x490   :  { %7687 = vmatpush1.bf16.msra.mxu1 %v16038_v34  ;;  %v16127_v20 = vcombine.high %v1365_v10, %v1369_v55  ;;  %v1229_v22 = vld [vmem:[#allocation12 + $0x12d0] sm:$0xff]  ;;  %v15998_v34 = vcombine.low %v1237_v6, %v1241_v9  ;;  %v16126_v30 = vcombine.low %v1365_v10, %v1369_v55 }
 0x491   :  { %7688 = vmatprep.subr.bf16.mxu1 %v16031_v31  ;;  %v1233_v23 = vld [vmem:[#allocation12 + $0x12f0] sm:$0xff] }
 0x492   :  { %7648 = vmatpush1.bf16.msra.mxu0 %v15902_v39  ;;  %v1357_v24 = vld [vmem:[#allocation12 + $0x16d0] sm:$0xff]  ;;  %v15991_v31 = vcombine.high %v1229_v22, %v1233_v23 }
 0x493   :  { %7649 = vmatprep.subr.bf16.mxu0 %v16023_v44  ;;  %v1361_v28 = vld [vmem:[#allocation12 + $0x16f0] sm:$0xff] }
 0x494   :  { %7689 = vmatpush1.bf16.msra.mxu1 %v16030_v43  ;;  %v16119_v35 = vcombine.high %v1357_v24, %v1361_v28  ;;  %v1221_v37 = vld [vmem:[#allocation12 + $0x1290] sm:$0xff]  ;;  %v15990_v43 = vcombine.low %v1229_v22, %v1233_v23  ;;  %v16118_v44 = vcombine.low %v1357_v24, %v1361_v28 }
 0x495   :  { %7690 = vmatprep.subr.bf16.mxu1 %v16151_v45  ;;  %v1225_v38 = vld [vmem:[#allocation12 + $0x12b0] sm:$0xff] }
 0x496   :  { %7650 = vmatpush2.bf16.msra.mxu0 %v16022_v57  ;;  %v1349_v0 = vld [vmem:[#allocation12 + $0x1690] sm:$0xff]  ;;  %v15983_v45 = vcombine.high %v1221_v37, %v1225_v38 }
 0x497   :  { %7651 = vmatprep.subr.bf16.mxu0 %v16015_v61  ;;  %v1353_v39 = vld [vmem:[#allocation12 + $0x16b0] sm:$0xff] }
 0x498   :  { %7691 = vmatpush2.bf16.msra.mxu1 %v16150_v58  ;;  %v16111_v46 = vcombine.high %v1349_v0, %v1353_v39  ;;  %v1213_v48 = vld [vmem:[#allocation12 + $0x1250] sm:$0xff]  ;;  %v15982_v58 = vcombine.low %v1221_v37, %v1225_v38  ;;  %v16110_v61 = vcombine.low %v1349_v0, %v1353_v39 }
 0x499   :  { %7692 = vmatprep.subr.bf16.mxu1 %v16143_v14  ;;  %v1217_v49 = vld [vmem:[#allocation12 + $0x1270] sm:$0xff] }
 0x49a   :  { %7652 = vmatpush2.bf16.msra.mxu0 %v16014_v2  ;;  %v1341_v53 = vld [vmem:[#allocation12 + $0x1650] sm:$0xff]  ;;  %v15975_v14 = vcombine.high %v1213_v48, %v1217_v49 }
 0x49b   :  { %7653 = vmatprep.subr.bf16.mxu0 %v16007_v4  ;;  %v1345_v57 = vld [vmem:[#allocation12 + $0x1670] sm:$0xff] }
 0x49c   :  { %7693 = vmatpush2.bf16.msra.mxu1 %v16142_v25  ;;  %v16103_v62 = vcombine.high %v1341_v53, %v1345_v57  ;;  %v1205_v42 = vld [vmem:[#allocation12 + $0x1210] sm:$0xff]  ;;  %v15974_v25 = vcombine.low %v1213_v48, %v1217_v49  ;;  %v16102_v4 = vcombine.low %v1341_v53, %v1345_v57 }
 0x49d   :  { %7694 = vmatprep.subr.bf16.mxu1 %v16135_v5  ;;  %v1209_v47 = vld [vmem:[#allocation12 + $0x1230] sm:$0xff] }
 0x49e   :  { %7654 = vmatpush2.bf16.msra.mxu0 %v16006_v11  ;;  %v1333_v1 = vld [vmem:[#allocation12 + $0x1610] sm:$0xff]  ;;  %v15967_v5 = vcombine.high %v1205_v42, %v1209_v47 }
 0x49f   :  { %7655 = vmatprep.subr.bf16.mxu0 %v15999_v13  ;;  %v1337_v2 = vld [vmem:[#allocation12 + $0x1630] sm:$0xff] }
 0x4a0   :  { %7695 = vmatpush2.bf16.msra.mxu1 %v16134_v12  ;;  %v16095_v6 = vcombine.high %v1333_v1, %v1337_v2  ;;  %v1453_v9 = vld [vmem:[#allocation12 + $0x19d0] sm:$0xff]  ;;  %v15966_v12 = vcombine.low %v1205_v42, %v1209_v47  ;;  %v16094_v13 = vcombine.low %v1333_v1, %v1337_v2 }
 0x4a1   :  { %7696 = vmatprep.subr.bf16.mxu1 %v16127_v20  ;;  %v1457_v10 = vld [vmem:[#allocation12 + $0x19f0] sm:$0xff] }
 0x4a2   :  { %7656 = vmatpush2.bf16.msra.mxu0 %v15998_v34  ;;  %v1581_v55 = vld [vmem:[#allocation12 + $0x1dd0] sm:$0xff]  ;;  %v16215_v20 = vcombine.high %v1453_v9, %v1457_v10 }
 0x4a3   :  { %7657 = vmatprep.subr.bf16.mxu0 %v15991_v31  ;;  %v1585_v11 = vld [vmem:[#allocation12 + $0x1df0] sm:$0xff] }
 0x4a4   :  { %7697 = vmatpush2.bf16.msra.mxu1 %v16126_v30  ;;  %v16343_v22 = vcombine.high %v1581_v55, %v1585_v11  ;;  %v1445_v23 = vld [vmem:[#allocation12 + $0x1990] sm:$0xff]  ;;  %v16214_v30 = vcombine.low %v1453_v9, %v1457_v10  ;;  %v16342_v31 = vcombine.low %v1581_v55, %v1585_v11 }
 0x4a5   :  { %7698 = vmatprep.subr.bf16.mxu1 %v16119_v35  ;;  %v1449_v24 = vld [vmem:[#allocation12 + $0x19b0] sm:$0xff] }
 0x4a6   :  { %7658 = vmatpush2.bf16.msra.mxu0 %v15990_v43  ;;  %v1573_v28 = vld [vmem:[#allocation12 + $0x1d90] sm:$0xff]  ;;  %v16207_v35 = vcombine.high %v1445_v23, %v1449_v24  ;;  %v16206_v48 = vcombine.low %v1445_v23, %v1449_v24 }
 0x4a7   :  { %7659 = vmatprep.subr.bf16.mxu0 %v15983_v45  ;;  %v1577_v34 = vld [vmem:[#allocation12 + $0x1db0] sm:$0xff] }
 0x4a8   :  { %7699 = vmatpush2.bf16.msra.mxu1 %v16118_v44  ;;  %v16335_v37 = vcombine.high %v1573_v28, %v1577_v34  ;;  %v1437_v38 = vld [vmem:[#allocation12 + $0x1950] sm:$0xff]  ;;  %v16334_v53 = vcombine.low %v1573_v28, %v1577_v34 }
 0x4a9   :  { %7700 = vmatprep.subr.bf16.mxu1 %v16111_v46  ;;  %v1441_v0 = vld [vmem:[#allocation12 + $0x1970] sm:$0xff] }
 0x4aa   :  { %7660 = vmatpush2.bf16.msra.mxu0 %v15982_v58  ;;  %v1565_v43 = vld [vmem:[#allocation12 + $0x1d50] sm:$0xff]  ;;  %v16199_v57 = vcombine.high %v1437_v38, %v1441_v0 }
 0x4ab   :  { %7661 = vmatprep.subr.bf16.mxu0 %v15975_v14  ;;  %v1569_v44 = vld [vmem:[#allocation12 + $0x1d70] sm:$0xff] }
 0x4ac   :  { %7701 = vmatpush2.bf16.msra.mxu1 %v16110_v61  ;;  %v1429_v42 = vld [vmem:[#allocation12 + $0x1910] sm:$0xff] }
 0x4ad   :  { %7702 = vmatprep.subr.bf16.mxu1 %v16103_v62  ;;  %v16327_v62 = vcombine.high %v1565_v43, %v1569_v44  ;;  %v1433_v47 = vld [vmem:[#allocation12 + $0x1930] sm:$0xff] }
 0x4ae   :  { %7662 = vmatpush2.bf16.msra.mxu0 %v15974_v25  ;;  %v1557_v1 = vld [vmem:[#allocation12 + $0x1d10] sm:$0xff]  ;;  %v16191_v9 = vcombine.high %v1429_v42, %v1433_v47 }
 0x4af   :  { %7663 = vmatprep.subr.bf16.mxu0 %v15967_v5  ;;  %v1561_v2 = vld [vmem:[#allocation12 + $0x1d30] sm:$0xff]  ;;  %v16198_v5 = vcombine.low %v1437_v38, %v1441_v0 }
 0x4b0   :  { %7703 = vmatpush2.bf16.msra.mxu1 %v16102_v4  ;;  %v16319_v55 = vcombine.high %v1557_v1, %v1561_v2  ;;  %v1421_v11 = vld [vmem:[#allocation12 + $0x18d0] sm:$0xff]  ;;  %v16318_v23 = vcombine.low %v1557_v1, %v1561_v2 }
 0x4b1   :  { %7704 = vmatprep.subr.bf16.mxu1 %v16095_v6  ;;  %v1413_v34 = vld [vmem:[#allocation12 + $0x1890] sm:$0xff] }
 0x4b2   :  { %7664 = vmatpush2.bf16.msra.mxu0 %v15966_v12  ;;  %v1425_v12 = vld [vmem:[#allocation12 + $0x18f0] sm:$0xff] }
 0x4b3   :  { %7715 = vmatprep.subr.bf16.mxu0 %v16215_v20  ;;  %v1553_v20 = vld [vmem:[#allocation12 + $0x1cf0] sm:$0xff]  ;;  %v16183_v24 = vcombine.high %v1421_v11, %v1425_v12 }
 0x4b4   :  { %7705 = vmatpush2.bf16.msra.mxu1 %v16094_v13  ;;  %v1549_v13 = vld [vmem:[#allocation12 + $0x1cd0] sm:$0xff] }
 0x4b5   :  { %7756 = vmatprep.subr.bf16.mxu1 %v16343_v22  ;;  %v7421_v39 = vpop.f32.mrf.mxu0  ;;  %7666 = vmatmul.mubr.bf16.vlgmr.msra.gmra.mxu0 %v19846_v7  ;;  %v16190_v22 = vcombine.low %v1429_v42, %v1433_v47  ;;  %v16311_v28 = vcombine.high %v1549_v13, %v1553_v20  ;;  %v16310_v38 = vcombine.low %v1549_v13, %v1553_v20  ;;  %v1529_v42 = vld [vmem:[#allocation12 + $0x1c30] sm:$0xff] }
 0x4b6   :  { %v7422_v45 = vadd.f32 %v7421_v39, %v19939_v15  ;;  %7716 = vmatpush1.bf16.msra.mxu0 %v16214_v30  ;;  %7747 = vmatprep.mubr.bf16.mxu0 %v19850_v18  ;;  %v1417_v30 = vld [vmem:[#allocation12 + $0x18b0] sm:$0xff] }
 0x4b7   :  { %v7462_v46 = vpop.f32.mrf.mxu1  ;;  %7707 = vmatmul.mubr.bf16.vlgmr.msra.gmra.mxu1 %v19848_v8  ;;  %v7423_v49 = vpop.f32.mrf.mxu0  ;;  %7717 = vmatprep.subr.bf16.mxu0 %v16207_v35  ;;  %v1545_v35 = vld [vmem:[#allocation12 + $0x1cb0] sm:$0xff]  ;;  %v16175_v0 = vcombine.high %v1413_v34, %v1417_v30 }
 0x4b8   :  { %7757 = vmatpush1.bf16.msra.mxu1 %v16342_v31  ;;  %v19949_v58 = vadd.f32 %v7462_v46, %v7422_v45  ;;  %v7424_v61 = vadd.f32 %v7423_v49, %v19944_v33  ;;  %7788 = vmatprep.mubr.bf16.mxu1 %v19853_v19  ;;  %v16326_v33 = vcombine.low %v1565_v43, %v1569_v44  ;;  %v1541_v31 = vld [vmem:[#allocation12 + $0x1c90] sm:$0xff] }
 0x4b9   :  { %v7464_v14 = vpop.f32.mrf.mxu1  ;;  %7758 = vmatprep.subr.bf16.mxu1 %v16335_v37  ;;  %v7425_v15 = vpop.f32.mrf.mxu0  ;;  %v16182_v37 = vcombine.low %v1421_v11, %v1425_v12  ;;  %v16303_v39 = vcombine.high %v1541_v31, %v1545_v35  ;;  %v1405_v43 = vld [vmem:[#allocation12 + $0x1850] sm:$0xff]  ;;  %v16302_v49 = vcombine.low %v1541_v31, %v1545_v35 }
 0x4ba   :  { %v19954_v25 = vadd.f32 %v7464_v14, %v7424_v61  ;;  %7718 = vmatpush1.bf16.msra.mxu0 %v16206_v48  ;;  %v1409_v44 = vld [vmem:[#allocation12 + $0x1870] sm:$0xff]  ;;  %v16174_v48 = vcombine.low %v1413_v34, %v1417_v30 }
 0x4bb   :  { %v7466_v4 = vpop.f32.mrf.mxu1  ;;  %v7426_v6 = vpop.f32.mrf.mxu0  ;;  %7719 = vmatprep.subr.bf16.mxu0 %v16199_v57  ;;  %v1533_v45 = vld [vmem:[#allocation12 + $0x1c50] sm:$0xff]  ;;  %v16166_v47 = vcombine.low %v1405_v43, %v1409_v44 }
 0x4bc   :  { %7759 = vmatpush1.bf16.msra.mxu1 %v16334_v53  ;;  %v1537_v46 = vld [vmem:[#allocation12 + $0x1c70] sm:$0xff]  ;;  %v16167_v53 = vcombine.high %v1405_v43, %v1409_v44 }
 0x4bd   :  { %v7467_v10 = vpop.f32.mrf.mxu1  ;;  %7760 = vmatprep.subr.bf16.mxu1 %v16327_v62  ;;  %v16295_v57 = vcombine.high %v1533_v45, %v1537_v46  ;;  %v1397_v61 = vld [vmem:[#allocation12 + $0x1810] sm:$0xff]  ;;  %v16294_v15 = vcombine.low %v1533_v45, %v1537_v46 }
 0x4be   :  { %7720 = vmatpush1.bf16.msra.mxu0 %v16198_v5  ;;  %v1401_v14 = vld [vmem:[#allocation12 + $0x1830] sm:$0xff] }
 0x4bf   :  { %7721 = vmatprep.subr.bf16.mxu0 %v16191_v9  ;;  %v1525_v62 = vld [vmem:[#allocation12 + $0x1c10] sm:$0xff]  ;;  %v16159_v1 = vcombine.high %v1397_v61, %v1401_v14  ;;  %v16158_v9 = vcombine.low %v1397_v61, %v1401_v14 }
 0x4c0   :  { %7761 = vmatpush1.bf16.msra.mxu1 %v16326_v33  ;;  %v16287_v2 = vcombine.high %v1525_v62, %v1529_v42  ;;  %v1517_v4 = vld [vmem:[#allocation12 + $0x1bd0] sm:$0xff]  ;;  %v16286_v10 = vcombine.low %v1525_v62, %v1529_v42 }
 0x4c1   :  { %7762 = vmatprep.subr.bf16.mxu1 %v16319_v55  ;;  %v1521_v5 = vld [vmem:[#allocation12 + $0x1bf0] sm:$0xff] }
 0x4c2   :  { %7722 = vmatpush1.bf16.msra.mxu0 %v16190_v22  ;;  %v1645_v6 = vld [vmem:[#allocation12 + $0x1fd0] sm:$0xff]  ;;  %v16279_v55 = vcombine.high %v1517_v4, %v1521_v5 }
 0x4c3   :  { %7723 = vmatprep.subr.bf16.mxu0 %v16183_v24  ;;  %v1649_v33 = vld [vmem:[#allocation12 + $0x1ff0] sm:$0xff] }
 0x4c4   :  { %7763 = vmatpush1.bf16.msra.mxu1 %v16318_v23  ;;  %v16407_v11 = vcombine.high %v1645_v6, %v1649_v33  ;;  %v1509_v12 = vld [vmem:[#allocation12 + $0x1b90] sm:$0xff]  ;;  %v16278_v23 = vcombine.low %v1517_v4, %v1521_v5  ;;  %v16406_v24 = vcombine.low %v1645_v6, %v1649_v33 }
 0x4c5   :  { %7764 = vmatprep.subr.bf16.mxu1 %v16311_v28  ;;  %v1513_v13 = vld [vmem:[#allocation12 + $0x1bb0] sm:$0xff] }
 0x4c6   :  { %7724 = vmatpush1.bf16.msra.mxu0 %v16182_v37  ;;  %v1637_v20 = vld [vmem:[#allocation12 + $0x1f90] sm:$0xff]  ;;  %v16271_v28 = vcombine.high %v1509_v12, %v1513_v13 }
 0x4c7   :  { %7725 = vmatprep.subr.bf16.mxu0 %v16175_v0  ;;  %v1641_v22 = vld [vmem:[#allocation12 + $0x1fb0] sm:$0xff] }
 0x4c8   :  { %7765 = vmatpush1.bf16.msra.mxu1 %v16310_v38  ;;  %v16399_v34 = vcombine.high %v1637_v20, %v1641_v22  ;;  %v1501_v30 = vld [vmem:[#allocation12 + $0x1b50] sm:$0xff]  ;;  %v16270_v38 = vcombine.low %v1509_v12, %v1513_v13  ;;  %v16398_v0 = vcombine.low %v1637_v20, %v1641_v22 }
 0x4c9   :  { %7766 = vmatprep.subr.bf16.mxu1 %v16303_v39  ;;  %v1505_v31 = vld [vmem:[#allocation12 + $0x1b70] sm:$0xff] }
 0x4ca   :  { %7726 = vmatpush1.bf16.msra.mxu0 %v16174_v48  ;;  %v1629_v35 = vld [vmem:[#allocation12 + $0x1f50] sm:$0xff]  ;;  %v16263_v39 = vcombine.high %v1501_v30, %v1505_v31 }
 0x4cb   :  { %7727 = vmatprep.subr.bf16.mxu0 %v16167_v53  ;;  %v1633_v37 = vld [vmem:[#allocation12 + $0x1f70] sm:$0xff] }
 0x4cc   :  { %7767 = vmatpush1.bf16.msra.mxu1 %v16302_v49  ;;  %v16391_v43 = vcombine.high %v1629_v35, %v1633_v37  ;;  %v1493_v44 = vld [vmem:[#allocation12 + $0x1b10] sm:$0xff]  ;;  %v16262_v49 = vcombine.low %v1501_v30, %v1505_v31  ;;  %v16390_v53 = vcombine.low %v1629_v35, %v1633_v37 }
 0x4cd   :  { %7768 = vmatprep.subr.bf16.mxu1 %v16295_v57  ;;  %v1497_v45 = vld [vmem:[#allocation12 + $0x1b30] sm:$0xff] }
 0x4ce   :  { %7728 = vmatpush1.bf16.msra.mxu0 %v16166_v47  ;;  %v1621_v46 = vld [vmem:[#allocation12 + $0x1f10] sm:$0xff]  ;;  %v16255_v57 = vcombine.high %v1493_v44, %v1497_v45 }
 0x4cf   :  { %7729 = vmatprep.subr.bf16.mxu0 %v16159_v1  ;;  %v1625_v48 = vld [vmem:[#allocation12 + $0x1f30] sm:$0xff] }
 0x4d0   :  { %7769 = vmatpush1.bf16.msra.mxu1 %v16294_v15  ;;  %v16383_v61 = vcombine.high %v1621_v46, %v1625_v48  ;;  %v1485_v14 = vld [vmem:[#allocation12 + $0x1ad0] sm:$0xff]  ;;  %v16254_v15 = vcombine.low %v1493_v44, %v1497_v45  ;;  %v16382_v1 = vcombine.low %v1621_v46, %v1625_v48  ;;  %v686_v45 = vld [vmem:[#allocation12 + $0x1d8] sm:$0xff] }
 0x4d1   :  { %7770 = vmatprep.subr.bf16.mxu1 %v16287_v2  ;;  %v1489_v62 = vld [vmem:[#allocation12 + $0x1af0] sm:$0xff]  ;;  %v690_v46 = vld [vmem:[#allocation12 + $0x1f8] sm:$0xff] }
 0x4d2   :  { %7730 = vmatpush1.bf16.msra.mxu0 %v16158_v9  ;;  %v1613_v42 = vld [vmem:[#allocation12 + $0x1ed0] sm:$0xff]  ;;  %v16247_v2 = vcombine.high %v1485_v14, %v1489_v62  ;;  %v814_v48 = vld [vmem:[#allocation12 + $0x5d8] sm:$0xff] }
 0x4d3   :  { %7731 = vmatprep.subr.bf16.mxu0 %v16279_v55  ;;  %v1617_v47 = vld [vmem:[#allocation12 + $0x1ef0] sm:$0xff] }
 0x4d4   :  { %7771 = vmatpush1.bf16.msra.mxu1 %v16286_v10  ;;  %v16375_v4 = vcombine.high %v1613_v42, %v1617_v47  ;;  %v1477_v5 = vld [vmem:[#allocation12 + $0x1a90] sm:$0xff]  ;;  %v16246_v10 = vcombine.low %v1485_v14, %v1489_v62  ;;  %v16374_v55 = vcombine.low %v1613_v42, %v1617_v47  ;;  %v15449_v14 = vcombine.high %v686_v45, %v690_v46  ;;  %v678_v47 = vld [vmem:[#allocation12 + $0x198] sm:$0xff] }
 0x4d5   :  { %7772 = vmatprep.subr.bf16.mxu1 %v16407_v11  ;;  %v1481_v6 = vld [vmem:[#allocation12 + $0x1ab0] sm:$0xff]  ;;  %v1675_v42 = vsub.s32 5, %v19858_v26 }
 0x4d6   :  { %7732 = vmatpush2.bf16.msra.mxu0 %v16278_v23  ;;  %v1605_v33 = vld [vmem:[#allocation12 + $0x1e90] sm:$0xff]  ;;  %v16239_v11 = vcombine.high %v1477_v5, %v1481_v6 }
 0x4d7   :  { %7733 = vmatprep.subr.bf16.mxu0 %v16271_v28  ;;  %v1609_v9 = vld [vmem:[#allocation12 + $0x1eb0] sm:$0xff] }
 0x4d8   :  { %7773 = vmatpush2.bf16.msra.mxu1 %v16406_v24  ;;  %v16367_v12 = vcombine.high %v1605_v33, %v1609_v9  ;;  %v1469_v13 = vld [vmem:[#allocation12 + $0x1a50] sm:$0xff]  ;;  %v16238_v24 = vcombine.low %v1477_v5, %v1481_v6  ;;  %v16366_v28 = vcombine.low %v1605_v33, %v1609_v9  ;;  %v15448_v6 = vcombine.low %v686_v45, %v690_v46  ;;  %v790_v45 = vld [vmem:[#allocation12 + $0x518] sm:$0xff] }
 0x4d9   :  { %7774 = vmatprep.subr.bf16.mxu1 %v16399_v34  ;;  %v1473_v20 = vld [vmem:[#allocation12 + $0x1a70] sm:$0xff]  ;;  %v794_v46 = vld [vmem:[#allocation12 + $0x538] sm:$0xff] }
 0x4da   :  { %7734 = vmatpush2.bf16.msra.mxu0 %v16270_v38  ;;  %v1597_v22 = vld [vmem:[#allocation12 + $0x1e50] sm:$0xff]  ;;  %v16231_v34 = vcombine.high %v1469_v13, %v1473_v20 }
 0x4db   :  { %7735 = vmatprep.subr.bf16.mxu0 %v16263_v39  ;;  %v1601_v23 = vld [vmem:[#allocation12 + $0x1e70] sm:$0xff] }
 0x4dc   :  { %7775 = vmatpush2.bf16.msra.mxu1 %v16398_v0  ;;  %v16359_v30 = vcombine.high %v1597_v22, %v1601_v23  ;;  %v1461_v31 = vld [vmem:[#allocation12 + $0x1a10] sm:$0xff]  ;;  %v16230_v0 = vcombine.low %v1469_v13, %v1473_v20  ;;  %v16358_v39 = vcombine.low %v1597_v22, %v1601_v23  ;;  %v798_v20 = vld [vmem:[#allocation12 + $0x558] sm:$0xff] }
 0x4dd   :  { %7776 = vmatprep.subr.bf16.mxu1 %v16391_v43  ;;  %v1465_v35 = vld [vmem:[#allocation12 + $0x1a30] sm:$0xff]  ;;  %v802_v22 = vld [vmem:[#allocation12 + $0x578] sm:$0xff] }
 0x4de   :  { %7736 = vmatpush2.bf16.msra.mxu0 %v16262_v49  ;;  %v1589_v37 = vld [vmem:[#allocation12 + $0x1e10] sm:$0xff]  ;;  %v16223_v43 = vcombine.high %v1461_v31, %v1465_v35  ;;  %v818_v49 = vld [vmem:[#allocation12 + $0x5f8] sm:$0xff] }
 0x4df   :  { %7737 = vmatprep.subr.bf16.mxu0 %v16255_v57  ;;  %v1593_v38 = vld [vmem:[#allocation12 + $0x1e30] sm:$0xff]  ;;  %v1671_v57 = vsub.s32 4, %v19858_v26  ;;  %v15577_v62 = vcombine.high %v814_v48, %v818_v49  ;;  %v15576_v33 = vcombine.low %v814_v48, %v818_v49 }
 0x4e0   :  { %7777 = vmatpush2.bf16.msra.mxu1 %v16390_v53  ;;  %v16351_v44 = vcombine.high %v1589_v37, %v1593_v38  ;;  %v16222_v53 = vcombine.low %v1461_v31, %v1465_v35 }
 0x4e1   :  { %7778 = vmatprep.subr.bf16.mxu1 %v16383_v61  ;;  %v16350_v61 = vcombine.low %v1589_v37, %v1593_v38 }
 0x4e2   :  { %7738 = vmatpush2.bf16.msra.mxu0 %v16254_v15  ;;  %v682_v15 = vld [vmem:[#allocation12 + $0x1b8] sm:$0xff] }
 0x4e3   :  { %7739 = vmatprep.subr.bf16.mxu0 %v16247_v2  ;;  %v810_v2 = vld [vmem:[#allocation12 + $0x5b8] sm:$0xff]  ;;  %v15441_v9 = vcombine.high %v678_v47, %v682_v15 }
 0x4e4   :  { %7779 = vmatpush2.bf16.msra.mxu1 %v16382_v1  ;;  %v806_v1 = vld [vmem:[#allocation12 + $0x598] sm:$0xff] }
 0x4e5   :  { %7780 = vmatprep.subr.bf16.mxu1 %v16375_v4  ;;  %v18673_v4 = vld [vmem:[#allocation14] sm:$0xff] }
 0x4e6   :  { %7740 = vmatpush2.bf16.msra.mxu0 %v16246_v10  ;;  %v1672_v5 = vrot.slane %v18673_v4, %v1671_v57  ;;  %v1676_v10 = vrot.slane %v18673_v4, %v1675_v42  ;;  %v15553_v42 = vcombine.high %v790_v45, %v794_v46 }
 0x4e7   :  { %7741 = vmatprep.subr.bf16.mxu0 %v16239_v11  ;;  %v670_v11 = vld [vmem:[#allocation12 + $0x158] sm:$0xff] }
 0x4e8   :  { %7781 = vmatpush2.bf16.msra.mxu1 %v16374_v55  ;;  %v15569_v55 = vcombine.high %v806_v1, %v810_v2 }
 0x4e9   :  { %7782 = vmatprep.subr.bf16.mxu1 %v16367_v12  ;;  %v674_v12 = vld [vmem:[#allocation12 + $0x178] sm:$0xff] }
 0x4ea   :  { %7742 = vmatpush2.bf16.msra.mxu0 %v16238_v24  ;;  %v15433_v31 = vcombine.high %v670_v11, %v674_v12 }
 0x4eb   :  { %7743 = vmatprep.subr.bf16.mxu0 %v16231_v34 }
 0x4ec   :  { %7783 = vmatpush2.bf16.msra.mxu1 %v16366_v28  ;;  %v15440_v28 = vcombine.low %v678_v47, %v682_v15  ;;  %v654_v47 = vld [vmem:[#allocation12 + $0xd8] sm:$0xff] }
 0x4ed   :  { %7784 = vmatprep.subr.bf16.mxu1 %v16359_v30  ;;  %v15568_v30 = vcombine.low %v806_v1, %v810_v2  ;;  %v782_v15 = vld [vmem:[#allocation12 + $0x4d8] sm:$0xff] }
 0x4ee   :  { %7744 = vmatpush2.bf16.msra.mxu0 %v16230_v0  ;;  %v15561_v0 = vcombine.high %v798_v20, %v802_v22  ;;  %v786_v1 = vld [vmem:[#allocation12 + $0x4f8] sm:$0xff] }
 0x4ef   :  { %7745 = vmatprep.subr.bf16.mxu0 %v16223_v43  ;;  %v666_v43 = vld [vmem:[#allocation12 + $0x138] sm:$0xff] }
 0x4f0   :  { %7785 = vmatpush2.bf16.msra.mxu1 %v16358_v39  ;;  %v662_v39 = vld [vmem:[#allocation12 + $0x118] sm:$0xff] }
 0x4f1   :  { %7786 = vmatprep.subr.bf16.mxu1 %v16351_v44  ;;  %v15424_v2 = vcombine.low %v662_v39, %v666_v43 }
 0x4f2   :  { %7746 = vmatpush2.bf16.msra.mxu0 %v16222_v53  ;;  %v15432_v53 = vcombine.low %v670_v11, %v674_v12  ;;  %v15544_v11 = vcombine.low %v782_v15, %v786_v1 }
 0x4f3   :  { %7797 = vmatprep.subr.bf16.mxu0 %v15449_v14  ;;  %v15425_v14 = vcombine.high %v662_v39, %v666_v43  ;;  %v762_v39 = vld [vmem:[#allocation12 + $0x438] sm:$0xff] }
 0x4f4   :  { %7787 = vmatpush2.bf16.msra.mxu1 %v16350_v61  ;;  %v15560_v61 = vcombine.low %v798_v20, %v802_v22  ;;  %v638_v20 = vld [vmem:[#allocation12 + $0x58] sm:$0xff] }
 0x4f5   :  { %7838 = vmatprep.subr.bf16.mxu1 %v15577_v62  ;;  %v7503_v13 = vpop.f32.mrf.mxu0  ;;  %7748 = vmatmul.mubr.bf16.vlgmr.msra.gmra.mxu0 %v19866_v54  ;;  %v642_v22 = vld [vmem:[#allocation12 + $0x78] sm:$0xff] }
 0x4f6   :  { %v7504_v23 = vadd.f32 %v7503_v13, %v1672_v5  ;;  %7798 = vmatpush1.bf16.msra.mxu0 %v15448_v6  ;;  %7829 = vmatprep.mubr.bf16.mxu0 %v19816_v59  ;;  %v658_v59 = vld [vmem:[#allocation12 + $0xf8] sm:$0xff]  ;;  %v15545_v5 = vcombine.high %v782_v15, %v786_v1  ;;  %v15400_v43 = vcombine.low %v638_v20, %v642_v22 }
 0x4f7   :  { %v7544_v24 = vpop.f32.mrf.mxu1  ;;  %7789 = vmatmul.mubr.bf16.vlgmr.msra.gmra.mxu1 %v19869_v56  ;;  %v7505_v34 = vpop.f32.mrf.mxu0  ;;  %7799 = vmatprep.subr.bf16.mxu0 %v15441_v9  ;;  %v15417_v4 = vcombine.high %v654_v47, %v658_v59  ;;  %v646_v6 = vld [vmem:[#allocation12 + $0x98] sm:$0xff] }
 0x4f8   :  { %7839 = vmatpush1.bf16.msra.mxu1 %v15576_v33  ;;  %v19960_v35 = vadd.f32 %v7544_v24, %v7504_v23  ;;  %v7506_v37 = vadd.f32 %v7505_v34, %v1676_v10  ;;  %7870 = vmatprep.mubr.bf16.mxu1 %v19818_v60  ;;  %v15552_v60 = vcombine.low %v790_v45, %v794_v46  ;;  %v650_v33 = vld [vmem:[#allocation12 + $0xb8] sm:$0xff] }
 0x4f9   :  { %v7546_v38 = vpop.f32.mrf.mxu1  ;;  %7840 = vmatprep.subr.bf16.mxu1 %v15569_v55  ;;  %v7507_v44 = vpop.f32.mrf.mxu0  ;;  %v774_v9 = vld [vmem:[#allocation12 + $0x498] sm:$0xff]  ;;  %v15416_v55 = vcombine.low %v654_v47, %v658_v59  ;;  %v15409_v12 = vcombine.high %v646_v6, %v650_v33 }
 0x4fa   :  { %v19964_v48 = vadd.f32 %v7546_v38, %v7506_v37  ;;  %7800 = vmatpush1.bf16.msra.mxu0 %v15440_v28  ;;  %v778_v10 = vld [vmem:[#allocation12 + $0x4b8] sm:$0xff]  ;;  %v15408_v28 = vcombine.low %v646_v6, %v650_v33 }
 0x4fb   :  { %v7548_v49 = vpop.f32.mrf.mxu1  ;;  %v7508_v57 = vpop.f32.mrf.mxu0  ;;  %7801 = vmatprep.subr.bf16.mxu0 %v15433_v31  ;;  %v15537_v13 = vcombine.high %v774_v9, %v778_v10  ;;  %v766_v23 = vld [vmem:[#allocation12 + $0x458] sm:$0xff]  ;;  %v15536_v34 = vcombine.low %v774_v9, %v778_v10 }
 0x4fc   :  { %7841 = vmatpush1.bf16.msra.mxu1 %v15568_v30  ;;  %v770_v24 = vld [vmem:[#allocation12 + $0x478] sm:$0xff]  ;;  %v15401_v30 = vcombine.high %v638_v20, %v642_v22 }
 0x4fd   :  { %v7549_v62 = vpop.f32.mrf.mxu1  ;;  %7842 = vmatprep.subr.bf16.mxu1 %v15561_v0  ;;  %v15529_v31 = vcombine.high %v766_v23, %v770_v24  ;;  %v630_v37 = vld [vmem:[#allocation12 + $0x18] sm:$0xff]  ;;  %v15528_v44 = vcombine.low %v766_v23, %v770_v24 }
 0x4fe   :  { %7802 = vmatpush1.bf16.msra.mxu0 %v15432_v53  ;;  %v634_v38 = vld [vmem:[#allocation12 + $0x38] sm:$0xff] }
 0x4ff   :  { %7803 = vmatprep.subr.bf16.mxu0 %v15425_v14  ;;  %v758_v0 = vld [vmem:[#allocation12 + $0x418] sm:$0xff]  ;;  %v15393_v45 = vcombine.high %v630_v37, %v634_v38  ;;  %v15392_v14 = vcombine.low %v630_v37, %v634_v38 }
 0x500   :  { %7843 = vmatpush1.bf16.msra.mxu1 %v15560_v61  ;;  %v15521_v46 = vcombine.high %v758_v0, %v762_v39  ;;  %v750_v49 = vld [vmem:[#allocation12 + $0x3d8] sm:$0xff]  ;;  %v15520_v62 = vcombine.low %v758_v0, %v762_v39 }
 0x501   :  { %7844 = vmatprep.subr.bf16.mxu1 %v15553_v42  ;;  %v754_v53 = vld [vmem:[#allocation12 + $0x3f8] sm:$0xff] }
 0x502   :  { %7804 = vmatpush1.bf16.msra.mxu0 %v15424_v2  ;;  %v878_v57 = vld [vmem:[#allocation12 + $0x7d8] sm:$0xff]  ;;  %v15513_v42 = vcombine.high %v750_v49, %v754_v53 }
 0x503   :  { %7805 = vmatprep.subr.bf16.mxu0 %v15417_v4  ;;  %v882_v61 = vld [vmem:[#allocation12 + $0x7f8] sm:$0xff] }
 0x504   :  { %7845 = vmatpush1.bf16.msra.mxu1 %v15552_v60  ;;  %v15641_v47 = vcombine.high %v878_v57, %v882_v61  ;;  %v742_v59 = vld [vmem:[#allocation12 + $0x398] sm:$0xff]  ;;  %v15512_v60 = vcombine.low %v750_v49, %v754_v53  ;;  %v15640_v4 = vcombine.low %v878_v57, %v882_v61 }
 0x505   :  { %7846 = vmatprep.subr.bf16.mxu1 %v15545_v5  ;;  %v746_v15 = vld [vmem:[#allocation12 + $0x3b8] sm:$0xff] }
 0x506   :  { %7806 = vmatpush1.bf16.msra.mxu0 %v15416_v55  ;;  %v870_v1 = vld [vmem:[#allocation12 + $0x798] sm:$0xff]  ;;  %v15505_v5 = vcombine.high %v742_v59, %v746_v15 }
 0x507   :  { %7807 = vmatprep.subr.bf16.mxu0 %v15409_v12  ;;  %v874_v2 = vld [vmem:[#allocation12 + $0x7b8] sm:$0xff] }
 0x508   :  { %7847 = vmatpush1.bf16.msra.mxu1 %v15544_v11  ;;  %v15633_v6 = vcombine.high %v870_v1, %v874_v2  ;;  %v734_v33 = vld [vmem:[#allocation12 + $0x358] sm:$0xff]  ;;  %v15504_v11 = vcombine.low %v742_v59, %v746_v15  ;;  %v15632_v12 = vcombine.low %v870_v1, %v874_v2 }
 0x509   :  { %7848 = vmatprep.subr.bf16.mxu1 %v15537_v13  ;;  %v738_v9 = vld [vmem:[#allocation12 + $0x378] sm:$0xff] }
 0x50a   :  { %7808 = vmatpush1.bf16.msra.mxu0 %v15408_v28  ;;  %v862_v10 = vld [vmem:[#allocation12 + $0x758] sm:$0xff]  ;;  %v15497_v13 = vcombine.high %v734_v33, %v738_v9 }
 0x50b   :  { %7809 = vmatprep.subr.bf16.mxu0 %v15401_v30  ;;  %v866_v55 = vld [vmem:[#allocation12 + $0x778] sm:$0xff] }
 0x50c   :  { %7849 = vmatpush1.bf16.msra.mxu1 %v15536_v34  ;;  %v15625_v20 = vcombine.high %v862_v10, %v866_v55  ;;  %v726_v22 = vld [vmem:[#allocation12 + $0x318] sm:$0xff]  ;;  %v15496_v34 = vcombine.low %v734_v33, %v738_v9  ;;  %v15624_v30 = vcombine.low %v862_v10, %v866_v55 }
 0x50d   :  { %7850 = vmatprep.subr.bf16.mxu1 %v15529_v31  ;;  %v730_v23 = vld [vmem:[#allocation12 + $0x338] sm:$0xff] }
 0x50e   :  { %7810 = vmatpush1.bf16.msra.mxu0 %v15400_v43  ;;  %v854_v24 = vld [vmem:[#allocation12 + $0x718] sm:$0xff]  ;;  %v15489_v31 = vcombine.high %v726_v22, %v730_v23 }
 0x50f   :  { %7811 = vmatprep.subr.bf16.mxu0 %v15393_v45  ;;  %v858_v28 = vld [vmem:[#allocation12 + $0x738] sm:$0xff] }
 0x510   :  { %7851 = vmatpush1.bf16.msra.mxu1 %v15528_v44  ;;  %v15617_v37 = vcombine.high %v854_v24, %v858_v28  ;;  %v718_v38 = vld [vmem:[#allocation12 + $0x2d8] sm:$0xff]  ;;  %v15488_v44 = vcombine.low %v726_v22, %v730_v23  ;;  %v15616_v45 = vcombine.low %v854_v24, %v858_v28 }
 0x511   :  { %7852 = vmatprep.subr.bf16.mxu1 %v15521_v46  ;;  %v722_v0 = vld [vmem:[#allocation12 + $0x2f8] sm:$0xff] }
 0x512   :  { %7812 = vmatpush1.bf16.msra.mxu0 %v15392_v14  ;;  %v846_v39 = vld [vmem:[#allocation12 + $0x6d8] sm:$0xff]  ;;  %v15481_v46 = vcombine.high %v718_v38, %v722_v0 }
 0x513   :  { %7813 = vmatprep.subr.bf16.mxu0 %v15513_v42  ;;  %v850_v43 = vld [vmem:[#allocation12 + $0x6f8] sm:$0xff] }
 0x514   :  { %7853 = vmatpush1.bf16.msra.mxu1 %v15520_v62  ;;  %v15609_v49 = vcombine.high %v846_v39, %v850_v43  ;;  %v710_v53 = vld [vmem:[#allocation12 + $0x298] sm:$0xff]  ;;  %v15480_v62 = vcombine.low %v718_v38, %v722_v0  ;;  %v15608_v42 = vcombine.low %v846_v39, %v850_v43 }
 0x515   :  { %7854 = vmatprep.subr.bf16.mxu1 %v15641_v47  ;;  %v714_v57 = vld [vmem:[#allocation12 + $0x2b8] sm:$0xff] }
 0x516   :  { %7814 = vmatpush2.bf16.msra.mxu0 %v15512_v60  ;;  %v838_v61 = vld [vmem:[#allocation12 + $0x698] sm:$0xff]  ;;  %v15473_v47 = vcombine.high %v710_v53, %v714_v57 }
 0x517   :  { %7815 = vmatprep.subr.bf16.mxu0 %v15505_v5  ;;  %v842_v14 = vld [vmem:[#allocation12 + $0x6b8] sm:$0xff] }
 0x518   :  { %7855 = vmatpush2.bf16.msra.mxu1 %v15640_v4  ;;  %v15601_v59 = vcombine.high %v838_v61, %v842_v14  ;;  %v702_v15 = vld [vmem:[#allocation12 + $0x258] sm:$0xff]  ;;  %v15472_v4 = vcombine.low %v710_v53, %v714_v57  ;;  %v15600_v5 = vcombine.low %v838_v61, %v842_v14 }
 0x519   :  { %7856 = vmatprep.subr.bf16.mxu1 %v15633_v6  ;;  %v706_v1 = vld [vmem:[#allocation12 + $0x278] sm:$0xff] }
 0x51a   :  { %7816 = vmatpush2.bf16.msra.mxu0 %v15504_v11  ;;  %v830_v2 = vld [vmem:[#allocation12 + $0x658] sm:$0xff]  ;;  %v15465_v6 = vcombine.high %v702_v15, %v706_v1 }
 0x51b   :  { %7817 = vmatprep.subr.bf16.mxu0 %v15497_v13  ;;  %v834_v60 = vld [vmem:[#allocation12 + $0x678] sm:$0xff] }
 0x51c   :  { %7857 = vmatpush2.bf16.msra.mxu1 %v15632_v12  ;;  %v15593_v33 = vcombine.high %v830_v2, %v834_v60  ;;  %v694_v9 = vld [vmem:[#allocation12 + $0x218] sm:$0xff]  ;;  %v15464_v12 = vcombine.low %v702_v15, %v706_v1  ;;  %v15592_v13 = vcombine.low %v830_v2, %v834_v60 }
 0x51d   :  { %7858 = vmatprep.subr.bf16.mxu1 %v15625_v20  ;;  %v698_v10 = vld [vmem:[#allocation12 + $0x238] sm:$0xff] }
 0x51e   :  { %7818 = vmatpush2.bf16.msra.mxu0 %v15496_v34  ;;  %v822_v55 = vld [vmem:[#allocation12 + $0x618] sm:$0xff]  ;;  %v15457_v20 = vcombine.high %v694_v9, %v698_v10 }
 0x51f   :  { %7819 = vmatprep.subr.bf16.mxu0 %v15489_v31  ;;  %v826_v11 = vld [vmem:[#allocation12 + $0x638] sm:$0xff] }
 0x520   :  { %7859 = vmatpush2.bf16.msra.mxu1 %v15624_v30  ;;  %v15585_v22 = vcombine.high %v822_v55, %v826_v11  ;;  %v942_v23 = vld [vmem:[#allocation12 + $0x9d8] sm:$0xff]  ;;  %v15456_v30 = vcombine.low %v694_v9, %v698_v10  ;;  %v15584_v31 = vcombine.low %v822_v55, %v826_v11 }
 0x521   :  { %7860 = vmatprep.subr.bf16.mxu1 %v15617_v37  ;;  %v946_v24 = vld [vmem:[#allocation12 + $0x9f8] sm:$0xff] }
 0x522   :  { %7820 = vmatpush2.bf16.msra.mxu0 %v15488_v44  ;;  %v1070_v28 = vld [vmem:[#allocation12 + $0xdd8] sm:$0xff]  ;;  %v15705_v37 = vcombine.high %v942_v23, %v946_v24 }
 0x523   :  { %7821 = vmatprep.subr.bf16.mxu0 %v15481_v46  ;;  %v1074_v34 = vld [vmem:[#allocation12 + $0xdf8] sm:$0xff] }
 0x524   :  { %7861 = vmatpush2.bf16.msra.mxu1 %v15616_v45  ;;  %v15833_v38 = vcombine.high %v1070_v28, %v1074_v34  ;;  %v934_v0 = vld [vmem:[#allocation12 + $0x998] sm:$0xff]  ;;  %v15704_v45 = vcombine.low %v942_v23, %v946_v24  ;;  %v15832_v46 = vcombine.low %v1070_v28, %v1074_v34 }
 0x525   :  { %7862 = vmatprep.subr.bf16.mxu1 %v15609_v49  ;;  %v938_v39 = vld [vmem:[#allocation12 + $0x9b8] sm:$0xff] }
 0x526   :  { %7822 = vmatpush2.bf16.msra.mxu0 %v15480_v62  ;;  %v1062_v43 = vld [vmem:[#allocation12 + $0xd98] sm:$0xff]  ;;  %v15697_v49 = vcombine.high %v934_v0, %v938_v39  ;;  %v15696_v15 = vcombine.low %v934_v0, %v938_v39 }
 0x527   :  { %7823 = vmatprep.subr.bf16.mxu0 %v15473_v47  ;;  %v1066_v44 = vld [vmem:[#allocation12 + $0xdb8] sm:$0xff] }
 0x528   :  { %7863 = vmatpush2.bf16.msra.mxu1 %v15608_v42  ;;  %v15825_v53 = vcombine.high %v1062_v43, %v1066_v44  ;;  %v926_v57 = vld [vmem:[#allocation12 + $0x958] sm:$0xff]  ;;  %v15824_v2 = vcombine.low %v1062_v43, %v1066_v44 }
 0x529   :  { %7864 = vmatprep.subr.bf16.mxu1 %v15601_v59  ;;  %v930_v61 = vld [vmem:[#allocation12 + $0x978] sm:$0xff] }
 0x52a   :  { %7824 = vmatpush2.bf16.msra.mxu0 %v15472_v4  ;;  %v1054_v62 = vld [vmem:[#allocation12 + $0xd58] sm:$0xff]  ;;  %v15689_v60 = vcombine.high %v926_v57, %v930_v61 }
 0x52b   :  { %7825 = vmatprep.subr.bf16.mxu0 %v15465_v6  ;;  %v1058_v42 = vld [vmem:[#allocation12 + $0xd78] sm:$0xff] }
 0x52c   :  { %7865 = vmatpush2.bf16.msra.mxu1 %v15600_v5  ;;  %v922_v9 = vld [vmem:[#allocation12 + $0x938] sm:$0xff] }
 0x52d   :  { %7866 = vmatprep.subr.bf16.mxu1 %v15593_v33  ;;  %v918_v33 = vld [vmem:[#allocation12 + $0x918] sm:$0xff] }
 0x52e   :  { %7826 = vmatpush2.bf16.msra.mxu0 %v15464_v12  ;;  %v1050_v10 = vld [vmem:[#allocation12 + $0xd38] sm:$0xff]  ;;  %v15688_v12 = vcombine.low %v926_v57, %v930_v61 }
 0x52f   :  { %7827 = vmatprep.subr.bf16.mxu0 %v15457_v20  ;;  %v15681_v20 = vcombine.high %v918_v33, %v922_v9  ;;  %v910_v24 = vld [vmem:[#allocation12 + $0x8d8] sm:$0xff] }
 0x530   :  { %7867 = vmatpush2.bf16.msra.mxu1 %v15592_v13  ;;  %v1038_v28 = vld [vmem:[#allocation12 + $0xcd8] sm:$0xff] }
 0x531   :  { %7868 = vmatprep.subr.bf16.mxu1 %v15585_v22  ;;  %v1042_v34 = vld [vmem:[#allocation12 + $0xcf8] sm:$0xff] }
 0x532   :  { %7828 = vmatpush2.bf16.msra.mxu0 %v15456_v30  ;;  %v15680_v30 = vcombine.low %v918_v33, %v922_v9  ;;  %v906_v0 = vld [vmem:[#allocation12 + $0x8b8] sm:$0xff] }
 0x533   :  { %7879 = vmatprep.subr.bf16.mxu0 %v15705_v37  ;;  %v15801_v37 = vcombine.high %v1038_v28, %v1042_v34  ;;  %v1030_v39 = vld [vmem:[#allocation12 + $0xc98] sm:$0xff] }
 0x534   :  { %7869 = vmatpush2.bf16.msra.mxu1 %v15584_v31  ;;  %v1034_v43 = vld [vmem:[#allocation12 + $0xcb8] sm:$0xff] }
 0x535   :  { %7920 = vmatprep.subr.bf16.mxu1 %v15833_v38  ;;  %v7585_v14 = vpop.f32.mrf.mxu0  ;;  %7830 = vmatmul.mubr.bf16.vlgmr.msra.gmra.mxu0 %v19822_v17  ;;  %v15817_v17 = vcombine.high %v1054_v62, %v1058_v42  ;;  %v902_v38 = vld [vmem:[#allocation12 + $0x898] sm:$0xff] }
 0x536   :  { %v7586_v47 = vadd.f32 %v7585_v14, %v19960_v35  ;;  %7880 = vmatpush1.bf16.msra.mxu0 %v15704_v45  ;;  %7911 = vmatprep.mubr.bf16.mxu0 %v19826_v29  ;;  %v914_v29 = vld [vmem:[#allocation12 + $0x8f8] sm:$0xff]  ;;  %v15800_v45 = vcombine.low %v1038_v28, %v1042_v34 }
 0x537   :  { %v7626_v59 = vpop.f32.mrf.mxu1  ;;  %7871 = vmatmul.mubr.bf16.vlgmr.msra.gmra.mxu1 %v19824_v21  ;;  %v7587_v1 = vpop.f32.mrf.mxu0  ;;  %7881 = vmatprep.subr.bf16.mxu0 %v15697_v49  ;;  %v1046_v21 = vld [vmem:[#allocation12 + $0xd18] sm:$0xff]  ;;  %v15673_v31 = vcombine.high %v910_v24, %v914_v29  ;;  %v15672_v44 = vcombine.low %v910_v24, %v914_v29  ;;  %v15793_v49 = vcombine.high %v1030_v39, %v1034_v43 }
 0x538   :  { %7921 = vmatpush1.bf16.msra.mxu1 %v15832_v46  ;;  %v19969_v4 = vadd.f32 %v7626_v59, %v7586_v47  ;;  %v7588_v5 = vadd.f32 %v7587_v1, %v19964_v48  ;;  %7952 = vmatprep.mubr.bf16.mxu1 %v19829_v32  ;;  %v15816_v48 = vcombine.low %v1054_v62, %v1058_v42  ;;  %v898_v57 = vld [vmem:[#allocation12 + $0x878] sm:$0xff] }
 0x539   :  { %v7628_v6 = vpop.f32.mrf.mxu1  ;;  %7922 = vmatprep.subr.bf16.mxu1 %v15825_v53  ;;  %v7589_v35 = vpop.f32.mrf.mxu0  ;;  %v15809_v23 = vcombine.high %v1046_v21, %v1050_v10  ;;  %v15808_v32 = vcombine.low %v1046_v21, %v1050_v10  ;;  %v15665_v46 = vcombine.high %v902_v38, %v906_v0  ;;  %v894_v53 = vld [vmem:[#allocation12 + $0x858] sm:$0xff]  ;;  %v15664_v62 = vcombine.low %v902_v38, %v906_v0 }
 0x53a   :  { %v19974_v55 = vadd.f32 %v7628_v6, %v7588_v5  ;;  %7882 = vmatpush1.bf16.msra.mxu0 %v15696_v15  ;;  %v1022_v61 = vld [vmem:[#allocation12 + $0xc58] sm:$0xff]  ;;  %v15792_v42 = vcombine.low %v1030_v39, %v1034_v43  ;;  %v15657_v47 = vcombine.high %v894_v53, %v898_v57  ;;  %v15656_v5 = vcombine.low %v894_v53, %v898_v57 }
 0x53b   :  { %v7630_v11 = vpop.f32.mrf.mxu1  ;;  %v7590_v13 = vpop.f32.mrf.mxu0  ;;  %7883 = vmatprep.subr.bf16.mxu0 %v15689_v60  ;;  %v1026_v14 = vld [vmem:[#allocation12 + $0xc78] sm:$0xff] }
 0x53c   :  { %7923 = vmatpush1.bf16.msra.mxu1 %v15824_v2  ;;  %v15785_v59 = vcombine.high %v1022_v61, %v1026_v14  ;;  %v886_v15 = vld [vmem:[#allocation12 + $0x818] sm:$0xff]  ;;  %v15784_v6 = vcombine.low %v1022_v61, %v1026_v14 }
 0x53d   :  { %v7631_v22 = vpop.f32.mrf.mxu1  ;;  %7924 = vmatprep.subr.bf16.mxu1 %v15817_v17  ;;  %v890_v1 = vld [vmem:[#allocation12 + $0x838] sm:$0xff] }
 0x53e   :  { %7884 = vmatpush1.bf16.msra.mxu0 %v15688_v12  ;;  %v1014_v2 = vld [vmem:[#allocation12 + $0xc18] sm:$0xff]  ;;  %v15649_v17 = vcombine.high %v886_v15, %v890_v1  ;;  %v15648_v11 = vcombine.low %v886_v15, %v890_v1 }
 0x53f   :  { %7885 = vmatprep.subr.bf16.mxu0 %v15681_v20  ;;  %v1018_v60 = vld [vmem:[#allocation12 + $0xc38] sm:$0xff] }
 0x540   :  { %7925 = vmatpush1.bf16.msra.mxu1 %v15816_v48  ;;  %v15777_v33 = vcombine.high %v1014_v2, %v1018_v60  ;;  %v1006_v9 = vld [vmem:[#allocation12 + $0xbd8] sm:$0xff]  ;;  %v15776_v12 = vcombine.low %v1014_v2, %v1018_v60 }
 0x541   :  { %7926 = vmatprep.subr.bf16.mxu1 %v15809_v23  ;;  %v1010_v35 = vld [vmem:[#allocation12 + $0xbf8] sm:$0xff] }
 0x542   :  { %7886 = vmatpush1.bf16.msra.mxu0 %v15680_v30  ;;  %v1134_v21 = vld [vmem:[#allocation12 + $0xfd8] sm:$0xff]  ;;  %v15769_v13 = vcombine.high %v1006_v9, %v1010_v35  ;;  %v15768_v29 = vcombine.low %v1006_v9, %v1010_v35 }
 0x543   :  { %7887 = vmatprep.subr.bf16.mxu0 %v15673_v31  ;;  %v1138_v10 = vld [vmem:[#allocation12 + $0xff8] sm:$0xff] }
 0x544   :  { %7927 = vmatpush1.bf16.msra.mxu1 %v15808_v32  ;;  %v15897_v48 = vcombine.high %v1134_v21, %v1138_v10  ;;  %v998_v20 = vld [vmem:[#allocation12 + $0xb98] sm:$0xff]  ;;  %v15896_v28 = vcombine.low %v1134_v21, %v1138_v10 }
 0x545   :  { %7928 = vmatprep.subr.bf16.mxu1 %v15801_v37  ;;  %v1002_v22 = vld [vmem:[#allocation12 + $0xbb8] sm:$0xff] }
 0x546   :  { %7888 = vmatpush1.bf16.msra.mxu0 %v15672_v44  ;;  %v1126_v23 = vld [vmem:[#allocation12 + $0xf98] sm:$0xff]  ;;  %v15761_v34 = vcombine.high %v998_v20, %v1002_v22  ;;  %v15760_v0 = vcombine.low %v998_v20, %v1002_v22 }
 0x547   :  { %7889 = vmatprep.subr.bf16.mxu0 %v15665_v46  ;;  %v1130_v24 = vld [vmem:[#allocation12 + $0xfb8] sm:$0xff] }
 0x548   :  { %7929 = vmatpush1.bf16.msra.mxu1 %v15800_v45  ;;  %v15889_v30 = vcombine.high %v1126_v23, %v1130_v24  ;;  %v990_v32 = vld [vmem:[#allocation12 + $0xb58] sm:$0xff]  ;;  %v15888_v39 = vcombine.low %v1126_v23, %v1130_v24 }
 0x549   :  { %7930 = vmatprep.subr.bf16.mxu1 %v15793_v49  ;;  %v994_v31 = vld [vmem:[#allocation12 + $0xb78] sm:$0xff] }
 0x54a   :  { %7890 = vmatpush1.bf16.msra.mxu0 %v15664_v62  ;;  %v1118_v37 = vld [vmem:[#allocation12 + $0xf58] sm:$0xff]  ;;  %v15753_v43 = vcombine.high %v990_v32, %v994_v31  ;;  %v15752_v57 = vcombine.low %v990_v32, %v994_v31 }
 0x54b   :  { %7891 = vmatprep.subr.bf16.mxu0 %v15657_v47  ;;  %v1122_v38 = vld [vmem:[#allocation12 + $0xf78] sm:$0xff] }
 0x54c   :  { %7931 = vmatpush1.bf16.msra.mxu1 %v15792_v42  ;;  %v15881_v44 = vcombine.high %v1118_v37, %v1122_v38  ;;  %v982_v45 = vld [vmem:[#allocation12 + $0xb18] sm:$0xff]  ;;  %v15880_v61 = vcombine.low %v1118_v37, %v1122_v38 }
 0x54d   :  { %7932 = vmatprep.subr.bf16.mxu1 %v15785_v59  ;;  %v986_v46 = vld [vmem:[#allocation12 + $0xb38] sm:$0xff] }
 0x54e   :  { %7892 = vmatpush1.bf16.msra.mxu0 %v15656_v5  ;;  %v1110_v49 = vld [vmem:[#allocation12 + $0xf18] sm:$0xff]  ;;  %v15745_v14 = vcombine.high %v982_v45, %v986_v46  ;;  %v15744_v1 = vcombine.low %v982_v45, %v986_v46 }
 0x54f   :  { %7893 = vmatprep.subr.bf16.mxu0 %v15649_v17  ;;  %v1114_v53 = vld [vmem:[#allocation12 + $0xf38] sm:$0xff] }
 0x550   :  { %7933 = vmatpush1.bf16.msra.mxu1 %v15784_v6  ;;  %v15873_v62 = vcombine.high %v1110_v49, %v1114_v53  ;;  %v974_v42 = vld [vmem:[#allocation12 + $0xad8] sm:$0xff]  ;;  %v15872_v2 = vcombine.low %v1110_v49, %v1114_v53 }
 0x551   :  { %7934 = vmatprep.subr.bf16.mxu1 %v15777_v33  ;;  %v978_v47 = vld [vmem:[#allocation12 + $0xaf8] sm:$0xff] }
 0x552   :  { %7894 = vmatpush1.bf16.msra.mxu0 %v15648_v11  ;;  %v1102_v59 = vld [vmem:[#allocation12 + $0xed8] sm:$0xff]  ;;  %v15737_v60 = vcombine.high %v974_v42, %v978_v47  ;;  %v15736_v35 = vcombine.low %v974_v42, %v978_v47 }
 0x553   :  { %7895 = vmatprep.subr.bf16.mxu0 %v15769_v13  ;;  %v1106_v15 = vld [vmem:[#allocation12 + $0xef8] sm:$0xff] }
 0x554   :  { %7935 = vmatpush1.bf16.msra.mxu1 %v15776_v12  ;;  %v15865_v5 = vcombine.high %v1102_v59, %v1106_v15  ;;  %v966_v6 = vld [vmem:[#allocation12 + $0xa98] sm:$0xff]  ;;  %v15864_v21 = vcombine.low %v1102_v59, %v1106_v15 }
 0x555   :  { %7936 = vmatprep.subr.bf16.mxu1 %v15897_v48  ;;  %v970_v17 = vld [vmem:[#allocation12 + $0xab8] sm:$0xff] }
 0x556   :  { %7896 = vmatpush2.bf16.msra.mxu0 %v15768_v29  ;;  %v1094_v33 = vld [vmem:[#allocation12 + $0xe98] sm:$0xff]  ;;  %v15729_v10 = vcombine.high %v966_v6, %v970_v17  ;;  %v15728_v22 = vcombine.low %v966_v6, %v970_v17 }
 0x557   :  { %7897 = vmatprep.subr.bf16.mxu0 %v15761_v34  ;;  %v1098_v9 = vld [vmem:[#allocation12 + $0xeb8] sm:$0xff] }
 0x558   :  { %7937 = vmatpush2.bf16.msra.mxu1 %v15896_v28  ;;  %v15857_v11 = vcombine.high %v1094_v33, %v1098_v9  ;;  %v958_v12 = vld [vmem:[#allocation12 + $0xa58] sm:$0xff]  ;;  %v15856_v23 = vcombine.low %v1094_v33, %v1098_v9 }
 0x559   :  { %7938 = vmatprep.subr.bf16.mxu1 %v15889_v30  ;;  %v962_v13 = vld [vmem:[#allocation12 + $0xa78] sm:$0xff] }
 0x55a   :  { %7898 = vmatpush2.bf16.msra.mxu0 %v15760_v0  ;;  %v1086_v48 = vld [vmem:[#allocation12 + $0xe58] sm:$0xff]  ;;  %v15721_v24 = vcombine.high %v958_v12, %v962_v13  ;;  %v15720_v31 = vcombine.low %v958_v12, %v962_v13 }
 0x55b   :  { %7899 = vmatprep.subr.bf16.mxu0 %v15753_v43  ;;  %v1090_v20 = vld [vmem:[#allocation12 + $0xe78] sm:$0xff] }
 0x55c   :  { %7939 = vmatpush2.bf16.msra.mxu1 %v15888_v39  ;;  %v15849_v29 = vcombine.high %v1086_v48, %v1090_v20  ;;  %v950_v28 = vld [vmem:[#allocation12 + $0xa18] sm:$0xff]  ;;  %v15848_v37 = vcombine.low %v1086_v48, %v1090_v20 }
 0x55d   :  { %7940 = vmatprep.subr.bf16.mxu1 %v15881_v44  ;;  %v954_v34 = vld [vmem:[#allocation12 + $0xa38] sm:$0xff] }
 0x55e   :  { %7900 = vmatpush2.bf16.msra.mxu0 %v15752_v57  ;;  %v1078_v30 = vld [vmem:[#allocation12 + $0xe18] sm:$0xff]  ;;  %v15713_v38 = vcombine.high %v950_v28, %v954_v34  ;;  %v15712_v46 = vcombine.low %v950_v28, %v954_v34 }
 0x55f   :  { %7901 = vmatprep.subr.bf16.mxu0 %v15745_v14  ;;  %v1082_v32 = vld [vmem:[#allocation12 + $0xe38] sm:$0xff] }
 0x560   :  { %7941 = vmatpush2.bf16.msra.mxu1 %v15880_v61  ;;  %v15841_v0 = vcombine.high %v1078_v30, %v1082_v32  ;;  %v1198_v39 = vld [vmem:[#allocation12 + $0x11d8] sm:$0xff]  ;;  %v15840_v49 = vcombine.low %v1078_v30, %v1082_v32 }
 0x561   :  { %7942 = vmatprep.subr.bf16.mxu1 %v15873_v62  ;;  %v1202_v43 = vld [vmem:[#allocation12 + $0x11f8] sm:$0xff] }
 0x562   :  { %7902 = vmatpush2.bf16.msra.mxu0 %v15744_v1  ;;  %v1326_v44 = vld [vmem:[#allocation12 + $0x15d8] sm:$0xff]  ;;  %v15961_v53 = vcombine.high %v1198_v39, %v1202_v43  ;;  %v15960_v47 = vcombine.low %v1198_v39, %v1202_v43 }
 0x563   :  { %7903 = vmatprep.subr.bf16.mxu0 %v15737_v60  ;;  %v1330_v45 = vld [vmem:[#allocation12 + $0x15f8] sm:$0xff] }
 0x564   :  { %7943 = vmatpush2.bf16.msra.mxu1 %v15872_v2  ;;  %v16089_v57 = vcombine.high %v1326_v44, %v1330_v45  ;;  %v1190_v61 = vld [vmem:[#allocation12 + $0x1198] sm:$0xff]  ;;  %v16088_v59 = vcombine.low %v1326_v44, %v1330_v45 }
 0x565   :  { %7944 = vmatprep.subr.bf16.mxu1 %v15865_v5  ;;  %v1194_v14 = vld [vmem:[#allocation12 + $0x11b8] sm:$0xff] }
 0x566   :  { %7904 = vmatpush2.bf16.msra.mxu0 %v15736_v35  ;;  %v1318_v62 = vld [vmem:[#allocation12 + $0x1598] sm:$0xff]  ;;  %v15953_v15 = vcombine.high %v1190_v61, %v1194_v14  ;;  %v15952_v35 = vcombine.low %v1190_v61, %v1194_v14 }
 0x567   :  { %7905 = vmatprep.subr.bf16.mxu0 %v15729_v10  ;;  %v1322_v42 = vld [vmem:[#allocation12 + $0x15b8] sm:$0xff] }
 0x568   :  { %7945 = vmatpush2.bf16.msra.mxu1 %v15864_v21  ;;  %v16081_v1 = vcombine.high %v1318_v62, %v1322_v42  ;;  %v1182_v2 = vld [vmem:[#allocation12 + $0x1158] sm:$0xff]  ;;  %v16080_v10 = vcombine.low %v1318_v62, %v1322_v42 }
 0x569   :  { %7946 = vmatprep.subr.bf16.mxu1 %v15857_v11  ;;  %v1186_v60 = vld [vmem:[#allocation12 + $0x1178] sm:$0xff] }
 0x56a   :  { %7906 = vmatpush2.bf16.msra.mxu0 %v15728_v22  ;;  %v1310_v6 = vld [vmem:[#allocation12 + $0x1558] sm:$0xff]  ;;  %v15945_v11 = vcombine.high %v1182_v2, %v1186_v60  ;;  %v15944_v28 = vcombine.low %v1182_v2, %v1186_v60 }
 0x56b   :  { %7907 = vmatprep.subr.bf16.mxu0 %v15721_v24  ;;  %v1314_v17 = vld [vmem:[#allocation12 + $0x1578] sm:$0xff] }
 0x56c   :  { %7947 = vmatpush2.bf16.msra.mxu1 %v15856_v23  ;;  %v1174_v20 = vld [vmem:[#allocation12 + $0x1118] sm:$0xff] }
 0x56d   :  { %7948 = vmatprep.subr.bf16.mxu1 %v15849_v29  ;;  %v1178_v22 = vld [vmem:[#allocation12 + $0x1138] sm:$0xff] }
 0x56e   :  { %7908 = vmatpush2.bf16.msra.mxu0 %v15720_v31  ;;  %v1306_v23 = vld [vmem:[#allocation12 + $0x1538] sm:$0xff]  ;;  %v15937_v30 = vcombine.high %v1174_v20, %v1178_v22  ;;  %v15936_v39 = vcombine.low %v1174_v20, %v1178_v22 }
 0x56f   :  { %7909 = vmatprep.subr.bf16.mxu0 %v15713_v38  ;;  %v1294_v38 = vld [vmem:[#allocation12 + $0x14d8] sm:$0xff] }
 0x570   :  { %7949 = vmatpush2.bf16.msra.mxu1 %v15848_v37  ;;  %v1166_v37 = vld [vmem:[#allocation12 + $0x10d8] sm:$0xff] }
 0x571   :  { %7950 = vmatprep.subr.bf16.mxu1 %v15841_v0  ;;  %v1298_v0 = vld [vmem:[#allocation12 + $0x14f8] sm:$0xff] }
 0x572   :  { %7910 = vmatpush2.bf16.msra.mxu0 %v15712_v46  ;;  %v16057_v44 = vcombine.high %v1294_v38, %v1298_v0  ;;  %v1158_v45 = vld [vmem:[#allocation12 + $0x1098] sm:$0xff]  ;;  %v16056_v61 = vcombine.low %v1294_v38, %v1298_v0 }
 0x573   :  { %7961 = vmatprep.subr.bf16.mxu0 %v15961_v53  ;;  %v1162_v46 = vld [vmem:[#allocation12 + $0x10b8] sm:$0xff] }
 0x574   :  { %7951 = vmatpush2.bf16.msra.mxu1 %v15840_v49  ;;  %v1286_v49 = vld [vmem:[#allocation12 + $0x1498] sm:$0xff]  ;;  %v15921_v14 = vcombine.high %v1158_v45, %v1162_v46 }
 0x575   :  { %8002 = vmatprep.subr.bf16.mxu1 %v16089_v57  ;;  %v7667_v5 = vpop.f32.mrf.mxu0  ;;  %7912 = vmatmul.mubr.bf16.vlgmr.msra.gmra.mxu0 %v19834_v40  ;;  %v16073_v40 = vcombine.high %v1310_v6, %v1314_v17  ;;  %v1290_v53 = vld [vmem:[#allocation12 + $0x14b8] sm:$0xff] }
 0x576   :  { %v7668_v33 = vadd.f32 %v7667_v5, %v19969_v4  ;;  %7962 = vmatpush1.bf16.msra.mxu0 %v15960_v47  ;;  %7993 = vmatprep.mubr.bf16.mxu0 %v19838_v50  ;;  %v1170_v50 = vld [vmem:[#allocation12 + $0x10f8] sm:$0xff]  ;;  %v16049_v62 = vcombine.high %v1286_v49, %v1290_v53  ;;  %v16048_v2 = vcombine.low %v1286_v49, %v1290_v53  ;;  %v8131_v53 = vrot.slane %v19908_v3, 4 }
 0x577   :  { %v7708_v9 = vpop.f32.mrf.mxu1  ;;  %7953 = vmatmul.mubr.bf16.vlgmr.msra.gmra.mxu1 %v19836_v41  ;;  %v7669_v21 = vpop.f32.mrf.mxu0  ;;  %7963 = vmatprep.subr.bf16.mxu0 %v15953_v15  ;;  %v1302_v41 = vld [vmem:[#allocation12 + $0x1518] sm:$0xff]  ;;  %v15929_v43 = vcombine.high %v1166_v37, %v1170_v50  ;;  %v15928_v57 = vcombine.low %v1166_v37, %v1170_v50 }
 0x578   :  { %8003 = vmatpush1.bf16.msra.mxu1 %v16088_v59  ;;  %v19979_v12 = vadd.f32 %v7708_v9, %v7668_v33  ;;  %v7670_v13 = vadd.f32 %v7669_v21, %v19974_v55  ;;  %8034 = vmatprep.mubr.bf16.mxu1 %v19841_v52  ;;  %v16072_v55 = vcombine.low %v1310_v6, %v1314_v17  ;;  %v1150_v42 = vld [vmem:[#allocation12 + $0x1058] sm:$0xff] }
 0x579   :  { %v7710_v48 = vpop.f32.mrf.mxu1  ;;  %8004 = vmatprep.subr.bf16.mxu1 %v16081_v1  ;;  %v7671_v4 = vpop.f32.mrf.mxu0  ;;  %v16065_v31 = vcombine.high %v1302_v41, %v1306_v23  ;;  %v16064_v52 = vcombine.low %v1302_v41, %v1306_v23  ;;  %v1154_v47 = vld [vmem:[#allocation12 + $0x1078] sm:$0xff]  ;;  %v15920_v1 = vcombine.low %v1158_v45, %v1162_v46 }
 0x57a   :  { %v19984_v24 = vadd.f32 %v7710_v48, %v7670_v13  ;;  %7964 = vmatpush1.bf16.msra.mxu0 %v15952_v35  ;;  %v1278_v59 = vld [vmem:[#allocation12 + $0x1458] sm:$0xff]  ;;  %v15913_v60 = vcombine.high %v1150_v42, %v1154_v47  ;;  %v15912_v35 = vcombine.low %v1150_v42, %v1154_v47 }
 0x57b   :  { %v7712_v29 = vpop.f32.mrf.mxu1  ;;  %v7672_v34 = vpop.f32.mrf.mxu0  ;;  %7965 = vmatprep.subr.bf16.mxu0 %v15945_v11  ;;  %v1282_v15 = vld [vmem:[#allocation12 + $0x1478] sm:$0xff] }
 0x57c   :  { %8005 = vmatpush1.bf16.msra.mxu1 %v16080_v10  ;;  %v16041_v5 = vcombine.high %v1278_v59, %v1282_v15  ;;  %v1142_v6 = vld [vmem:[#allocation12 + $0x1018] sm:$0xff]  ;;  %v16040_v21 = vcombine.low %v1278_v59, %v1282_v15 }
 0x57d   :  { %v7713_v32 = vpop.f32.mrf.mxu1  ;;  %8006 = vmatprep.subr.bf16.mxu1 %v16073_v40  ;;  %v1146_v17 = vld [vmem:[#allocation12 + $0x1038] sm:$0xff] }
 0x57e   :  { %7966 = vmatpush1.bf16.msra.mxu0 %v15944_v28  ;;  %v1270_v33 = vld [vmem:[#allocation12 + $0x1418] sm:$0xff]  ;;  %v15905_v10 = vcombine.high %v1142_v6, %v1146_v17  ;;  %v15904_v22 = vcombine.low %v1142_v6, %v1146_v17 }
 0x57f   :  { %7967 = vmatprep.subr.bf16.mxu0 %v15937_v30  ;;  %v1274_v9 = vld [vmem:[#allocation12 + $0x1438] sm:$0xff] }
 0x580   :  { %8007 = vmatpush1.bf16.msra.mxu1 %v16072_v55  ;;  %v16033_v11 = vcombine.high %v1270_v33, %v1274_v9  ;;  %v1262_v13 = vld [vmem:[#allocation12 + $0x13d8] sm:$0xff]  ;;  %v16032_v4 = vcombine.low %v1270_v33, %v1274_v9 }
 0x581   :  { %8008 = vmatprep.subr.bf16.mxu1 %v16065_v31  ;;  %v1266_v48 = vld [vmem:[#allocation12 + $0x13f8] sm:$0xff] }
 0x582   :  { %7968 = vmatpush1.bf16.msra.mxu0 %v15936_v39  ;;  %v1390_v40 = vld [vmem:[#allocation12 + $0x17d8] sm:$0xff]  ;;  %v16025_v41 = vcombine.high %v1262_v13, %v1266_v48  ;;  %v16024_v30 = vcombine.low %v1262_v13, %v1266_v48 }
 0x583   :  { %7969 = vmatprep.subr.bf16.mxu0 %v15929_v43  ;;  %v1394_v20 = vld [vmem:[#allocation12 + $0x17f8] sm:$0xff] }
 0x584   :  { %8009 = vmatpush1.bf16.msra.mxu1 %v16064_v52  ;;  %v16153_v23 = vcombine.high %v1390_v40, %v1394_v20  ;;  %v1254_v29 = vld [vmem:[#allocation12 + $0x1398] sm:$0xff]  ;;  %v16152_v32 = vcombine.low %v1390_v40, %v1394_v20 }
 0x585   :  { %8010 = vmatprep.subr.bf16.mxu1 %v16057_v44  ;;  %v1258_v28 = vld [vmem:[#allocation12 + $0x13b8] sm:$0xff] }
 0x586   :  { %7970 = vmatpush1.bf16.msra.mxu0 %v15928_v57  ;;  %v1382_v34 = vld [vmem:[#allocation12 + $0x1798] sm:$0xff]  ;;  %v16017_v31 = vcombine.high %v1254_v29, %v1258_v28  ;;  %v16016_v52 = vcombine.low %v1254_v29, %v1258_v28 }
 0x587   :  { %7971 = vmatprep.subr.bf16.mxu0 %v15921_v14  ;;  %v1386_v55 = vld [vmem:[#allocation12 + $0x17b8] sm:$0xff]  ;;  %v8143_v14 = vrot.slane %v19954_v25, 4 }
 0x588   :  { %8011 = vmatpush1.bf16.msra.mxu1 %v16056_v61  ;;  %v16145_v37 = vcombine.high %v1382_v34, %v1386_v55  ;;  %v1246_v50 = vld [vmem:[#allocation12 + $0x1358] sm:$0xff]  ;;  %v16144_v43 = vcombine.low %v1382_v34, %v1386_v55 }
 0x589   :  { %8012 = vmatprep.subr.bf16.mxu1 %v16049_v62  ;;  %v1250_v38 = vld [vmem:[#allocation12 + $0x1378] sm:$0xff]  ;;  %v8144_v6 = vadd.f32 %v8143_v14, %v19954_v25 }
 0x58a   :  { %7972 = vmatpush1.bf16.msra.mxu0 %v15920_v1  ;;  %v1374_v0 = vld [vmem:[#allocation12 + $0x1758] sm:$0xff]  ;;  %v16009_v44 = vcombine.high %v1246_v50, %v1250_v38  ;;  %v16008_v62 = vcombine.low %v1246_v50, %v1250_v38 }
 0x58b   :  { %7973 = vmatprep.subr.bf16.mxu0 %v15913_v60  ;;  %v1378_v39 = vld [vmem:[#allocation12 + $0x1778] sm:$0xff]  ;;  %v8145_v40 = vrot.slane %v8144_v6, 2 }
 0x58c   :  { %8013 = vmatpush1.bf16.msra.mxu1 %v16048_v2  ;;  %v16137_v45 = vcombine.high %v1374_v0, %v1378_v39  ;;  %v1238_v46 = vld [vmem:[#allocation12 + $0x1318] sm:$0xff]  ;;  %v16136_v42 = vcombine.low %v1374_v0, %v1378_v39  ;;  %v8132_v2 = vadd.f32 %v8131_v53, %v19908_v3 }
 0x58d   :  { %8014 = vmatprep.subr.bf16.mxu1 %v16041_v5  ;;  %v1242_v49 = vld [vmem:[#allocation12 + $0x1338] sm:$0xff] }
 0x58e   :  { %7974 = vmatpush1.bf16.msra.mxu0 %v15912_v35  ;;  %v1366_v57 = vld [vmem:[#allocation12 + $0x1718] sm:$0xff]  ;;  %v16001_v47 = vcombine.high %v1238_v46, %v1242_v49  ;;  %v16000_v17 = vcombine.low %v1238_v46, %v1242_v49 }
 0x58f   :  { %7975 = vmatprep.subr.bf16.mxu0 %v15905_v10  ;;  %v1370_v61 = vld [vmem:[#allocation12 + $0x1738] sm:$0xff] }
 0x590   :  { %8015 = vmatpush1.bf16.msra.mxu1 %v16040_v21  ;;  %v16129_v59 = vcombine.high %v1366_v57, %v1370_v61  ;;  %v1230_v15 = vld [vmem:[#allocation12 + $0x12d8] sm:$0xff]  ;;  %v16128_v33 = vcombine.low %v1366_v57, %v1370_v61 }
 0x591   :  { %8016 = vmatprep.subr.bf16.mxu1 %v16033_v11  ;;  %v1234_v1 = vld [vmem:[#allocation12 + $0x12f8] sm:$0xff]  ;;  %v8133_v11 = vrot.slane %v8132_v2, 2 }
 0x592   :  { %7976 = vmatpush1.bf16.msra.mxu0 %v15904_v22  ;;  %v1358_v60 = vld [vmem:[#allocation12 + $0x16d8] sm:$0xff]  ;;  %v15993_v9 = vcombine.high %v1230_v15, %v1234_v1  ;;  %v15992_v20 = vcombine.low %v1230_v15, %v1234_v1 }
 0x593   :  { %7977 = vmatprep.subr.bf16.mxu0 %v16025_v41  ;;  %v1362_v5 = vld [vmem:[#allocation12 + $0x16f8] sm:$0xff]  ;;  %v8134_v28 = vadd.f32 %v8133_v11, %v8132_v2 }
 0x594   :  { %8017 = vmatpush1.bf16.msra.mxu1 %v16032_v4  ;;  %v16121_v35 = vcombine.high %v1358_v60, %v1362_v5  ;;  %v1222_v21 = vld [vmem:[#allocation12 + $0x1298] sm:$0xff]  ;;  %v16120_v22 = vcombine.low %v1358_v60, %v1362_v5 }
 0x595   :  { %8018 = vmatprep.subr.bf16.mxu1 %v16153_v23  ;;  %v1226_v10 = vld [vmem:[#allocation12 + $0x12b8] sm:$0xff]  ;;  %v8135_v39 = vrot.slane %v8134_v28, 1 }
 0x596   :  { %7978 = vmatpush2.bf16.msra.mxu0 %v16024_v30  ;;  %v1350_v13 = vld [vmem:[#allocation12 + $0x1698] sm:$0xff]  ;;  %v15985_v4 = vcombine.high %v1222_v21, %v1226_v10  ;;  %v8146_v30 = vadd.f32 %v8145_v40, %v8144_v6 }
 0x597   :  { %7979 = vmatprep.subr.bf16.mxu0 %v16017_v31  ;;  %v1354_v48 = vld [vmem:[#allocation12 + $0x16b8] sm:$0xff]  ;;  %v8136_v14 = vadd.f32 %v8135_v39, %v8134_v28 }
 0x598   :  { %8019 = vmatpush2.bf16.msra.mxu1 %v16152_v32  ;;  %v16113_v41 = vcombine.high %v1350_v13, %v1354_v48  ;;  %v1214_v23 = vld [vmem:[#allocation12 + $0x1258] sm:$0xff]  ;;  %v15984_v32 = vcombine.low %v1222_v21, %v1226_v10  ;;  %v16112_v31 = vcombine.low %v1350_v13, %v1354_v48 }
 0x599   :  { %8020 = vmatprep.subr.bf16.mxu1 %v16145_v37  ;;  %v1218_v29 = vld [vmem:[#allocation12 + $0x1278] sm:$0xff]  ;;  %v8175_v6 = vmul.f32 0.125, %v8136_v14 }
 0x59a   :  { %7980 = vmatpush2.bf16.msra.mxu0 %v16016_v52  ;;  %v1342_v34 = vld [vmem:[#allocation12 + $0x1658] sm:$0xff]  ;;  %v15977_v37 = vcombine.high %v1214_v23, %v1218_v29 }
 0x59b   :  { %7981 = vmatprep.subr.bf16.mxu0 %v16009_v44  ;;  %v1346_v55 = vld [vmem:[#allocation12 + $0x1678] sm:$0xff]  ;;  %v8147_v44 = vrot.slane %v8146_v30, 1  ;;  %v19991_v40 = vsub.f32 %v19908_v3, %v8175_v6 }
 0x59c   :  { %8021 = vmatpush2.bf16.msra.mxu1 %v16144_v43  ;;  %v16105_v50 = vcombine.high %v1342_v34, %v1346_v55  ;;  %v1206_v38 = vld [vmem:[#allocation12 + $0x1218] sm:$0xff]  ;;  %v16104_v46 = vcombine.low %v1342_v34, %v1346_v55 }
 0x59d   :  { %8022 = vmatprep.subr.bf16.mxu1 %v16137_v45  ;;  %v1210_v0 = vld [vmem:[#allocation12 + $0x1238] sm:$0xff]  ;;  %v15976_v45 = vcombine.low %v1214_v23, %v1218_v29 }
 0x59e   :  { %7982 = vmatpush2.bf16.msra.mxu0 %v16008_v62  ;;  %v1334_v52 = vld [vmem:[#allocation12 + $0x1618] sm:$0xff]  ;;  %v15969_v49 = vcombine.high %v1206_v38, %v1210_v0 }
 0x59f   :  { %7983 = vmatprep.subr.bf16.mxu0 %v16001_v47  ;;  %v1338_v43 = vld [vmem:[#allocation12 + $0x1638] sm:$0xff]  ;;  %v8148_v47 = vadd.f32 %v8147_v44, %v8146_v30 }
 0x5a0   :  { %8023 = vmatpush2.bf16.msra.mxu1 %v16136_v42  ;;  %v16097_v53 = vcombine.high %v1334_v52, %v1338_v43  ;;  %v1454_v57 = vld [vmem:[#allocation12 + $0x19d8] sm:$0xff]  ;;  %v16096_v15 = vcombine.low %v1334_v52, %v1338_v43 }
 0x5a1   :  { %8024 = vmatprep.subr.bf16.mxu1 %v16129_v59  ;;  %v1458_v61 = vld [vmem:[#allocation12 + $0x19f8] sm:$0xff]  ;;  %v15968_v59 = vcombine.low %v1206_v38, %v1210_v0 }
 0x5a2   :  { %7984 = vmatpush2.bf16.msra.mxu0 %v16000_v17  ;;  %v1582_v62 = vld [vmem:[#allocation12 + $0x1dd8] sm:$0xff]  ;;  %v16217_v1 = vcombine.high %v1454_v57, %v1458_v61 }
 0x5a3   :  { %7985 = vmatprep.subr.bf16.mxu0 %v15993_v9  ;;  %v1586_v42 = vld [vmem:[#allocation12 + $0x1df8] sm:$0xff]  ;;  %v8177_v9 = vmul.f32 0.125, %v8148_v47 }
 0x5a4   :  { %8025 = vmatpush2.bf16.msra.mxu1 %v16128_v33  ;;  %v16345_v2 = vcombine.high %v1582_v62, %v1586_v42  ;;  %v1446_v60 = vld [vmem:[#allocation12 + $0x1998] sm:$0xff]  ;;  %v16344_v21 = vcombine.low %v1582_v62, %v1586_v42 }
 0x5a5   :  { %8026 = vmatprep.subr.bf16.mxu1 %v16121_v35  ;;  %v1450_v5 = vld [vmem:[#allocation12 + $0x19b8] sm:$0xff]  ;;  %v16216_v35 = vcombine.low %v1454_v57, %v1458_v61 }
 0x5a6   :  { %7986 = vmatpush2.bf16.msra.mxu0 %v15992_v20  ;;  %v1574_v17 = vld [vmem:[#allocation12 + $0x1d98] sm:$0xff]  ;;  %v16209_v10 = vcombine.high %v1446_v60, %v1450_v5  ;;  %v16208_v28 = vcombine.low %v1446_v60, %v1450_v5 }
 0x5a7   :  { %7987 = vmatprep.subr.bf16.mxu0 %v15985_v4  ;;  %v1578_v33 = vld [vmem:[#allocation12 + $0x1db8] sm:$0xff] }
 0x5a8   :  { %8027 = vmatpush2.bf16.msra.mxu1 %v16120_v22  ;;  %v16337_v11 = vcombine.high %v1574_v17, %v1578_v33  ;;  %v1438_v13 = vld [vmem:[#allocation12 + $0x1958] sm:$0xff]  ;;  %v16336_v3 = vcombine.low %v1574_v17, %v1578_v33 }
 0x5a9   :  { %8028 = vmatprep.subr.bf16.mxu1 %v16113_v41  ;;  %v1442_v48 = vld [vmem:[#allocation12 + $0x1978] sm:$0xff]  ;;  %v19995_v41 = vsub.f32 %v19954_v25, %v8177_v9 }
 0x5aa   :  { %7988 = vmatpush2.bf16.msra.mxu0 %v15984_v32  ;;  %v1566_v22 = vld [vmem:[#allocation12 + $0x1d58] sm:$0xff]  ;;  %v16201_v55 = vcombine.high %v1438_v13, %v1442_v48  ;;  %v16200_v52 = vcombine.low %v1438_v13, %v1442_v48 }
 0x5ab   :  { %7989 = vmatprep.subr.bf16.mxu0 %v15977_v37  ;;  %v1570_v4 = vld [vmem:[#allocation12 + $0x1d78] sm:$0xff]  ;;  %v8193_v0 = vmul.f32 %v19995_v41, %v19995_v41 }
 0x5ac   :  { %8029 = vmatpush2.bf16.msra.mxu1 %v16112_v31  ;;  %v16329_v25 = vcombine.high %v1566_v22, %v1570_v4  ;;  %v1430_v31 = vld [vmem:[#allocation12 + $0x1918] sm:$0xff] }
 0x5ad   :  { %8030 = vmatprep.subr.bf16.mxu1 %v16105_v50  ;;  %v1434_v37 = vld [vmem:[#allocation12 + $0x1938] sm:$0xff]  ;;  %v8216_v14 = vrot.slane %v8193_v0, 4 }
 0x5ae   :  { %7990 = vmatpush2.bf16.msra.mxu0 %v15976_v45  ;;  %v1558_v50 = vld [vmem:[#allocation12 + $0x1d18] sm:$0xff]  ;;  %v16193_v44 = vcombine.high %v1430_v31, %v1434_v37  ;;  %v16192_v62 = vcombine.low %v1430_v31, %v1434_v37 }
 0x5af   :  { %7991 = vmatprep.subr.bf16.mxu0 %v15969_v49  ;;  %v1562_v38 = vld [vmem:[#allocation12 + $0x1d38] sm:$0xff]  ;;  %v8217_v6 = vadd.f32 %v8216_v14, %v8193_v0 }
 0x5b0   :  { %8031 = vmatpush2.bf16.msra.mxu1 %v16104_v46  ;;  %v16321_v46 = vcombine.high %v1558_v50, %v1562_v38  ;;  %v1422_v49 = vld [vmem:[#allocation12 + $0x18d8] sm:$0xff]  ;;  %v16320_v42 = vcombine.low %v1558_v50, %v1562_v38 }
 0x5b1   :  { %8032 = vmatprep.subr.bf16.mxu1 %v16097_v53  ;;  %v1426_v53 = vld [vmem:[#allocation12 + $0x18f8] sm:$0xff] }
 0x5b2   :  { %7992 = vmatpush2.bf16.msra.mxu0 %v15968_v59  ;;  %v1554_v61 = vld [vmem:[#allocation12 + $0x1cf8] sm:$0xff]  ;;  %v16185_v47 = vcombine.high %v1422_v49, %v1426_v53  ;;  %v16184_v17 = vcombine.low %v1422_v49, %v1426_v53 }
 0x5b3   :  { %8043 = vmatprep.subr.bf16.mxu0 %v16217_v1  ;;  %v1418_v1 = vld [vmem:[#allocation12 + $0x18b8] sm:$0xff] }
 0x5b4   :  { %8033 = vmatpush2.bf16.msra.mxu1 %v16096_v15  ;;  %v1414_v15 = vld [vmem:[#allocation12 + $0x1898] sm:$0xff] }
 0x5b5   :  { %8084 = vmatprep.subr.bf16.mxu1 %v16345_v2  ;;  %v7749_v20 = vpop.f32.mrf.mxu0  ;;  %7994 = vmatmul.mubr.bf16.vlgmr.msra.gmra.mxu0 %v19846_v7  ;;  %v1542_v60 = vld [vmem:[#allocation12 + $0x1c98] sm:$0xff]  ;;  %v16177_v9 = vcombine.high %v1414_v15, %v1418_v1 }
 0x5b6   :  { %v7750_v23 = vadd.f32 %v7749_v20, %v19979_v12  ;;  %8044 = vmatpush1.bf16.msra.mxu0 %v16216_v35  ;;  %8075 = vmatprep.mubr.bf16.mxu0 %v19850_v18  ;;  %v16328_v18 = vcombine.low %v1566_v22, %v1570_v4  ;;  %v1546_v5 = vld [vmem:[#allocation12 + $0x1cb8] sm:$0xff]  ;;  %v8218_v20 = vrot.slane %v8217_v6, 2  ;;  %v16176_v22 = vcombine.low %v1414_v15, %v1418_v1 }
 0x5b7   :  { %v7790_v29 = vpop.f32.mrf.mxu1  ;;  %8035 = vmatmul.mubr.bf16.vlgmr.msra.gmra.mxu1 %v19848_v8  ;;  %v7751_v34 = vpop.f32.mrf.mxu0  ;;  %8045 = vmatprep.subr.bf16.mxu0 %v16209_v10  ;;  %v8191_v8 = vmul.f32 %v19991_v40, %v19991_v40  ;;  %v16305_v35 = vcombine.high %v1542_v60, %v1546_v5  ;;  %v1410_v10 = vld [vmem:[#allocation12 + $0x1878] sm:$0xff]  ;;  %v16304_v4 = vcombine.low %v1542_v60, %v1546_v5  ;;  %v8125_v5 = vrot.slane %v19903_v63, 4 }
 0x5b8   :  { %8085 = vmatpush1.bf16.msra.mxu1 %v16344_v21  ;;  %v19999_v30 = vadd.f32 %v7790_v29, %v7750_v23  ;;  %v7752_v7 = vadd.f32 %v7751_v34, %v19984_v24  ;;  %8116 = vmatprep.mubr.bf16.mxu1 %v19853_v19  ;;  %v1550_v19 = vld [vmem:[#allocation12 + $0x1cd8] sm:$0xff] }
 0x5b9   :  { %v7792_v32 = vpop.f32.mrf.mxu1  ;;  %8086 = vmatprep.subr.bf16.mxu1 %v16337_v11  ;;  %v7753_v12 = vpop.f32.mrf.mxu0  ;;  %v8204_v57 = vrot.slane %v8191_v8, 4  ;;  %v16313_v59 = vcombine.high %v1550_v19, %v1554_v61  ;;  %v16312_v33 = vcombine.low %v1550_v19, %v1554_v61  ;;  %v1406_v21 = vld [vmem:[#allocation12 + $0x1858] sm:$0xff] }
 0x5ba   :  { %v20008_v39 = vadd.f32 %v7792_v32, %v7752_v7  ;;  %8046 = vmatpush1.bf16.msra.mxu0 %v16208_v28  ;;  %v1534_v13 = vld [vmem:[#allocation12 + $0x1c58] sm:$0xff]  ;;  %v16169_v23 = vcombine.high %v1406_v21, %v1410_v10  ;;  %v8219_v32 = vadd.f32 %v8218_v20, %v8217_v6 }
 0x5bb   :  { %v7794_v24 = vpop.f32.mrf.mxu1  ;;  %v7754_v43 = vpop.f32.mrf.mxu0  ;;  %8047 = vmatprep.subr.bf16.mxu0 %v16201_v55  ;;  %v8205_v2 = vadd.f32 %v8204_v57, %v8191_v8  ;;  %v1538_v48 = vld [vmem:[#allocation12 + $0x1c78] sm:$0xff] }
 0x5bc   :  { %8087 = vmatpush1.bf16.msra.mxu1 %v16336_v3  ;;  %v16297_v29 = vcombine.high %v1534_v13, %v1538_v48  ;;  %v1398_v28 = vld [vmem:[#allocation12 + $0x1818] sm:$0xff]  ;;  %v16296_v31 = vcombine.low %v1534_v13, %v1538_v48  ;;  %v8155_v48 = vrot.slane %v20008_v39, 4 }
 0x5bd   :  { %v7795_v45 = vpop.f32.mrf.mxu1  ;;  %8088 = vmatprep.subr.bf16.mxu1 %v16329_v25  ;;  %v8206_v11 = vrot.slane %v8205_v2, 2  ;;  %v1402_v34 = vld [vmem:[#allocation12 + $0x1838] sm:$0xff]  ;;  %v16168_v25 = vcombine.low %v1406_v21, %v1410_v10 }
 0x5be   :  { %8048 = vmatpush1.bf16.msra.mxu0 %v16200_v52  ;;  %v1526_v55 = vld [vmem:[#allocation12 + $0x1c18] sm:$0xff]  ;;  %v16161_v37 = vcombine.high %v1398_v28, %v1402_v34  ;;  %v8220_v52 = vrot.slane %v8219_v32, 1  ;;  %v16160_v43 = vcombine.low %v1398_v28, %v1402_v34 }
 0x5bf   :  { %8049 = vmatprep.subr.bf16.mxu0 %v16193_v44  ;;  %v8207_v3 = vadd.f32 %v8206_v11, %v8205_v2  ;;  %v1530_v7 = vld [vmem:[#allocation12 + $0x1c38] sm:$0xff] }
 0x5c0   :  { %8089 = vmatpush1.bf16.msra.mxu1 %v16328_v18  ;;  %v16289_v8 = vcombine.high %v1526_v55, %v1530_v7  ;;  %v1518_v12 = vld [vmem:[#allocation12 + $0x1bd8] sm:$0xff]  ;;  %v16288_v18 = vcombine.low %v1526_v55, %v1530_v7  ;;  %v8221_v61 = vadd.f32 %v8220_v52, %v8219_v32 }
 0x5c1   :  { %8090 = vmatprep.subr.bf16.mxu1 %v16321_v46  ;;  %v1522_v50 = vld [vmem:[#allocation12 + $0x1bf8] sm:$0xff]  ;;  %v8208_v38 = vrot.slane %v8207_v3, 1 }
 0x5c2   :  { %8050 = vmatpush1.bf16.msra.mxu0 %v16192_v62  ;;  %v1646_v0 = vld [vmem:[#allocation12 + $0x1fd8] sm:$0xff]  ;;  %v16281_v44 = vcombine.high %v1518_v12, %v1522_v50  ;;  %v16280_v14 = vcombine.low %v1518_v12, %v1522_v50  ;;  %v8249_v6 = vmul.f32 0.125, %v8221_v61 }
 0x5c3   :  { %8051 = vmatprep.subr.bf16.mxu0 %v16185_v47  ;;  %v1650_v24 = vld [vmem:[#allocation12 + $0x1ff8] sm:$0xff]  ;;  %v8209_v53 = vadd.f32 %v8208_v38, %v8207_v3 }
 0x5c4   :  { %8091 = vmatpush1.bf16.msra.mxu1 %v16320_v42  ;;  %v16409_v45 = vcombine.high %v1646_v0, %v1650_v24  ;;  %v1510_v46 = vld [vmem:[#allocation12 + $0x1b98] sm:$0xff]  ;;  %v16408_v62 = vcombine.low %v1646_v0, %v1650_v24 }
 0x5c5   :  { %8092 = vmatprep.subr.bf16.mxu1 %v16313_v59  ;;  %v1514_v49 = vld [vmem:[#allocation12 + $0x1bb8] sm:$0xff]  ;;  %v8247_v1 = vmul.f32 0.125, %v8209_v53 }
 0x5c6   :  { %8052 = vmatpush1.bf16.msra.mxu0 %v16184_v17  ;;  %v1638_v57 = vld [vmem:[#allocation12 + $0x1f98] sm:$0xff]  ;;  %v16273_v42 = vcombine.high %v1510_v46, %v1514_v49  ;;  %v16272_v17 = vcombine.low %v1510_v46, %v1514_v49 }
 0x5c7   :  { %8053 = vmatprep.subr.bf16.mxu0 %v16177_v9  ;;  %v1642_v19 = vld [vmem:[#allocation12 + $0x1fb8] sm:$0xff]  ;;  %v8255_v13 = vadd.f32 1e-05, %v8247_v1 }
 0x5c8   :  { %8093 = vmatpush1.bf16.msra.mxu1 %v16312_v33  ;;  %v16401_v47 = vcombine.high %v1638_v57, %v1642_v19  ;;  %v1502_v59 = vld [vmem:[#allocation12 + $0x1b58] sm:$0xff]  ;;  %v16400_v33 = vcombine.low %v1638_v57, %v1642_v19 }
 0x5c9   :  { %8094 = vmatprep.subr.bf16.mxu1 %v16305_v35  ;;  %v1506_v15 = vld [vmem:[#allocation12 + $0x1b78] sm:$0xff]  ;;  %v8137_v35 = vrot.slane %v19949_v58, 4  ;;  %18618 = vrsqrt.f32 %v8255_v13 }
 0x5ca   :  { %8054 = vmatpush1.bf16.msra.mxu0 %v16176_v22  ;;  %v1630_v2 = vld [vmem:[#allocation12 + $0x1f58] sm:$0xff]  ;;  %v16265_v9 = vcombine.high %v1502_v59, %v1506_v15 }
 0x5cb   :  { %8055 = vmatprep.subr.bf16.mxu0 %v16169_v23  ;;  %v1634_v60 = vld [vmem:[#allocation12 + $0x1f78] sm:$0xff]  ;;  %v8257_v23 = vadd.f32 1e-05, %v8249_v6  ;;  %v8138_v3 = vadd.f32 %v8137_v35, %v19949_v58 }
 0x5cc   :  { %8095 = vmatpush1.bf16.msra.mxu1 %v16304_v4  ;;  %v16393_v21 = vcombine.high %v1630_v2, %v1634_v60  ;;  %v1494_v10 = vld [vmem:[#allocation12 + $0x1b18] sm:$0xff]  ;;  %v8126_v4 = vadd.f32 %v8125_v5, %v19903_v63  ;;  %v16392_v28 = vcombine.low %v1630_v2, %v1634_v60 }
 0x5cd   :  { %8096 = vmatprep.subr.bf16.mxu1 %v16297_v29  ;;  %v1498_v11 = vld [vmem:[#allocation12 + $0x1b38] sm:$0xff]  ;;  %v16264_v29 = vcombine.low %v1502_v59, %v1506_v15  ;;  %18620 = vrsqrt.f32 %v8257_v23  ;;  %v8139_v0 = vrot.slane %v8138_v3, 2 }
 0x5ce   :  { %8056 = vmatpush1.bf16.msra.mxu0 %v16168_v25  ;;  %v1622_v20 = vld [vmem:[#allocation12 + $0x1f18] sm:$0xff]  ;;  %v16257_v34 = vcombine.high %v1494_v10, %v1498_v11  ;;  %v8156_v25 = vadd.f32 %v8155_v48, %v20008_v39  ;;  %v16256_v12 = vcombine.low %v1494_v10, %v1498_v11 }
 0x5cf   :  { %8057 = vmatprep.subr.bf16.mxu0 %v16161_v37  ;;  %v1626_v22 = vld [vmem:[#allocation12 + $0x1f38] sm:$0xff]  ;;  %v8140_v19 = vadd.f32 %v8139_v0, %v8138_v3 }
 0x5d0   :  { %8097 = vmatpush1.bf16.msra.mxu1 %v16296_v31  ;;  %v16385_v55 = vcombine.high %v1622_v20, %v1626_v22  ;;  %v1486_v7 = vld [vmem:[#allocation12 + $0x1ad8] sm:$0xff]  ;;  %v16384_v50 = vcombine.low %v1622_v20, %v1626_v22 }
 0x5d1   :  { %8098 = vmatprep.subr.bf16.mxu1 %v16289_v8  ;;  %v1490_v32 = vld [vmem:[#allocation12 + $0x1af8] sm:$0xff]  ;;  %v8127_v8 = vrot.slane %v8126_v4, 2  ;;  %v8141_v5 = vrot.slane %v8140_v19, 1 }
 0x5d2   :  { %8058 = vmatpush1.bf16.msra.mxu0 %v16160_v43  ;;  %v1614_v31 = vld [vmem:[#allocation12 + $0x1ed8] sm:$0xff]  ;;  %v16249_v38 = vcombine.high %v1486_v7, %v1490_v32  ;;  %v16248_v49 = vcombine.low %v1486_v7, %v1490_v32 }
 0x5d3   :  { %8059 = vmatprep.subr.bf16.mxu0 %v16281_v44  ;;  %v1618_v37 = vld [vmem:[#allocation12 + $0x1ef8] sm:$0xff]  ;;  %v8128_v46 = vadd.f32 %v8127_v8, %v8126_v4  ;;  %v8142_v4 = vadd.f32 %v8141_v5, %v8140_v19  ;;  %v1683_v8 = vsub.s32 7, %v19858_v26 }
 0x5d4   :  { %8099 = vmatpush1.bf16.msra.mxu1 %v16288_v18  ;;  %v16377_v24 = vcombine.high %v1614_v31, %v1618_v37  ;;  %v1478_v52 = vld [vmem:[#allocation12 + $0x1a98] sm:$0xff]  ;;  %v8157_v18 = vrot.slane %v8156_v25, 2  ;;  %v16376_v53 = vcombine.low %v1614_v31, %v1618_v37 }
 0x5d5   :  { %8100 = vmatprep.subr.bf16.mxu1 %v16409_v45  ;;  %v1482_v43 = vld [vmem:[#allocation12 + $0x1ab8] sm:$0xff]  ;;  %v8129_v15 = vrot.slane %v8128_v46, 1  ;;  %v8176_v31 = vmul.f32 0.125, %v8142_v4 }
 0x5d6   :  { %8060 = vmatpush2.bf16.msra.mxu0 %v16280_v14  ;;  %v1606_v44 = vld [vmem:[#allocation12 + $0x1e98] sm:$0xff]  ;;  %v16241_v57 = vcombine.high %v1478_v52, %v1482_v43  ;;  %v16240_v1 = vcombine.low %v1478_v52, %v1482_v43  ;;  %v18619_v10 = vpop.eup %18618 }
 0x5d7   :  { %8061 = vmatprep.subr.bf16.mxu0 %v16273_v42  ;;  %v1610_v45 = vld [vmem:[#allocation12 + $0x1eb8] sm:$0xff]  ;;  %v8158_v42 = vadd.f32 %v8157_v18, %v8156_v25  ;;  %v8130_v11 = vadd.f32 %v8129_v15, %v8128_v46  ;;  %v20024_v43 = vsub.f32 %v19949_v58, %v8176_v31 }
 0x5d8   :  { %8101 = vmatpush2.bf16.msra.mxu1 %v16408_v62  ;;  %v16369_v61 = vcombine.high %v1606_v44, %v1610_v45  ;;  %v1470_v14 = vld [vmem:[#allocation12 + $0x1a58] sm:$0xff]  ;;  %v16368_v2 = vcombine.low %v1606_v44, %v1610_v45 }
 0x5d9   :  { %8102 = vmatprep.subr.bf16.mxu1 %v16401_v47  ;;  %v1474_v62 = vld [vmem:[#allocation12 + $0x1a78] sm:$0xff] }
 0x5da   :  { %8062 = vmatpush2.bf16.msra.mxu0 %v16272_v17  ;;  %v1598_v47 = vld [vmem:[#allocation12 + $0x1e58] sm:$0xff]  ;;  %v16233_v60 = vcombine.high %v1470_v14, %v1474_v62  ;;  %v16232_v13 = vcombine.low %v1470_v14, %v1474_v62  ;;  %v18621_v48 = vpop.eup %18620  ;;  %v8192_v14 = vmul.f32 %v20024_v43, %v20024_v43 }
 0x5db   :  { %8063 = vmatprep.subr.bf16.mxu0 %v16265_v9  ;;  %v1602_v59 = vld [vmem:[#allocation12 + $0x1e78] sm:$0xff]  ;;  %v8159_v9 = vrot.slane %v8158_v42, 1  ;;  %v8273_v7 = vmul.f32 %v18621_v48, %v19995_v41 }
 0x5dc   :  { %8103 = vmatpush2.bf16.msra.mxu1 %v16400_v33  ;;  %v16361_v6 = vcombine.high %v1598_v47, %v1602_v59  ;;  %v1462_v17 = vld [vmem:[#allocation12 + $0x1a18] sm:$0xff]  ;;  %v16360_v20 = vcombine.low %v1598_v47, %v1602_v59 }
 0x5dd   :  { %8104 = vmatprep.subr.bf16.mxu1 %v16393_v21  ;;  %v1466_v33 = vld [vmem:[#allocation12 + $0x1a38] sm:$0xff]  ;;  %v8281_v52 = vmax.f32 %v8273_v7, 0.0 }
 0x5de   :  { %8064 = vmatpush2.bf16.msra.mxu0 %v16264_v29  ;;  %v1590_v35 = vld [vmem:[#allocation12 + $0x1e18] sm:$0xff]  ;;  %v16225_v22 = vcombine.high %v1462_v17, %v1466_v33  ;;  %v8160_v29 = vadd.f32 %v8159_v9, %v8158_v42  ;;  %v16224_v3 = vcombine.low %v1462_v17, %v1466_v33  ;;  %v8210_v9 = vrot.slane %v8192_v14, 4 }
 0x5df   :  { %8065 = vmatprep.subr.bf16.mxu0 %v16257_v34  ;;  %v1594_v21 = vld [vmem:[#allocation12 + $0x1e38] sm:$0xff]  ;;  %v8174_v34 = vmul.f32 0.125, %v8130_v11  ;;  %v20035_v58 = vpack.c.bf16 %v8281_v52, %v8281_v52 }
 0x5e0   :  { %8105 = vmatpush2.bf16.msra.mxu1 %v16392_v28  ;;  %v16353_v23 = vcombine.high %v1590_v35, %v1594_v21  ;;  %v8271_v28 = vmul.f32 %v18619_v10, %v19991_v40  ;;  %v16352_v32 = vcombine.low %v1590_v35, %v1594_v21  ;;  %v17532_v25 = vld [vmem:[#allocation15 + $0xe4] ss:$16 sps:$4 sm:$0xff]   ;;  %v17533_v41 = vld [vmem:[#allocation15 + $0x2e0] ss:$16 sps:$4 sm:$0xff]  }
 0x5e1   :  { %8106 = vmatprep.subr.bf16.mxu1 %v16385_v55  ;;  %v1679_v55 = vsub.s32 6, %v19858_v26  ;;  %v17535_v37 = vld [vmem:[#allocation15 + $0x2e4] ss:$16 sps:$4 sm:$0xff]   ;;  %v20021_v40 = vsub.f32 %v19903_v63, %v8174_v34  ;;  %v17536_v19 = vld [vmem:[#allocation15 + $0xc0] ss:$16 sps:$4 sm:$0xff]  }
 0x5e2   :  { %8066 = vmatpush2.bf16.msra.mxu0 %v16256_v12  ;;  %v8179_v12 = vmul.f32 0.125, %v8160_v29  ;;  %v17538_v44 = vld [vmem:[#allocation15 + $0xc4] ss:$16 sps:$4 sm:$0xff]   ;;  %v17542_v5 = vld [vmem:[#allocation15 + $0xa0] ss:$16 sps:$4 sm:$0xff]  }
 0x5e3   :  { %8067 = vmatprep.subr.bf16.mxu0 %v16249_v38  ;;  %v18674_v38 = vld [vmem:[#allocation14] sm:$0xff]  ;;  %v17541_v46 = vld [vmem:[#allocation15 + $0x2c4] ss:$16 sps:$4 sm:$0xff]   ;;  %v17545_v17 = vld [vmem:[#allocation15 + $0x2a0] ss:$16 sps:$4 sm:$0xff]  }
 0x5e4   :  { %8107 = vmatpush2.bf16.msra.mxu1 %v16384_v50  ;;  %v8279_v50 = vmax.f32 %v8271_v28, 0.0  ;;  %v1680_v0 = vrot.slane %v18674_v38, %v1679_v55  ;;  %v1684_v18 = vrot.slane %v18674_v38, %v1683_v8  ;;  %v20027_v26 = vsub.f32 %v20008_v39, %v8179_v12  ;;  %v17550_v33 = vld [vmem:[#allocation15 + $0x84] ss:$16 sps:$4 sm:$0xff]   ;;  %v17551_v48 = vld [vmem:[#allocation15 + $0x280] ss:$16 sps:$4 sm:$0xff]  }
 0x5e5   :  { %8108 = vmatprep.subr.bf16.mxu1 %v16377_v24  ;;  %v17530_v24 = vld [vmem:[#allocation15 + $0xe0] ss:$16 sps:$4 sm:$0xff]   ;;  %v17553_v21 = vld [vmem:[#allocation15 + $0x284] ss:$16 sps:$4 sm:$0xff]  }
 0x5e6   :  { %8068 = vmatpush2.bf16.msra.mxu0 %v16248_v49  ;;  %v20030_v63 = vpack.c.bf16 %v8279_v50, %v8279_v50  ;;  %v8190_v49 = vmul.f32 %v20021_v40, %v20021_v40  ;;  %v8195_v59 = vmul.f32 %v20027_v26, %v20027_v26  ;;  %v17559_v4 = vld [vmem:[#allocation15 + $0x264] ss:$16 sps:$4 sm:$0xff]   ;;  %v17554_v28 = vld [vmem:[#allocation15 + $0x60] ss:$16 sps:$4 sm:$0xff]  }
 0x5e7   :  { %8069 = vmatprep.subr.bf16.mxu0 %v16241_v57  ;;  %v17557_v34 = vld [vmem:[#allocation15 + $0x260] ss:$16 sps:$4 sm:$0xff]   ;;  %v17565_v7 = vld [vmem:[#allocation15 + $0x244] ss:$16 sps:$4 sm:$0xff]  }
 0x5e8   :  { %8109 = vmatpush2.bf16.msra.mxu1 %v16376_v53  ;;  %v8228_v10 = vrot.slane %v8195_v59, 4  ;;  %v17560_v31 = vld [vmem:[#allocation15 + $0x40] ss:$16 sps:$4 sm:$0xff]   ;;  %v17568_v8 = vld [vmem:[#allocation15 + $0x24] ss:$16 sps:$4 sm:$0xff]  }
 0x5e9   :  { %8110 = vmatprep.subr.bf16.mxu1 %v16369_v61  ;;  %v17539_v61 = vld [vmem:[#allocation15 + $0x2c0] ss:$16 sps:$4 sm:$0xff]   ;;  %v17571_v50 = vld [vmem:[#allocation15 + $0x224] ss:$16 sps:$4 sm:$0xff]  }
 0x5ea   :  { %8070 = vmatpush2.bf16.msra.mxu0 %v16240_v1  ;;  %v8198_v1 = vrot.slane %v8190_v49, 4  ;;  %v17569_v52 = vld [vmem:[#allocation15 + $0x220] ss:$16 sps:$4 sm:$0xff]  }
 0x5eb   :  { %8071 = vmatprep.subr.bf16.mxu0 %v16233_v60 }
 0x5ec   :  { %8111 = vmatpush2.bf16.msra.mxu1 %v16368_v2  ;;  %v8199_v11 = vadd.f32 %v8198_v1, %v8190_v49  ;;  %v17572_v49 = vld [vmem:[#allocation15] ss:$16 sps:$4 sm:$0xff]  }
 0x5ed   :  { %8112 = vmatprep.subr.bf16.mxu1 %v16361_v6 }
 0x5ee   :  { %8072 = vmatpush2.bf16.msra.mxu0 %v16232_v13  ;;  %v17548_v13 = vld [vmem:[#allocation15 + $0x80] ss:$16 sps:$4 sm:$0xff]   ;;  %v8200_v29 = vrot.slane %v8199_v11, 2 }
 0x5ef   :  { %8073 = vmatprep.subr.bf16.mxu0 %v16225_v22  ;;  %v8211_v22 = vadd.f32 %v8210_v9, %v8192_v14  ;;  %v17578_v14 = vld [vmem:[#allocation15 + $0x1e0] ss:$16 sps:$4 sm:$0xff]   ;;  %v17595_v9 = vld [vmem:[#allocation15 + $0x3a4] ss:$16 sps:$4 sm:$0xff]  }
 0x5f0   :  { %8113 = vmatpush2.bf16.msra.mxu1 %v16360_v20  ;;  %v17556_v20 = vld [vmem:[#allocation15 + $0x64] ss:$16 sps:$4 sm:$0xff]  }
 0x5f1   :  { %8114 = vmatprep.subr.bf16.mxu1 %v16353_v23  ;;  %v8229_v23 = vadd.f32 %v8228_v10, %v8195_v59  ;;  %v8212_v55 = vrot.slane %v8211_v22, 2  ;;  %v17589_v59 = vld [vmem:[#allocation15 + $0x3c4] ss:$16 sps:$4 sm:$0xff]  }
 0x5f2   :  { %8074 = vmatpush2.bf16.msra.mxu0 %v16224_v3  ;;  %v17562_v3 = vld [vmem:[#allocation15 + $0x44] ss:$16 sps:$4 sm:$0xff]  }
 0x5f3   :  { %9852 = vmatprep.subr.bf16.mxu0 %v17532_v25  ;;  %v8201_v25 = vadd.f32 %v8200_v29, %v8199_v11  ;;  %v8213_v12 = vadd.f32 %v8212_v55, %v8211_v22  ;;  %v17593_v11 = vld [vmem:[#allocation15 + $0x3a0] ss:$16 sps:$4 sm:$0xff]   ;;  %v17607_v29 = vld [vmem:[#allocation15 + $0x364] ss:$16 sps:$4 sm:$0xff]  }
 0x5f4   :  { %8115 = vmatpush2.bf16.msra.mxu1 %v16352_v32  ;;  %v8230_v32 = vrot.slane %v8229_v23, 2  ;;  %v17610_v55 = vld [vmem:[#allocation15 + $0x144] ss:$16 sps:$4 sm:$0xff]  }
 0x5f5   :  { %9893 = vmatprep.subr.bf16.mxu1 %v17535_v37  ;;  %v7831_v45 = vpop.f32.mrf.mxu0  ;;  %8076 = vmatmul.mubr.bf16.vlgmr.msra.gmra.mxu0 %v19866_v54  ;;  %v17544_v54 = vld [vmem:[#allocation15 + $0xa4] ss:$16 sps:$4 sm:$0xff]   ;;  %v17563_v37 = vld [vmem:[#allocation15 + $0x240] ss:$16 sps:$4 sm:$0xff]  }
 0x5f6   :  { %v7832_v53 = vadd.f32 %v7831_v45, %v1680_v0  ;;  %9853 = vmatpush1.bf16.msra.mxu0 %v17530_v24  ;;  %9884 = vmatprep.mubr.bf16.mxu0 %v20030_v63  ;;  %v8231_v38 = vadd.f32 %v8230_v32, %v8229_v23  ;;  %v8202_v0 = vrot.slane %v8201_v25, 1  ;;  %v17566_v24 = vld [vmem:[#allocation15 + $0x20] ss:$16 sps:$4 sm:$0xff]   ;;  %v17604_v23 = vld [vmem:[#allocation15 + $0x164] ss:$16 sps:$4 sm:$0xff]  }
 0x5f7   :  { %v7872_v57 = vpop.f32.mrf.mxu1  ;;  %8117 = vmatmul.mubr.bf16.vlgmr.msra.gmra.mxu1 %v19869_v56  ;;  %v7833_v39 = vpop.f32.mrf.mxu0  ;;  %9854 = vmatprep.subr.bf16.mxu0 %v17538_v44  ;;  %v17547_v56 = vld [vmem:[#allocation15 + $0x2a4] ss:$16 sps:$4 sm:$0xff]   ;;  %v17608_v32 = vld [vmem:[#allocation15 + $0x140] ss:$16 sps:$4 sm:$0xff]  }
 0x5f8   :  { %9894 = vmatpush1.bf16.msra.mxu1 %v17533_v41  ;;  %v20040_v62 = vadd.f32 %v7872_v57, %v7832_v53  ;;  %9925 = vmatprep.mubr.bf16.mxu1 %v20035_v58  ;;  %v7834_v42 = vadd.f32 %v7833_v39, %v1684_v18  ;;  %v17574_v41 = vld [vmem:[#allocation15 + $0x4] ss:$16 sps:$4 sm:$0xff]   ;;  %v8214_v18 = vrot.slane %v8213_v12, 1  ;;  %v8232_v45 = vrot.slane %v8231_v38, 1  ;;  %v17575_v53 = vld [vmem:[#allocation15 + $0x200] ss:$16 sps:$4 sm:$0xff]  }
 0x5f9   :  { %v7874_v47 = vpop.f32.mrf.mxu1  ;;  %v7835_v15 = vpop.f32.mrf.mxu0  ;;  %9895 = vmatprep.subr.bf16.mxu1 %v17541_v46  ;;  %v17577_v44 = vld [vmem:[#allocation15 + $0x204] ss:$16 sps:$4 sm:$0xff]   ;;  %v8203_v46 = vadd.f32 %v8202_v0, %v8201_v25  ;;  %v17614_v0 = vld [vmem:[#allocation15 + $0x120] ss:$16 sps:$4 sm:$0xff]  }
 0x5fa   :  { %v20045_v2 = vadd.f32 %v7874_v47, %v7834_v42  ;;  %9855 = vmatpush1.bf16.msra.mxu0 %v17536_v19  ;;  %v17580_v57 = vld [vmem:[#allocation15 + $0x1e4] ss:$16 sps:$4 sm:$0xff]   ;;  %v8215_v19 = vadd.f32 %v8214_v18, %v8213_v12  ;;  %v17581_v42 = vld [vmem:[#allocation15 + $0x3e0] ss:$16 sps:$4 sm:$0xff]  }
 0x5fb   :  { %v7876_v60 = vpop.f32.mrf.mxu1  ;;  %v7836_v6 = vpop.f32.mrf.mxu0  ;;  %9856 = vmatprep.subr.bf16.mxu0 %v17544_v54  ;;  %v17583_v39 = vld [vmem:[#allocation15 + $0x3e4] ss:$16 sps:$4 sm:$0xff]   ;;  %v8246_v54 = vmul.f32 0.125, %v8203_v46 }
 0x5fc   :  { %9896 = vmatpush1.bf16.msra.mxu1 %v17539_v61  ;;  %v8233_v61 = vadd.f32 %v8232_v45, %v8231_v38  ;;  %v17586_v47 = vld [vmem:[#allocation15 + $0x1c4] ss:$16 sps:$4 sm:$0xff]   ;;  %v17584_v60 = vld [vmem:[#allocation15 + $0x1c0] ss:$16 sps:$4 sm:$0xff]  }
 0x5fd   :  { %v7877_v35 = vpop.f32.mrf.mxu1  ;;  %9897 = vmatprep.subr.bf16.mxu1 %v17547_v56  ;;  %v8248_v56 = vmul.f32 0.125, %v8215_v19  ;;  %v8254_v1 = vadd.f32 1e-05, %v8246_v54  ;;  %v17587_v6 = vld [vmem:[#allocation15 + $0x3c0] ss:$16 sps:$4 sm:$0xff]  }
 0x5fe   :  { %9857 = vmatpush1.bf16.msra.mxu0 %v17542_v5  ;;  %v8251_v15 = vmul.f32 0.125, %v8233_v61  ;;  %v8149_v5 = vrot.slane %v19999_v30, 4  ;;  %v17619_v12 = vld [vmem:[#allocation15 + $0x324] ss:$16 sps:$4 sm:$0xff]   ;;  %v17623_v19 = vld [vmem:[#allocation15 + $0x300] ss:$16 sps:$4 sm:$0xff]  }
 0x5ff   :  { %9858 = vmatprep.subr.bf16.mxu0 %v17550_v33  ;;  %v8256_v33 = vadd.f32 1e-05, %v8248_v56  ;;  %18622 = vrsqrt.f32 %v8254_v1  ;;  %v17622_v18 = vld [vmem:[#allocation15 + $0x104] ss:$16 sps:$4 sm:$0xff]   ;;  %v17722_v56 = vld [vmem:[#allocation15 + $0x6e0] ss:$16 sps:$4 sm:$0xff]  }
 0x600   :  { %9898 = vmatpush1.bf16.msra.mxu1 %v17545_v17  ;;  %v17592_v17 = vld [vmem:[#allocation15 + $0x1a4] ss:$16 sps:$4 sm:$0xff]   ;;  %v8259_v35 = vadd.f32 1e-05, %v8251_v15  ;;  %v8150_v10 = vadd.f32 %v8149_v5, %v19999_v30 }
 0x601   :  { %9899 = vmatprep.subr.bf16.mxu1 %v17553_v21  ;;  %v17590_v21 = vld [vmem:[#allocation15 + $0x1a0] ss:$16 sps:$4 sm:$0xff]   ;;  %18624 = vrsqrt.f32 %v8256_v33  ;;  %v17625_v45 = vld [vmem:[#allocation15 + $0x304] ss:$16 sps:$4 sm:$0xff]  }
 0x602   :  { %9859 = vmatpush1.bf16.msra.mxu0 %v17548_v13  ;;  %v17598_v13 = vld [vmem:[#allocation15 + $0x184] ss:$16 sps:$4 sm:$0xff]   ;;  %18626 = vrsqrt.f32 %v8259_v35  ;;  %v8151_v22 = vrot.slane %v8150_v10, 2 }
 0x603   :  { %9860 = vmatprep.subr.bf16.mxu0 %v17556_v20  ;;  %v17596_v20 = vld [vmem:[#allocation15 + $0x180] ss:$16 sps:$4 sm:$0xff]   ;;  %v17724_v61 = vld [vmem:[#allocation15 + $0x6e4] ss:$16 sps:$4 sm:$0xff]  }
 0x604   :  { %9900 = vmatpush1.bf16.msra.mxu1 %v17551_v48  ;;  %v17601_v48 = vld [vmem:[#allocation15 + $0x384] ss:$16 sps:$4 sm:$0xff]  }
 0x605   :  { %9901 = vmatprep.subr.bf16.mxu1 %v17559_v4  ;;  %v17599_v4 = vld [vmem:[#allocation15 + $0x380] ss:$16 sps:$4 sm:$0xff]   ;;  %v17730_v5 = vld [vmem:[#allocation15 + $0x6c4] ss:$16 sps:$4 sm:$0xff]  }
 0x606   :  { %9861 = vmatpush1.bf16.msra.mxu0 %v17554_v28  ;;  %v17602_v28 = vld [vmem:[#allocation15 + $0x160] ss:$16 sps:$4 sm:$0xff]   ;;  %v17634_v33 = vld [vmem:[#allocation15 + $0x4a4] ss:$16 sps:$4 sm:$0xff]  }
 0x607   :  { %9862 = vmatprep.subr.bf16.mxu0 %v17562_v3  ;;  %v17605_v3 = vld [vmem:[#allocation15 + $0x360] ss:$16 sps:$4 sm:$0xff]  }
 0x608   :  { %9902 = vmatpush1.bf16.msra.mxu1 %v17557_v34  ;;  %v8152_v34 = vadd.f32 %v8151_v22, %v8150_v10 }
 0x609   :  { %9903 = vmatprep.subr.bf16.mxu1 %v17565_v7  ;;  %v17613_v7 = vld [vmem:[#allocation15 + $0x344] ss:$16 sps:$4 sm:$0xff]  }
 0x60a   :  { %9863 = vmatpush1.bf16.msra.mxu0 %v17560_v31  ;;  %v8153_v25 = vrot.slane %v8152_v34, 1  ;;  %v17611_v31 = vld [vmem:[#allocation15 + $0x340] ss:$16 sps:$4 sm:$0xff]  }
 0x60b   :  { %9864 = vmatprep.subr.bf16.mxu0 %v17568_v8 }
 0x60c   :  { %9904 = vmatpush1.bf16.msra.mxu1 %v17563_v37  ;;  %v17616_v37 = vld [vmem:[#allocation15 + $0x124] ss:$16 sps:$4 sm:$0xff]   ;;  %v18623_v8 = vpop.eup %18622 }
 0x60d   :  { %9905 = vmatprep.subr.bf16.mxu1 %v17571_v50 }
 0x60e   :  { %9865 = vmatpush1.bf16.msra.mxu0 %v17566_v24  ;;  %v18625_v50 = vpop.eup %18624  ;;  %v8270_v24 = vmul.f32 %v18623_v8, %v20021_v40  ;;  %v17746_v8 = vld [vmem:[#allocation15 + $0x660] ss:$16 sps:$4 sm:$0xff]  }
 0x60f   :  { %9866 = vmatprep.subr.bf16.mxu0 %v17574_v41  ;;  %v18627_v38 = vpop.eup %18626  ;;  %v17617_v41 = vld [vmem:[#allocation15 + $0x320] ss:$16 sps:$4 sm:$0xff]  }
 0x610   :  { %9906 = vmatpush1.bf16.msra.mxu1 %v17569_v52  ;;  %v8154_v52 = vadd.f32 %v8153_v25, %v8152_v34  ;;  %v8275_v46 = vmul.f32 %v18627_v38, %v20027_v26  ;;  %v17631_v26 = vld [vmem:[#allocation15 + $0x4c4] ss:$16 sps:$4 sm:$0xff]  }
 0x611   :  { %9907 = vmatprep.subr.bf16.mxu1 %v17577_v44  ;;  %v8272_v44 = vmul.f32 %v18625_v50, %v20024_v43  ;;  %v17742_v34 = vld [vmem:[#allocation15 + $0x684] ss:$16 sps:$4 sm:$0xff]  }
 0x612   :  { %9867 = vmatpush1.bf16.msra.mxu0 %v17572_v49  ;;  %v17620_v49 = vld [vmem:[#allocation15 + $0x100] ss:$16 sps:$4 sm:$0xff]   ;;  %v8283_v54 = vmax.f32 %v8275_v46, 0.0  ;;  %v17748_v25 = vld [vmem:[#allocation15 + $0x664] ss:$16 sps:$4 sm:$0xff]  }
 0x613   :  { %9868 = vmatprep.subr.bf16.mxu0 %v17580_v57  ;;  %v8178_v57 = vmul.f32 0.125, %v8154_v52  ;;  %v8280_v40 = vmax.f32 %v8272_v44, 0.0  ;;  %v17754_v50 = vld [vmem:[#allocation15 + $0x644] ss:$16 sps:$4 sm:$0xff]   ;;  %v17644_v52 = vld [vmem:[#allocation15 + $0x420] ss:$16 sps:$4 sm:$0xff]  }
 0x614   :  { %9908 = vmatpush1.bf16.msra.mxu1 %v17575_v53  ;;  %v8278_v53 = vmax.f32 %v8270_v24, 0.0  ;;  %v20060_v15 = vpack.c.bf16 %v8283_v54, %v8283_v54  ;;  %v17752_v24 = vld [vmem:[#allocation15 + $0x640] ss:$16 sps:$4 sm:$0xff]   ;;  %v17649_v44 = vld [vmem:[#allocation15 + $0x404] ss:$16 sps:$4 sm:$0xff]  }
 0x615   :  { %9909 = vmatprep.subr.bf16.mxu1 %v17583_v39  ;;  %v17628_v39 = vld [vmem:[#allocation15 + $0x4e4] ss:$16 sps:$4 sm:$0xff]   ;;  %v20053_v43 = vsub.f32 %v19999_v30, %v8178_v57  ;;  %v17629_v30 = vld [vmem:[#allocation15 + $0x4c0] ss:$16 sps:$4 sm:$0xff]  }
 0x616   :  { %9869 = vmatpush2.bf16.msra.mxu0 %v17578_v14  ;;  %v17626_v14 = vld [vmem:[#allocation15 + $0x4e0] ss:$16 sps:$4 sm:$0xff]   ;;  %v17652_v57 = vld [vmem:[#allocation15 + $0x5e4] ss:$16 sps:$4 sm:$0xff]  }
 0x617   :  { %9870 = vmatprep.subr.bf16.mxu0 %v17586_v47  ;;  %v20057_v47 = vpack.c.bf16 %v8280_v40, %v8280_v40  ;;  %v17647_v46 = vld [vmem:[#allocation15 + $0x400] ss:$16 sps:$4 sm:$0xff]   ;;  %v17772_v40 = vld [vmem:[#allocation15 + $0x7e4] ss:$16 sps:$4 sm:$0xff]  }
 0x618   :  { %9910 = vmatpush2.bf16.msra.mxu1 %v17581_v42  ;;  %v20055_v42 = vpack.c.bf16 %v8278_v53, %v8278_v53  ;;  %v17655_v54 = vld [vmem:[#allocation15 + $0x5c4] ss:$16 sps:$4 sm:$0xff]  }
 0x619   :  { %9911 = vmatprep.subr.bf16.mxu1 %v17589_v59 }
 0x61a   :  { %9871 = vmatpush2.bf16.msra.mxu0 %v17584_v60 }
 0x61b   :  { %9872 = vmatprep.subr.bf16.mxu0 %v17592_v17 }
 0x61c   :  { %9912 = vmatpush2.bf16.msra.mxu1 %v17587_v6  ;;  %v8194_v6 = vmul.f32 %v20053_v43, %v20053_v43 }
 0x61d   :  { %9913 = vmatprep.subr.bf16.mxu1 %v17595_v9 }
 0x61e   :  { %9873 = vmatpush2.bf16.msra.mxu0 %v17590_v21  ;;  %v8222_v22 = vrot.slane %v8194_v6, 4 }
 0x61f   :  { %9874 = vmatprep.subr.bf16.mxu0 %v17598_v13 }
 0x620   :  { %9914 = vmatpush2.bf16.msra.mxu1 %v17593_v11 }
 0x621   :  { %9915 = vmatprep.subr.bf16.mxu1 %v17601_v48  ;;  %v17632_v48 = vld [vmem:[#allocation15 + $0x4a0] ss:$16 sps:$4 sm:$0xff]  }
 0x622   :  { %9875 = vmatpush2.bf16.msra.mxu0 %v17596_v20  ;;  %v17736_v20 = vld [vmem:[#allocation15 + $0x6a4] ss:$16 sps:$4 sm:$0xff]  }
 0x623   :  { %9876 = vmatprep.subr.bf16.mxu0 %v17604_v23  ;;  %v17637_v23 = vld [vmem:[#allocation15 + $0x484] ss:$16 sps:$4 sm:$0xff]  }
 0x624   :  { %9916 = vmatpush2.bf16.msra.mxu1 %v17599_v4 }
 0x625   :  { %9917 = vmatprep.subr.bf16.mxu1 %v17607_v29 }
 0x626   :  { %9877 = vmatpush2.bf16.msra.mxu0 %v17602_v28  ;;  %v17734_v28 = vld [vmem:[#allocation15 + $0x6a0] ss:$16 sps:$4 sm:$0xff]  }
 0x627   :  { %9878 = vmatprep.subr.bf16.mxu0 %v17610_v55  ;;  %v17640_v55 = vld [vmem:[#allocation15 + $0x464] ss:$16 sps:$4 sm:$0xff]  }
 0x628   :  { %9918 = vmatpush2.bf16.msra.mxu1 %v17605_v3  ;;  %v8223_v3 = vadd.f32 %v8222_v22, %v8194_v6  ;;  %v17661_v6 = vld [vmem:[#allocation15 + $0x584] ss:$16 sps:$4 sm:$0xff]   ;;  %v17665_v22 = vld [vmem:[#allocation15 + $0x540] ss:$16 sps:$4 sm:$0xff]  }
 0x629   :  { %9919 = vmatprep.subr.bf16.mxu1 %v17613_v7  ;;  %v17740_v7 = vld [vmem:[#allocation15 + $0x680] ss:$16 sps:$4 sm:$0xff]  }
 0x62a   :  { %9879 = vmatpush2.bf16.msra.mxu0 %v17608_v32  ;;  %v17638_v32 = vld [vmem:[#allocation15 + $0x460] ss:$16 sps:$4 sm:$0xff]  }
 0x62b   :  { %9880 = vmatprep.subr.bf16.mxu0 %v17616_v37  ;;  %v17643_v37 = vld [vmem:[#allocation15 + $0x444] ss:$16 sps:$4 sm:$0xff]  }
 0x62c   :  { %9920 = vmatpush2.bf16.msra.mxu1 %v17611_v31  ;;  %v8224_v31 = vrot.slane %v8223_v3, 2 }
 0x62d   :  { %9921 = vmatprep.subr.bf16.mxu1 %v17619_v12  ;;  %v17641_v12 = vld [vmem:[#allocation15 + $0x440] ss:$16 sps:$4 sm:$0xff]  }
 0x62e   :  { %9881 = vmatpush2.bf16.msra.mxu0 %v17614_v0  ;;  %v8225_v38 = vadd.f32 %v8224_v31, %v8223_v3  ;;  %v17646_v0 = vld [vmem:[#allocation15 + $0x424] ss:$16 sps:$4 sm:$0xff]  }
 0x62f   :  { %9882 = vmatprep.subr.bf16.mxu0 %v17622_v18 }
 0x630   :  { %9922 = vmatpush2.bf16.msra.mxu1 %v17617_v41  ;;  %v17760_v41 = vld [vmem:[#allocation15 + $0x624] ss:$16 sps:$4 sm:$0xff]   ;;  %v8226_v18 = vrot.slane %v8225_v38, 1 }
 0x631   :  { %9923 = vmatprep.subr.bf16.mxu1 %v17625_v45  ;;  %v17758_v45 = vld [vmem:[#allocation15 + $0x620] ss:$16 sps:$4 sm:$0xff]  }
 0x632   :  { %9883 = vmatpush2.bf16.msra.mxu0 %v17620_v49  ;;  %v17766_v49 = vld [vmem:[#allocation15 + $0x604] ss:$16 sps:$4 sm:$0xff]   ;;  %v8227_v53 = vadd.f32 %v8226_v18, %v8225_v38 }
 0x633   :  { %9934 = vmatprep.subr.bf16.mxu0 %v17628_v39  ;;  %v17650_v39 = vld [vmem:[#allocation15 + $0x5e0] ss:$16 sps:$4 sm:$0xff]  }
 0x634   :  { %9924 = vmatpush2.bf16.msra.mxu1 %v17623_v19  ;;  %v17764_v19 = vld [vmem:[#allocation15 + $0x600] ss:$16 sps:$4 sm:$0xff]  }
 0x635   :  { %9975 = vmatprep.subr.bf16.mxu1 %v17724_v61  ;;  %v7913_v59 = vpop.f32.mrf.mxu0  ;;  %9885 = vmatmul.mubr.bf16.vlgmr.msra.gmra.mxu0 %v20055_v42  ;;  %v8250_v61 = vmul.f32 0.125, %v8227_v53 }
 0x636   :  { %v7914_v1 = vadd.f32 %v7913_v59, %v20040_v62  ;;  %9935 = vmatpush1.bf16.msra.mxu0 %v17626_v14  ;;  %9966 = vmatprep.mubr.bf16.mxu0 %v20060_v15  ;;  %v17728_v62 = vld [vmem:[#allocation15 + $0x6c0] ss:$16 sps:$4 sm:$0xff]  }
 0x637   :  { %v7954_v60 = vpop.f32.mrf.mxu1  ;;  %9926 = vmatmul.mubr.bf16.vlgmr.msra.gmra.mxu1 %v20057_v47  ;;  %v7915_v17 = vpop.f32.mrf.mxu0  ;;  %9936 = vmatprep.subr.bf16.mxu0 %v17631_v26  ;;  %v17770_v14 = vld [vmem:[#allocation15 + $0x7e0] ss:$16 sps:$4 sm:$0xff]   ;;  %v8258_v59 = vadd.f32 1e-05, %v8250_v61  ;;  %v17686_v61 = vld [vmem:[#allocation15 + $0x68] ss:$16 sps:$4 sm:$0xff]  }
 0x638   :  { %v20067_v9 = vadd.f32 %v7954_v60, %v7914_v1  ;;  %v7916_v35 = vadd.f32 %v7915_v17, %v20045_v2  ;;  %9976 = vmatpush1.bf16.msra.mxu1 %v17722_v56  ;;  %v17635_v2 = vld [vmem:[#allocation15 + $0x480] ss:$16 sps:$4 sm:$0xff]   ;;  %v17778_v56 = vld [vmem:[#allocation15 + $0x7c4] ss:$16 sps:$4 sm:$0xff]  }
 0x639   :  { %v7956_v21 = vpop.f32.mrf.mxu1  ;;  %v7917_v10 = vpop.f32.mrf.mxu0  ;;  %9977 = vmatprep.subr.bf16.mxu1 %v17730_v5  ;;  %v17653_v26 = vld [vmem:[#allocation15 + $0x5c0] ss:$16 sps:$4 sm:$0xff]   ;;  %v17658_v1 = vld [vmem:[#allocation15 + $0x5a4] ss:$16 sps:$4 sm:$0xff]   ;;  %18628 = vrsqrt.f32 %v8258_v59  ;;  %v17697_v59 = vld [vmem:[#allocation15 + $0xc] ss:$16 sps:$4 sm:$0xff]  }
 0x63a   :  { %v20070_v11 = vadd.f32 %v7956_v21, %v7916_v35  ;;  %9937 = vmatpush1.bf16.msra.mxu0 %v17629_v30  ;;  %v17776_v60 = vld [vmem:[#allocation15 + $0x7c0] ss:$16 sps:$4 sm:$0xff]   ;;  %v17784_v5 = vld [vmem:[#allocation15 + $0x7a4] ss:$16 sps:$4 sm:$0xff]  }
 0x63b   :  { %v7958_v13 = vpop.f32.mrf.mxu1  ;;  %v7918_v4 = vpop.f32.mrf.mxu0  ;;  %9938 = vmatprep.subr.bf16.mxu0 %v17634_v33  ;;  %v17656_v30 = vld [vmem:[#allocation15 + $0x5a0] ss:$16 sps:$4 sm:$0xff]   ;;  %v17790_v35 = vld [vmem:[#allocation15 + $0x784] ss:$16 sps:$4 sm:$0xff]  }
 0x63c   :  { %9978 = vmatpush1.bf16.msra.mxu1 %v17728_v62  ;;  %v17782_v17 = vld [vmem:[#allocation15 + $0x7a0] ss:$16 sps:$4 sm:$0xff]   ;;  %v17664_v21 = vld [vmem:[#allocation15 + $0x564] ss:$16 sps:$4 sm:$0xff]  }
 0x63d   :  { %v7959_v29 = vpop.f32.mrf.mxu1  ;;  %9979 = vmatprep.subr.bf16.mxu1 %v17736_v20  ;;  %v17659_v33 = vld [vmem:[#allocation15 + $0x580] ss:$16 sps:$4 sm:$0xff]   ;;  %v17796_v13 = vld [vmem:[#allocation15 + $0x764] ss:$16 sps:$4 sm:$0xff]  }
 0x63e   :  { %9939 = vmatpush1.bf16.msra.mxu0 %v17632_v48  ;;  %v17788_v62 = vld [vmem:[#allocation15 + $0x780] ss:$16 sps:$4 sm:$0xff]   ;;  %v17667_v48 = vld [vmem:[#allocation15 + $0x544] ss:$16 sps:$4 sm:$0xff]  }
 0x63f   :  { %9940 = vmatprep.subr.bf16.mxu0 %v17637_v23  ;;  %v17662_v10 = vld [vmem:[#allocation15 + $0x560] ss:$16 sps:$4 sm:$0xff]   ;;  %v17802_v4 = vld [vmem:[#allocation15 + $0x744] ss:$16 sps:$4 sm:$0xff]  }
 0x640   :  { %9980 = vmatpush1.bf16.msra.mxu1 %v17734_v28  ;;  %v17794_v20 = vld [vmem:[#allocation15 + $0x760] ss:$16 sps:$4 sm:$0xff]   ;;  %v17670_v23 = vld [vmem:[#allocation15 + $0x524] ss:$16 sps:$4 sm:$0xff]  }
 0x641   :  { %9981 = vmatprep.subr.bf16.mxu1 %v17742_v34  ;;  %v17800_v28 = vld [vmem:[#allocation15 + $0x740] ss:$16 sps:$4 sm:$0xff]   ;;  %v17808_v34 = vld [vmem:[#allocation15 + $0x724] ss:$16 sps:$4 sm:$0xff]  }
 0x642   :  { %9941 = vmatpush1.bf16.msra.mxu0 %v17635_v2  ;;  %v17668_v2 = vld [vmem:[#allocation15 + $0x520] ss:$16 sps:$4 sm:$0xff]  }
 0x643   :  { %9942 = vmatprep.subr.bf16.mxu0 %v17640_v55  ;;  %v17673_v55 = vld [vmem:[#allocation15 + $0x504] ss:$16 sps:$4 sm:$0xff]  }
 0x644   :  { %9982 = vmatpush1.bf16.msra.mxu1 %v17740_v7  ;;  %v17806_v7 = vld [vmem:[#allocation15 + $0x720] ss:$16 sps:$4 sm:$0xff]  }
 0x645   :  { %9983 = vmatprep.subr.bf16.mxu1 %v17748_v25  ;;  %v17671_v25 = vld [vmem:[#allocation15 + $0x500] ss:$16 sps:$4 sm:$0xff]  }
 0x646   :  { %9943 = vmatpush1.bf16.msra.mxu0 %v17638_v32  ;;  %v18629_v29 = vpop.eup %18628  ;;  %v17814_v32 = vld [vmem:[#allocation15 + $0x704] ss:$16 sps:$4 sm:$0xff]  }
 0x647   :  { %9944 = vmatprep.subr.bf16.mxu0 %v17643_v37  ;;  %v8274_v3 = vmul.f32 %v18629_v29, %v20053_v43  ;;  %v17676_v37 = vld [vmem:[#allocation15 + $0xec] ss:$16 sps:$4 sm:$0xff]  }
 0x648   :  { %9984 = vmatpush1.bf16.msra.mxu1 %v17746_v8  ;;  %v17812_v8 = vld [vmem:[#allocation15 + $0x700] ss:$16 sps:$4 sm:$0xff]   ;;  %v17679_v43 = vld [vmem:[#allocation15 + $0xcc] ss:$16 sps:$4 sm:$0xff]  }
 0x649   :  { %9985 = vmatprep.subr.bf16.mxu1 %v17754_v50  ;;  %v8282_v31 = vmax.f32 %v8274_v3, 0.0  ;;  %v17820_v50 = vld [vmem:[#allocation15 + $0x2ec] ss:$16 sps:$4 sm:$0xff]  }
 0x64a   :  { %9945 = vmatpush1.bf16.msra.mxu0 %v17641_v12  ;;  %v17674_v12 = vld [vmem:[#allocation15 + $0xe8] ss:$16 sps:$4 sm:$0xff]   ;;  %v17727_v29 = vld [vmem:[#allocation15 + $0x4ec] ss:$16 sps:$4 sm:$0xff]  }
 0x64b   :  { %9946 = vmatprep.subr.bf16.mxu0 %v17646_v0  ;;  %v20073_v38 = vpack.c.bf16 %v8282_v31, %v8282_v31 }
 0x64c   :  { %9986 = vmatpush1.bf16.msra.mxu1 %v17752_v24 }
 0x64d   :  { %9987 = vmatprep.subr.bf16.mxu1 %v17760_v41  ;;  %v17677_v41 = vld [vmem:[#allocation15 + $0xc8] ss:$16 sps:$4 sm:$0xff]  }
 0x64e   :  { %9947 = vmatpush1.bf16.msra.mxu0 %v17644_v52 }
 0x64f   :  { %9948 = vmatprep.subr.bf16.mxu0 %v17649_v44  ;;  %v17682_v44 = vld [vmem:[#allocation15 + $0xac] ss:$16 sps:$4 sm:$0xff]  }
 0x650   :  { %9988 = vmatpush1.bf16.msra.mxu1 %v17758_v45 }
 0x651   :  { %9989 = vmatprep.subr.bf16.mxu1 %v17766_v49 }
 0x652   :  { %9949 = vmatpush1.bf16.msra.mxu0 %v17647_v46 }
 0x653   :  { %9950 = vmatprep.subr.bf16.mxu0 %v17652_v57  ;;  %v17680_v57 = vld [vmem:[#allocation15 + $0xa8] ss:$16 sps:$4 sm:$0xff]  }
 0x654   :  { %9990 = vmatpush1.bf16.msra.mxu1 %v17764_v19 }
 0x655   :  { %9991 = vmatprep.subr.bf16.mxu1 %v17772_v40  ;;  %v17683_v40 = vld [vmem:[#allocation15 + $0x88] ss:$16 sps:$4 sm:$0xff]  }
 0x656   :  { %9951 = vmatpush2.bf16.msra.mxu0 %v17650_v39 }
 0x657   :  { %9952 = vmatprep.subr.bf16.mxu0 %v17655_v54  ;;  %v17691_v54 = vld [vmem:[#allocation15 + $0x4c] ss:$16 sps:$4 sm:$0xff]  }
 0x658   :  { %9992 = vmatpush2.bf16.msra.mxu1 %v17770_v14  ;;  %v17689_v14 = vld [vmem:[#allocation15 + $0x48] ss:$16 sps:$4 sm:$0xff]  }
 0x659   :  { %9993 = vmatprep.subr.bf16.mxu1 %v17778_v56  ;;  %v17692_v56 = vld [vmem:[#allocation15 + $0x28] ss:$16 sps:$4 sm:$0xff]  }
 0x65a   :  { %9953 = vmatpush2.bf16.msra.mxu0 %v17653_v26  ;;  %v17694_v26 = vld [vmem:[#allocation15 + $0x2c] ss:$16 sps:$4 sm:$0xff]  }
 0x65b   :  { %9954 = vmatprep.subr.bf16.mxu0 %v17658_v1  ;;  %v17695_v1 = vld [vmem:[#allocation15 + $0x8] ss:$16 sps:$4 sm:$0xff]  }
 0x65c   :  { %9994 = vmatpush2.bf16.msra.mxu1 %v17776_v60  ;;  %v17700_v60 = vld [vmem:[#allocation15 + $0x1ec] ss:$16 sps:$4 sm:$0xff]  }
 0x65d   :  { %9995 = vmatprep.subr.bf16.mxu1 %v17784_v5  ;;  %v17703_v5 = vld [vmem:[#allocation15 + $0x1cc] ss:$16 sps:$4 sm:$0xff]  }
 0x65e   :  { %9955 = vmatpush2.bf16.msra.mxu0 %v17656_v30  ;;  %v17698_v30 = vld [vmem:[#allocation15 + $0x1e8] ss:$16 sps:$4 sm:$0xff]  }
 0x65f   :  { %9956 = vmatprep.subr.bf16.mxu0 %v17661_v6  ;;  %v17701_v6 = vld [vmem:[#allocation15 + $0x1c8] ss:$16 sps:$4 sm:$0xff]  }
 0x660   :  { %9996 = vmatpush2.bf16.msra.mxu1 %v17782_v17  ;;  %v17706_v17 = vld [vmem:[#allocation15 + $0x1ac] ss:$16 sps:$4 sm:$0xff]  }
 0x661   :  { %9997 = vmatprep.subr.bf16.mxu1 %v17790_v35  ;;  %v17709_v35 = vld [vmem:[#allocation15 + $0x18c] ss:$16 sps:$4 sm:$0xff]  }
 0x662   :  { %9957 = vmatpush2.bf16.msra.mxu0 %v17659_v33  ;;  %v17704_v33 = vld [vmem:[#allocation15 + $0x1a8] ss:$16 sps:$4 sm:$0xff]  }
 0x663   :  { %9958 = vmatprep.subr.bf16.mxu0 %v17664_v21  ;;  %v17707_v21 = vld [vmem:[#allocation15 + $0x188] ss:$16 sps:$4 sm:$0xff]  }
 0x664   :  { %9998 = vmatpush2.bf16.msra.mxu1 %v17788_v62  ;;  %v17712_v62 = vld [vmem:[#allocation15 + $0x16c] ss:$16 sps:$4 sm:$0xff]  }
 0x665   :  { %9999 = vmatprep.subr.bf16.mxu1 %v17796_v13  ;;  %v17715_v13 = vld [vmem:[#allocation15 + $0x14c] ss:$16 sps:$4 sm:$0xff]  }
 0x666   :  { %9959 = vmatpush2.bf16.msra.mxu0 %v17662_v10  ;;  %v17710_v10 = vld [vmem:[#allocation15 + $0x168] ss:$16 sps:$4 sm:$0xff]  }
 0x667   :  { %9960 = vmatprep.subr.bf16.mxu0 %v17667_v48  ;;  %v17713_v48 = vld [vmem:[#allocation15 + $0x148] ss:$16 sps:$4 sm:$0xff]  }
 0x668   :  { %10000 = vmatpush2.bf16.msra.mxu1 %v17794_v20  ;;  %v17718_v20 = vld [vmem:[#allocation15 + $0x12c] ss:$16 sps:$4 sm:$0xff]  }
 0x669   :  { %10001 = vmatprep.subr.bf16.mxu1 %v17802_v4  ;;  %v17721_v4 = vld [vmem:[#allocation15 + $0x10c] ss:$16 sps:$4 sm:$0xff]  }
 0x66a   :  { %9961 = vmatpush2.bf16.msra.mxu0 %v17665_v22  ;;  %v17716_v22 = vld [vmem:[#allocation15 + $0x128] ss:$16 sps:$4 sm:$0xff]  }
 0x66b   :  { %9962 = vmatprep.subr.bf16.mxu0 %v17670_v23  ;;  %v17719_v23 = vld [vmem:[#allocation15 + $0x108] ss:$16 sps:$4 sm:$0xff]  }
 0x66c   :  { %10002 = vmatpush2.bf16.msra.mxu1 %v17800_v28 }
 0x66d   :  { %10003 = vmatprep.subr.bf16.mxu1 %v17808_v34  ;;  %v17733_v34 = vld [vmem:[#allocation15 + $0x4cc] ss:$16 sps:$4 sm:$0xff]  }
 0x66e   :  { %9963 = vmatpush2.bf16.msra.mxu0 %v17668_v2  ;;  %v17725_v2 = vld [vmem:[#allocation15 + $0x4e8] ss:$16 sps:$4 sm:$0xff]  }
 0x66f   :  { %9964 = vmatprep.subr.bf16.mxu0 %v17673_v55 }
 0x670   :  { %10004 = vmatpush2.bf16.msra.mxu1 %v17806_v7 }
 0x671   :  { %10005 = vmatprep.subr.bf16.mxu1 %v17814_v32 }
 0x672   :  { %9965 = vmatpush2.bf16.msra.mxu0 %v17671_v25  ;;  %v17731_v25 = vld [vmem:[#allocation15 + $0x4c8] ss:$16 sps:$4 sm:$0xff]  }
 0x673   :  { %10016 = vmatprep.subr.bf16.mxu0 %v17676_v37  ;;  %v17739_v37 = vld [vmem:[#allocation15 + $0x4ac] ss:$16 sps:$4 sm:$0xff]  }
 0x674   :  { %10006 = vmatpush2.bf16.msra.mxu1 %v17812_v8 }
 0x675   :  { %v7995_v0 = vpop.f32.mrf.mxu0  ;;  %9967 = vmatmul.mubr.bf16.vlgmr.msra.gmra.mxu0 %v20073_v38  ;;  %10057 = vmatprep.subr.bf16.mxu1 %v17820_v50 }
 0x676   :  { %v7996_v24 = vadd.f32 %v7995_v0, %v20067_v9  ;;  %10017 = vmatpush1.bf16.msra.mxu0 %v17674_v12  ;;  %10048 = vmatprep.mubr.bf16.mxu0 %v20030_v63  ;;  %v17685_v9 = vld [vmem:[#allocation15 + $0x8c] ss:$16 sps:$4 sm:$0xff]  }
 0x677   :  { %v8036_v52 = vpop.f32.mrf.mxu1  ;;  %v20078_v18 = vpop.f32.mrf.mxu0  ;;  %10018 = vmatprep.subr.bf16.mxu0 %v17679_v43  ;;  %v17688_v63 = vld [vmem:[#allocation15 + $0x6c] ss:$16 sps:$4 sm:$0xff]  }
 0x678   :  { %v20080_v45 = vadd.f32 %v8036_v52, %v7996_v24  ;;  %v7998_v28 = vadd.f32 %v20078_v18, %v20070_v11 }
 0x679   :  { %v20082_v46 = vpop.f32.mrf.mxu1  ;;  %v7999_v49 = vpop.f32.mrf.mxu0 }
 0x67a   :  { %10019 = vmatpush1.bf16.msra.mxu0 %v17677_v41  ;;  %v8039_v55 = vadd.f32 %v20082_v46, %v7998_v28  ;;  %v17745_v41 = vld [vmem:[#allocation15 + $0x48c] ss:$16 sps:$4 sm:$0xff]   ;;  %v17743_v49 = vld [vmem:[#allocation15 + $0x488] ss:$16 sps:$4 sm:$0xff]  }
 0x67b   :  { %v8040_v53 = vpop.f32.mrf.mxu1  ;;  %v8000_v19 = vpop.f32.mrf.mxu0  ;;  %10020 = vmatprep.subr.bf16.mxu0 %v17682_v44 }
 0x67c   :  { %v17751_v53 = vld [vmem:[#allocation15 + $0x46c] ss:$16 sps:$4 sm:$0xff]  }
 0x67d   :  { %v8041_v39 = vpop.f32.mrf.mxu1 }
 0x67e   :  { %10021 = vmatpush1.bf16.msra.mxu0 %v17680_v57 }
 0x67f   :  { %10022 = vmatprep.subr.bf16.mxu0 %v17685_v9 }
 0x682   :  { %10023 = vmatpush1.bf16.msra.mxu0 %v17683_v40  ;;  %v17749_v40 = vld [vmem:[#allocation15 + $0x468] ss:$16 sps:$4 sm:$0xff]  }
 0x683   :  { %10024 = vmatprep.subr.bf16.mxu0 %v17688_v63  ;;  %v17757_v63 = vld [vmem:[#allocation15 + $0x44c] ss:$16 sps:$4 sm:$0xff]  }
 0x686   :  { %10025 = vmatpush1.bf16.msra.mxu0 %v17686_v61 }
 0x687   :  { %10026 = vmatprep.subr.bf16.mxu0 %v17691_v54 }
 0x68a   :  { %10027 = vmatpush1.bf16.msra.mxu0 %v17689_v14 }
 0x68b   :  { %10028 = vmatprep.subr.bf16.mxu0 %v17694_v26 }
 0x68e   :  { %10029 = vmatpush1.bf16.msra.mxu0 %v17692_v56  ;;  %v17755_v56 = vld [vmem:[#allocation15 + $0x448] ss:$16 sps:$4 sm:$0xff]  }
 0x68f   :  { %10030 = vmatprep.subr.bf16.mxu0 %v17697_v59  ;;  %v17763_v59 = vld [vmem:[#allocation15 + $0x42c] ss:$16 sps:$4 sm:$0xff]  }
 0x692   :  { %10031 = vmatpush1.bf16.msra.mxu0 %v17695_v1 }
 0x693   :  { %10032 = vmatprep.subr.bf16.mxu0 %v17700_v60 }
 0x696   :  { %10033 = vmatpush2.bf16.msra.mxu0 %v17698_v30 }
 0x697   :  { %10034 = vmatprep.subr.bf16.mxu0 %v17703_v5 }
 0x69a   :  { %10035 = vmatpush2.bf16.msra.mxu0 %v17701_v6  ;;  %v17761_v6 = vld [vmem:[#allocation15 + $0x428] ss:$16 sps:$4 sm:$0xff]  }
 0x69b   :  { %10036 = vmatprep.subr.bf16.mxu0 %v17706_v17  ;;  %v17769_v17 = vld [vmem:[#allocation15 + $0x40c] ss:$16 sps:$4 sm:$0xff]  }
 0x69e   :  { %10037 = vmatpush2.bf16.msra.mxu0 %v17704_v33 }
 0x69f   :  { %10038 = vmatprep.subr.bf16.mxu0 %v17709_v35 }
 0x6a2   :  { %10039 = vmatpush2.bf16.msra.mxu0 %v17707_v21 }
 0x6a3   :  { %10040 = vmatprep.subr.bf16.mxu0 %v17712_v62 }
 0x6a6   :  { %10041 = vmatpush2.bf16.msra.mxu0 %v17710_v10  ;;  %v17767_v10 = vld [vmem:[#allocation15 + $0x408] ss:$16 sps:$4 sm:$0xff]  }
 0x6a7   :  { %10042 = vmatprep.subr.bf16.mxu0 %v17715_v13  ;;  %v17775_v13 = vld [vmem:[#allocation15 + $0x5ec] ss:$16 sps:$4 sm:$0xff]  }
 0x6aa   :  { %10043 = vmatpush2.bf16.msra.mxu0 %v17713_v48 }
 0x6ab   :  { %10044 = vmatprep.subr.bf16.mxu0 %v17718_v20 }
 0x6ae   :  { %10045 = vmatpush2.bf16.msra.mxu0 %v17716_v22 }
 0x6af   :  { %10046 = vmatprep.subr.bf16.mxu0 %v17721_v4 }
 0x6b2   :  { %10047 = vmatpush2.bf16.msra.mxu0 %v17719_v23  ;;  %v17773_v23 = vld [vmem:[#allocation15 + $0x5e8] ss:$16 sps:$4 sm:$0xff]  }
 0x6b3   :  { %10098 = vmatprep.subr.bf16.mxu0 %v17727_v29  ;;  %v17781_v29 = vld [vmem:[#allocation15 + $0x5cc] ss:$16 sps:$4 sm:$0xff]  }
 0x6b5   :  { %v8077_v3 = vpop.f32.mrf.mxu0  ;;  %10049 = vmatmul.mubr.bf16.vlgmr.msra.gmra.mxu0 %v20055_v42  ;;  %v17737_v42 = vld [vmem:[#allocation15 + $0x4a8] ss:$16 sps:$4 sm:$0xff]  }
 0x6b6   :  { %v8078_v7 = vadd.f32 %v8077_v3, %v20080_v45  ;;  %10099 = vmatpush1.bf16.msra.mxu0 %v17725_v2  ;;  %10130 = vmatprep.mubr.bf16.mxu0 %v20060_v15 }
 0x6b7   :  { %v8118_v32 = vpop.f32.mrf.mxu1  ;;  %v8079_v31 = vpop.f32.mrf.mxu0  ;;  %10100 = vmatprep.subr.bf16.mxu0 %v17733_v34 }
 0x6b8   :  { %v8119_v11 = vadd.f32 %v8118_v32, %v8078_v7  ;;  %v8080_v8 = vadd.f32 %v8079_v31, %v8039_v55  ;;  %v17779_v55 = vld [vmem:[#allocation15 + $0x5c8] ss:$16 sps:$4 sm:$0xff]   ;;  %v17787_v7 = vld [vmem:[#allocation15 + $0x5ac] ss:$16 sps:$4 sm:$0xff]  }
 0x6b9   :  { %v8120_v12 = vpop.f32.mrf.mxu1  ;;  %v8081_v50 = vpop.f32.mrf.mxu0 }
 0x6ba   :  { %v8161_v43 = vrot.slane %v8119_v11, 4  ;;  %v8121_v0 = vadd.f32 %v8120_v12, %v8080_v8  ;;  %10101 = vmatpush1.bf16.msra.mxu0 %v17731_v25  ;;  %v17793_v8 = vld [vmem:[#allocation15 + $0x58c] ss:$16 sps:$4 sm:$0xff]   ;;  %v17791_v50 = vld [vmem:[#allocation15 + $0x588] ss:$16 sps:$4 sm:$0xff]  }
 0x6bb   :  { %v8122_v24 = vpop.f32.mrf.mxu1  ;;  %v8082_v52 = vpop.f32.mrf.mxu0  ;;  %10102 = vmatprep.subr.bf16.mxu0 %v17739_v37 }
 0x6bc   :  { %v8162_v18 = vadd.f32 %v8161_v43, %v8119_v11  ;;  %v8167_v44 = vrot.slane %v8121_v0, 4  ;;  %v17799_v43 = vld [vmem:[#allocation15 + $0x56c] ss:$16 sps:$4 sm:$0xff]  }
 0x6bd   :  { %v8123_v45 = vpop.f32.mrf.mxu1  ;;  %v17805_v24 = vld [vmem:[#allocation15 + $0x54c] ss:$16 sps:$4 sm:$0xff]  }
 0x6be   :  { %v8163_v15 = vrot.slane %v8162_v18, 2  ;;  %v8168_v46 = vadd.f32 %v8167_v44, %v8121_v0  ;;  %10103 = vmatpush1.bf16.msra.mxu0 %v17737_v42  ;;  %v17803_v42 = vld [vmem:[#allocation15 + $0x548] ss:$16 sps:$4 sm:$0xff]   ;;  %v17811_v52 = vld [vmem:[#allocation15 + $0x52c] ss:$16 sps:$4 sm:$0xff]  }
 0x6bf   :  { %10104 = vmatprep.subr.bf16.mxu0 %v17745_v41  ;;  %v17809_v44 = vld [vmem:[#allocation15 + $0x528] ss:$16 sps:$4 sm:$0xff]  }
 0x6c0   :  { %v8164_v57 = vadd.f32 %v8163_v15, %v8162_v18  ;;  %v8169_v19 = vrot.slane %v8168_v46, 2  ;;  %v17817_v15 = vld [vmem:[#allocation15 + $0x50c] ss:$16 sps:$4 sm:$0xff]  }
 0x6c2   :  { %v8165_v9 = vrot.slane %v8164_v57, 1  ;;  %v8170_v39 = vadd.f32 %v8169_v19, %v8168_v46  ;;  %10105 = vmatpush1.bf16.msra.mxu0 %v17743_v49  ;;  %v20090_v19 = vld [vmem:[#allocation17] sm:$0xf] }
 0x6c3   :  { %10106 = vmatprep.subr.bf16.mxu0 %v17751_v53  ;;  %v17815_v53 = vld [vmem:[#allocation15 + $0x508] ss:$16 sps:$4 sm:$0xff]  }
 0x6c4   :  { %v8166_v61 = vadd.f32 %v8165_v9, %v8164_v57  ;;  %v8171_v54 = vrot.slane %v8170_v39, 1 }
 0x6c6   :  { %v8180_v14 = vmul.f32 0.125, %v8166_v61  ;;  %v8172_v26 = vadd.f32 %v8171_v54, %v8170_v39  ;;  %10107 = vmatpush1.bf16.msra.mxu0 %v17749_v40  ;;  %v17818_v39 = vld [vmem:[#allocation15 + $0x2e8] ss:$16 sps:$4 sm:$0xff]   ;;  %v8555_v61 = vrot.slane %v20090_v19, %v19861_v36 }
 0x6c7   :  { %10108 = vmatprep.subr.bf16.mxu0 %v17757_v63  ;;  %v17823_v63 = vld [vmem:[#allocation15 + $0x2cc] ss:$16 sps:$4 sm:$0xff]   ;;  %v17821_v54 = vld [vmem:[#allocation15 + $0x2c8] ss:$16 sps:$4 sm:$0xff]  }
 0x6c8   :  { %v8188_v1 = vsub.f32 %v8119_v11, %v8180_v14  ;;  %v8181_v60 = vmul.f32 0.125, %v8172_v26  ;;  %v17785_v11 = vld [vmem:[#allocation15 + $0x5a8] ss:$16 sps:$4 sm:$0xff]   ;;  %v8559_v14 = vrot.slane %v20090_v19, %v19864_v51 }
 0x6ca   :  { %v8196_v30 = vmul.f32 %v8188_v1, %v8188_v1  ;;  %v8189_v5 = vsub.f32 %v8121_v0, %v8181_v60  ;;  %10109 = vmatpush1.bf16.msra.mxu0 %v17755_v56  ;;  %v17797_v0 = vld [vmem:[#allocation15 + $0x568] ss:$16 sps:$4 sm:$0xff]   ;;  %v17826_v56 = vld [vmem:[#allocation15 + $0x2ac] ss:$16 sps:$4 sm:$0xff]  }
 0x6cb   :  { %10110 = vmatprep.subr.bf16.mxu0 %v17763_v59 }
 0x6cc   :  { %v8234_v33 = vrot.slane %v8196_v30, 4  ;;  %v8197_v35 = vmul.f32 %v8189_v5, %v8189_v5 }
 0x6ce   :  { %v8235_v21 = vadd.f32 %v8234_v33, %v8196_v30  ;;  %v8240_v62 = vrot.slane %v8197_v35, 4  ;;  %10111 = vmatpush1.bf16.msra.mxu0 %v17761_v6 }
 0x6cf   :  { %10112 = vmatprep.subr.bf16.mxu0 %v17769_v17  ;;  %v17824_v17 = vld [vmem:[#allocation15 + $0x2a8] ss:$16 sps:$4 sm:$0xff]  }
 0x6d0   :  { %v8236_v48 = vrot.slane %v8235_v21, 2  ;;  %v8241_v20 = vadd.f32 %v8240_v62, %v8197_v35 }
 0x6d2   :  { %v8237_v22 = vadd.f32 %v8236_v48, %v8235_v21  ;;  %v8242_v4 = vrot.slane %v8241_v20, 2  ;;  %10113 = vmatpush1.bf16.msra.mxu0 %v17767_v10  ;;  %v17830_v48 = vld [vmem:[#allocation15 + $0x268] ss:$16 sps:$4 sm:$0xff]  }
 0x6d3   :  { %10114 = vmatprep.subr.bf16.mxu0 %v17775_v13  ;;  %v17832_v13 = vld [vmem:[#allocation15 + $0x26c] ss:$16 sps:$4 sm:$0xff]  }
 0x6d4   :  { %v8238_v28 = vrot.slane %v8237_v22, 1  ;;  %v8243_v2 = vadd.f32 %v8242_v4, %v8241_v20  ;;  %v17835_v20 = vld [vmem:[#allocation15 + $0x24c] ss:$16 sps:$4 sm:$0xff]  }
 0x6d5   :  { %v17838_v4 = vld [vmem:[#allocation15 + $0x22c] ss:$16 sps:$4 sm:$0xff]  }
 0x6d6   :  { %v8239_v34 = vadd.f32 %v8238_v28, %v8237_v22  ;;  %v8244_v3 = vrot.slane %v8243_v2, 1  ;;  %10115 = vmatpush2.bf16.msra.mxu0 %v17773_v23  ;;  %v17833_v22 = vld [vmem:[#allocation15 + $0x248] ss:$16 sps:$4 sm:$0xff]  }
 0x6d7   :  { %10116 = vmatprep.subr.bf16.mxu0 %v17781_v29  ;;  %v17836_v23 = vld [vmem:[#allocation15 + $0x228] ss:$16 sps:$4 sm:$0xff]   ;;  %v17841_v29 = vld [vmem:[#allocation15 + $0x20c] ss:$16 sps:$4 sm:$0xff]  }
 0x6d8   :  { %v8252_v32 = vmul.f32 0.125, %v8239_v34  ;;  %v8245_v25 = vadd.f32 %v8244_v3, %v8243_v2  ;;  %v17839_v28 = vld [vmem:[#allocation15 + $0x208] ss:$16 sps:$4 sm:$0xff]   ;;  %v17844_v2 = vld [vmem:[#allocation15 + $0x3ec] ss:$16 sps:$4 sm:$0xff]  }
 0x6d9   :  { %v17842_v34 = vld [vmem:[#allocation15 + $0x3e8] ss:$16 sps:$4 sm:$0xff]   ;;  %v17847_v3 = vld [vmem:[#allocation15 + $0x3cc] ss:$16 sps:$4 sm:$0xff]  }
 0x6da   :  { %v8260_v31 = vadd.f32 1e-05, %v8252_v32  ;;  %v8253_v37 = vmul.f32 0.125, %v8245_v25  ;;  %10117 = vmatpush2.bf16.msra.mxu0 %v17779_v55  ;;  %v17845_v55 = vld [vmem:[#allocation15 + $0x3c8] ss:$16 sps:$4 sm:$0xff]  }
 0x6db   :  { %10118 = vmatprep.subr.bf16.mxu0 %v17787_v7  ;;  %v17850_v7 = vld [vmem:[#allocation15 + $0x3ac] ss:$16 sps:$4 sm:$0xff]   ;;  %v17848_v32 = vld [vmem:[#allocation15 + $0x3a8] ss:$16 sps:$4 sm:$0xff]  }
 0x6dc   :  { %18630 = vrsqrt.f32 %v8260_v31  ;;  %v8261_v12 = vadd.f32 1e-05, %v8253_v37  ;;  %v17853_v25 = vld [vmem:[#allocation15 + $0x38c] ss:$16 sps:$4 sm:$0xff]   ;;  %v17851_v31 = vld [vmem:[#allocation15 + $0x388] ss:$16 sps:$4 sm:$0xff]  }
 0x6dd   :  { %v17856_v37 = vld [vmem:[#allocation15 + $0x36c] ss:$16 sps:$4 sm:$0xff]  }
 0x6de   :  { %18632 = vrsqrt.f32 %v8261_v12  ;;  %10119 = vmatpush2.bf16.msra.mxu0 %v17785_v11  ;;  %v17854_v11 = vld [vmem:[#allocation15 + $0x368] ss:$16 sps:$4 sm:$0xff]  }
 0x6df   :  { %10120 = vmatprep.subr.bf16.mxu0 %v17793_v8  ;;  %v17859_v8 = vld [vmem:[#allocation15 + $0x34c] ss:$16 sps:$4 sm:$0xff]   ;;  %v17857_v12 = vld [vmem:[#allocation15 + $0x348] ss:$16 sps:$4 sm:$0xff]  }
 0x6e2   :  { %10121 = vmatpush2.bf16.msra.mxu0 %v17791_v50  ;;  %v17862_v50 = vld [vmem:[#allocation15 + $0x32c] ss:$16 sps:$4 sm:$0xff]  }
 0x6e3   :  { %10122 = vmatprep.subr.bf16.mxu0 %v17799_v43  ;;  %v17860_v43 = vld [vmem:[#allocation15 + $0x328] ss:$16 sps:$4 sm:$0xff]  }
 0x6e6   :  { %10123 = vmatpush2.bf16.msra.mxu0 %v17797_v0  ;;  %v17865_v0 = vld [vmem:[#allocation15 + $0x30c] ss:$16 sps:$4 sm:$0xff]  }
 0x6e7   :  { %10124 = vmatprep.subr.bf16.mxu0 %v17805_v24  ;;  %v17863_v24 = vld [vmem:[#allocation15 + $0x308] ss:$16 sps:$4 sm:$0xff]  }
 0x6e9   :  { %v18631_v41 = vpop.eup %18630 }
 0x6ea   :  { %v8276_v18 = vmul.f32 %v18631_v41, %v8188_v1  ;;  %10125 = vmatpush2.bf16.msra.mxu0 %v17803_v42  ;;  %v17868_v42 = vld [vmem:[#allocation15 + $0x6ec] ss:$16 sps:$4 sm:$0xff]  }
 0x6eb   :  { %v18633_v45 = vpop.eup %18632  ;;  %10126 = vmatprep.subr.bf16.mxu0 %v17811_v52  ;;  %v17866_v52 = vld [vmem:[#allocation15 + $0x6e8] ss:$16 sps:$4 sm:$0xff]   ;;  %v17871_v41 = vld [vmem:[#allocation15 + $0x6cc] ss:$16 sps:$4 sm:$0xff]  }
 0x6ec   :  { %v8277_v46 = vmul.f32 %v18633_v45, %v8189_v5  ;;  %v8284_v49 = vmax.f32 %v8276_v18, 0.0  ;;  %v17869_v18 = vld [vmem:[#allocation15 + $0x6c8] ss:$16 sps:$4 sm:$0xff]   ;;  %v17874_v45 = vld [vmem:[#allocation15 + $0x6ac] ss:$16 sps:$4 sm:$0xff]  }
 0x6ee   :  { %10127 = vmatpush2.bf16.msra.mxu0 %v17809_v44  ;;  %v8285_v57 = vmax.f32 %v8277_v46, 0.0  ;;  %v20094_v40 = vpack.c.bf16 %v8284_v49, %v8284_v49 }
 0x6ef   :  { %10128 = vmatprep.subr.bf16.mxu0 %v17817_v15 }
 0x6f0   :  { %v20092_v9 = vpack.c.bf16 %v8285_v57, %v8285_v57 }
 0x6f2   :  { %10007 = vmatprep.mubr.bf16.mxu1 %v20092_v9  ;;  %10129 = vmatpush2.bf16.msra.mxu0 %v17815_v53  ;;  %v17872_v53 = vld [vmem:[#allocation15 + $0x6a8] ss:$16 sps:$4 sm:$0xff]  }
 0x6f3   :  { %10008 = vmatmul.mubr.bf16.vlgmr.msra.gmra.mxu1 %v20094_v40 }
 0x6f4   :  { %10058 = vmatpush1.bf16.msra.mxu1 %v17818_v39  ;;  %10089 = vmatprep.mubr.bf16.mxu1 %v20035_v58  ;;  %v17829_v58 = vld [vmem:[#allocation15 + $0x28c] ss:$16 sps:$4 sm:$0xff]  }
 0x6f5   :  { %v9886_v26 = vpop.f32.mrf.mxu0  ;;  %10131 = vmatmul.mubr.bf16.vlgmr.msra.gmra.mxu0 %v20073_v38  ;;  %10059 = vmatprep.subr.bf16.mxu1 %v17823_v63  ;;  %v17827_v38 = vld [vmem:[#allocation15 + $0x288] ss:$16 sps:$4 sm:$0xff]   ;;  %v17877_v39 = vld [vmem:[#allocation15 + $0x68c] ss:$16 sps:$4 sm:$0xff]  }
 0x6f6   :  { %v9887_v59 = vadd.f32 %v9886_v26, %v8555_v61  ;;  %v17875_v63 = vld [vmem:[#allocation15 + $0x688] ss:$16 sps:$4 sm:$0xff]   ;;  %v17886_v26 = vld [vmem:[#allocation15 + $0x62c] ss:$16 sps:$4 sm:$0xff]  }
 0x6f7   :  { %v9927_v1 = vpop.f32.mrf.mxu1  ;;  %v9888_v60 = vpop.f32.mrf.mxu0  ;;  %v17878_v61 = vld [vmem:[#allocation15 + $0x668] ss:$16 sps:$4 sm:$0xff]  }
 0x6f8   :  { %v20104_v30 = vadd.f32 %v9927_v1, %v9887_v59  ;;  %v9889_v5 = vadd.f32 %v9888_v60, %v8559_v14  ;;  %10060 = vmatpush1.bf16.msra.mxu1 %v17821_v54  ;;  %v17883_v54 = vld [vmem:[#allocation15 + $0x64c] ss:$16 sps:$4 sm:$0xff]   ;;  %v17881_v14 = vld [vmem:[#allocation15 + $0x648] ss:$16 sps:$4 sm:$0xff]  }
 0x6f9   :  { %v9929_v6 = vpop.f32.mrf.mxu1  ;;  %v9890_v33 = vpop.f32.mrf.mxu0  ;;  %10061 = vmatprep.subr.bf16.mxu1 %v17826_v56  ;;  %v17884_v56 = vld [vmem:[#allocation15 + $0x628] ss:$16 sps:$4 sm:$0xff]   ;;  %v17889_v59 = vld [vmem:[#allocation15 + $0x60c] ss:$16 sps:$4 sm:$0xff]  }
 0x6fa   :  { %v20106_v35 = vadd.f32 %v9929_v6, %v9889_v5  ;;  %v17887_v1 = vld [vmem:[#allocation15 + $0x608] ss:$16 sps:$4 sm:$0xff]   ;;  %v17892_v60 = vld [vmem:[#allocation15 + $0x7ec] ss:$16 sps:$4 sm:$0xff]  }
 0x6fb   :  { %v9931_v21 = vpop.f32.mrf.mxu1  ;;  %v9891_v62 = vpop.f32.mrf.mxu0  ;;  %v17915_v5 = vld [vmem:[#allocation18 + $0x38] sm:$0xff]   ;;  %v17890_v6 = vld [vmem:[#allocation15 + $0x7e8] ss:$16 sps:$4 sm:$0xff]  }
 0x6fc   :  { %10062 = vmatpush1.bf16.msra.mxu1 %v17824_v17  ;;  %v17895_v17 = vld [vmem:[#allocation15 + $0x7cc] ss:$16 sps:$4 sm:$0xff]   ;;  %v17916_v33 = vld [vmem:[#allocation18 + $0x70] sm:$0xff]  }
 0x6fd   :  { %v9932_v10 = vpop.f32.mrf.mxu1  ;;  %10063 = vmatprep.subr.bf16.mxu1 %v17829_v58  ;;  %v17917_v58 = vld [vmem:[#allocation18 + $0x30] sm:$0xff]   ;;  %v17898_v21 = vld [vmem:[#allocation15 + $0x7ac] ss:$16 sps:$4 sm:$0xff]  }
 0x6fe   :  { %v17918_v62 = vld [vmem:[#allocation18 + $0x68] sm:$0xff]  }
 0x6ff   :  { %v17919_v10 = vld [vmem:[#allocation18 + $0x28] sm:$0xff]  }
 0x700   :  { %10064 = vmatpush1.bf16.msra.mxu1 %v17827_v38  ;;  %v17896_v38 = vld [vmem:[#allocation15 + $0x7a8] ss:$16 sps:$4 sm:$0xff]  }
 0x701   :  { %10065 = vmatprep.subr.bf16.mxu1 %v17832_v13  ;;  %v17901_v13 = vld [vmem:[#allocation15 + $0x78c] ss:$16 sps:$4 sm:$0xff]  }
 0x704   :  { %10066 = vmatpush1.bf16.msra.mxu1 %v17830_v48  ;;  %v17920_v48 = vld [vmem:[#allocation18 + $0x60] sm:$0xff]  }
 0x705   :  { %10067 = vmatprep.subr.bf16.mxu1 %v17835_v20  ;;  %v17921_v20 = vld [vmem:[#allocation18 + $0x20] sm:$0xff]  }
 0x708   :  { %10068 = vmatpush1.bf16.msra.mxu1 %v17833_v22  ;;  %v17899_v22 = vld [vmem:[#allocation15 + $0x788] ss:$16 sps:$4 sm:$0xff]  }
 0x709   :  { %10069 = vmatprep.subr.bf16.mxu1 %v17838_v4  ;;  %v17904_v4 = vld [vmem:[#allocation15 + $0x76c] ss:$16 sps:$4 sm:$0xff]  }
 0x70c   :  { %10070 = vmatpush1.bf16.msra.mxu1 %v17836_v23  ;;  %v17922_v23 = vld [vmem:[#allocation18 + $0x58] sm:$0xff]  }
 0x70d   :  { %10071 = vmatprep.subr.bf16.mxu1 %v17841_v29  ;;  %v17923_v29 = vld [vmem:[#allocation18 + $0x18] sm:$0xff]  }
 0x710   :  { %10072 = vmatpush1.bf16.msra.mxu1 %v17839_v28  ;;  %v17902_v28 = vld [vmem:[#allocation15 + $0x768] ss:$16 sps:$4 sm:$0xff]  }
 0x711   :  { %10073 = vmatprep.subr.bf16.mxu1 %v17844_v2  ;;  %v17907_v2 = vld [vmem:[#allocation15 + $0x74c] ss:$16 sps:$4 sm:$0xff]  }
 0x714   :  { %10074 = vmatpush2.bf16.msra.mxu1 %v17842_v34  ;;  %v17924_v34 = vld [vmem:[#allocation18 + $0x50] sm:$0xff]  }
 0x715   :  { %10075 = vmatprep.subr.bf16.mxu1 %v17847_v3  ;;  %v17925_v3 = vld [vmem:[#allocation18 + $0x10] sm:$0xff]  }
 0x718   :  { %10076 = vmatpush2.bf16.msra.mxu1 %v17845_v55  ;;  %v17905_v55 = vld [vmem:[#allocation15 + $0x748] ss:$16 sps:$4 sm:$0xff]  }
 0x719   :  { %10077 = vmatprep.subr.bf16.mxu1 %v17850_v7  ;;  %v17910_v7 = vld [vmem:[#allocation15 + $0x72c] ss:$16 sps:$4 sm:$0xff]  }
 0x71c   :  { %10078 = vmatpush2.bf16.msra.mxu1 %v17848_v32  ;;  %v17926_v32 = vld [vmem:[#allocation18 + $0x48] sm:$0xff]  }
 0x71d   :  { %10079 = vmatprep.subr.bf16.mxu1 %v17853_v25  ;;  %v17927_v25 = vld [vmem:[#allocation18 + $0x8] sm:$0xff]  }
 0x720   :  { %10080 = vmatpush2.bf16.msra.mxu1 %v17851_v31  ;;  %v17908_v31 = vld [vmem:[#allocation15 + $0x728] ss:$16 sps:$4 sm:$0xff]  }
 0x721   :  { %10081 = vmatprep.subr.bf16.mxu1 %v17856_v37  ;;  %v17928_v37 = vld [vmem:[#allocation18 + $0x40] sm:$0xff]  }
 0x724   :  { %10082 = vmatpush2.bf16.msra.mxu1 %v17854_v11  ;;  %v17913_v11 = vld [vmem:[#allocation15 + $0x70c] ss:$16 sps:$4 sm:$0xff]  }
 0x725   :  { %10083 = vmatprep.subr.bf16.mxu1 %v17859_v8  ;;  %v17929_v8 = vld [vmem:[#allocation18] sm:$0xff]  }
 0x728   :  { %10084 = vmatpush2.bf16.msra.mxu1 %v17857_v12  ;;  %v17911_v12 = vld [vmem:[#allocation15 + $0x708] ss:$16 sps:$4 sm:$0xff]  }
 0x729   :  { %10085 = vmatprep.subr.bf16.mxu1 %v17862_v50  ;;  %v17932_v50 = vld [vmem:[#allocation21 + $0x74] ss:$8 sps:$4 sm:$0xff]  }
 0x72c   :  { %10086 = vmatpush2.bf16.msra.mxu1 %v17860_v43 }
 0x72d   :  { %10087 = vmatprep.subr.bf16.mxu1 %v17865_v0 }
 0x730   :  { %10088 = vmatpush2.bf16.msra.mxu1 %v17863_v24 }
 0x731   :  { %10139 = vmatprep.subr.bf16.mxu1 %v17868_v42 }
 0x733   :  { %10090 = vmatmul.mubr.bf16.vlgmr.msra.gmra.mxu1 %v20057_v47 }
 0x734   :  { %10140 = vmatpush1.bf16.msra.mxu1 %v17866_v52  ;;  %10171 = vmatprep.mubr.bf16.mxu1 %v20092_v9  ;;  %v17880_v9 = vld [vmem:[#allocation15 + $0x66c] ss:$16 sps:$4 sm:$0xff]   ;;  %v19539_v52 = vmov 0  }
 0x735   :  { %v9968_v44 = vpop.f32.mrf.mxu0  ;;  %10141 = vmatprep.subr.bf16.mxu1 %v17871_v41  ;;  %17528 = vset.pattern.permute.xlu0 %v19539_v52 }
 0x736   :  { %v20111_v15 = vadd.f32 %v9968_v44, %v20104_v30  ;;  %v17914_v30 = vld [vmem:[#allocation18 + $0x78] sm:$0xff]   ;;  %17529 = vset.pattern.permute.xlu1 %v19539_v52 }
 0x737   :  { %v9970_v46 = vpop.f32.mrf.mxu0  ;;  %17205 = vmatprep.subr.bf16.mxu0 %v17914_v30 }
 0x738   :  { %v20114_v49 = vadd.f32 %v9970_v46, %v20106_v35  ;;  %10142 = vmatpush1.bf16.msra.mxu1 %v17869_v18  ;;  %17206 = vmatpush3.bf16.msra.mxu0 %v17915_v5  ;;  %v17893_v35 = vld [vmem:[#allocation15 + $0x7c8] ss:$16 sps:$4 sm:$0xff]  }
 0x739   :  { %v9972_v57 = vpop.f32.mrf.mxu0  ;;  %10143 = vmatprep.subr.bf16.mxu1 %v17874_v45  ;;  %17207 = vmatprep.subr.bf16.mxu0 %v17916_v33 }
 0x73b   :  { %v9973_v47 = vpop.f32.mrf.mxu0 }
 0x73c   :  { %10144 = vmatpush1.bf16.msra.mxu1 %v17872_v53  ;;  %17208 = vmatpush3.bf16.msra.mxu0 %v17917_v58 }
 0x73d   :  { %10145 = vmatprep.subr.bf16.mxu1 %v17877_v39  ;;  %17209 = vmatprep.subr.bf16.mxu0 %v17918_v62 }
 0x740   :  { %10146 = vmatpush1.bf16.msra.mxu1 %v17875_v63  ;;  %17210 = vmatpush3.bf16.msra.mxu0 %v17919_v10 }
 0x741   :  { %10147 = vmatprep.subr.bf16.mxu1 %v17880_v9  ;;  %17211 = vmatprep.subr.bf16.mxu0 %v17920_v48 }
 0x744   :  { %10148 = vmatpush1.bf16.msra.mxu1 %v17878_v61  ;;  %17212 = vmatpush3.bf16.msra.mxu0 %v17921_v20  ;;  %v17978_v20 = vld [vmem:[#allocation18 + $0xf8] sm:$0xff]  }
 0x745   :  { %10149 = vmatprep.subr.bf16.mxu1 %v17883_v54  ;;  %17213 = vmatprep.subr.bf16.mxu0 %v17922_v23 }
 0x748   :  { %10150 = vmatpush1.bf16.msra.mxu1 %v17881_v14  ;;  %17214 = vmatpush3.bf16.msra.mxu0 %v17923_v29 }
 0x749   :  { %10151 = vmatprep.subr.bf16.mxu1 %v17886_v26  ;;  %17215 = vmatprep.subr.bf16.mxu0 %v17924_v34  ;;  %v17981_v34 = vld [vmem:[#allocation18 + $0xb0] sm:$0xff]  }
 0x74c   :  { %10152 = vmatpush1.bf16.msra.mxu1 %v17884_v56  ;;  %17216 = vmatpush3.bf16.msra.mxu0 %v17925_v3 }
 0x74d   :  { %10153 = vmatprep.subr.bf16.mxu1 %v17889_v59  ;;  %17217 = vmatprep.subr.bf16.mxu0 %v17926_v32 }
 0x750   :  { %10154 = vmatpush1.bf16.msra.mxu1 %v17887_v1  ;;  %17218 = vmatpush3.bf16.msra.mxu0 %v17927_v25  ;;  %v17982_v25 = vld [vmem:[#allocation18 + $0xe8] sm:$0xff]  }
 0x751   :  { %10155 = vmatprep.subr.bf16.mxu1 %v17892_v60  ;;  %17219 = vmatprep.subr.bf16.mxu0 %v17928_v37 }
 0x754   :  { %10156 = vmatpush2.bf16.msra.mxu1 %v17890_v6  ;;  %17220 = vmatpush3.bf16.msra.mxu0 %v17929_v8  ;;  %v17985_v8 = vld [vmem:[#allocation18 + $0xa0] sm:$0xff]  }
 0x755   :  { %10157 = vmatprep.subr.bf16.mxu1 %v17895_v17  ;;  %10717 = vmatprep.subr.bf16.mxu0 %v17932_v50  ;;  %v17987_v50 = vld [vmem:[#allocation18 + $0x98] sm:$0xff]  }
 0x758   :  { %10158 = vmatpush2.bf16.msra.mxu1 %v17893_v35 }
 0x759   :  { %10159 = vmatprep.subr.bf16.mxu1 %v17898_v21 }
 0x75c   :  { %10160 = vmatpush2.bf16.msra.mxu1 %v17896_v38 }
 0x75d   :  { %10161 = vmatprep.subr.bf16.mxu1 %v17901_v13 }
 0x760   :  { %10162 = vmatpush2.bf16.msra.mxu1 %v17899_v22  ;;  %v17979_v22 = vld [vmem:[#allocation18 + $0xb8] sm:$0xff]  }
 0x761   :  { %10163 = vmatprep.subr.bf16.mxu1 %v17904_v4 }
 0x764   :  { %10164 = vmatpush2.bf16.msra.mxu1 %v17902_v28 }
 0x765   :  { %10165 = vmatprep.subr.bf16.mxu1 %v17907_v2  ;;  %v17980_v2 = vld [vmem:[#allocation18 + $0xf0] sm:$0xff]  }
 0x768   :  { %10166 = vmatpush2.bf16.msra.mxu1 %v17905_v55 }
 0x769   :  { %10167 = vmatprep.subr.bf16.mxu1 %v17910_v7 }
 0x76c   :  { %10168 = vmatpush2.bf16.msra.mxu1 %v17908_v31  ;;  %v17983_v31 = vld [vmem:[#allocation18 + $0xa8] sm:$0xff]  }
 0x76d   :  { %10169 = vmatprep.subr.bf16.mxu1 %v17913_v11  ;;  %v17984_v11 = vld [vmem:[#allocation18 + $0xe0] sm:$0xff]  }
 0x770   :  { %10170 = vmatpush2.bf16.msra.mxu1 %v17911_v12  ;;  %v17986_v12 = vld [vmem:[#allocation18 + $0xd8] sm:$0xff]  }
 0x771   :  { %17227 = vmatprep.subr.bf16.mxu1 %v17978_v20  ;;  %v17953_v20 = vld [vmem:[#allocation21 + $0x4] ss:$8 sps:$4 sm:$0xff]  }
 0x773   :  { %10172 = vmatmul.mubr.bf16.vlgmr.msra.gmra.mxu1 %v20094_v40 }
 0x774   :  { %17228 = vmatpush3.bf16.msra.mxu1 %v17979_v22  ;;  %v17951_v22 = vld [vmem:[#allocation21] ss:$8 sps:$4 sm:$0xff]  }
 0x775   :  { %v20117_v43 = vpop.f32.mrf.mxu0  ;;  %17229 = vmatprep.subr.bf16.mxu1 %v17980_v2  ;;  %v17957_v2 = vld [vmem:[#allocation27 + $0x60] ss:$8 sps:$4 sm:$0xff]  }
 0x777   :  { %v20119_v0 = vpop.f32.mrf.mxu0 }
 0x778   :  { %17230 = vmatpush3.bf16.msra.mxu1 %v17981_v34  ;;  %v17962_v34 = vld [vmem:[#allocation27 + $0x54] ss:$8 sps:$4 sm:$0xff]  }
 0x779   :  { %v10054_v24 = vpop.f32.mrf.mxu0  ;;  %17231 = vmatprep.subr.bf16.mxu1 %v17982_v25  ;;  %v17966_v25 = vld [vmem:[#allocation27 + $0x30] ss:$8 sps:$4 sm:$0xff]  }
 0x77a   :  { %v17988_v24 = vld [vmem:[#allocation18 + $0xd0] sm:$0xff]  }
 0x77b   :  { %v10055_v42 = vpop.f32.mrf.mxu0 }
 0x77c   :  { %17232 = vmatpush3.bf16.msra.mxu1 %v17983_v31  ;;  %v17989_v42 = vld [vmem:[#allocation18 + $0x90] sm:$0xff]  }
 0x77d   :  { %17233 = vmatprep.subr.bf16.mxu1 %v17984_v11  ;;  %v17971_v31 = vld [vmem:[#allocation27 + $0x24] ss:$8 sps:$4 sm:$0xff]   ;;  %v17974_v11 = vld [vmem:[#allocation27 + $0x14] ss:$8 sps:$4 sm:$0xff]  }
 0x780   :  { %17234 = vmatpush3.bf16.msra.mxu1 %v17985_v8  ;;  %v17972_v8 = vld [vmem:[#allocation27 + $0x10] ss:$8 sps:$4 sm:$0xff]  }
 0x781   :  { %17235 = vmatprep.subr.bf16.mxu1 %v17986_v12  ;;  %v17977_v12 = vld [vmem:[#allocation27 + $0x4] ss:$8 sps:$4 sm:$0xff]  }
 0x784   :  { %17236 = vmatpush3.bf16.msra.mxu1 %v17987_v50  ;;  %v17975_v50 = vld [vmem:[#allocation27] ss:$8 sps:$4 sm:$0xff]  }
 0x785   :  { %17237 = vmatprep.subr.bf16.mxu1 %v17988_v24  ;;  %v10975_v24 = vld [vmem:[#allocation11] sm:$0xff] }
 0x788   :  { %17238 = vmatpush3.bf16.msra.mxu1 %v17989_v42  ;;  %v10976_v42 = vpack.c.bf16 %v10975_v24, %v10975_v24  ;;  %v18004_v24 = vld [vmem:[#allocation24 + $0x50] sm:$0xff]  }
 0x7b3   :  { %v10009_v41 = vpop.f32.mrf.mxu1 }
 0x7b4   :  { %v10010_v18 = vadd.f32 %v10009_v41, %v20111_v15 }
 0x7b5   :  { %v10011_v44 = vpop.f32.mrf.mxu1  ;;  %v20124_v45 = vpop.f32.mrf.mxu0 }
 0x7b6   :  { %v10180_v46 = vrot.slane %v10010_v18, 4  ;;  %v10012_v40 = vadd.f32 %v10011_v44, %v20114_v49  ;;  %v17990_v44 = vld [vmem:[#allocation18 + $0xc8] sm:$0xff]  }
 0x7b7   :  { %v10013_v53 = vpop.f32.mrf.mxu1  ;;  %v20127_v57 = vpop.f32.mrf.mxu0  ;;  %17239 = vmatprep.subr.bf16.mxu1 %v17990_v44 }
 0x7b8   :  { %v10181_v39 = vadd.f32 %v10180_v46, %v10010_v18  ;;  %v10186_v47 = vrot.slane %v10012_v40, 4 }
 0x7b9   :  { %v10014_v63 = vpop.f32.mrf.mxu1  ;;  %v10136_v9 = vpop.f32.mrf.mxu0 }
 0x7ba   :  { %v10182_v61 = vrot.slane %v10181_v39, 2  ;;  %v10187_v54 = vadd.f32 %v10186_v47, %v10012_v40  ;;  %v17993_v63 = vld [vmem:[#allocation18 + $0x80] sm:$0xff]  }
 0x7bb   :  { %v10137_v14 = vpop.f32.mrf.mxu0 }
 0x7bc   :  { %v10183_v26 = vadd.f32 %v10182_v61, %v10181_v39  ;;  %v10188_v56 = vrot.slane %v10187_v54, 2  ;;  %v17992_v39 = vld [vmem:[#allocation18 + $0xc0] sm:$0xff]  }
 0x7be   :  { %v10184_v59 = vrot.slane %v10183_v26, 1  ;;  %v10189_v15 = vadd.f32 %v10188_v56, %v10187_v54  ;;  %v17930_v54 = vld [vmem:[#allocation21 + $0x70] ss:$8 sps:$4 sm:$0xff]   ;;  %v8563_v56 = vrot.slane %v20090_v19, %v19911_v16 }
 0x7c0   :  { %v10185_v1 = vadd.f32 %v10184_v59, %v10183_v26  ;;  %v10190_v60 = vrot.slane %v10189_v15, 1  ;;  %v17935_v26 = vld [vmem:[#allocation21 + $0x64] ss:$8 sps:$4 sm:$0xff]   ;;  %v8567_v59 = vrot.slane %v20090_v19, %v19914_v27 }
 0x7c2   :  { %v10204_v30 = vmul.f32 0.125, %v10185_v1  ;;  %v10191_v5 = vadd.f32 %v10190_v60, %v10189_v15  ;;  %v17933_v15 = vld [vmem:[#allocation21 + $0x60] ss:$8 sps:$4 sm:$0xff]   ;;  %v17938_v1 = vld [vmem:[#allocation21 + $0x54] ss:$8 sps:$4 sm:$0xff]   ;;  %v10051_v60 = vadd.f32 %v20117_v43, %v8563_v56 }
 0x7c4   :  { %v10208_v6 = vsub.f32 %v10010_v18, %v10204_v30  ;;  %v10205_v49 = vmul.f32 0.125, %v10191_v5  ;;  %v10053_v5 = vadd.f32 %v20119_v0, %v8567_v59  ;;  %v17942_v0 = vld [vmem:[#allocation21 + $0x30] ss:$8 sps:$4 sm:$0xff]  }
 0x7c6   :  { %v10212_v17 = vmul.f32 %v10208_v6, %v10208_v6  ;;  %v10209_v33 = vsub.f32 %v10012_v40, %v10205_v49  ;;  %v17991_v40 = vld [vmem:[#allocation18 + $0x88] sm:$0xff]   ;;  %v17936_v49 = vld [vmem:[#allocation21 + $0x50] ss:$8 sps:$4 sm:$0xff]  }
 0x7c7   :  { %17240 = vmatpush3.bf16.msra.mxu1 %v17991_v40 }
 0x7c8   :  { %v10216_v58 = vrot.slane %v10212_v17, 4  ;;  %v10213_v35 = vmul.f32 %v10209_v33, %v10209_v33  ;;  %17241 = vmatprep.subr.bf16.mxu1 %v17992_v39 }
 0x7ca   :  { %v10217_v21 = vadd.f32 %v10216_v58, %v10212_v17  ;;  %v10222_v62 = vrot.slane %v10213_v35, 4 }
 0x7cb   :  { %17242 = vmatpush3.bf16.msra.mxu1 %v17993_v63 }
 0x7cc   :  { %v10218_v10 = vrot.slane %v10217_v21, 2  ;;  %v10223_v38 = vadd.f32 %v10222_v62, %v10213_v35 }
 0x7ce   :  { %v10219_v13 = vadd.f32 %v10218_v10, %v10217_v21  ;;  %v10224_v48 = vrot.slane %v10223_v38, 2  ;;  %v17939_v21 = vld [vmem:[#allocation21 + $0x40] ss:$8 sps:$4 sm:$0xff]   ;;  %v17944_v10 = vld [vmem:[#allocation21 + $0x34] ss:$8 sps:$4 sm:$0xff]  }
 0x7d0   :  { %v10220_v4 = vrot.slane %v10219_v13, 1  ;;  %v10225_v23 = vadd.f32 %v10224_v48, %v10223_v38  ;;  %v17947_v38 = vld [vmem:[#allocation21 + $0x24] ss:$8 sps:$4 sm:$0xff]   ;;  %v17950_v48 = vld [vmem:[#allocation21 + $0x14] ss:$8 sps:$4 sm:$0xff]  }
 0x7d2   :  { %v10221_v29 = vadd.f32 %v10220_v4, %v10219_v13  ;;  %v10226_v28 = vrot.slane %v10225_v23, 1  ;;  %v17945_v13 = vld [vmem:[#allocation21 + $0x20] ss:$8 sps:$4 sm:$0xff]  }
 0x7d3   :  { %v10607_v4 = vld [vmem:[#allocation9] sm:$0xff] }
 0x7d4   :  { %v10240_v3 = vmul.f32 0.125, %v10221_v29  ;;  %v10227_v55 = vadd.f32 %v10226_v28, %v10225_v23  ;;  %v10608_v23 = vpack.c.bf16 %v10607_v4, %v10607_v4  ;;  %v17954_v29 = vld [vmem:[#allocation27 + $0x70] ss:$8 sps:$4 sm:$0xff]   ;;  %v17959_v28 = vld [vmem:[#allocation27 + $0x64] ss:$8 sps:$4 sm:$0xff]  }
 0x7d6   :  { %v10244_v7 = vadd.f32 1e-05, %v10240_v3  ;;  %v10241_v32 = vmul.f32 0.125, %v10227_v55  ;;  %v17960_v3 = vld [vmem:[#allocation27 + $0x50] ss:$8 sps:$4 sm:$0xff]  }
 0x7d7   :  { %v17965_v55 = vld [vmem:[#allocation27 + $0x44] ss:$8 sps:$4 sm:$0xff]  }
 0x7d8   :  { %18634 = vrsqrt.f32 %v10244_v7  ;;  %v10245_v37 = vadd.f32 1e-05, %v10241_v32  ;;  %v17963_v7 = vld [vmem:[#allocation27 + $0x40] ss:$8 sps:$4 sm:$0xff]   ;;  %v17968_v32 = vld [vmem:[#allocation27 + $0x34] ss:$8 sps:$4 sm:$0xff]  }
 0x7da   :  { %18636 = vrsqrt.f32 %v10245_v37  ;;  %v17969_v37 = vld [vmem:[#allocation27 + $0x20] ss:$8 sps:$4 sm:$0xff]  }
 0x7e5   :  { %v18635_v41 = vpop.eup %18634 }
 0x7e6   :  { %v10252_v18 = vmul.f32 %v18635_v41, %v10208_v6 }
 0x7e7   :  { %v18637_v46 = vpop.eup %18636 }
 0x7e8   :  { %v10253_v53 = vmul.f32 %v18637_v46, %v10209_v33  ;;  %v10256_v47 = vmax.f32 %v10252_v18, 0.0  ;;  %v17941_v33 = vld [vmem:[#allocation21 + $0x44] ss:$8 sps:$4 sm:$0xff]  }
 0x7ea   :  { %v10257_v9 = vmax.f32 %v10253_v53, 0.0  ;;  %v10260_v14 = vpack.c.bf16 %v10256_v47, %v10256_v47 }
 0x7ec   :  { %v10261_v61 = vpack.c.bf16 %v10257_v9, %v10257_v9 }
 0x7ee   :  { %10559 = vmatprep.mubr.bf16.mxu0 %v10261_v61 }
 0x7ef   :  { %10560 = vmatmul.mubr.bf16.vlgmr.msra.gmra.mxu0 %v10260_v14 }
 0x7f0   :  { %10718 = vmatpush1.bf16.msra.mxu0 %v17930_v54  ;;  %10749 = vmatprep.mubr.bf16.mxu0 %v19539_v52 }
 0x7f1   :  { %10719 = vmatprep.subr.bf16.mxu0 %v17935_v26 }
 0x7f3   :  { %v10091_v30 = vpop.f32.mrf.mxu1 }
 0x7f4   :  { %v10092_v6 = vadd.f32 %v10091_v30, %v10051_v60  ;;  %10720 = vmatpush1.bf16.msra.mxu0 %v17933_v15 }
 0x7f5   :  { %v10093_v17 = vpop.f32.mrf.mxu1  ;;  %10721 = vmatprep.subr.bf16.mxu0 %v17938_v1 }
 0x7f6   :  { %v10094_v58 = vadd.f32 %v10093_v17, %v10053_v5  ;;  %v20137_v19 = vadd.f32 %v20124_v45, %v10092_v6  ;;  %v17948_v45 = vld [vmem:[#allocation21 + $0x10] ss:$8 sps:$4 sm:$0xff]  }
 0x7f7   :  { %v10095_v35 = vpop.f32.mrf.mxu1 }
 0x7f8   :  { %10722 = vmatpush1.bf16.msra.mxu0 %v17936_v49  ;;  %v20140_v62 = vadd.f32 %v20127_v57, %v10094_v58  ;;  %v17956_v57 = vld [vmem:[#allocation27 + $0x74] ss:$8 sps:$4 sm:$0xff]  }
 0x7f9   :  { %v10096_v43 = vpop.f32.mrf.mxu1  ;;  %10723 = vmatprep.subr.bf16.mxu0 %v17941_v33 }
 0x7fc   :  { %10724 = vmatpush1.bf16.msra.mxu0 %v17939_v21 }
 0x7fd   :  { %10725 = vmatprep.subr.bf16.mxu0 %v17944_v10 }
 0x800   :  { %10726 = vmatpush1.bf16.msra.mxu0 %v17942_v0 }
 0x801   :  { %10727 = vmatprep.subr.bf16.mxu0 %v17947_v38 }
 0x804   :  { %10728 = vmatpush1.bf16.msra.mxu0 %v17945_v13 }
 0x805   :  { %10729 = vmatprep.subr.bf16.mxu0 %v17950_v48 }
 0x808   :  { %10730 = vmatpush1.bf16.msra.mxu0 %v17948_v45 }
 0x809   :  { %10731 = vmatprep.subr.bf16.mxu0 %v17953_v20 }
 0x80c   :  { %10732 = vmatpush1.bf16.msra.mxu0 %v17951_v22 }
 0x80d   :  { %11085 = vmatprep.subr.bf16.mxu0 %v17956_v57 }
 0x80f   :  { %10750 = vmatmul.mubr.bf16.vlgmr.msra.gmra.mxu0 %v10608_v23 }
 0x810   :  { %11086 = vmatpush1.bf16.msra.mxu0 %v17954_v29  ;;  %11117 = vmatprep.mubr.bf16.mxu0 %v19539_v52 }
 0x811   :  { %11087 = vmatprep.subr.bf16.mxu0 %v17959_v28 }
 0x814   :  { %11088 = vmatpush1.bf16.msra.mxu0 %v17957_v2 }
 0x815   :  { %11089 = vmatprep.subr.bf16.mxu0 %v17962_v34  ;;  %v17994_v34 = vld [vmem:[#allocation24 + $0x78] sm:$0xff]  }
 0x816   :  { %17249 = vmatprep.subr.bf16.mxu1 %v17994_v34 }
 0x818   :  { %11090 = vmatpush1.bf16.msra.mxu0 %v17960_v3 }
 0x819   :  { %11091 = vmatprep.subr.bf16.mxu0 %v17965_v55  ;;  %v17995_v55 = vld [vmem:[#allocation24 + $0x38] sm:$0xff]  }
 0x81c   :  { %11092 = vmatpush1.bf16.msra.mxu0 %v17963_v7 }
 0x81d   :  { %11093 = vmatprep.subr.bf16.mxu0 %v17968_v32  ;;  %v17996_v32 = vld [vmem:[#allocation24 + $0x70] sm:$0xff]  }
 0x820   :  { %11094 = vmatpush1.bf16.msra.mxu0 %v17966_v25  ;;  %v17997_v25 = vld [vmem:[#allocation24 + $0x30] sm:$0xff]  }
 0x821   :  { %11095 = vmatprep.subr.bf16.mxu0 %v17971_v31  ;;  %v17998_v31 = vld [vmem:[#allocation24 + $0x68] sm:$0xff]  }
 0x824   :  { %11096 = vmatpush1.bf16.msra.mxu0 %v17969_v37  ;;  %v17999_v37 = vld [vmem:[#allocation24 + $0x28] sm:$0xff]  }
 0x825   :  { %11097 = vmatprep.subr.bf16.mxu0 %v17974_v11  ;;  %v18000_v11 = vld [vmem:[#allocation24 + $0x60] sm:$0xff]  }
 0x828   :  { %11098 = vmatpush1.bf16.msra.mxu0 %v17972_v8  ;;  %v18001_v8 = vld [vmem:[#allocation24 + $0x20] sm:$0xff]  }
 0x829   :  { %11099 = vmatprep.subr.bf16.mxu0 %v17977_v12  ;;  %v18002_v12 = vld [vmem:[#allocation24 + $0x58] sm:$0xff]  }
 0x82c   :  { %11100 = vmatpush1.bf16.msra.mxu0 %v17975_v50  ;;  %v18003_v50 = vld [vmem:[#allocation24 + $0x18] sm:$0xff]  }
 0x82f   :  { %11118 = vmatmul.mubr.bf16.vlgmr.msra.gmra.mxu0 %v10976_v42  ;;  %v18005_v42 = vld [vmem:[#allocation24 + $0x10] sm:$0xff]  }
 0x830   :  { %11485 = vmatprep.mubr.bf16.mxu0 %v19539_v52 }
 0x833   :  { %v10173_v41 = vpop.f32.mrf.mxu1 }
 0x834   :  { %v10174_v18 = vadd.f32 %v10173_v41, %v20137_v19  ;;  %v18006_v41 = vld [vmem:[#allocation24 + $0x48] sm:$0xff]  }
 0x835   :  { %v10175_v44 = vpop.f32.mrf.mxu1 }
 0x836   :  { %v10192_v46 = vrot.slane %v10174_v18, 4  ;;  %v10176_v40 = vadd.f32 %v10175_v44, %v20140_v62  ;;  %v18008_v44 = vld [vmem:[#allocation24 + $0x40] sm:$0xff]  }
 0x837   :  { %v10177_v53 = vpop.f32.mrf.mxu1 }
 0x838   :  { %v10193_v39 = vadd.f32 %v10192_v46, %v10174_v18  ;;  %v10198_v47 = vrot.slane %v10176_v40, 4  ;;  %v18009_v46 = vld [vmem:[#allocation24] sm:$0xff]  }
 0x839   :  { %v10178_v63 = vpop.f32.mrf.mxu1 }
 0x83a   :  { %v10194_v9 = vrot.slane %v10193_v39, 2  ;;  %v10199_v61 = vadd.f32 %v10198_v47, %v10176_v40 }
 0x83c   :  { %v10195_v54 = vadd.f32 %v10194_v9, %v10193_v39  ;;  %v10200_v14 = vrot.slane %v10199_v61, 2 }
 0x83e   :  { %v10196_v26 = vrot.slane %v10195_v54, 1  ;;  %v10201_v56 = vadd.f32 %v10200_v14, %v10199_v61  ;;  %v10625_v61 = vld [vmem:[#allocation23] sm:$0x3] }
 0x83f   :  { %v10634_v14 = vrot.slane %v10625_v61, %v19864_v51 }
 0x840   :  { %v10197_v59 = vadd.f32 %v10196_v26, %v10195_v54  ;;  %v10202_v15 = vrot.slane %v10201_v56, 1  ;;  %v10630_v54 = vrot.slane %v10625_v61, %v19861_v36 }
 0x842   :  { %v10206_v52 = vmul.f32 0.125, %v10197_v59  ;;  %v10203_v1 = vadd.f32 %v10202_v15, %v10201_v56 }
 0x844   :  { %v10210_v60 = vsub.f32 %v10174_v18, %v10206_v52  ;;  %v10207_v30 = vmul.f32 0.125, %v10203_v1  ;;  %v18007_v18 = vld [vmem:[#allocation24 + $0x8] sm:$0xff]  }
 0x846   :  { %v10214_v5 = vmul.f32 %v10210_v60, %v10210_v60  ;;  %v10211_v6 = vsub.f32 %v10176_v40, %v10207_v30  ;;  %v18010_v40 = vld [vmem:[#allocation30 + $0x78] sm:$0xff]  }
 0x848   :  { %v10228_v49 = vrot.slane %v10214_v5, 4  ;;  %v10215_v17 = vmul.f32 %v10211_v6, %v10211_v6 }
 0x84a   :  { %v10229_v33 = vadd.f32 %v10228_v49, %v10214_v5  ;;  %v10234_v58 = vrot.slane %v10215_v17, 4 }
 0x84c   :  { %v10230_v19 = vrot.slane %v10229_v33, 2  ;;  %v10235_v35 = vadd.f32 %v10234_v58, %v10215_v17 }
 0x84e   :  { %v10231_v21 = vadd.f32 %v10230_v19, %v10229_v33  ;;  %v10236_v62 = vrot.slane %v10235_v35, 2 }
 0x850   :  { %v10232_v43 = vrot.slane %v10231_v21, 1  ;;  %v10237_v10 = vadd.f32 %v10236_v62, %v10235_v35 }
 0x852   :  { %v10233_v0 = vadd.f32 %v10232_v43, %v10231_v21  ;;  %v10238_v38 = vrot.slane %v10237_v10, 1 }
 0x854   :  { %v10242_v13 = vmul.f32 0.125, %v10233_v0  ;;  %v10239_v48 = vadd.f32 %v10238_v38, %v10237_v10 }
 0x856   :  { %v10246_v45 = vadd.f32 1e-05, %v10242_v13  ;;  %v10243_v20 = vmul.f32 0.125, %v10239_v48 }
 0x858   :  { %18638 = vrsqrt.f32 %v10246_v45  ;;  %v10247_v22 = vadd.f32 1e-05, %v10243_v20 }
 0x85a   :  { %18640 = vrsqrt.f32 %v10247_v22 }
 0x865   :  { %v18639_v4 = vpop.eup %18638 }
 0x866   :  { %v10254_v57 = vmul.f32 %v18639_v4, %v10210_v60 }
 0x867   :  { %v18641_v23 = vpop.eup %18640 }
 0x868   :  { %v10255_v29 = vmul.f32 %v18641_v23, %v10211_v6  ;;  %v10258_v28 = vmax.f32 %v10254_v57, 0.0  ;;  %v10993_v23 = vld [vmem:[#allocation29] sm:$0x3] }
 0x86a   :  { %v10259_v2 = vmax.f32 %v10255_v29, 0.0  ;;  %v10262_v7 = vpack.c.bf16 %v10258_v28, %v10258_v28 }
 0x86c   :  { %v10263_v3 = vpack.c.bf16 %v10259_v2, %v10259_v2 }
 0x86e   :  { %10599 = vmatprep.mubr.bf16.mxu1 %v10263_v3  ;;  %v10998_v3 = vrot.slane %v10993_v23, %v19861_v36 }
 0x86f   :  { %10600 = vmatmul.mubr.bf16.vlgmr.msra.gmra.mxu1 %v10262_v7 }
 0x870   :  { %17250 = vmatpush3.bf16.msra.mxu1 %v17995_v55 }
 0x871   :  { %17251 = vmatprep.subr.bf16.mxu1 %v17996_v32  ;;  %v11002_v32 = vrot.slane %v10993_v23, %v19864_v51 }
 0x874   :  { %17252 = vmatpush3.bf16.msra.mxu1 %v17997_v25 }
 0x875   :  { %17253 = vmatprep.subr.bf16.mxu1 %v17998_v31 }
 0x878   :  { %17254 = vmatpush3.bf16.msra.mxu1 %v17999_v37 }
 0x879   :  { %17255 = vmatprep.subr.bf16.mxu1 %v18000_v11 }
 0x87c   :  { %17256 = vmatpush3.bf16.msra.mxu1 %v18001_v8 }
 0x87d   :  { %17257 = vmatprep.subr.bf16.mxu1 %v18002_v12 }
 0x880   :  { %17258 = vmatpush3.bf16.msra.mxu1 %v18003_v50 }
 0x881   :  { %17259 = vmatprep.subr.bf16.mxu1 %v18004_v24 }
 0x884   :  { %17260 = vmatpush3.bf16.msra.mxu1 %v18005_v42 }
 0x885   :  { %17261 = vmatprep.subr.bf16.mxu1 %v18006_v41 }
 0x888   :  { %17262 = vmatpush3.bf16.msra.mxu1 %v18007_v18 }
 0x889   :  { %17263 = vmatprep.subr.bf16.mxu1 %v18008_v44 }
 0x88c   :  { %17264 = vmatpush3.bf16.msra.mxu1 %v18009_v46 }
 0x88d   :  { %17271 = vmatprep.subr.bf16.mxu1 %v18010_v40 }
 0x8af   :  { %v17221_v53 = vpop.f32.mrf.mxu0 }
 0x8b1   :  { %v17222_v39 = vpop.f32.mrf.mxu0 }
 0x8b2   :  { %v20146_v47 = vadd.f32 %v17222_v39, %v17221_v53 }
 0x8b3   :  { %v17224_v63 = vpop.f32.mrf.mxu0 }
 0x8b5   :  { %v17225_v9 = vpop.f32.mrf.mxu0 }
 0x8cf   :  { %v10751_v26 = vpop.f32.mrf.mxu0 }
 0x8d0   :  { %v10752_v56 = vadd.f32 %v10751_v26, %v10630_v54 }
 0x8d1   :  { %v10753_v59 = vpop.f32.mrf.mxu0 }
 0x8d2   :  { %v10758_v15 = vrot.slane %v10752_v56, 4  ;;  %v10754_v52 = vadd.f32 %v10753_v59, %v10634_v14 }
 0x8d3   :  { %v10755_v1 = vpop.f32.mrf.mxu0 }
 0x8d4   :  { %v10759_v60 = vadd.f32 %v10758_v15, %v10752_v56  ;;  %v10764_v30 = vrot.slane %v10754_v52, 4 }
 0x8d5   :  { %v10756_v5 = vpop.f32.mrf.mxu0 }
 0x8d6   :  { %v10760_v6 = vrot.slane %v10759_v60, 2  ;;  %v10765_v49 = vadd.f32 %v10764_v30, %v10754_v52 }
 0x8d8   :  { %v10761_v17 = vadd.f32 %v10760_v6, %v10759_v60  ;;  %v10766_v33 = vrot.slane %v10765_v49, 2 }
 0x8da   :  { %v10762_v58 = vrot.slane %v10761_v17, 1  ;;  %v10767_v19 = vadd.f32 %v10766_v33, %v10765_v49 }
 0x8dc   :  { %v10763_v35 = vadd.f32 %v10762_v58, %v10761_v17  ;;  %v10768_v21 = vrot.slane %v10767_v19, 1 }
 0x8de   :  { %v10770_v62 = vmul.f32 0.125, %v10763_v35  ;;  %v10769_v43 = vadd.f32 %v10768_v21, %v10767_v19 }
 0x8e0   :  { %v10772_v10 = vsub.f32 %v10752_v56, %v10770_v62  ;;  %v10771_v0 = vmul.f32 0.125, %v10769_v43 }
 0x8e2   :  { %v10774_v38 = vmul.f32 %v10772_v10, %v10772_v10  ;;  %v10773_v13 = vsub.f32 %v10754_v52, %v10771_v0 }
 0x8e4   :  { %v10776_v48 = vrot.slane %v10774_v38, 4  ;;  %v10775_v45 = vmul.f32 %v10773_v13, %v10773_v13 }
 0x8e6   :  { %v10777_v20 = vadd.f32 %v10776_v48, %v10774_v38  ;;  %v10782_v22 = vrot.slane %v10775_v45, 4  ;;  %v18011_v38 = vld [vmem:[#allocation30 + $0x38] sm:$0xff]  }
 0x8e8   :  { %v10778_v4 = vrot.slane %v10777_v20, 2  ;;  %v10783_v57 = vadd.f32 %v10782_v22, %v10775_v45  ;;  %v18012_v45 = vld [vmem:[#allocation30 + $0x70] sm:$0xff]  }
 0x8ea   :  { %v10779_v29 = vadd.f32 %v10778_v4, %v10777_v20  ;;  %v10784_v28 = vrot.slane %v10783_v57, 2 }
 0x8ec   :  { %v10780_v2 = vrot.slane %v10779_v29, 1  ;;  %v10785_v34 = vadd.f32 %v10784_v28, %v10783_v57  ;;  %v18013_v57 = vld [vmem:[#allocation30 + $0x30] sm:$0xff]  }
 0x8ee   :  { %v10781_v55 = vadd.f32 %v10780_v2, %v10779_v29  ;;  %v10786_v7 = vrot.slane %v10785_v34, 1 }
 0x8ef   :  { %v11119_v25 = vpop.f32.mrf.mxu0 }
 0x8f0   :  { %v10788_v31 = vmul.f32 0.125, %v10781_v55  ;;  %v10787_v37 = vadd.f32 %v10786_v7, %v10785_v34  ;;  %v11120_v11 = vadd.f32 %v11119_v25, %v10998_v3  ;;  %v18015_v34 = vld [vmem:[#allocation30 + $0x28] sm:$0xff]   ;;  %v18016_v3 = vld [vmem:[#allocation30 + $0x60] sm:$0xff]  }
 0x8f1   :  { %v11121_v8 = vpop.f32.mrf.mxu0  ;;  %v18017_v25 = vld [vmem:[#allocation30 + $0x20] sm:$0xff]  }
 0x8f2   :  { %v10790_v12 = vadd.f32 1e-05, %v10788_v31  ;;  %v10789_v50 = vmul.f32 0.125, %v10787_v37  ;;  %v11126_v24 = vrot.slane %v11120_v11, 4  ;;  %v11122_v42 = vadd.f32 %v11121_v8, %v11002_v32  ;;  %v18018_v31 = vld [vmem:[#allocation30 + $0x58] sm:$0xff]   ;;  %v18021_v8 = vld [vmem:[#allocation30 + $0x10] sm:$0xff]  }
 0x8f3   :  { %v11123_v41 = vpop.f32.mrf.mxu0  ;;  %v18019_v37 = vld [vmem:[#allocation30 + $0x18] sm:$0xff]  }
 0x8f4   :  { %18642 = vrsqrt.f32 %v10790_v12  ;;  %v10791_v18 = vadd.f32 1e-05, %v10789_v50  ;;  %v11127_v44 = vadd.f32 %v11126_v24, %v11120_v11  ;;  %v11132_v46 = vrot.slane %v11122_v42, 4  ;;  %v18022_v12 = vld [vmem:[#allocation30 + $0x48] sm:$0xff]  }
 0x8f5   :  { %v11124_v40 = vpop.f32.mrf.mxu0  ;;  %v18023_v50 = vld [vmem:[#allocation30 + $0x8] sm:$0xff]  }
 0x8f6   :  { %18644 = vrsqrt.f32 %v10791_v18  ;;  %v11128_v53 = vrot.slane %v11127_v44, 2  ;;  %v11133_v39 = vadd.f32 %v11132_v46, %v11122_v42 }
 0x8f8   :  { %v11129_v63 = vadd.f32 %v11128_v53, %v11127_v44  ;;  %v11134_v9 = vrot.slane %v11133_v39, 2  ;;  %v18025_v44 = vld [vmem:[#allocation30] sm:$0xff]  }
 0x8fa   :  { %v11130_v61 = vrot.slane %v11129_v63, 1  ;;  %v11135_v54 = vadd.f32 %v11134_v9, %v11133_v39  ;;  %v16666_v9 = vld [vmem:[#allocation20] ss:$0 sm:$0xff] }
 0x8fc   :  { %v11131_v14 = vadd.f32 %v11130_v61, %v11129_v63  ;;  %v11136_v26 = vrot.slane %v11135_v54, 1 }
 0x8fe   :  { %v11138_v56 = vmul.f32 0.125, %v11131_v14  ;;  %v11137_v59 = vadd.f32 %v11136_v26, %v11135_v54  ;;  %v10562_v14 = vadd.f32 %v20146_v47, %v16666_v9  ;;  %v16803_v47 = vld [vmem:[%s20363_s1 + $0x2] ss:$0 sm:$0xff] }
 0x900   :  { %v11140_v15 = vsub.f32 %v11120_v11, %v11138_v56  ;;  %v11139_v52 = vmul.f32 0.125, %v11137_v59  ;;  %v18020_v11 = vld [vmem:[#allocation30 + $0x50] sm:$0xff]  }
 0x901   :  { %v18643_v1 = vpop.eup %18642 }
 0x902   :  { %v10794_v60 = vmul.f32 %v18643_v1, %v10772_v10  ;;  %v11142_v30 = vmul.f32 %v11140_v15, %v11140_v15  ;;  %v11141_v5 = vsub.f32 %v11122_v42, %v11139_v52  ;;  %v18024_v42 = vld [vmem:[#allocation30 + $0x40] sm:$0xff]   ;;  %v18026_v52 = vld [vmem:[#allocation33 + $0x70] ss:$8 sps:$4 sm:$0xff]  }
 0x903   :  { %v18645_v6 = vpop.eup %18644  ;;  %v18028_v1 = vld [vmem:[#allocation33 + $0x74] ss:$8 sps:$4 sm:$0xff]  }
 0x904   :  { %v11144_v49 = vrot.slane %v11142_v30, 4  ;;  %v11143_v17 = vmul.f32 %v11141_v5, %v11141_v5  ;;  %v10795_v33 = vmul.f32 %v18645_v6, %v10773_v13  ;;  %v10796_v58 = vmax.f32 %v10794_v60, 0.0  ;;  %v18014_v13 = vld [vmem:[#allocation30 + $0x68] sm:$0xff]   ;;  %v16798_v60 = vld [vmem:[%s20363_s1] ss:$0 sm:$0xff]  ;;  %11453 = vmatprep.subr.bf16.mxu0 %v18028_v1 }
 0x905   :  { %11725 = vperm.xlu0 %17528, %v16798_v60   ;;  %v16799_v6 = vld [vmem:[#allocation2] ss:$0 sm:$0xff]  ;;  %11454 = vmatpush1.bf16.msra.mxu0 %v18026_v52  ;;  %v11781_v52 = vld [vmem:[#allocation6 + $0x68] sm:$0xff] }
 0x906   :  { %v11145_v19 = vadd.f32 %v11144_v49, %v11142_v30  ;;  %v11150_v35 = vrot.slane %v11143_v17, 4  ;;  %v10797_v21 = vmax.f32 %v10795_v33, 0.0  ;;  %v10798_v48 = vpack.c.bf16 %v10796_v58, %v10796_v58  ;;  %v18031_v30 = vld [vmem:[#allocation33 + $0x64] ss:$8 sps:$4 sm:$0xff]   ;;  %v18029_v49 = vld [vmem:[#allocation33 + $0x60] ss:$8 sps:$4 sm:$0xff]  }
 0x907   :  { %11455 = vmatprep.subr.bf16.mxu0 %v18031_v30  ;;  %v16805_v33 = vld [vmem:[%s20363_s1 + $0x3] ss:$0 sm:$0xff]  ;;  %v18032_v58 = vld [vmem:[#allocation33 + $0x50] ss:$8 sps:$4 sm:$0xff]  }
 0x908   :  { %v11146_v62 = vrot.slane %v11145_v19, 2  ;;  %v11151_v43 = vadd.f32 %v11150_v35, %v11143_v17  ;;  %v10799_v0 = vpack.c.bf16 %v10797_v21, %v10797_v21  ;;  %v18034_v17 = vld [vmem:[#allocation33 + $0x54] ss:$8 sps:$4 sm:$0xff]   ;;  %v18037_v35 = vld [vmem:[#allocation33 + $0x44] ss:$8 sps:$4 sm:$0xff]  }
 0x909   :  { %11740 = vperm.xlu0 %17528, %v16799_v6   ;;  %11456 = vmatpush1.bf16.msra.mxu0 %v18029_v49  ;;  %v18035_v21 = vld [vmem:[#allocation33 + $0x40] ss:$8 sps:$4 sm:$0xff]  }
 0x90a   :  { %v11147_v20 = vadd.f32 %v11146_v62, %v11145_v19  ;;  %v11152_v22 = vrot.slane %v11151_v43, 2  ;;  %10967 = vmatprep.mubr.bf16.mxu1 %v10799_v0  ;;  %v16807_v19 = vld [vmem:[%s20363_s1 + $0x4] ss:$0 sm:$0xff]  ;;  %11457 = vmatprep.subr.bf16.mxu0 %v18034_v17  ;;  %v18040_v62 = vld [vmem:[#allocation33 + $0x34] ss:$8 sps:$4 sm:$0xff]   ;;  %v11841_v17 = vld [vmem:[#allocation6 + $0xc8] sm:$0xff] }
 0x90b   :  { %10968 = vmatmul.mubr.bf16.vlgmr.msra.gmra.mxu1 %v10798_v48  ;;  %v18043_v0 = vld [vmem:[#allocation33 + $0x24] ss:$8 sps:$4 sm:$0xff]   ;;  %v18046_v48 = vld [vmem:[#allocation33 + $0x14] ss:$8 sps:$4 sm:$0xff]  }
 0x90c   :  { %v11148_v10 = vrot.slane %v11147_v20, 1  ;;  %v11153_v4 = vadd.f32 %v11152_v22, %v11151_v43  ;;  %17272 = vmatpush3.bf16.msra.mxu1 %v18011_v38  ;;  %v18038_v43 = vld [vmem:[#allocation33 + $0x30] ss:$8 sps:$4 sm:$0xff]   ;;  %v18041_v38 = vld [vmem:[#allocation33 + $0x20] ss:$8 sps:$4 sm:$0xff]  }
 0x90d   :  { %17273 = vmatprep.subr.bf16.mxu1 %v18012_v45  ;;  %11824 = vperm.xlu0 %17528, %v16805_v33   ;;  %v18044_v45 = vld [vmem:[#allocation33 + $0x10] ss:$8 sps:$4 sm:$0xff]   ;;  %v18047_v22 = vld [vmem:[#allocation33] ss:$8 sps:$4 sm:$0xff]  }
 0x90e   :  { %v11149_v23 = vadd.f32 %v11148_v10, %v11147_v20  ;;  %v11154_v29 = vrot.slane %v11153_v4, 1  ;;  %11458 = vmatpush1.bf16.msra.mxu0 %v18032_v58  ;;  %v18049_v20 = vld [vmem:[#allocation33 + $0x4] ss:$8 sps:$4 sm:$0xff]   ;;  %v18052_v10 = vld [vmem:[#allocation39 + $0xe4] ss:$16 sps:$4 sm:$0xff]  }
 0x90f   :  { %11459 = vmatprep.subr.bf16.mxu0 %v18037_v35 }
 0x910   :  { %v11156_v28 = vmul.f32 0.125, %v11149_v23  ;;  %v11155_v2 = vadd.f32 %v11154_v29, %v11153_v4  ;;  %17274 = vmatpush3.bf16.msra.mxu1 %v18013_v57  ;;  %v11712_v57 = vld [vmem:[#allocation6] sm:$0xff]  ;;  %v11715_v23 = vld [vmem:[#allocation6 + $0x18] sm:$0xff] }
 0x911   :  { %17275 = vmatprep.subr.bf16.mxu1 %v18014_v13  ;;  %v11714_v13 = vld [vmem:[#allocation6 + $0x10] sm:$0xff]  ;;  %v11716_v29 = vld [vmem:[#allocation6 + $0x20] sm:$0xff] }
 0x912   :  { %v11158_v55 = vadd.f32 1e-05, %v11156_v28  ;;  %v11157_v7 = vmul.f32 0.125, %v11155_v2  ;;  %11460 = vmatpush1.bf16.msra.mxu0 %v18035_v21  ;;  %v11717_v28 = vld [vmem:[#allocation6 + $0x28] sm:$0xff]  ;;  %v11755_v21 = vld [vmem:[#allocation6 + $0x58] sm:$0xff] }
 0x913   :  { %11461 = vmatprep.subr.bf16.mxu0 %v18040_v62  ;;  %v16715_v62 = vld [vmem:[#allocation26] ss:$0 sm:$0xff] }
 0x914   :  { %18646 = vrsqrt.f32 %v11158_v55  ;;  %v11159_v32 = vadd.f32 1e-05, %v11157_v7  ;;  %17276 = vmatpush3.bf16.msra.mxu1 %v18015_v34  ;;  %v11752_v55 = vld [vmem:[#allocation6 + $0x40] sm:$0xff] }
 0x915   :  { %17277 = vmatprep.subr.bf16.mxu1 %v18016_v3  ;;  %v11750_v3 = vld [vmem:[#allocation6 + $0x30] sm:$0xff] }
 0x916   :  { %18648 = vrsqrt.f32 %v11159_v32  ;;  %11462 = vmatpush1.bf16.msra.mxu0 %v18038_v43  ;;  %v16748_v43 = vld [vmem:[#allocation32] ss:$0 sm:$0xff] }
 0x917   :  { %11463 = vmatprep.subr.bf16.mxu0 %v18043_v0 }
 0x918   :  { %17278 = vmatpush3.bf16.msra.mxu1 %v18017_v25  ;;  %v11754_v25 = vld [vmem:[#allocation6 + $0x50] sm:$0xff] }
 0x919   :  { %17279 = vmatprep.subr.bf16.mxu1 %v18018_v31 }
 0x91a   :  { %11464 = vmatpush1.bf16.msra.mxu0 %v18041_v38 }
 0x91b   :  { %11465 = vmatprep.subr.bf16.mxu0 %v18046_v48 }
 0x91c   :  { %17280 = vmatpush3.bf16.msra.mxu1 %v18019_v37 }
 0x91d   :  { %17281 = vmatprep.subr.bf16.mxu1 %v18020_v11 }
 0x91e   :  { %11466 = vmatpush1.bf16.msra.mxu0 %v18044_v45 }
 0x91f   :  { %11467 = vmatprep.subr.bf16.mxu0 %v18049_v20 }
 0x920   :  { %17282 = vmatpush3.bf16.msra.mxu1 %v18021_v8 }
 0x921   :  { %v18647_v24 = vpop.eup %18646  ;;  %17283 = vmatprep.subr.bf16.mxu1 %v18022_v12 }
 0x922   :  { %v11162_v41 = vmul.f32 %v18647_v24, %v11140_v15  ;;  %11468 = vmatpush1.bf16.msra.mxu0 %v18047_v22 }
 0x923   :  { %v18649_v18 = vpop.eup %18648  ;;  %13049 = vmatprep.subr.bf16.mxu0 %v18052_v10 }
 0x924   :  { %17284 = vmatpush3.bf16.msra.mxu1 %v18023_v50  ;;  %v11163_v46 = vmul.f32 %v18649_v18, %v11141_v5  ;;  %v11164_v40 = vmax.f32 %v11162_v41, 0.0  ;;  %v16801_v5 = vld [vmem:[%s20363_s1 + $0x1] ss:$0 sm:$0xff] }
 0x925   :  { %17285 = vmatprep.subr.bf16.mxu1 %v18024_v42  ;;  %11764 = vperm.xlu1 %17529, %v16801_v5   ;;  %v11811_v5 = vld [vmem:[#allocation6 + $0x98] sm:$0xff] }
 0x926   :  { %v11165_v53 = vmax.f32 %v11163_v46, 0.0  ;;  %v11166_v63 = vpack.c.bf16 %v11164_v40, %v11164_v40 }
 0x928   :  { %17286 = vmatpush3.bf16.msra.mxu1 %v18025_v44  ;;  %v11167_v39 = vpack.c.bf16 %v11165_v53, %v11165_v53 }
 0x929   :  { %11794 = vperm.xlu1 %17529, %v16803_v47  }
 0x92a   :  { %11335 = vmatprep.mubr.bf16.mxu1 %v11167_v39 }
 0x92b   :  { %11336 = vmatmul.mubr.bf16.vlgmr.msra.gmra.mxu1 %v11166_v63 }
 0x92d   :  { %11854 = vperm.xlu1 %17529, %v16807_v19  }
 0x92f   :  { %v17243_v61 = vpop.f32.mrf.mxu1 }
 0x931   :  { %v17244_v54 = vpop.f32.mrf.mxu1 }
 0x932   :  { %v17245_v26 = vadd.f32 %v17244_v54, %v17243_v61  ;;  %v11713_v54 = vld [vmem:[#allocation6 + $0x8] sm:$0xff] }
 0x933   :  { %v17246_v56 = vpop.f32.mrf.mxu1 }
 0x934   :  { %v10602_v59 = vadd.f32 %v17245_v26, %v10562_v14  ;;  %v11751_v26 = vld [vmem:[#allocation6 + $0x38] sm:$0xff] }
 0x935   :  { %v17247_v15 = vpop.f32.mrf.mxu1 }
 0x936   :  { %15297 = vst [vmem:[#allocation57] sm:$0xff] %v10602_v59 }
 0x980   :  { %v11726_v34 = vpop.permute.xlu0 %11725 }
 0x981   :  { %v11728_v7 = vmul.f32 %v11726_v34, %v11712_v57  ;;  %v11730_v32 = vmul.f32 %v11726_v34, %v11714_v13  ;;  %v11731_v37 = vmul.f32 %v11726_v34, %v11715_v23  ;;  %v11732_v11 = vmul.f32 %v11726_v34, %v11716_v29  ;;  %v18050_v23 = vld [vmem:[#allocation39 + $0xe0] ss:$16 sps:$4 sm:$0xff]  }
 0x982   :  { %v11733_v8 = vmul.f32 %v11726_v34, %v11717_v28  ;;  %v11729_v14 = vmul.f32 %v11726_v34, %v11713_v54  ;;  %v18085_v54 = vld [vmem:[#allocation39 + $0x184] ss:$16 sps:$4 sm:$0xff]  }
 0x984   :  { %v11741_v18 = vpop.permute.xlu0 %11740 }
 0x985   :  { %v11743_v44 = vadd.f32 %v11741_v18, %v11728_v7  ;;  %v11745_v46 = vadd.f32 %v11741_v18, %v11730_v32  ;;  %v20163_v40 = vadd.f32 %v11741_v18, %v11731_v37  ;;  %v11747_v53 = vadd.f32 %v11741_v18, %v11732_v11  ;;  %v18061_v7 = vld [vmem:[#allocation39 + $0x84] ss:$16 sps:$4 sm:$0xff]   ;;  %v18059_v32 = vld [vmem:[#allocation39 + $0x80] ss:$16 sps:$4 sm:$0xff]  }
 0x986   :  { %v11748_v39 = vadd.f32 %v11741_v18, %v11733_v8  ;;  %v11744_v59 = vadd.f32 %v11741_v18, %v11729_v14  ;;  %v18067_v37 = vld [vmem:[#allocation39 + $0x44] ss:$16 sps:$4 sm:$0xff]   ;;  %v18065_v11 = vld [vmem:[#allocation39 + $0x40] ss:$16 sps:$4 sm:$0xff]  }
 0x987   :  { %v18070_v8 = vld [vmem:[#allocation39 + $0x24] ss:$16 sps:$4 sm:$0xff]   ;;  %v18074_v18 = vld [vmem:[#allocation39 + $0x1e0] ss:$16 sps:$4 sm:$0xff]  }
 0x988   :  { %v20175_v30 = vpop.permute.xlu0 %11824  ;;  %v18083_v14 = vld [vmem:[#allocation39 + $0x180] ss:$16 sps:$4 sm:$0xff]  }
 0x989   :  { %v11828_v49 = vmul.f32 %v20175_v30, %v11811_v5 }
 0x9a0   :  { %v20158_v12 = vpop.permute.xlu1 %11764 }
 0x9a1   :  { %v11767_v50 = vmul.f32 %v20158_v12, %v11750_v3  ;;  %v11769_v24 = vmul.f32 %v20158_v12, %v11752_v55  ;;  %v11771_v41 = vmul.f32 %v20158_v12, %v11754_v25  ;;  %v11768_v56 = vmul.f32 %v20158_v12, %v11751_v26  ;;  %v18058_v3 = vld [vmem:[#allocation39 + $0xa4] ss:$16 sps:$4 sm:$0xff]   ;;  %v18056_v55 = vld [vmem:[#allocation39 + $0xa0] ss:$16 sps:$4 sm:$0xff]  }
 0x9a2   :  { %v11772_v45 = vmul.f32 %v20158_v12, %v11755_v21  ;;  %v18064_v25 = vld [vmem:[#allocation39 + $0x64] ss:$16 sps:$4 sm:$0xff]  }
 0x9a3   :  { %v20165_v63 = vadd.f32 %v11767_v50, %v11743_v44  ;;  %v20167_v9 = vadd.f32 %v11769_v24, %v11745_v46  ;;  %v20169_v61 = vadd.f32 %v11771_v41, %v11747_v53  ;;  %v11774_v1 = vadd.f32 %v11768_v56, %v11744_v59  ;;  %v18068_v50 = vld [vmem:[#allocation39 + $0x20] ss:$16 sps:$4 sm:$0xff]   ;;  %v18073_v24 = vld [vmem:[#allocation39 + $0x4] ss:$16 sps:$4 sm:$0xff]  }
 0x9a4   :  { %v20172_v15 = vpop.permute.xlu1 %11794  ;;  %v20184_v28 = vadd.f32 %v11772_v45, %v11748_v39  ;;  %v18076_v41 = vld [vmem:[#allocation39 + $0x1e4] ss:$16 sps:$4 sm:$0xff]   ;;  %v18077_v46 = vld [vmem:[#allocation39 + $0x1c0] ss:$16 sps:$4 sm:$0xff]  }
 0x9a5   :  { %v11798_v60 = vmul.f32 %v20172_v15, %v11781_v52  ;;  %v18079_v44 = vld [vmem:[#allocation39 + $0x1c4] ss:$16 sps:$4 sm:$0xff]   ;;  %v18080_v39 = vld [vmem:[#allocation39 + $0x1a0] ss:$16 sps:$4 sm:$0xff]  }
 0x9a6   :  { %v18082_v53 = vld [vmem:[#allocation39 + $0x1a4] ss:$16 sps:$4 sm:$0xff]  }
 0x9a7   :  { %v11804_v6 = vadd.f32 %v11798_v60, %v11774_v1  ;;  %v11780_v26 = vld [vmem:[#allocation6 + $0x60] sm:$0xff]  ;;  %v11785_v59 = vld [vmem:[#allocation6 + $0x88] sm:$0xff]  ;;  %v11810_v60 = vld [vmem:[#allocation6 + $0x90] sm:$0xff] }
 0x9a8   :  { %v20178_v47 = vpop.permute.xlu1 %11854  ;;  %v18088_v56 = vld [vmem:[#allocation39 + $0x164] ss:$16 sps:$4 sm:$0xff]   ;;  %v11797_v52 = vmul.f32 %v20172_v15, %v11780_v26  ;;  %v18086_v1 = vld [vmem:[#allocation39 + $0x160] ss:$16 sps:$4 sm:$0xff]   ;;  %v11802_v5 = vmul.f32 %v20172_v15, %v11785_v59 }
 0x9a9   :  { %v11834_v58 = vadd.f32 %v11828_v49, %v11804_v6  ;;  %v11858_v19 = vmul.f32 %v20178_v47, %v11841_v17  ;;  %v18091_v6 = vld [vmem:[#allocation39 + $0x144] ss:$16 sps:$4 sm:$0xff]   ;;  %v11827_v17 = vmul.f32 %v20175_v30, %v11810_v60  ;;  %v18128_v60 = vld [vmem:[#allocation39 + $0x5a0] ss:$16 sps:$4 sm:$0xff]  }
 0x9aa   :  { %v11815_v49 = vld [vmem:[#allocation6 + $0xb8] sm:$0xff] }
 0x9ab   :  { %v11864_v20 = vadd.f32 %v11858_v19, %v11834_v58  ;;  %v18089_v58 = vld [vmem:[#allocation39 + $0x140] ss:$16 sps:$4 sm:$0xff]   ;;  %v11832_v21 = vmul.f32 %v20175_v30, %v11815_v49  ;;  %v18130_v59 = vld [vmem:[#allocation39 + $0x5a4] ss:$16 sps:$4 sm:$0xff]  }
 0x9ac   :  { %v11840_v19 = vld [vmem:[#allocation6 + $0xc0] sm:$0xff] }
 0x9ad   :  { %v20182_v29 = vpack.c.bf16 %v11864_v20, %v11864_v20  ;;  %v18194_v49 = vld [vmem:[#allocation36 + $0x60] sm:$0xff]  }
 0x9cb   :  { %v17265_v4 = vpop.f32.mrf.mxu1 }
 0x9cd   :  { %v17266_v2 = vpop.f32.mrf.mxu1 }
 0x9ce   :  { %v17267_v35 = vadd.f32 %v17266_v2, %v17265_v4  ;;  %v18055_v4 = vld [vmem:[#allocation39 + $0xc4] ss:$16 sps:$4 sm:$0xff]   ;;  %v18053_v2 = vld [vmem:[#allocation39 + $0xc0] ss:$16 sps:$4 sm:$0xff]  }
 0x9cf   :  { %v17268_v31 = vpop.f32.mrf.mxu1 }
 0x9d0   :  { %v10970_v22 = vadd.f32 %v17267_v35, %v16715_v62  ;;  %v18062_v31 = vld [vmem:[#allocation39 + $0x60] ss:$16 sps:$4 sm:$0xff]   ;;  %v11808_v35 = vadd.f32 %v11802_v5, %v20184_v28  ;;  %v18094_v62 = vld [vmem:[#allocation39 + $0x124] ss:$16 sps:$4 sm:$0xff]  }
 0x9d1   :  { %v17269_v42 = vpop.f32.mrf.mxu1  ;;  %v18098_v28 = vld [vmem:[#allocation39 + $0x4e0] ss:$16 sps:$4 sm:$0xff]  }
 0x9d2   :  { %v18071_v42 = vld [vmem:[#allocation39] ss:$16 sps:$4 sm:$0xff]   ;;  %v11838_v45 = vadd.f32 %v11832_v21, %v11808_v35  ;;  %v11783_v35 = vld [vmem:[#allocation6 + $0x78] sm:$0xff] }
 0x9d3   :  { %v18203_v21 = vld [vmem:[#allocation36 + $0x18] sm:$0xff]  }
 0x9eb   :  { %v17287_v33 = vpop.f32.mrf.mxu1 }
 0x9ed   :  { %v17288_v0 = vpop.f32.mrf.mxu1 }
 0x9ee   :  { %v17289_v38 = vadd.f32 %v17288_v0, %v17287_v33  ;;  %v11803_v33 = vadd.f32 %v11797_v52, %v20165_v63  ;;  %v11857_v0 = vmul.f32 %v20178_v47, %v11840_v19  ;;  %v18097_v63 = vld [vmem:[#allocation39 + $0x104] ss:$16 sps:$4 sm:$0xff]  }
 0x9ef   :  { %v17290_v48 = vpop.f32.mrf.mxu1  ;;  %v18189_v52 = vld [vmem:[#allocation36 + $0x68] sm:$0xff]   ;;  %v18199_v19 = vld [vmem:[#allocation36 + $0x58] sm:$0xff]  }
 0x9f0   :  { %v11338_v10 = vadd.f32 %v17289_v38, %v16748_v43  ;;  %v11845_v43 = vld [vmem:[#allocation6 + $0xe8] sm:$0xff]  ;;  %v11833_v38 = vadd.f32 %v11827_v17, %v11803_v33  ;;  %v18092_v48 = vld [vmem:[#allocation39 + $0x120] ss:$16 sps:$4 sm:$0xff]  }
 0x9f1   :  { %v17291_v57 = vpop.f32.mrf.mxu1  ;;  %v11862_v20 = vmul.f32 %v20178_v47, %v11845_v43  ;;  %v18198_v17 = vld [vmem:[#allocation36 + $0x20] sm:$0xff]   ;;  %v11814_v43 = vld [vmem:[#allocation6 + $0xb0] sm:$0xff] }
 0x9f2   :  { %v11343_v13 = vmul.f32 %v11338_v10, %v10970_v22  ;;  %v11863_v22 = vadd.f32 %v11857_v0, %v11833_v38  ;;  %v18095_v10 = vld [vmem:[#allocation39 + $0x100] ss:$16 sps:$4 sm:$0xff]   ;;  %v11800_v0 = vmul.f32 %v20172_v15, %v11783_v35  ;;  %v18139_v38 = vld [vmem:[#allocation39 + $0x544] ss:$16 sps:$4 sm:$0xff]   ;;  %v18173_v35 = vld [vmem:[#allocation39 + $0x3c8] ss:$16 sps:$4 sm:$0xff]  }
 0x9f3   :  { %v11868_v57 = vadd.f32 %v11862_v20, %v11838_v45  ;;  %v11784_v33 = vld [vmem:[#allocation6 + $0x80] sm:$0xff]  ;;  %v18204_v45 = vld [vmem:[#allocation36 + $0x50] sm:$0xff]  }
 0x9f4   :  { %v11344_v34 = vpack.c.bf16 %v11343_v13, %v11343_v13  ;;  %v18100_v13 = vld [vmem:[#allocation39 + $0x4e4] ss:$16 sps:$4 sm:$0xff]  }
 0x9f5   :  { %v18205_v20 = vld [vmem:[#allocation36 + $0x10] sm:$0xff]  }
 0x9f6   :  { %11486 = vmatmul.mubr.bf16.vlgmr.msra.gmra.mxu0 %v11344_v34  ;;  %v20197_v34 = vpack.c.bf16 %v11868_v57, %v11868_v57  ;;  %v18137_v57 = vld [vmem:[#allocation39 + $0x540] ss:$16 sps:$4 sm:$0xff]  }
 0x9f7   :  { %13050 = vmatpush1.bf16.msra.mxu0 %v18050_v23  ;;  %13081 = vmatprep.mubr.bf16.mxu0 %v20182_v29  ;;  %v20195_v23 = vpack.c.bf16 %v11863_v22, %v11863_v22 }
 0x9f8   :  { %13051 = vmatprep.subr.bf16.mxu0 %v18055_v4  ;;  %v18103_v4 = vld [vmem:[#allocation39 + $0x4c4] ss:$16 sps:$4 sm:$0xff]  }
 0x9fb   :  { %13052 = vmatpush1.bf16.msra.mxu0 %v18053_v2  ;;  %v18101_v2 = vld [vmem:[#allocation39 + $0x4c0] ss:$16 sps:$4 sm:$0xff]  }
 0x9fc   :  { %13053 = vmatprep.subr.bf16.mxu0 %v18058_v3  ;;  %v18106_v3 = vld [vmem:[#allocation39 + $0x4a4] ss:$16 sps:$4 sm:$0xff]  }
 0x9ff   :  { %13054 = vmatpush1.bf16.msra.mxu0 %v18056_v55  ;;  %v18104_v55 = vld [vmem:[#allocation39 + $0x4a0] ss:$16 sps:$4 sm:$0xff]  }
 0xa00   :  { %13055 = vmatprep.subr.bf16.mxu0 %v18061_v7  ;;  %v18109_v7 = vld [vmem:[#allocation39 + $0x484] ss:$16 sps:$4 sm:$0xff]  }
 0xa03   :  { %13056 = vmatpush1.bf16.msra.mxu0 %v18059_v32  ;;  %v18107_v32 = vld [vmem:[#allocation39 + $0x480] ss:$16 sps:$4 sm:$0xff]  }
 0xa04   :  { %13057 = vmatprep.subr.bf16.mxu0 %v18064_v25  ;;  %v18112_v25 = vld [vmem:[#allocation39 + $0x464] ss:$16 sps:$4 sm:$0xff]  }
 0xa07   :  { %13058 = vmatpush1.bf16.msra.mxu0 %v18062_v31  ;;  %v18110_v31 = vld [vmem:[#allocation39 + $0x460] ss:$16 sps:$4 sm:$0xff]  }
 0xa08   :  { %13059 = vmatprep.subr.bf16.mxu0 %v18067_v37  ;;  %v18115_v37 = vld [vmem:[#allocation39 + $0x444] ss:$16 sps:$4 sm:$0xff]  }
 0xa0b   :  { %13060 = vmatpush1.bf16.msra.mxu0 %v18065_v11  ;;  %v18113_v11 = vld [vmem:[#allocation39 + $0x440] ss:$16 sps:$4 sm:$0xff]  }
 0xa0c   :  { %13061 = vmatprep.subr.bf16.mxu0 %v18070_v8  ;;  %v18118_v8 = vld [vmem:[#allocation39 + $0x424] ss:$16 sps:$4 sm:$0xff]  }
 0xa0f   :  { %13062 = vmatpush1.bf16.msra.mxu0 %v18068_v50  ;;  %v18116_v50 = vld [vmem:[#allocation39 + $0x420] ss:$16 sps:$4 sm:$0xff]  }
 0xa10   :  { %13063 = vmatprep.subr.bf16.mxu0 %v18073_v24  ;;  %v18121_v24 = vld [vmem:[#allocation39 + $0x404] ss:$16 sps:$4 sm:$0xff]  }
 0xa13   :  { %13064 = vmatpush1.bf16.msra.mxu0 %v18071_v42  ;;  %v18119_v42 = vld [vmem:[#allocation39 + $0x400] ss:$16 sps:$4 sm:$0xff]  }
 0xa14   :  { %13065 = vmatprep.subr.bf16.mxu0 %v18076_v41  ;;  %v18124_v41 = vld [vmem:[#allocation39 + $0x5e4] ss:$16 sps:$4 sm:$0xff]  }
 0xa17   :  { %13066 = vmatpush2.bf16.msra.mxu0 %v18074_v18  ;;  %v18179_v18 = vld [vmem:[#allocation36 + $0x78] sm:$0xff]  }
 0xa18   :  { %13067 = vmatprep.subr.bf16.mxu0 %v18079_v44  ;;  %v18183_v44 = vld [vmem:[#allocation36 + $0x38] sm:$0xff]   ;;  %17293 = vmatprep.subr.bf16.mxu1 %v18179_v18 }
 0xa19   :  { %17294 = vmatpush3.bf16.msra.mxu1 %v18183_v44  ;;  %v18212_v18 = vld [vmem:[#allocation39 + $0x2e4] ss:$16 sps:$4 sm:$0xff]  }
 0xa1b   :  { %13068 = vmatpush2.bf16.msra.mxu0 %v18077_v46  ;;  %v18122_v46 = vld [vmem:[#allocation39 + $0x5e0] ss:$16 sps:$4 sm:$0xff]  }
 0xa1c   :  { %13069 = vmatprep.subr.bf16.mxu0 %v18082_v53  ;;  %v11753_v53 = vld [vmem:[#allocation6 + $0x48] sm:$0xff] }
 0xa1d   :  { %v11770_v26 = vmul.f32 %v20158_v12, %v11753_v53  ;;  %v18131_v12 = vld [vmem:[#allocation39 + $0x580] ss:$16 sps:$4 sm:$0xff]  }
 0xa1f   :  { %13070 = vmatpush2.bf16.msra.mxu0 %v18080_v39  ;;  %v18127_v39 = vld [vmem:[#allocation39 + $0x5c4] ss:$16 sps:$4 sm:$0xff]   ;;  %v11776_v5 = vadd.f32 %v11770_v26, %v20163_v40  ;;  %v18134_v40 = vld [vmem:[#allocation39 + $0x560] ss:$16 sps:$4 sm:$0xff]   ;;  %v18152_v26 = vld [vmem:[#allocation39 + $0x2a8] ss:$16 sps:$4 sm:$0xff]  }
 0xa20   :  { %13071 = vmatprep.subr.bf16.mxu0 %v18085_v54  ;;  %v18184_v54 = vld [vmem:[#allocation36 + $0x70] sm:$0xff]  }
 0xa21   :  { %17295 = vmatprep.subr.bf16.mxu1 %v18184_v54  ;;  %v18149_v54 = vld [vmem:[#allocation39 + $0x2c8] ss:$16 sps:$4 sm:$0xff]  }
 0xa23   :  { %13072 = vmatpush2.bf16.msra.mxu0 %v18083_v14  ;;  %v18188_v14 = vld [vmem:[#allocation36 + $0x30] sm:$0xff]  }
 0xa24   :  { %13073 = vmatprep.subr.bf16.mxu0 %v18088_v56  ;;  %v18125_v56 = vld [vmem:[#allocation39 + $0x5c0] ss:$16 sps:$4 sm:$0xff]   ;;  %17296 = vmatpush3.bf16.msra.mxu1 %v18188_v14  ;;  %v18154_v14 = vld [vmem:[#allocation39 + $0x2ac] ss:$16 sps:$4 sm:$0xff]  }
 0xa25   :  { %17297 = vmatprep.subr.bf16.mxu1 %v18189_v52  ;;  %v18160_v52 = vld [vmem:[#allocation39 + $0x26c] ss:$16 sps:$4 sm:$0xff]  }
 0xa27   :  { %13074 = vmatpush2.bf16.msra.mxu0 %v18086_v1  ;;  %v18193_v1 = vld [vmem:[#allocation36 + $0x28] sm:$0xff]  }
 0xa28   :  { %13075 = vmatprep.subr.bf16.mxu0 %v18091_v6  ;;  %17298 = vmatpush3.bf16.msra.mxu1 %v18193_v1  ;;  %v18133_v6 = vld [vmem:[#allocation39 + $0x584] ss:$16 sps:$4 sm:$0xff]   ;;  %v18158_v1 = vld [vmem:[#allocation39 + $0x268] ss:$16 sps:$4 sm:$0xff]  }
 0xa29   :  { %17299 = vmatprep.subr.bf16.mxu1 %v18194_v49  ;;  %v18164_v49 = vld [vmem:[#allocation39 + $0x228] ss:$16 sps:$4 sm:$0xff]  }
 0xa2b   :  { %13076 = vmatpush2.bf16.msra.mxu0 %v18089_v58  ;;  %v18136_v58 = vld [vmem:[#allocation39 + $0x564] ss:$16 sps:$4 sm:$0xff]  }
 0xa2c   :  { %13077 = vmatprep.subr.bf16.mxu0 %v18094_v62  ;;  %17300 = vmatpush3.bf16.msra.mxu1 %v18198_v17  ;;  %v11801_v62 = vmul.f32 %v20172_v15, %v11784_v33  ;;  %v18169_v17 = vld [vmem:[#allocation39 + $0x20c] ss:$16 sps:$4 sm:$0xff]   ;;  %v18167_v33 = vld [vmem:[#allocation39 + $0x208] ss:$16 sps:$4 sm:$0xff]  }
 0xa2d   :  { %17301 = vmatprep.subr.bf16.mxu1 %v18199_v19  ;;  %v18175_v19 = vld [vmem:[#allocation39 + $0x3cc] ss:$16 sps:$4 sm:$0xff]  }
 0xa2e   :  { %v11807_v22 = vadd.f32 %v11801_v62, %v20169_v61  ;;  %v18176_v62 = vld [vmem:[#allocation39 + $0x3a8] ss:$16 sps:$4 sm:$0xff]  }
 0xa2f   :  { %13078 = vmatpush2.bf16.msra.mxu0 %v18092_v48  ;;  %v11813_v48 = vld [vmem:[#allocation6 + $0xa8] sm:$0xff] }
 0xa30   :  { %13079 = vmatprep.subr.bf16.mxu0 %v18097_v63  ;;  %17302 = vmatpush3.bf16.msra.mxu1 %v18203_v21  ;;  %v11831_v63 = vmul.f32 %v20175_v30, %v11814_v43  ;;  %v18178_v21 = vld [vmem:[#allocation39 + $0x3ac] ss:$16 sps:$4 sm:$0xff]  }
 0xa31   :  { %17303 = vmatprep.subr.bf16.mxu1 %v18204_v45  ;;  %v18182_v43 = vld [vmem:[#allocation39 + $0x38c] ss:$16 sps:$4 sm:$0xff]  }
 0xa32   :  { %v11812_v45 = vld [vmem:[#allocation6 + $0xa0] sm:$0xff] }
 0xa33   :  { %13080 = vmatpush2.bf16.msra.mxu0 %v18095_v10  ;;  %v11844_v10 = vld [vmem:[#allocation6 + $0xe0] sm:$0xff] }
 0xa34   :  { %13131 = vmatprep.subr.bf16.mxu0 %v18100_v13  ;;  %v11806_v13 = vadd.f32 %v11800_v0, %v11776_v5  ;;  %17304 = vmatpush3.bf16.msra.mxu1 %v18205_v20  ;;  %v18161_v5 = vld [vmem:[#allocation39 + $0x248] ss:$16 sps:$4 sm:$0xff]  }
 0xa35   :  { %v18180_v0 = vld [vmem:[#allocation39 + $0x388] ss:$16 sps:$4 sm:$0xff]  }
 0xa36   :  { %13082 = vmatmul.mubr.bf16.vlgmr.msra.gmra.mxu0 %v20195_v23  ;;  %v18185_v20 = vld [vmem:[#allocation39 + $0x368] ss:$16 sps:$4 sm:$0xff]  }
 0xa37   :  { %13132 = vmatpush1.bf16.msra.mxu0 %v18098_v28  ;;  %13163 = vmatprep.mubr.bf16.mxu0 %v20197_v34  ;;  %v11830_v28 = vmul.f32 %v20175_v30, %v11813_v48 }
 0xa38   :  { %13133 = vmatprep.subr.bf16.mxu0 %v18103_v4  ;;  %v18142_v4 = vld [vmem:[#allocation39 + $0x524] ss:$16 sps:$4 sm:$0xff]  }
 0xa39   :  { %v11836_v61 = vadd.f32 %v11830_v28, %v11806_v13  ;;  %v18190_v13 = vld [vmem:[#allocation39 + $0x348] ss:$16 sps:$4 sm:$0xff]   ;;  %v18197_v28 = vld [vmem:[#allocation39 + $0x32c] ss:$16 sps:$4 sm:$0xff]  }
 0xa3b   :  { %13134 = vmatpush1.bf16.msra.mxu0 %v18101_v2  ;;  %v11843_v2 = vld [vmem:[#allocation6 + $0xd8] sm:$0xff] }
 0xa3c   :  { %13135 = vmatprep.subr.bf16.mxu0 %v18106_v3  ;;  %v18206_v3 = vld [vmem:[#allocation36 + $0x48] sm:$0xff]  }
 0xa3d   :  { %17305 = vmatprep.subr.bf16.mxu1 %v18206_v3  ;;  %v18195_v3 = vld [vmem:[#allocation39 + $0x328] ss:$16 sps:$4 sm:$0xff]  }
 0xa3f   :  { %13136 = vmatpush1.bf16.msra.mxu0 %v18104_v55  ;;  %v18207_v55 = vld [vmem:[#allocation36 + $0x8] sm:$0xff]  }
 0xa40   :  { %13137 = vmatprep.subr.bf16.mxu0 %v18109_v7  ;;  %v11861_v7 = vmul.f32 %v20178_v47, %v11844_v10  ;;  %17306 = vmatpush3.bf16.msra.mxu1 %v18207_v55 }
 0xa43   :  { %13138 = vmatpush1.bf16.msra.mxu0 %v18107_v32  ;;  %v11837_v32 = vadd.f32 %v11831_v63, %v11807_v22  ;;  %v18192_v63 = vld [vmem:[#allocation39 + $0x34c] ss:$16 sps:$4 sm:$0xff]   ;;  %v11829_v22 = vmul.f32 %v20175_v30, %v11812_v45 }
 0xa44   :  { %13139 = vmatprep.subr.bf16.mxu0 %v18112_v25  ;;  %v18140_v25 = vld [vmem:[#allocation39 + $0x520] ss:$16 sps:$4 sm:$0xff]  }
 0xa47   :  { %13140 = vmatpush1.bf16.msra.mxu0 %v18110_v31  ;;  %v11860_v31 = vmul.f32 %v20178_v47, %v11843_v2 }
 0xa48   :  { %13141 = vmatprep.subr.bf16.mxu0 %v18115_v37  ;;  %v18208_v37 = vld [vmem:[#allocation36 + $0x40] sm:$0xff]  }
 0xa49   :  { %17307 = vmatprep.subr.bf16.mxu1 %v18208_v37 }
 0xa4b   :  { %13142 = vmatpush1.bf16.msra.mxu0 %v18113_v11  ;;  %v18209_v11 = vld [vmem:[#allocation36] sm:$0xff]  }
 0xa4c   :  { %13143 = vmatprep.subr.bf16.mxu0 %v18118_v8  ;;  %v18145_v8 = vld [vmem:[#allocation39 + $0x504] ss:$16 sps:$4 sm:$0xff]   ;;  %17308 = vmatpush3.bf16.msra.mxu1 %v18209_v11 }
 0xa4d   :  { %13090 = vmatprep.subr.bf16.mxu1 %v18212_v18 }
 0xa4f   :  { %13144 = vmatpush1.bf16.msra.mxu0 %v18116_v50  ;;  %v11867_v50 = vadd.f32 %v11861_v7, %v11837_v32  ;;  %v18200_v7 = vld [vmem:[#allocation39 + $0x308] ss:$16 sps:$4 sm:$0xff]   ;;  %v11361_v32 = vld [vmem:[#allocation35] sm:$0x3] }
 0xa50   :  { %13145 = vmatprep.subr.bf16.mxu0 %v18121_v24  ;;  %v18143_v24 = vld [vmem:[#allocation39 + $0x500] ss:$16 sps:$4 sm:$0xff]  }
 0xa51   :  { %v20210_v44 = vpack.c.bf16 %v11867_v50, %v11867_v50 }
 0xa53   :  { %13146 = vmatpush1.bf16.msra.mxu0 %v18119_v42  ;;  %v11866_v42 = vadd.f32 %v11860_v31, %v11836_v61 }
 0xa54   :  { %13147 = vmatprep.subr.bf16.mxu0 %v18124_v41  ;;  %v18148_v41 = vld [vmem:[#allocation39 + $0x2ec] ss:$16 sps:$4 sm:$0xff]  }
 0xa55   :  { %v20212_v53 = vpack.c.bf16 %v11866_v42, %v11866_v42 }
 0xa57   :  { %13148 = vmatpush2.bf16.msra.mxu0 %v18122_v46  ;;  %v18146_v46 = vld [vmem:[#allocation39 + $0x2e8] ss:$16 sps:$4 sm:$0xff]  }
 0xa58   :  { %13149 = vmatprep.subr.bf16.mxu0 %v18127_v39  ;;  %v18151_v39 = vld [vmem:[#allocation39 + $0x2cc] ss:$16 sps:$4 sm:$0xff]  }
 0xa5b   :  { %13150 = vmatpush2.bf16.msra.mxu0 %v18125_v56  ;;  %v18157_v56 = vld [vmem:[#allocation39 + $0x28c] ss:$16 sps:$4 sm:$0xff]  }
 0xa5c   :  { %13151 = vmatprep.subr.bf16.mxu0 %v18130_v59  ;;  %v18155_v59 = vld [vmem:[#allocation39 + $0x288] ss:$16 sps:$4 sm:$0xff]  }
 0xa5f   :  { %13152 = vmatpush2.bf16.msra.mxu0 %v18128_v60  ;;  %v18163_v60 = vld [vmem:[#allocation39 + $0x24c] ss:$16 sps:$4 sm:$0xff]  }
 0xa60   :  { %13153 = vmatprep.subr.bf16.mxu0 %v18133_v6  ;;  %v18166_v6 = vld [vmem:[#allocation39 + $0x22c] ss:$16 sps:$4 sm:$0xff]  }
 0xa63   :  { %13154 = vmatpush2.bf16.msra.mxu0 %v18131_v12  ;;  %v18172_v12 = vld [vmem:[#allocation39 + $0x3ec] ss:$16 sps:$4 sm:$0xff]  }
 0xa64   :  { %13155 = vmatprep.subr.bf16.mxu0 %v18136_v58  ;;  %v18170_v58 = vld [vmem:[#allocation39 + $0x3e8] ss:$16 sps:$4 sm:$0xff]  }
 0xa67   :  { %13156 = vmatpush2.bf16.msra.mxu0 %v18134_v40  ;;  %v11782_v40 = vld [vmem:[#allocation6 + $0x70] sm:$0xff] }
 0xa68   :  { %13157 = vmatprep.subr.bf16.mxu0 %v18139_v38  ;;  %v18187_v38 = vld [vmem:[#allocation39 + $0x36c] ss:$16 sps:$4 sm:$0xff]   ;;  %v11799_v48 = vmul.f32 %v20172_v15, %v11782_v40 }
 0xa69   :  { %v18202_v15 = vld [vmem:[#allocation39 + $0x30c] ss:$16 sps:$4 sm:$0xff]  }
 0xa6a   :  { %v11805_v10 = vadd.f32 %v11799_v48, %v20167_v9  ;;  %v11366_v9 = vrot.slane %v11361_v32, %v19861_v36 }
 0xa6b   :  { %13158 = vmatpush2.bf16.msra.mxu0 %v18137_v57  ;;  %v11842_v57 = vld [vmem:[#allocation6 + $0xd0] sm:$0xff] }
 0xa6c   :  { %13159 = vmatprep.subr.bf16.mxu0 %v18142_v4  ;;  %v11859_v4 = vmul.f32 %v20178_v47, %v11842_v57  ;;  %v11835_v2 = vadd.f32 %v11829_v22, %v11805_v10 }
 0xa6e   :  { %v11865_v55 = vadd.f32 %v11859_v4, %v11835_v2 }
 0xa6f   :  { %13160 = vmatpush2.bf16.msra.mxu0 %v18140_v25  ;;  %v11370_v25 = vrot.slane %v11361_v32, %v19864_v51  ;;  %v18218_v32 = vld [vmem:[#allocation39 + $0x2a4] ss:$16 sps:$4 sm:$0xff]  }
 0xa70   :  { %13161 = vmatprep.subr.bf16.mxu0 %v18145_v8  ;;  %v20220_v30 = vpack.c.bf16 %v11865_v55, %v11865_v55  ;;  %v18215_v55 = vld [vmem:[#allocation39 + $0x2c4] ss:$16 sps:$4 sm:$0xff]  }
 0xa73   :  { %13162 = vmatpush2.bf16.msra.mxu0 %v18143_v24 }
 0xa74   :  { %13213 = vmatprep.subr.bf16.mxu0 %v18148_v41 }
 0xa76   :  { %13164 = vmatmul.mubr.bf16.vlgmr.msra.gmra.mxu0 %v20210_v44 }
 0xa77   :  { %13214 = vmatpush1.bf16.msra.mxu0 %v18146_v46  ;;  %13245 = vmatprep.mubr.bf16.mxu0 %v20212_v53 }
 0xa78   :  { %13215 = vmatprep.subr.bf16.mxu0 %v18151_v39 }
 0xa7b   :  { %13216 = vmatpush1.bf16.msra.mxu0 %v18149_v54 }
 0xa7c   :  { %13217 = vmatprep.subr.bf16.mxu0 %v18154_v14 }
 0xa7f   :  { %13218 = vmatpush1.bf16.msra.mxu0 %v18152_v26 }
 0xa80   :  { %13219 = vmatprep.subr.bf16.mxu0 %v18157_v56 }
 0xa83   :  { %13220 = vmatpush1.bf16.msra.mxu0 %v18155_v59 }
 0xa84   :  { %13221 = vmatprep.subr.bf16.mxu0 %v18160_v52 }
 0xa87   :  { %13222 = vmatpush1.bf16.msra.mxu0 %v18158_v1 }
 0xa88   :  { %13223 = vmatprep.subr.bf16.mxu0 %v18163_v60 }
 0xa8b   :  { %13224 = vmatpush1.bf16.msra.mxu0 %v18161_v5 }
 0xa8c   :  { %13225 = vmatprep.subr.bf16.mxu0 %v18166_v6 }
 0xa8f   :  { %13226 = vmatpush1.bf16.msra.mxu0 %v18164_v49 }
 0xa90   :  { %13227 = vmatprep.subr.bf16.mxu0 %v18169_v17 }
 0xa93   :  { %13228 = vmatpush1.bf16.msra.mxu0 %v18167_v33 }
 0xa94   :  { %13229 = vmatprep.subr.bf16.mxu0 %v18172_v12 }
 0xa97   :  { %13230 = vmatpush2.bf16.msra.mxu0 %v18170_v58 }
 0xa98   :  { %13231 = vmatprep.subr.bf16.mxu0 %v18175_v19 }
 0xa9b   :  { %13232 = vmatpush2.bf16.msra.mxu0 %v18173_v35 }
 0xa9c   :  { %13233 = vmatprep.subr.bf16.mxu0 %v18178_v21 }
 0xa9f   :  { %13234 = vmatpush2.bf16.msra.mxu0 %v18176_v62 }
 0xaa0   :  { %13235 = vmatprep.subr.bf16.mxu0 %v18182_v43 }
 0xaa3   :  { %13236 = vmatpush2.bf16.msra.mxu0 %v18180_v0 }
 0xaa4   :  { %13237 = vmatprep.subr.bf16.mxu0 %v18187_v38 }
 0xaa7   :  { %13238 = vmatpush2.bf16.msra.mxu0 %v18185_v20 }
 0xaa8   :  { %13239 = vmatprep.subr.bf16.mxu0 %v18192_v63 }
 0xaab   :  { %13240 = vmatpush2.bf16.msra.mxu0 %v18190_v13 }
 0xaac   :  { %13241 = vmatprep.subr.bf16.mxu0 %v18197_v28 }
 0xaaf   :  { %13242 = vmatpush2.bf16.msra.mxu0 %v18195_v3  ;;  %v18210_v3 = vld [vmem:[#allocation39 + $0x2e0] ss:$16 sps:$4 sm:$0xff]  }
 0xab0   :  { %13243 = vmatprep.subr.bf16.mxu0 %v18202_v15 }
 0xab3   :  { %13244 = vmatpush2.bf16.msra.mxu0 %v18200_v7  ;;  %v18213_v7 = vld [vmem:[#allocation39 + $0x2c0] ss:$16 sps:$4 sm:$0xff]  }
 0xab6   :  { %v11487_v61 = vpop.f32.mrf.mxu0  ;;  %13246 = vmatmul.mubr.bf16.vlgmr.msra.gmra.mxu0 %v20220_v30 }
 0xab7   :  { %v11488_v47 = vadd.f32 %v11487_v61, %v11366_v9  ;;  %v18216_v9 = vld [vmem:[#allocation39 + $0x2a0] ss:$16 sps:$4 sm:$0xff]  }
 0xab8   :  { %v11489_v31 = vpop.f32.mrf.mxu0  ;;  %v18219_v61 = vld [vmem:[#allocation39 + $0x280] ss:$16 sps:$4 sm:$0xff]  }
 0xab9   :  { %v11494_v37 = vrot.slane %v11488_v47, 4  ;;  %v11490_v11 = vadd.f32 %v11489_v31, %v11370_v25  ;;  %v18221_v25 = vld [vmem:[#allocation39 + $0x284] ss:$16 sps:$4 sm:$0xff]   ;;  %v18222_v31 = vld [vmem:[#allocation39 + $0x260] ss:$16 sps:$4 sm:$0xff]  }
 0xaba   :  { %v11491_v8 = vpop.f32.mrf.mxu0 }
 0xabb   :  { %v11495_v50 = vadd.f32 %v11494_v37, %v11488_v47  ;;  %v11500_v24 = vrot.slane %v11490_v11, 4  ;;  %v18227_v37 = vld [vmem:[#allocation39 + $0x244] ss:$16 sps:$4 sm:$0xff]  }
 0xabc   :  { %v11492_v42 = vpop.f32.mrf.mxu0  ;;  %v18230_v8 = vld [vmem:[#allocation39 + $0x224] ss:$16 sps:$4 sm:$0xff]  }
 0xabd   :  { %v11496_v41 = vrot.slane %v11495_v50, 2  ;;  %v11501_v18 = vadd.f32 %v11500_v24, %v11490_v11  ;;  %v18231_v24 = vld [vmem:[#allocation39 + $0x200] ss:$16 sps:$4 sm:$0xff]   ;;  %v18236_v42 = vld [vmem:[#allocation39 + $0x3e4] ss:$16 sps:$4 sm:$0xff]  }
 0xabf   :  { %v11497_v46 = vadd.f32 %v11496_v41, %v11495_v50  ;;  %v11502_v39 = vrot.slane %v11501_v18, 2  ;;  %v18233_v50 = vld [vmem:[#allocation39 + $0x204] ss:$16 sps:$4 sm:$0xff]   ;;  %v18234_v41 = vld [vmem:[#allocation39 + $0x3e0] ss:$16 sps:$4 sm:$0xff]  }
 0xac1   :  { %v11498_v54 = vrot.slane %v11497_v46, 1  ;;  %v11503_v14 = vadd.f32 %v11502_v39, %v11501_v18  ;;  %v18239_v18 = vld [vmem:[#allocation39 + $0x3c4] ss:$16 sps:$4 sm:$0xff]  }
 0xac3   :  { %v11499_v26 = vadd.f32 %v11498_v54, %v11497_v46  ;;  %v11504_v56 = vrot.slane %v11503_v14, 1  ;;  %v18237_v46 = vld [vmem:[#allocation39 + $0x3c0] ss:$16 sps:$4 sm:$0xff]   ;;  %v18242_v54 = vld [vmem:[#allocation39 + $0x3a4] ss:$16 sps:$4 sm:$0xff]  }
 0xac5   :  { %v11506_v59 = vmul.f32 0.125, %v11499_v26  ;;  %v11505_v52 = vadd.f32 %v11504_v56, %v11503_v14  ;;  %v18240_v14 = vld [vmem:[#allocation39 + $0x3a0] ss:$16 sps:$4 sm:$0xff]   ;;  %v18245_v56 = vld [vmem:[#allocation39 + $0x384] ss:$16 sps:$4 sm:$0xff]  }
 0xac7   :  { %v11508_v1 = vsub.f32 %v11488_v47, %v11506_v59  ;;  %v11507_v60 = vmul.f32 0.125, %v11505_v52  ;;  %v18224_v47 = vld [vmem:[#allocation39 + $0x264] ss:$16 sps:$4 sm:$0xff]   ;;  %v18243_v52 = vld [vmem:[#allocation39 + $0x380] ss:$16 sps:$4 sm:$0xff]  }
 0xac9   :  { %v11510_v5 = vmul.f32 %v11508_v1, %v11508_v1  ;;  %v11509_v6 = vsub.f32 %v11490_v11, %v11507_v60  ;;  %v18225_v11 = vld [vmem:[#allocation39 + $0x240] ss:$16 sps:$4 sm:$0xff]   ;;  %v18248_v60 = vld [vmem:[#allocation39 + $0x364] ss:$16 sps:$4 sm:$0xff]  }
 0xacb   :  { %v11512_v49 = vrot.slane %v11510_v5, 4  ;;  %v11511_v17 = vmul.f32 %v11509_v6, %v11509_v6 }
 0xacd   :  { %v11513_v33 = vadd.f32 %v11512_v49, %v11510_v5  ;;  %v11518_v12 = vrot.slane %v11511_v17, 4  ;;  %v18246_v5 = vld [vmem:[#allocation39 + $0x360] ss:$16 sps:$4 sm:$0xff]  }
 0xace   :  { %v18249_v49 = vld [vmem:[#allocation39 + $0x340] ss:$16 sps:$4 sm:$0xff]  }
 0xacf   :  { %v11514_v58 = vrot.slane %v11513_v33, 2  ;;  %v11519_v19 = vadd.f32 %v11518_v12, %v11511_v17  ;;  %v18254_v17 = vld [vmem:[#allocation39 + $0x324] ss:$16 sps:$4 sm:$0xff]  }
 0xad0   :  { %v18257_v12 = vld [vmem:[#allocation39 + $0x304] ss:$16 sps:$4 sm:$0xff]  }
 0xad1   :  { %v11515_v35 = vadd.f32 %v11514_v58, %v11513_v33  ;;  %v11520_v21 = vrot.slane %v11519_v19, 2  ;;  %v18252_v33 = vld [vmem:[#allocation39 + $0x320] ss:$16 sps:$4 sm:$0xff]  }
 0xad2   :  { %v18255_v58 = vld [vmem:[#allocation39 + $0x300] ss:$16 sps:$4 sm:$0xff]  }
 0xad3   :  { %v11516_v62 = vrot.slane %v11515_v35, 1  ;;  %v11521_v43 = vadd.f32 %v11520_v21, %v11519_v19  ;;  %v18260_v19 = vld [vmem:[#allocation39 + $0xec] ss:$16 sps:$4 sm:$0xff]  }
 0xad4   :  { %v18263_v21 = vld [vmem:[#allocation39 + $0xcc] ss:$16 sps:$4 sm:$0xff]  }
 0xad5   :  { %v11517_v40 = vadd.f32 %v11516_v62, %v11515_v35  ;;  %v11522_v0 = vrot.slane %v11521_v43, 1  ;;  %v18258_v35 = vld [vmem:[#allocation39 + $0xe8] ss:$16 sps:$4 sm:$0xff]  }
 0xad6   :  { %v18261_v62 = vld [vmem:[#allocation39 + $0xc8] ss:$16 sps:$4 sm:$0xff]  }
 0xad7   :  { %v11524_v38 = vmul.f32 0.125, %v11517_v40  ;;  %v11523_v48 = vadd.f32 %v11522_v0, %v11521_v43  ;;  %v18266_v43 = vld [vmem:[#allocation39 + $0xac] ss:$16 sps:$4 sm:$0xff]   ;;  %v18264_v0 = vld [vmem:[#allocation39 + $0xa8] ss:$16 sps:$4 sm:$0xff]  }
 0xad9   :  { %v11526_v45 = vadd.f32 1e-05, %v11524_v38  ;;  %v11525_v20 = vmul.f32 0.125, %v11523_v48  ;;  %v18269_v38 = vld [vmem:[#allocation39 + $0x8c] ss:$16 sps:$4 sm:$0xff]  }
 0xadb   :  { %18650 = vrsqrt.f32 %v11526_v45  ;;  %v11527_v63 = vadd.f32 1e-05, %v11525_v20  ;;  %v18267_v20 = vld [vmem:[#allocation39 + $0x88] ss:$16 sps:$4 sm:$0xff]  }
 0xadd   :  { %18652 = vrsqrt.f32 %v11527_v63  ;;  %v18272_v63 = vld [vmem:[#allocation39 + $0x6c] ss:$16 sps:$4 sm:$0xff]  }
 0xae8   :  { %v18651_v22 = vpop.eup %18650 }
 0xae9   :  { %v11530_v10 = vmul.f32 %v18651_v22, %v11508_v1  ;;  %v18270_v22 = vld [vmem:[#allocation39 + $0x68] ss:$16 sps:$4 sm:$0xff]  }
 0xaea   :  { %v18653_v57 = vpop.eup %18652 }
 0xaeb   :  { %v11531_v13 = vmul.f32 %v18653_v57, %v11509_v6  ;;  %v11532_v28 = vmax.f32 %v11530_v10, 0.0  ;;  %v18251_v6 = vld [vmem:[#allocation39 + $0x344] ss:$16 sps:$4 sm:$0xff]   ;;  %v18273_v10 = vld [vmem:[#allocation39 + $0x48] ss:$16 sps:$4 sm:$0xff]  }
 0xaec   :  { %v18278_v57 = vld [vmem:[#allocation39 + $0x2c] ss:$16 sps:$4 sm:$0xff]  }
 0xaed   :  { %v11533_v4 = vmax.f32 %v11531_v13, 0.0  ;;  %v11534_v15 = vpack.c.bf16 %v11532_v28, %v11532_v28  ;;  %v18276_v13 = vld [vmem:[#allocation39 + $0x28] ss:$16 sps:$4 sm:$0xff]   ;;  %v18281_v28 = vld [vmem:[#allocation39 + $0xc] ss:$16 sps:$4 sm:$0xff]  }
 0xaef   :  { %v11535_v2 = vpack.c.bf16 %v11533_v4, %v11533_v4  ;;  %v18279_v4 = vld [vmem:[#allocation39 + $0x8] ss:$16 sps:$4 sm:$0xff]  }
 0xaf1   :  { %11703 = vmatprep.mubr.bf16.mxu1 %v11535_v2  ;;  %v18284_v2 = vld [vmem:[#allocation39 + $0x1ec] ss:$16 sps:$4 sm:$0xff]  }
 0xaf2   :  { %11704 = vmatmul.mubr.bf16.vlgmr.msra.gmra.mxu1 %v11534_v15  ;;  %v18287_v15 = vld [vmem:[#allocation39 + $0x1cc] ss:$16 sps:$4 sm:$0xff]  }
 0xaf3   :  { %13091 = vmatpush1.bf16.msra.mxu1 %v18210_v3  ;;  %13122 = vmatprep.mubr.bf16.mxu1 %v20212_v53  ;;  %v18228_v53 = vld [vmem:[#allocation39 + $0x220] ss:$16 sps:$4 sm:$0xff]   ;;  %v18282_v3 = vld [vmem:[#allocation39 + $0x1e8] ss:$16 sps:$4 sm:$0xff]  }
 0xaf4   :  { %13092 = vmatprep.subr.bf16.mxu1 %v18215_v55  ;;  %v18285_v55 = vld [vmem:[#allocation39 + $0x1c8] ss:$16 sps:$4 sm:$0xff]  }
 0xaf6   :  { %v20226_v39 = vpop.f32.mrf.mxu0 }
 0xaf7   :  { %13093 = vmatpush1.bf16.msra.mxu1 %v18213_v7  ;;  %v18290_v7 = vld [vmem:[#allocation39 + $0x1ac] ss:$16 sps:$4 sm:$0xff]  }
 0xaf8   :  { %13094 = vmatprep.subr.bf16.mxu1 %v18218_v32  ;;  %v20228_v26 = vpop.f32.mrf.mxu0  ;;  %v18288_v32 = vld [vmem:[#allocation39 + $0x1a8] ss:$16 sps:$4 sm:$0xff]  }
 0xafa   :  { %v13087_v59 = vpop.f32.mrf.mxu0 }
 0xafb   :  { %13095 = vmatpush1.bf16.msra.mxu1 %v18216_v9  ;;  %v18293_v9 = vld [vmem:[#allocation39 + $0x18c] ss:$16 sps:$4 sm:$0xff]  }
 0xafc   :  { %13096 = vmatprep.subr.bf16.mxu1 %v18221_v25  ;;  %v13088_v1 = vpop.f32.mrf.mxu0  ;;  %v18291_v25 = vld [vmem:[#allocation39 + $0x188] ss:$16 sps:$4 sm:$0xff]  }
 0xafd   :  { %v18315_v1 = vld [vmem:[#allocation39 + $0x488] ss:$16 sps:$4 sm:$0xff]  }
 0xaff   :  { %13097 = vmatpush1.bf16.msra.mxu1 %v18219_v61  ;;  %v18296_v61 = vld [vmem:[#allocation39 + $0x16c] ss:$16 sps:$4 sm:$0xff]  }
 0xb00   :  { %13098 = vmatprep.subr.bf16.mxu1 %v18224_v47  ;;  %v18294_v47 = vld [vmem:[#allocation39 + $0x168] ss:$16 sps:$4 sm:$0xff]  }
 0xb03   :  { %13099 = vmatpush1.bf16.msra.mxu1 %v18222_v31  ;;  %v18299_v31 = vld [vmem:[#allocation39 + $0x14c] ss:$16 sps:$4 sm:$0xff]  }
 0xb04   :  { %13100 = vmatprep.subr.bf16.mxu1 %v18227_v37  ;;  %v18297_v37 = vld [vmem:[#allocation39 + $0x148] ss:$16 sps:$4 sm:$0xff]  }
 0xb07   :  { %13101 = vmatpush1.bf16.msra.mxu1 %v18225_v11  ;;  %v18302_v11 = vld [vmem:[#allocation39 + $0x12c] ss:$16 sps:$4 sm:$0xff]  }
 0xb08   :  { %13102 = vmatprep.subr.bf16.mxu1 %v18230_v8  ;;  %v18300_v8 = vld [vmem:[#allocation39 + $0x128] ss:$16 sps:$4 sm:$0xff]  }
 0xb0b   :  { %13103 = vmatpush1.bf16.msra.mxu1 %v18228_v53  ;;  %v18305_v53 = vld [vmem:[#allocation39 + $0x10c] ss:$16 sps:$4 sm:$0xff]  }
 0xb0c   :  { %13104 = vmatprep.subr.bf16.mxu1 %v18233_v50  ;;  %v18303_v50 = vld [vmem:[#allocation39 + $0x108] ss:$16 sps:$4 sm:$0xff]  }
 0xb0f   :  { %13105 = vmatpush1.bf16.msra.mxu1 %v18231_v24  ;;  %v18308_v24 = vld [vmem:[#allocation39 + $0x4ec] ss:$16 sps:$4 sm:$0xff]  }
 0xb10   :  { %13106 = vmatprep.subr.bf16.mxu1 %v18236_v42  ;;  %v18306_v42 = vld [vmem:[#allocation39 + $0x4e8] ss:$16 sps:$4 sm:$0xff]  }
 0xb13   :  { %13107 = vmatpush2.bf16.msra.mxu1 %v18234_v41  ;;  %v18311_v41 = vld [vmem:[#allocation39 + $0x4cc] ss:$16 sps:$4 sm:$0xff]  }
 0xb14   :  { %13108 = vmatprep.subr.bf16.mxu1 %v18239_v18  ;;  %v18309_v18 = vld [vmem:[#allocation39 + $0x4c8] ss:$16 sps:$4 sm:$0xff]  }
 0xb17   :  { %13109 = vmatpush2.bf16.msra.mxu1 %v18237_v46  ;;  %v18314_v46 = vld [vmem:[#allocation39 + $0x4ac] ss:$16 sps:$4 sm:$0xff]  }
 0xb18   :  { %13110 = vmatprep.subr.bf16.mxu1 %v18242_v54 }
 0xb1b   :  { %13111 = vmatpush2.bf16.msra.mxu1 %v18240_v14  ;;  %v18312_v14 = vld [vmem:[#allocation39 + $0x4a8] ss:$16 sps:$4 sm:$0xff]  }
 0xb1c   :  { %13112 = vmatprep.subr.bf16.mxu1 %v18245_v56  ;;  %v18317_v56 = vld [vmem:[#allocation39 + $0x48c] ss:$16 sps:$4 sm:$0xff]  }
 0xb1f   :  { %13113 = vmatpush2.bf16.msra.mxu1 %v18243_v52 }
 0xb20   :  { %13114 = vmatprep.subr.bf16.mxu1 %v18248_v60  ;;  %v18320_v60 = vld [vmem:[#allocation39 + $0x46c] ss:$16 sps:$4 sm:$0xff]  }
 0xb23   :  { %13115 = vmatpush2.bf16.msra.mxu1 %v18246_v5  ;;  %v18318_v5 = vld [vmem:[#allocation39 + $0x468] ss:$16 sps:$4 sm:$0xff]  }
 0xb24   :  { %13116 = vmatprep.subr.bf16.mxu1 %v18251_v6  ;;  %v18321_v6 = vld [vmem:[#allocation39 + $0x448] ss:$16 sps:$4 sm:$0xff]  }
 0xb27   :  { %13117 = vmatpush2.bf16.msra.mxu1 %v18249_v49  ;;  %v18326_v49 = vld [vmem:[#allocation39 + $0x42c] ss:$16 sps:$4 sm:$0xff]  }
 0xb28   :  { %13118 = vmatprep.subr.bf16.mxu1 %v18254_v17  ;;  %v18324_v17 = vld [vmem:[#allocation39 + $0x428] ss:$16 sps:$4 sm:$0xff]  }
 0xb2b   :  { %13119 = vmatpush2.bf16.msra.mxu1 %v18252_v33  ;;  %v18329_v33 = vld [vmem:[#allocation39 + $0x40c] ss:$16 sps:$4 sm:$0xff]  }
 0xb2c   :  { %13120 = vmatprep.subr.bf16.mxu1 %v18257_v12  ;;  %v18327_v12 = vld [vmem:[#allocation39 + $0x408] ss:$16 sps:$4 sm:$0xff]  }
 0xb2f   :  { %13121 = vmatpush2.bf16.msra.mxu1 %v18255_v58  ;;  %v18332_v58 = vld [vmem:[#allocation39 + $0x5ec] ss:$16 sps:$4 sm:$0xff]  }
 0xb30   :  { %13172 = vmatprep.subr.bf16.mxu1 %v18260_v19  ;;  %v18354_v19 = vld [vmem:[#allocation42 + $0x78] sm:$0xff]  }
 0xb31   :  { %17315 = vmatprep.subr.bf16.mxu0 %v18354_v19 }
 0xb32   :  { %13123 = vmatmul.mubr.bf16.vlgmr.msra.gmra.mxu1 %v20220_v30 }
 0xb33   :  { %13173 = vmatpush1.bf16.msra.mxu1 %v18258_v35  ;;  %13204 = vmatprep.mubr.bf16.mxu1 %v20182_v29  ;;  %v18275_v29 = vld [vmem:[#allocation39 + $0x4c] ss:$16 sps:$4 sm:$0xff]   ;;  %v18330_v35 = vld [vmem:[#allocation39 + $0x5e8] ss:$16 sps:$4 sm:$0xff]  }
 0xb34   :  { %13174 = vmatprep.subr.bf16.mxu1 %v18263_v21  ;;  %v18355_v21 = vld [vmem:[#allocation42 + $0x38] sm:$0xff]  }
 0xb35   :  { %17316 = vmatpush3.bf16.msra.mxu0 %v18355_v21 }
 0xb36   :  { %v20232_v40 = vpop.f32.mrf.mxu0 }
 0xb37   :  { %13175 = vmatpush1.bf16.msra.mxu1 %v18261_v62  ;;  %v18335_v62 = vld [vmem:[#allocation39 + $0x5cc] ss:$16 sps:$4 sm:$0xff]  }
 0xb38   :  { %13176 = vmatprep.subr.bf16.mxu1 %v18266_v43  ;;  %v20234_v48 = vpop.f32.mrf.mxu0  ;;  %v18356_v43 = vld [vmem:[#allocation42 + $0x70] sm:$0xff]  }
 0xb39   :  { %17317 = vmatprep.subr.bf16.mxu0 %v18356_v43 }
 0xb3a   :  { %v13169_v45 = vpop.f32.mrf.mxu0 }
 0xb3b   :  { %13177 = vmatpush1.bf16.msra.mxu1 %v18264_v0  ;;  %v18333_v0 = vld [vmem:[#allocation39 + $0x5c8] ss:$16 sps:$4 sm:$0xff]   ;;  %v18338_v45 = vld [vmem:[#allocation39 + $0x5ac] ss:$16 sps:$4 sm:$0xff]  }
 0xb3c   :  { %13178 = vmatprep.subr.bf16.mxu1 %v18269_v38  ;;  %v13170_v30 = vpop.f32.mrf.mxu0  ;;  %v18357_v38 = vld [vmem:[#allocation42 + $0x30] sm:$0xff]  }
 0xb3d   :  { %17318 = vmatpush3.bf16.msra.mxu0 %v18357_v38  ;;  %v18359_v30 = vld [vmem:[#allocation42 + $0x28] sm:$0xff]  }
 0xb3f   :  { %13179 = vmatpush1.bf16.msra.mxu1 %v18267_v20  ;;  %v18358_v20 = vld [vmem:[#allocation42 + $0x68] sm:$0xff]  }
 0xb40   :  { %13180 = vmatprep.subr.bf16.mxu1 %v18272_v63  ;;  %v18336_v63 = vld [vmem:[#allocation39 + $0x5a8] ss:$16 sps:$4 sm:$0xff]   ;;  %17319 = vmatprep.subr.bf16.mxu0 %v18358_v20 }
 0xb41   :  { %17320 = vmatpush3.bf16.msra.mxu0 %v18359_v30 }
 0xb43   :  { %13181 = vmatpush1.bf16.msra.mxu1 %v18270_v22  ;;  %v18341_v22 = vld [vmem:[#allocation39 + $0x58c] ss:$16 sps:$4 sm:$0xff]  }
 0xb44   :  { %13182 = vmatprep.subr.bf16.mxu1 %v18275_v29  ;;  %v18360_v29 = vld [vmem:[#allocation42 + $0x60] sm:$0xff]  }
 0xb45   :  { %17321 = vmatprep.subr.bf16.mxu0 %v18360_v29 }
 0xb47   :  { %13183 = vmatpush1.bf16.msra.mxu1 %v18273_v10  ;;  %v18361_v10 = vld [vmem:[#allocation42 + $0x20] sm:$0xff]  }
 0xb48   :  { %13184 = vmatprep.subr.bf16.mxu1 %v18278_v57  ;;  %v18362_v57 = vld [vmem:[#allocation42 + $0x58] sm:$0xff]   ;;  %17322 = vmatpush3.bf16.msra.mxu0 %v18361_v10 }
 0xb49   :  { %17323 = vmatprep.subr.bf16.mxu0 %v18362_v57 }
 0xb4b   :  { %13185 = vmatpush1.bf16.msra.mxu1 %v18276_v13  ;;  %v18339_v13 = vld [vmem:[#allocation39 + $0x588] ss:$16 sps:$4 sm:$0xff]  }
 0xb4c   :  { %13186 = vmatprep.subr.bf16.mxu1 %v18281_v28  ;;  %v18344_v28 = vld [vmem:[#allocation39 + $0x56c] ss:$16 sps:$4 sm:$0xff]  }
 0xb4f   :  { %13187 = vmatpush1.bf16.msra.mxu1 %v18279_v4  ;;  %v18363_v4 = vld [vmem:[#allocation42 + $0x18] sm:$0xff]  }
 0xb50   :  { %13188 = vmatprep.subr.bf16.mxu1 %v18284_v2  ;;  %v18364_v2 = vld [vmem:[#allocation42 + $0x50] sm:$0xff]   ;;  %17324 = vmatpush3.bf16.msra.mxu0 %v18363_v4  ;;  %v18436_v4 = vld [vmem:[#allocation42 + $0xf8] sm:$0xff]  }
 0xb51   :  { %17325 = vmatprep.subr.bf16.mxu0 %v18364_v2  ;;  %v18437_v2 = vld [vmem:[#allocation42 + $0xb8] sm:$0xff]  }
 0xb53   :  { %13189 = vmatpush2.bf16.msra.mxu1 %v18282_v3  ;;  %v18342_v3 = vld [vmem:[#allocation39 + $0x568] ss:$16 sps:$4 sm:$0xff]  }
 0xb54   :  { %13190 = vmatprep.subr.bf16.mxu1 %v18287_v15  ;;  %v18347_v15 = vld [vmem:[#allocation39 + $0x54c] ss:$16 sps:$4 sm:$0xff]  }
 0xb57   :  { %13191 = vmatpush2.bf16.msra.mxu1 %v18285_v55  ;;  %v18365_v55 = vld [vmem:[#allocation42 + $0x10] sm:$0xff]  }
 0xb58   :  { %13192 = vmatprep.subr.bf16.mxu1 %v18290_v7  ;;  %v18366_v7 = vld [vmem:[#allocation42 + $0x48] sm:$0xff]   ;;  %17326 = vmatpush3.bf16.msra.mxu0 %v18365_v55 }
 0xb59   :  { %17327 = vmatprep.subr.bf16.mxu0 %v18366_v7 }
 0xb5b   :  { %13193 = vmatpush2.bf16.msra.mxu1 %v18288_v32  ;;  %v18345_v32 = vld [vmem:[#allocation39 + $0x548] ss:$16 sps:$4 sm:$0xff]  }
 0xb5c   :  { %13194 = vmatprep.subr.bf16.mxu1 %v18293_v9  ;;  %v18350_v9 = vld [vmem:[#allocation39 + $0x52c] ss:$16 sps:$4 sm:$0xff]  }
 0xb5f   :  { %13195 = vmatpush2.bf16.msra.mxu1 %v18291_v25  ;;  %v18367_v25 = vld [vmem:[#allocation42 + $0x8] sm:$0xff]  }
 0xb60   :  { %13196 = vmatprep.subr.bf16.mxu1 %v18296_v61  ;;  %v18368_v61 = vld [vmem:[#allocation42 + $0x40] sm:$0xff]   ;;  %17328 = vmatpush3.bf16.msra.mxu0 %v18367_v25 }
 0xb61   :  { %17329 = vmatprep.subr.bf16.mxu0 %v18368_v61 }
 0xb63   :  { %13197 = vmatpush2.bf16.msra.mxu1 %v18294_v47  ;;  %v18348_v47 = vld [vmem:[#allocation39 + $0x528] ss:$16 sps:$4 sm:$0xff]  }
 0xb64   :  { %13198 = vmatprep.subr.bf16.mxu1 %v18299_v31  ;;  %v18353_v31 = vld [vmem:[#allocation39 + $0x50c] ss:$16 sps:$4 sm:$0xff]  }
 0xb67   :  { %13199 = vmatpush2.bf16.msra.mxu1 %v18297_v37  ;;  %v18369_v37 = vld [vmem:[#allocation42] sm:$0xff]  }
 0xb68   :  { %13200 = vmatprep.subr.bf16.mxu1 %v18302_v11  ;;  %v18351_v11 = vld [vmem:[#allocation39 + $0x508] ss:$16 sps:$4 sm:$0xff]   ;;  %17330 = vmatpush3.bf16.msra.mxu0 %v18369_v37  ;;  %v18446_v37 = vld [vmem:[#allocation42 + $0xe8] sm:$0xff]  }
 0xb6b   :  { %13201 = vmatpush2.bf16.msra.mxu1 %v18300_v8  ;;  %v19540_v8 = vmov 0.0  }
 0xb6c   :  { %13202 = vmatprep.subr.bf16.mxu1 %v18305_v53  ;;  %17414 = vmatprep.subr.bf16.mxu0 %v19540_v8 }
 0xb6f   :  { %13203 = vmatpush2.bf16.msra.mxu1 %v18303_v50  ;;  %v16781_v50 = vld [vmem:[#allocation38] ss:$0 sm:$0xff] }
 0xb70   :  { %13254 = vmatprep.subr.bf16.mxu1 %v18308_v24 }
 0xb72   :  { %13205 = vmatmul.mubr.bf16.vlgmr.msra.gmra.mxu1 %v20195_v23 }
 0xb73   :  { %13255 = vmatpush1.bf16.msra.mxu1 %v18306_v42  ;;  %13286 = vmatprep.mubr.bf16.mxu1 %v20197_v34  ;;  %v18323_v34 = vld [vmem:[#allocation39 + $0x44c] ss:$16 sps:$4 sm:$0xff]  }
 0xb74   :  { %13256 = vmatprep.subr.bf16.mxu1 %v18311_v41 }
 0xb76   :  { %v20238_v54 = vpop.f32.mrf.mxu0 }
 0xb77   :  { %13257 = vmatpush1.bf16.msra.mxu1 %v18309_v18 }
 0xb78   :  { %13258 = vmatprep.subr.bf16.mxu1 %v18314_v46  ;;  %v20240_v59 = vpop.f32.mrf.mxu0 }
 0xb7a   :  { %v13251_v52 = vpop.f32.mrf.mxu0 }
 0xb7b   :  { %13259 = vmatpush1.bf16.msra.mxu1 %v18312_v14  ;;  %v20247_v14 = vld [vmem:[#allocation41] sm:$0xf] }
 0xb7c   :  { %13260 = vmatprep.subr.bf16.mxu1 %v18317_v56  ;;  %v13252_v23 = vpop.f32.mrf.mxu0  ;;  %v12072_v56 = vrot.slane %v20247_v14, %v19861_v36  ;;  %v12076_v52 = vrot.slane %v20247_v14, %v19864_v51 }
 0xb7f   :  { %13261 = vmatpush1.bf16.msra.mxu1 %v18315_v1 }
 0xb80   :  { %13262 = vmatprep.subr.bf16.mxu1 %v18320_v60  ;;  %v13086_v60 = vadd.f32 %v20228_v26, %v12076_v52  ;;  %v18461_v52 = vld [vmem:[#allocation42 + $0xd0] sm:$0xff]  }
 0xb83   :  { %13263 = vmatpush1.bf16.msra.mxu1 %v18318_v5 }
 0xb84   :  { %13264 = vmatprep.subr.bf16.mxu1 %v18323_v34 }
 0xb87   :  { %13265 = vmatpush1.bf16.msra.mxu1 %v18321_v6 }
 0xb88   :  { %13266 = vmatprep.subr.bf16.mxu1 %v18326_v49 }
 0xb8b   :  { %13267 = vmatpush1.bf16.msra.mxu1 %v18324_v17 }
 0xb8c   :  { %13268 = vmatprep.subr.bf16.mxu1 %v18329_v33 }
 0xb8f   :  { %13269 = vmatpush1.bf16.msra.mxu1 %v18327_v12 }
 0xb90   :  { %13270 = vmatprep.subr.bf16.mxu1 %v18332_v58 }
 0xb93   :  { %13271 = vmatpush2.bf16.msra.mxu1 %v18330_v35 }
 0xb94   :  { %13272 = vmatprep.subr.bf16.mxu1 %v18335_v62 }
 0xb97   :  { %13273 = vmatpush2.bf16.msra.mxu1 %v18333_v0 }
 0xb98   :  { %13274 = vmatprep.subr.bf16.mxu1 %v18338_v45 }
 0xb9b   :  { %13275 = vmatpush2.bf16.msra.mxu1 %v18336_v63 }
 0xb9c   :  { %13276 = vmatprep.subr.bf16.mxu1 %v18341_v22 }
 0xb9f   :  { %13277 = vmatpush2.bf16.msra.mxu1 %v18339_v13 }
 0xba0   :  { %13278 = vmatprep.subr.bf16.mxu1 %v18344_v28 }
 0xba3   :  { %13279 = vmatpush2.bf16.msra.mxu1 %v18342_v3 }
 0xba4   :  { %13280 = vmatprep.subr.bf16.mxu1 %v18347_v15 }
 0xba7   :  { %13281 = vmatpush2.bf16.msra.mxu1 %v18345_v32  ;;  %v18441_v32 = vld [vmem:[#allocation42 + $0xf0] sm:$0xff]  }
 0xba8   :  { %13282 = vmatprep.subr.bf16.mxu1 %v18350_v9  ;;  %v18442_v9 = vld [vmem:[#allocation42 + $0xb0] sm:$0xff]  }
 0xbab   :  { %13283 = vmatpush2.bf16.msra.mxu1 %v18348_v47 }
 0xbac   :  { %13284 = vmatprep.subr.bf16.mxu1 %v18353_v31 }
 0xbaf   :  { %13285 = vmatpush2.bf16.msra.mxu1 %v18351_v11  ;;  %v18447_v11 = vld [vmem:[#allocation42 + $0xa8] sm:$0xff]  }
 0xbb0   :  { %17337 = vmatprep.subr.bf16.mxu1 %v18436_v4  ;;  %v18390_v4 = vld [vmem:[#allocation51 + $0x24] ss:$16 sps:$4 sm:$0xff]  }
 0xbb2   :  { %13287 = vmatmul.mubr.bf16.vlgmr.msra.gmra.mxu1 %v20210_v44  ;;  %v17309_v53 = vpop.f32.mrf.mxu1  ;;  %v13084_v44 = vadd.f32 %v20226_v39, %v12072_v56  ;;  %v18457_v56 = vld [vmem:[#allocation42 + $0x98] sm:$0xff]  }
 0xbb3   :  { %17338 = vmatpush3.bf16.msra.mxu1 %v18437_v2  ;;  %v18388_v2 = vld [vmem:[#allocation51 + $0x20] ss:$16 sps:$4 sm:$0xff]  }
 0xbb4   :  { %v17310_v24 = vpop.f32.mrf.mxu1  ;;  %17339 = vmatprep.subr.bf16.mxu1 %v18441_v32  ;;  %v18399_v32 = vld [vmem:[#allocation51 + $0x1c4] ss:$16 sps:$4 sm:$0xff]  }
 0xbb5   :  { %v17311_v42 = vadd.f32 %v17310_v24, %v17309_v53 }
 0xbb6   :  { %v17312_v41 = vpop.f32.mrf.mxu1 }
 0xbb7   :  { %v20244_v18 = vadd.f32 %v17311_v42, %v16781_v50  ;;  %17340 = vmatpush3.bf16.msra.mxu1 %v18442_v9  ;;  %v18451_v42 = vld [vmem:[#allocation42 + $0xe0] sm:$0xff]   ;;  %v18397_v9 = vld [vmem:[#allocation51 + $0x1c0] ss:$16 sps:$4 sm:$0xff]  }
 0xbb8   :  { %v17313_v46 = vpop.f32.mrf.mxu1  ;;  %17341 = vmatprep.subr.bf16.mxu1 %v18446_v37  ;;  %v18452_v41 = vld [vmem:[#allocation42 + $0xa0] sm:$0xff]  }
 0xbb9   :  { %15298 = vst [vmem:[#allocation57 + $0x8] sm:$0xff] %v20244_v18  ;;  %v18456_v46 = vld [vmem:[#allocation42 + $0xd8] sm:$0xff]  }
 0xbba   :  { %v18408_v37 = vld [vmem:[#allocation51 + $0x164] ss:$16 sps:$4 sm:$0xff]  }
 0xbbb   :  { %17342 = vmatpush3.bf16.msra.mxu1 %v18447_v11  ;;  %v18406_v11 = vld [vmem:[#allocation51 + $0x160] ss:$16 sps:$4 sm:$0xff]  }
 0xbbc   :  { %17343 = vmatprep.subr.bf16.mxu1 %v18451_v42  ;;  %v18414_v42 = vld [vmem:[#allocation51 + $0x124] ss:$16 sps:$4 sm:$0xff]  }
 0xbbf   :  { %17344 = vmatpush3.bf16.msra.mxu1 %v18452_v41  ;;  %v12084_v41 = vrot.slane %v20247_v14, %v19914_v27 }
 0xbc0   :  { %17345 = vmatprep.subr.bf16.mxu1 %v18456_v46 }
 0xbc3   :  { %17346 = vmatpush3.bf16.msra.mxu1 %v18457_v56  ;;  %v18412_v56 = vld [vmem:[#allocation51 + $0x120] ss:$16 sps:$4 sm:$0xff]  }
 0xbc4   :  { %17347 = vmatprep.subr.bf16.mxu1 %v18461_v52  ;;  %v18417_v52 = vld [vmem:[#allocation51 + $0x104] ss:$16 sps:$4 sm:$0xff]  }
 0xbf2   :  { %v13124_v1 = vpop.f32.mrf.mxu1 }
 0xbf3   :  { %v13125_v23 = vadd.f32 %v13124_v1, %v13084_v44  ;;  %v18462_v44 = vld [vmem:[#allocation42 + $0x90] sm:$0xff]   ;;  %v18466_v1 = vld [vmem:[#allocation42 + $0xc8] sm:$0xff]  }
 0xbf4   :  { %v13126_v5 = vpop.f32.mrf.mxu1  ;;  %17348 = vmatpush3.bf16.msra.mxu1 %v18462_v44 }
 0xbf5   :  { %v13166_v34 = vadd.f32 %v20232_v40, %v13125_v23  ;;  %v13127_v6 = vadd.f32 %v13126_v5, %v13086_v60  ;;  %v18467_v23 = vld [vmem:[#allocation42 + $0x88] sm:$0xff]   ;;  %17349 = vmatprep.subr.bf16.mxu1 %v18466_v1 }
 0xbf6   :  { %v13128_v49 = vpop.f32.mrf.mxu1 }
 0xbf7   :  { %v13295_v17 = vrot.slane %v13166_v34, 4  ;;  %v13168_v33 = vadd.f32 %v20234_v48, %v13127_v6  ;;  %v18471_v49 = vld [vmem:[#allocation42 + $0xc0] sm:$0xff]  }
 0xbf8   :  { %v13129_v12 = vpop.f32.mrf.mxu1  ;;  %17350 = vmatpush3.bf16.msra.mxu1 %v18467_v23 }
 0xbf9   :  { %v13296_v58 = vadd.f32 %v13295_v17, %v13166_v34  ;;  %v13301_v19 = vrot.slane %v13168_v33, 4  ;;  %v18472_v17 = vld [vmem:[#allocation42 + $0x80] sm:$0xff]   ;;  %17351 = vmatprep.subr.bf16.mxu1 %v18471_v49 }
 0xbfb   :  { %v13297_v35 = vrot.slane %v13296_v58, 2  ;;  %v13302_v21 = vadd.f32 %v13301_v19, %v13168_v33 }
 0xbfc   :  { %17352 = vmatpush3.bf16.msra.mxu1 %v18472_v17 }
 0xbfd   :  { %v13298_v62 = vadd.f32 %v13297_v35, %v13296_v58  ;;  %v13303_v43 = vrot.slane %v13302_v21, 2  ;;  %v13724_v58 = vld [vmem:[#allocation45] sm:$0x7]  ;;  %17420 = vmatprep.subr.bf16.mxu1 %v19540_v8 }
 0xbff   :  { %v13299_v39 = vrot.slane %v13298_v62, 1  ;;  %v13304_v0 = vadd.f32 %v13303_v43, %v13302_v21  ;;  %v13738_v21 = vsel %vm13736_vm0, %v13724_v58, 0  ;;  %v13722_v43 = vld [vmem:[#allocation8] sm:$0xff] }
 0xc01   :  { %v13300_v38 = vadd.f32 %v13299_v39, %v13298_v62  ;;  %v13305_v26 = vrot.slane %v13304_v0, 1  ;;  %v18372_v62 = vld [vmem:[#allocation51 + $0xe4] ss:$16 sps:$4 sm:$0xff]  }
 0xc03   :  { %v13319_v45 = vmul.f32 0.125, %v13300_v38  ;;  %v13306_v20 = vadd.f32 %v13305_v26, %v13304_v0  ;;  %v13723_v38 = vpack.c.bf16 %v13722_v43, %v13722_v43  ;;  %v18370_v26 = vld [vmem:[#allocation51 + $0xe0] ss:$16 sps:$4 sm:$0xff]  }
 0xc05   :  { %v13323_v63 = vsub.f32 %v13166_v34, %v13319_v45  ;;  %v13320_v40 = vmul.f32 0.125, %v13306_v20  ;;  %v18375_v20 = vld [vmem:[#allocation51 + $0xc4] ss:$16 sps:$4 sm:$0xff]  }
 0xc07   :  { %v13327_v30 = vmul.f32 %v13323_v63, %v13323_v63  ;;  %v13324_v22 = vsub.f32 %v13168_v33, %v13320_v40 }
 0xc09   :  { %v13331_v29 = vrot.slane %v13327_v30, 4  ;;  %v13328_v10 = vmul.f32 %v13324_v22, %v13324_v22 }
 0xc0b   :  { %v13332_v48 = vadd.f32 %v13331_v29, %v13327_v30  ;;  %v13337_v57 = vrot.slane %v13328_v10, 4  ;;  %v18373_v30 = vld [vmem:[#allocation51 + $0xc0] ss:$16 sps:$4 sm:$0xff]  }
 0xc0c   :  { %v18376_v29 = vld [vmem:[#allocation51 + $0xa0] ss:$16 sps:$4 sm:$0xff]  }
 0xc0d   :  { %v13333_v13 = vrot.slane %v13332_v48, 2  ;;  %v13338_v28 = vadd.f32 %v13337_v57, %v13328_v10  ;;  %v18381_v10 = vld [vmem:[#allocation51 + $0x84] ss:$16 sps:$4 sm:$0xff]  }
 0xc0e   :  { %v18384_v57 = vld [vmem:[#allocation51 + $0x64] ss:$16 sps:$4 sm:$0xff]  }
 0xc0f   :  { %v13334_v3 = vadd.f32 %v13333_v13, %v13332_v48  ;;  %v13339_v15 = vrot.slane %v13338_v28, 2  ;;  %v18379_v48 = vld [vmem:[#allocation51 + $0x80] ss:$16 sps:$4 sm:$0xff]  }
 0xc10   :  { %v18382_v13 = vld [vmem:[#allocation51 + $0x60] ss:$16 sps:$4 sm:$0xff]  }
 0xc11   :  { %v13335_v55 = vrot.slane %v13334_v3, 1  ;;  %v13340_v7 = vadd.f32 %v13339_v15, %v13338_v28  ;;  %v18385_v28 = vld [vmem:[#allocation51 + $0x40] ss:$16 sps:$4 sm:$0xff]  }
 0xc12   :  { %v18391_v15 = vld [vmem:[#allocation51] ss:$16 sps:$4 sm:$0xff]  }
 0xc13   :  { %v13336_v25 = vadd.f32 %v13335_v55, %v13334_v3  ;;  %v13341_v61 = vrot.slane %v13340_v7, 1  ;;  %v18393_v3 = vld [vmem:[#allocation51 + $0x4] ss:$16 sps:$4 sm:$0xff]  }
 0xc14   :  { %v18396_v55 = vld [vmem:[#allocation51 + $0x1e4] ss:$16 sps:$4 sm:$0xff]  }
 0xc15   :  { %v13355_v47 = vmul.f32 0.125, %v13336_v25  ;;  %v13342_v31 = vadd.f32 %v13341_v61, %v13340_v7  ;;  %v18394_v7 = vld [vmem:[#allocation51 + $0x1e0] ss:$16 sps:$4 sm:$0xff]   ;;  %v18402_v25 = vld [vmem:[#allocation51 + $0x1a4] ss:$16 sps:$4 sm:$0xff]  }
 0xc16   :  { %v18400_v61 = vld [vmem:[#allocation51 + $0x1a0] ss:$16 sps:$4 sm:$0xff]  }
 0xc17   :  { %v13359_v53 = vadd.f32 1e-05, %v13355_v47  ;;  %v13356_v50 = vmul.f32 0.125, %v13342_v31  ;;  %v18405_v47 = vld [vmem:[#allocation51 + $0x184] ss:$16 sps:$4 sm:$0xff]  }
 0xc18   :  { %v18403_v31 = vld [vmem:[#allocation51 + $0x180] ss:$16 sps:$4 sm:$0xff]  }
 0xc19   :  { %18654 = vrsqrt.f32 %v13359_v53  ;;  %v13360_v24 = vadd.f32 1e-05, %v13356_v50  ;;  %v18411_v53 = vld [vmem:[#allocation51 + $0x144] ss:$16 sps:$4 sm:$0xff]   ;;  %v12080_v50 = vrot.slane %v20247_v14, %v19911_v16 }
 0xc1b   :  { %18656 = vrsqrt.f32 %v13360_v24  ;;  %v18409_v24 = vld [vmem:[#allocation51 + $0x140] ss:$16 sps:$4 sm:$0xff]  }
 0xc26   :  { %v18655_v60 = vpop.eup %18654 }
 0xc27   :  { %v13367_v5 = vmul.f32 %v18655_v60, %v13323_v63  ;;  %v20266_v63 = vpack.c.bf16 %v20244_v18, %v20244_v18  ;;  %v18387_v18 = vld [vmem:[#allocation51 + $0x44] ss:$16 sps:$4 sm:$0xff]   ;;  %v18415_v60 = vld [vmem:[#allocation51 + $0x100] ss:$16 sps:$4 sm:$0xff]  }
 0xc28   :  { %v18657_v34 = vpop.eup %18656 }
 0xc29   :  { %v13368_v6 = vmul.f32 %v18657_v34, %v13324_v22  ;;  %v13371_v33 = vmax.f32 %v13367_v5, 0.0  ;;  %v18378_v22 = vld [vmem:[#allocation51 + $0xa4] ss:$16 sps:$4 sm:$0xff]   ;;  %v18420_v5 = vld [vmem:[#allocation51 + $0xec] ss:$16 sps:$4 sm:$0xff]  }
 0xc2b   :  { %v13372_v12 = vmax.f32 %v13368_v6, 0.0  ;;  %v13375_v35 = vpack.c.bf16 %v13371_v33, %v13371_v33  ;;  %v18418_v33 = vld [vmem:[#allocation51 + $0xe8] ss:$16 sps:$4 sm:$0xff]  }
 0xc2d   :  { %v13376_v19 = vpack.c.bf16 %v13372_v12, %v13372_v12  ;;  %v18675_v12 = vld [vmem:[#allocation57] sm:$0xff] }
 0xc2e   :  { %v20277_v58 = vpack.c.bf16 %v18675_v12, %v18675_v12  ;;  %v18470_v12 = vld [vmem:[#allocation51 + $0x16c] ss:$16 sps:$4 sm:$0xff]  }
 0xc2f   :  { %13674 = vmatprep.mubr.bf16.mxu0 %v13376_v19 }
 0xc30   :  { %13675 = vmatmul.mubr.bf16.vlgmr.msra.gmra.mxu0 %v13375_v35  ;;  %v18423_v35 = vld [vmem:[#allocation51 + $0xcc] ss:$16 sps:$4 sm:$0xff]  }
 0xc31   :  { %17415 = vmatpush3.bf16.msra.mxu0 %v13738_v21  ;;  %17416 = vmatprep.mubr.msk.bf16.mxu0 %vm19541_vm1, %v19540_v8 }
 0xc32   :  { %v20260_v39 = vpop.f32.mrf.mxu1  ;;  %14706 = vmatprep.subr.bf16.mxu0 %v18372_v62 }
 0xc33   :  { %v13207_v46 = vadd.f32 %v20260_v39, %v12080_v50 }
 0xc34   :  { %v20262_v0 = vpop.f32.mrf.mxu1 }
 0xc35   :  { %v13209_v44 = vadd.f32 %v20262_v0, %v12084_v41  ;;  %v13248_v1 = vadd.f32 %v20238_v54, %v13207_v46  ;;  %v18426_v0 = vld [vmem:[#allocation51 + $0xac] ss:$16 sps:$4 sm:$0xff]   ;;  %v18443_v46 = vld [vmem:[#allocation51 + $0x8] ss:$16 sps:$4 sm:$0xff]  }
 0xc36   :  { %v13210_v45 = vpop.f32.mrf.mxu1 }
 0xc37   :  { %v13250_v6 = vadd.f32 %v20240_v59, %v13209_v44  ;;  %v18421_v59 = vld [vmem:[#allocation51 + $0xc8] ss:$16 sps:$4 sm:$0xff]  }
 0xc38   :  { %v13211_v40 = vpop.f32.mrf.mxu1  ;;  %17417 = vmatmul.mubr.msk.bf16.vlgmr.msra.gmra.mxu0 %vm13732_vm2, %v13723_v38 }
 0xc39   :  { %14707 = vmatpush1.bf16.msra.mxu0 %v18370_v26  ;;  %14738 = vmatprep.mubr.bf16.mxu0 %v20266_v63  ;;  %v18424_v40 = vld [vmem:[#allocation51 + $0xa8] ss:$16 sps:$4 sm:$0xff]  }
 0xc3a   :  { %14708 = vmatprep.subr.bf16.mxu0 %v18375_v20 }
 0xc3d   :  { %14709 = vmatpush1.bf16.msra.mxu0 %v18373_v30  ;;  %v18429_v30 = vld [vmem:[#allocation51 + $0x8c] ss:$16 sps:$4 sm:$0xff]  }
 0xc3e   :  { %14710 = vmatprep.subr.bf16.mxu0 %v18378_v22 }
 0xc41   :  { %14711 = vmatpush1.bf16.msra.mxu0 %v18376_v29 }
 0xc42   :  { %14712 = vmatprep.subr.bf16.mxu0 %v18381_v10 }
 0xc45   :  { %14713 = vmatpush1.bf16.msra.mxu0 %v18379_v48 }
 0xc46   :  { %14714 = vmatprep.subr.bf16.mxu0 %v18384_v57  ;;  %v18427_v57 = vld [vmem:[#allocation51 + $0x88] ss:$16 sps:$4 sm:$0xff]  }
 0xc49   :  { %14715 = vmatpush1.bf16.msra.mxu0 %v18382_v13  ;;  %v18432_v13 = vld [vmem:[#allocation51 + $0x6c] ss:$16 sps:$4 sm:$0xff]  }
 0xc4a   :  { %14716 = vmatprep.subr.bf16.mxu0 %v18387_v18 }
 0xc4d   :  { %14717 = vmatpush1.bf16.msra.mxu0 %v18385_v28 }
 0xc4e   :  { %14718 = vmatprep.subr.bf16.mxu0 %v18390_v4 }
 0xc51   :  { %14719 = vmatpush1.bf16.msra.mxu0 %v18388_v2  ;;  %v18430_v2 = vld [vmem:[#allocation51 + $0x68] ss:$16 sps:$4 sm:$0xff]  }
 0xc52   :  { %14720 = vmatprep.subr.bf16.mxu0 %v18393_v3  ;;  %v18435_v3 = vld [vmem:[#allocation51 + $0x4c] ss:$16 sps:$4 sm:$0xff]  }
 0xc55   :  { %14721 = vmatpush1.bf16.msra.mxu0 %v18391_v15 }
 0xc56   :  { %14722 = vmatprep.subr.bf16.mxu0 %v18396_v55 }
 0xc59   :  { %14723 = vmatpush2.bf16.msra.mxu0 %v18394_v7 }
 0xc5a   :  { %14724 = vmatprep.subr.bf16.mxu0 %v18399_v32 }
 0xc5d   :  { %14725 = vmatpush2.bf16.msra.mxu0 %v18397_v9  ;;  %v18433_v9 = vld [vmem:[#allocation51 + $0x48] ss:$16 sps:$4 sm:$0xff]  }
 0xc5e   :  { %14726 = vmatprep.subr.bf16.mxu0 %v18402_v25  ;;  %v18440_v25 = vld [vmem:[#allocation51 + $0x2c] ss:$16 sps:$4 sm:$0xff]  }
 0xc61   :  { %14727 = vmatpush2.bf16.msra.mxu0 %v18400_v61 }
 0xc62   :  { %14728 = vmatprep.subr.bf16.mxu0 %v18405_v47 }
 0xc65   :  { %14729 = vmatpush2.bf16.msra.mxu0 %v18403_v31 }
 0xc66   :  { %14730 = vmatprep.subr.bf16.mxu0 %v18408_v37 }
 0xc69   :  { %14731 = vmatpush2.bf16.msra.mxu0 %v18406_v11  ;;  %v18438_v11 = vld [vmem:[#allocation51 + $0x28] ss:$16 sps:$4 sm:$0xff]  }
 0xc6a   :  { %14732 = vmatprep.subr.bf16.mxu0 %v18411_v53  ;;  %v18445_v53 = vld [vmem:[#allocation51 + $0xc] ss:$16 sps:$4 sm:$0xff]  }
 0xc6d   :  { %14733 = vmatpush2.bf16.msra.mxu0 %v18409_v24 }
 0xc6e   :  { %14734 = vmatprep.subr.bf16.mxu0 %v18414_v42 }
 0xc71   :  { %14735 = vmatpush2.bf16.msra.mxu0 %v18412_v56  ;;  %v18450_v56 = vld [vmem:[#allocation51 + $0x1ec] ss:$16 sps:$4 sm:$0xff]  }
 0xc72   :  { %v13288_v23 = vpop.f32.mrf.mxu1  ;;  %14736 = vmatprep.subr.bf16.mxu0 %v18417_v52 }
 0xc73   :  { %v13289_v34 = vadd.f32 %v13288_v23, %v13248_v1  ;;  %v18448_v23 = vld [vmem:[#allocation51 + $0x1e8] ss:$16 sps:$4 sm:$0xff]  }
 0xc74   :  { %v13290_v49 = vpop.f32.mrf.mxu1 }
 0xc75   :  { %v13307_v14 = vrot.slane %v13289_v34, 4  ;;  %v13291_v17 = vadd.f32 %v13290_v49, %v13250_v6  ;;  %14737 = vmatpush2.bf16.msra.mxu0 %v18415_v60  ;;  %v18453_v6 = vld [vmem:[#allocation51 + $0x1c8] ss:$16 sps:$4 sm:$0xff]   ;;  %v18460_v49 = vld [vmem:[#allocation51 + $0x1ac] ss:$16 sps:$4 sm:$0xff]  }
 0xc76   :  { %v13292_v19 = vpop.f32.mrf.mxu1  ;;  %14788 = vmatprep.subr.bf16.mxu0 %v18420_v5  ;;  %v18455_v5 = vld [vmem:[#allocation51 + $0x1cc] ss:$16 sps:$4 sm:$0xff]  }
 0xc77   :  { %v13308_v21 = vadd.f32 %v13307_v14, %v13289_v34  ;;  %v13313_v54 = vrot.slane %v13291_v17, 4  ;;  %v18458_v14 = vld [vmem:[#allocation51 + $0x1a8] ss:$16 sps:$4 sm:$0xff]  }
 0xc78   :  { %14739 = vmatmul.mubr.bf16.vlgmr.msra.gmra.mxu0 %v20277_v58  ;;  %v13293_v62 = vpop.f32.mrf.mxu1 }
 0xc79   :  { %v13309_v43 = vrot.slane %v13308_v21, 2  ;;  %v13314_v39 = vadd.f32 %v13313_v54, %v13291_v17  ;;  %14789 = vmatpush1.bf16.msra.mxu0 %v18418_v33  ;;  %14820 = vmatprep.mubr.bf16.mxu0 %v20266_v63  ;;  %v18463_v33 = vld [vmem:[#allocation51 + $0x188] ss:$16 sps:$4 sm:$0xff]   ;;  %v18475_v62 = vld [vmem:[#allocation51 + $0x14c] ss:$16 sps:$4 sm:$0xff]  }
 0xc7a   :  { %14790 = vmatprep.subr.bf16.mxu0 %v18423_v35 }
 0xc7b   :  { %v13310_v38 = vadd.f32 %v13309_v43, %v13308_v21  ;;  %v13315_v26 = vrot.slane %v13314_v39, 2  ;;  %v18468_v21 = vld [vmem:[#allocation51 + $0x168] ss:$16 sps:$4 sm:$0xff]  }
 0xc7d   :  { %v13311_v45 = vrot.slane %v13310_v38, 1  ;;  %v13316_v20 = vadd.f32 %v13315_v26, %v13314_v39  ;;  %14791 = vmatpush1.bf16.msra.mxu0 %v18421_v59  ;;  %v18473_v59 = vld [vmem:[#allocation51 + $0x148] ss:$16 sps:$4 sm:$0xff]  }
 0xc7e   :  { %14792 = vmatprep.subr.bf16.mxu0 %v18426_v0 }
 0xc7f   :  { %v13312_v22 = vadd.f32 %v13311_v45, %v13310_v38  ;;  %v13317_v29 = vrot.slane %v13316_v20, 1  ;;  %v18478_v38 = vld [vmem:[#allocation51 + $0x12c] ss:$16 sps:$4 sm:$0xff]  }
 0xc80   :  { %v18482_v45 = vld [vmem:[#allocation48 + $0x38] sm:$0xff]  }
 0xc81   :  { %v13321_v10 = vmul.f32 0.125, %v13312_v22  ;;  %v13318_v48 = vadd.f32 %v13317_v29, %v13316_v20  ;;  %14793 = vmatpush1.bf16.msra.mxu0 %v18424_v40  ;;  %v18476_v40 = vld [vmem:[#allocation51 + $0x128] ss:$16 sps:$4 sm:$0xff]   ;;  %v18483_v22 = vld [vmem:[#allocation48 + $0x30] sm:$0xff]  }
 0xc82   :  { %14794 = vmatprep.subr.bf16.mxu0 %v18429_v30  ;;  %v18481_v30 = vld [vmem:[#allocation51 + $0x10c] ss:$16 sps:$4 sm:$0xff]   ;;  %v18479_v29 = vld [vmem:[#allocation51 + $0x108] ss:$16 sps:$4 sm:$0xff]  }
 0xc83   :  { %v13325_v63 = vsub.f32 %v13289_v34, %v13321_v10  ;;  %v13322_v18 = vmul.f32 0.125, %v13318_v48  ;;  %v18484_v10 = vld [vmem:[#allocation48 + $0x28] sm:$0xff]   ;;  %v18485_v48 = vld [vmem:[#allocation48 + $0x20] sm:$0xff]  }
 0xc85   :  { %v13329_v28 = vmul.f32 %v13325_v63, %v13325_v63  ;;  %v13326_v4 = vsub.f32 %v13291_v17, %v13322_v18  ;;  %14795 = vmatpush1.bf16.msra.mxu0 %v18427_v57  ;;  %v18465_v17 = vld [vmem:[#allocation51 + $0x18c] ss:$16 sps:$4 sm:$0xff]  }
 0xc86   :  { %14796 = vmatprep.subr.bf16.mxu0 %v18432_v13  ;;  %v18486_v57 = vld [vmem:[#allocation48 + $0x18] sm:$0xff]   ;;  %v18487_v13 = vld [vmem:[#allocation48 + $0x10] sm:$0xff]   ;;  %v18489_v18 = vld [vmem:[#allocation48] sm:$0xff]  }
 0xc87   :  { %v13343_v15 = vrot.slane %v13329_v28, 4  ;;  %v13330_v55 = vmul.f32 %v13326_v4, %v13326_v4 }
 0xc89   :  { %v13344_v7 = vadd.f32 %v13343_v15, %v13329_v28  ;;  %v13349_v32 = vrot.slane %v13330_v55, 4  ;;  %14797 = vmatpush1.bf16.msra.mxu0 %v18430_v2  ;;  %v17033_v15 = vld [vmem:[#allocation47] ss:$0 sm:$0xff] }
 0xc8a   :  { %14798 = vmatprep.subr.bf16.mxu0 %v18435_v3 }
 0xc8b   :  { %v13345_v61 = vrot.slane %v13344_v7, 2  ;;  %v13350_v47 = vadd.f32 %v13349_v32, %v13330_v55 }
 0xc8d   :  { %v13346_v31 = vadd.f32 %v13345_v61, %v13344_v7  ;;  %v13351_v37 = vrot.slane %v13350_v47, 2  ;;  %14799 = vmatpush1.bf16.msra.mxu0 %v18433_v9 }
 0xc8e   :  { %14800 = vmatprep.subr.bf16.mxu0 %v18440_v25 }
 0xc8f   :  { %v13347_v50 = vrot.slane %v13346_v31, 1  ;;  %v13352_v24 = vadd.f32 %v13351_v37, %v13350_v47 }
 0xc91   :  { %v13348_v42 = vadd.f32 %v13347_v50, %v13346_v31  ;;  %v13353_v41 = vrot.slane %v13352_v24, 1  ;;  %14801 = vmatpush1.bf16.msra.mxu0 %v18438_v11  ;;  %v18492_v31 = vld [vmem:[#allocation51 + $0x2e4] ss:$16 sps:$4 sm:$0xff]  }
 0xc92   :  { %14802 = vmatprep.subr.bf16.mxu0 %v18445_v53 }
 0xc93   :  { %v13357_v52 = vmul.f32 0.125, %v13348_v42  ;;  %v13354_v44 = vadd.f32 %v13353_v41, %v13352_v24 }
 0xc95   :  { %v13361_v1 = vadd.f32 1e-05, %v13357_v52  ;;  %v13358_v60 = vmul.f32 0.125, %v13354_v44  ;;  %14803 = vmatpush1.bf16.msra.mxu0 %v18443_v46 }
 0xc96   :  { %14804 = vmatprep.subr.bf16.mxu0 %v18450_v56 }
 0xc97   :  { %18658 = vrsqrt.f32 %v13361_v1  ;;  %v13362_v34 = vadd.f32 1e-05, %v13358_v60 }
 0xc99   :  { %18660 = vrsqrt.f32 %v13362_v34  ;;  %14805 = vmatpush2.bf16.msra.mxu0 %v18448_v23 }
 0xc9a   :  { %14806 = vmatprep.subr.bf16.mxu0 %v18455_v5 }
 0xc9d   :  { %14807 = vmatpush2.bf16.msra.mxu0 %v18453_v6 }
 0xc9e   :  { %14808 = vmatprep.subr.bf16.mxu0 %v18460_v49  ;;  %v18490_v49 = vld [vmem:[#allocation51 + $0x2e0] ss:$16 sps:$4 sm:$0xff]  }
 0xca1   :  { %14809 = vmatpush2.bf16.msra.mxu0 %v18458_v14 }
 0xca2   :  { %14810 = vmatprep.subr.bf16.mxu0 %v18465_v17  ;;  %v18495_v17 = vld [vmem:[#allocation51 + $0x2c4] ss:$16 sps:$4 sm:$0xff]  }
 0xca4   :  { %v18659_v19 = vpop.eup %18658 }
 0xca5   :  { %v13369_v35 = vmul.f32 %v18659_v19, %v13325_v63  ;;  %14811 = vmatpush2.bf16.msra.mxu0 %v18463_v33  ;;  %v18488_v63 = vld [vmem:[#allocation48 + $0x8] sm:$0xff]   ;;  %v18493_v33 = vld [vmem:[#allocation51 + $0x2c0] ss:$16 sps:$4 sm:$0xff]  }
 0xca6   :  { %v18661_v54 = vpop.eup %18660  ;;  %14812 = vmatprep.subr.bf16.mxu0 %v18470_v12  ;;  %v18498_v12 = vld [vmem:[#allocation51 + $0x2a4] ss:$16 sps:$4 sm:$0xff]   ;;  %v18496_v19 = vld [vmem:[#allocation51 + $0x2a0] ss:$16 sps:$4 sm:$0xff]  }
 0xca7   :  { %v13370_v43 = vmul.f32 %v18661_v54, %v13326_v4  ;;  %v13373_v39 = vmax.f32 %v13369_v35, 0.0  ;;  %v18501_v35 = vld [vmem:[#allocation51 + $0x284] ss:$16 sps:$4 sm:$0xff]  }
 0xca9   :  { %14813 = vmatpush2.bf16.msra.mxu0 %v18468_v21  ;;  %v13374_v0 = vmax.f32 %v13370_v43, 0.0  ;;  %v13377_v20 = vpack.c.bf16 %v13373_v39, %v13373_v39  ;;  %v18504_v43 = vld [vmem:[#allocation51 + $0x264] ss:$16 sps:$4 sm:$0xff]  }
 0xcaa   :  { %14814 = vmatprep.subr.bf16.mxu0 %v18475_v62  ;;  %v18499_v62 = vld [vmem:[#allocation51 + $0x280] ss:$16 sps:$4 sm:$0xff]  }
 0xcab   :  { %v13378_v26 = vpack.c.bf16 %v13374_v0, %v13374_v0  ;;  %v18502_v0 = vld [vmem:[#allocation51 + $0x260] ss:$16 sps:$4 sm:$0xff]  }
 0xcad   :  { %14815 = vmatpush2.bf16.msra.mxu0 %v18473_v59  ;;  %13714 = vmatprep.mubr.bf16.mxu1 %v13378_v26  ;;  %v18505_v26 = vld [vmem:[#allocation51 + $0x240] ss:$16 sps:$4 sm:$0xff]  }
 0xcae   :  { %13715 = vmatmul.mubr.bf16.vlgmr.msra.gmra.mxu1 %v13377_v20  ;;  %14816 = vmatprep.subr.bf16.mxu0 %v18478_v38  ;;  %v18507_v38 = vld [vmem:[#allocation51 + $0x244] ss:$16 sps:$4 sm:$0xff]   ;;  %v18508_v20 = vld [vmem:[#allocation51 + $0x220] ss:$16 sps:$4 sm:$0xff]  }
 0xcaf   :  { %17421 = vmatpush3.bf16.msra.mxu1 %v18482_v45  ;;  %17436 = vmatprep.mubr.msk.bf16.mxu1 %vm19541_vm1, %v19540_v8  ;;  %v18510_v45 = vld [vmem:[#allocation51 + $0x224] ss:$16 sps:$4 sm:$0xff]  }
 0xcb0   :  { %17422 = vmatprep.subr.bf16.mxu1 %v19540_v8 }
 0xcb1   :  { %14817 = vmatpush2.bf16.msra.mxu0 %v18476_v40  ;;  %v18513_v40 = vld [vmem:[#allocation51 + $0x204] ss:$16 sps:$4 sm:$0xff]  }
 0xcb2   :  { %14818 = vmatprep.subr.bf16.mxu0 %v18481_v30  ;;  %v18511_v30 = vld [vmem:[#allocation51 + $0x200] ss:$16 sps:$4 sm:$0xff]  }
 0xcb3   :  { %17423 = vmatpush3.bf16.msra.mxu1 %v18483_v22  ;;  %v18516_v22 = vld [vmem:[#allocation51 + $0x3e4] ss:$16 sps:$4 sm:$0xff]  }
 0xcb4   :  { %17424 = vmatprep.subr.bf16.mxu1 %v19540_v8 }
 0xcb5   :  { %14819 = vmatpush2.bf16.msra.mxu0 %v18479_v29  ;;  %v18514_v29 = vld [vmem:[#allocation51 + $0x3e0] ss:$16 sps:$4 sm:$0xff]  }
 0xcb7   :  { %17425 = vmatpush3.bf16.msra.mxu1 %v18484_v10  ;;  %v18519_v10 = vld [vmem:[#allocation51 + $0x3c4] ss:$16 sps:$4 sm:$0xff]  }
 0xcb8   :  { %14821 = vmatmul.mubr.bf16.vlgmr.msra.gmra.mxu0 %v20277_v58  ;;  %17426 = vmatprep.subr.bf16.mxu1 %v19540_v8 }
 0xcbb   :  { %17427 = vmatpush3.bf16.msra.mxu1 %v18485_v48  ;;  %v18517_v48 = vld [vmem:[#allocation51 + $0x3c0] ss:$16 sps:$4 sm:$0xff]  }
 0xcbc   :  { %17428 = vmatprep.subr.bf16.mxu1 %v19540_v8 }
 0xcbf   :  { %17429 = vmatpush3.bf16.msra.mxu1 %v18486_v57  ;;  %v18522_v57 = vld [vmem:[#allocation51 + $0x3a4] ss:$16 sps:$4 sm:$0xff]  }
 0xcc0   :  { %17430 = vmatprep.subr.bf16.mxu1 %v19540_v8 }
 0xcc3   :  { %17431 = vmatpush3.bf16.msra.mxu1 %v18487_v13  ;;  %v18520_v13 = vld [vmem:[#allocation51 + $0x3a0] ss:$16 sps:$4 sm:$0xff]  }
 0xcc4   :  { %17432 = vmatprep.subr.bf16.mxu1 %v19540_v8 }
 0xcc7   :  { %17433 = vmatpush3.bf16.msra.mxu1 %v18488_v63  ;;  %v18525_v63 = vld [vmem:[#allocation51 + $0x384] ss:$16 sps:$4 sm:$0xff]  }
 0xcc8   :  { %17434 = vmatprep.subr.bf16.mxu1 %v19540_v8 }
 0xccb   :  { %17435 = vmatpush3.bf16.msra.mxu1 %v18489_v18  ;;  %v18523_v18 = vld [vmem:[#allocation51 + $0x380] ss:$16 sps:$4 sm:$0xff]  }
 0xccc   :  { %14747 = vmatprep.subr.bf16.mxu1 %v18492_v31 }
 0xcf0   :  { %v17331_v58 = vpop.f32.mrf.mxu0 }
 0xcf2   :  { %v17332_v28 = vpop.f32.mrf.mxu0 }
 0xcf3   :  { %v20291_v4 = vadd.f32 %v17332_v28, %v17331_v58  ;;  %v18528_v58 = vld [vmem:[#allocation51 + $0x364] ss:$16 sps:$4 sm:$0xff]   ;;  %v18526_v28 = vld [vmem:[#allocation51 + $0x360] ss:$16 sps:$4 sm:$0xff]  }
 0xcf4   :  { %v17334_v2 = vpop.f32.mrf.mxu0 }
 0xcf5   :  { %v18531_v2 = vld [vmem:[#allocation51 + $0x344] ss:$16 sps:$4 sm:$0xff]  }
 0xcf6   :  { %v17335_v3 = vpop.f32.mrf.mxu0 }
 0xcf7   :  { %v18529_v3 = vld [vmem:[#allocation51 + $0x340] ss:$16 sps:$4 sm:$0xff]  }
 0xcf8   :  { %v13774_v55 = vpop.f32.mrf.mxu0 }
 0xcf9   :  { %v13775_v7 = vadd.f32 %v17033_v15, %v13774_v55  ;;  %v18534_v15 = vld [vmem:[#allocation51 + $0x324] ss:$16 sps:$4 sm:$0xff]   ;;  %v18532_v55 = vld [vmem:[#allocation51 + $0x320] ss:$16 sps:$4 sm:$0xff]  }
 0xcfa   :  { %v17418_v32 = vpop.f32.mrf.mxu0 }
 0xcfb   :  { %v13780_v9 = vrot.slane %v13775_v7, 4 }
 0xcfc   :  { %v13777_v25 = vpop.f32.mrf.mxu0 }
 0xcfd   :  { %v13781_v61 = vadd.f32 %v13780_v9, %v13775_v7 }
 0xcfe   :  { %v17419_v47 = vpop.f32.mrf.mxu0 }
 0xcff   :  { %v13782_v37 = vrot.slane %v13781_v61, 2  ;;  %v18537_v47 = vld [vmem:[#allocation51 + $0x304] ss:$16 sps:$4 sm:$0xff]  }
 0xd01   :  { %v13783_v11 = vadd.f32 %v13782_v37, %v13781_v61  ;;  %v18535_v37 = vld [vmem:[#allocation51 + $0x300] ss:$16 sps:$4 sm:$0xff]  }
 0xd03   :  { %v13784_v8 = vrot.slane %v13783_v11, 1 }
 0xd05   :  { %v13785_v53 = vadd.f32 %v13784_v8, %v13783_v11 }
 0xd07   :  { %v13786_v50 = vmul.f32 0.125, %v13785_v53  ;;  %v18540_v53 = vld [vmem:[#allocation51 + $0x2ec] ss:$16 sps:$4 sm:$0xff]  }
 0xd09   :  { %v13787_v24 = vsub.f32 %v13775_v7, %v13786_v50  ;;  %v17000_v7 = vld [vmem:[#allocation44] ss:$0 sm:$0xff] }
 0xd0a   :  { %v13677_v25 = vadd.f32 %v20291_v4, %v17000_v7  ;;  %v18590_v7 = vld [vmem:[#allocation54 + $0x68] sm:$0xff]  }
 0xd0b   :  { %v13788_v42 = vmul.f32 %v13787_v24, %v13787_v24 }
 0xd0d   :  { %v13789_v41 = vrot.slane %v13788_v42, 4 }
 0xd0f   :  { %v13790_v46 = vadd.f32 %v13789_v41, %v13788_v42 }
 0xd11   :  { %v13791_v56 = vrot.slane %v13790_v46, 2 }
 0xd13   :  { %v13792_v52 = vadd.f32 %v13791_v56, %v13790_v46  ;;  %v17035_v46 = vld [vmem:[#allocation50] ss:$0 sm:$0xff] }
 0xd15   :  { %v13793_v44 = vrot.slane %v13792_v52, 1 }
 0xd17   :  { %v13794_v1 = vadd.f32 %v13793_v44, %v13792_v52 }
 0xd19   :  { %v13795_v60 = vmul.f32 0.125, %v13794_v1  ;;  %v18538_v1 = vld [vmem:[#allocation51 + $0x2e8] ss:$16 sps:$4 sm:$0xff]  }
 0xd1b   :  { %v13796_v23 = vadd.f32 1e-05, %v13795_v60 }
 0xd1d   :  { %18662 = vrsqrt.f32 %v13796_v23 }
 0xd2a   :  { %v18663_v5 = vpop.eup %18662 }
 0xd2b   :  { %v13798_v34 = vmul.f32 %v18663_v5, %v13787_v24  ;;  %v18543_v5 = vld [vmem:[#allocation51 + $0x2cc] ss:$16 sps:$4 sm:$0xff]  }
 0xd2d   :  { %v13799_v6 = vmax.f32 %v13798_v34, 0.0 }
 0xd2f   :  { %v13800_v14 = vpack.c.bf16 %v13799_v6, %v13799_v6  ;;  %v18541_v6 = vld [vmem:[#allocation51 + $0x2c8] ss:$16 sps:$4 sm:$0xff]  }
 0xd31   :  { %17437 = vmatmul.mubr.bf16.vlgmr.msra.gmra.mxu1 %v13800_v14  ;;  %v18544_v14 = vld [vmem:[#allocation51 + $0x2a8] ss:$16 sps:$4 sm:$0xff]  }
 0xd32   :  { %14748 = vmatpush1.bf16.msra.mxu1 %v18490_v49  ;;  %v18546_v49 = vld [vmem:[#allocation51 + $0x2ac] ss:$16 sps:$4 sm:$0xff]  }
 0xd33   :  { %14749 = vmatprep.subr.bf16.mxu1 %v18495_v17  ;;  %v18549_v17 = vld [vmem:[#allocation51 + $0x28c] ss:$16 sps:$4 sm:$0xff]  }
 0xd36   :  { %14750 = vmatpush1.bf16.msra.mxu1 %v18493_v33  ;;  %v18547_v33 = vld [vmem:[#allocation51 + $0x288] ss:$16 sps:$4 sm:$0xff]  }
 0xd37   :  { %14751 = vmatprep.subr.bf16.mxu1 %v18498_v12  ;;  %v18552_v12 = vld [vmem:[#allocation51 + $0x26c] ss:$16 sps:$4 sm:$0xff]  }
 0xd38   :  { %v20293_v21 = vpop.f32.mrf.mxu0 }
 0xd3a   :  { %v20295_v54 = vpop.f32.mrf.mxu0  ;;  %14752 = vmatpush1.bf16.msra.mxu1 %v18496_v19  ;;  %v18550_v19 = vld [vmem:[#allocation51 + $0x268] ss:$16 sps:$4 sm:$0xff]  }
 0xd3b   :  { %14753 = vmatprep.subr.bf16.mxu1 %v18501_v35  ;;  %v18555_v35 = vld [vmem:[#allocation51 + $0x24c] ss:$16 sps:$4 sm:$0xff]  }
 0xd3c   :  { %v14744_v39 = vpop.f32.mrf.mxu0 }
 0xd3d   :  { %v18556_v39 = vld [vmem:[#allocation51 + $0x228] ss:$16 sps:$4 sm:$0xff]  }
 0xd3e   :  { %v14745_v59 = vpop.f32.mrf.mxu0  ;;  %14754 = vmatpush1.bf16.msra.mxu1 %v18499_v62  ;;  %v18553_v62 = vld [vmem:[#allocation51 + $0x248] ss:$16 sps:$4 sm:$0xff]  }
 0xd3f   :  { %14755 = vmatprep.subr.bf16.mxu1 %v18504_v43  ;;  %v18558_v43 = vld [vmem:[#allocation51 + $0x22c] ss:$16 sps:$4 sm:$0xff]  }
 0xd40   :  { %v18561_v59 = vld [vmem:[#allocation51 + $0x20c] ss:$16 sps:$4 sm:$0xff]  }
 0xd42   :  { %14756 = vmatpush1.bf16.msra.mxu1 %v18502_v0  ;;  %v18559_v0 = vld [vmem:[#allocation51 + $0x208] ss:$16 sps:$4 sm:$0xff]  }
 0xd43   :  { %14757 = vmatprep.subr.bf16.mxu1 %v18507_v38  ;;  %v18564_v38 = vld [vmem:[#allocation51 + $0x3ec] ss:$16 sps:$4 sm:$0xff]  }
 0xd46   :  { %14758 = vmatpush1.bf16.msra.mxu1 %v18505_v26  ;;  %v18562_v26 = vld [vmem:[#allocation51 + $0x3e8] ss:$16 sps:$4 sm:$0xff]  }
 0xd47   :  { %14759 = vmatprep.subr.bf16.mxu1 %v18510_v45  ;;  %v18567_v45 = vld [vmem:[#allocation51 + $0x3cc] ss:$16 sps:$4 sm:$0xff]  }
 0xd4a   :  { %14760 = vmatpush1.bf16.msra.mxu1 %v18508_v20  ;;  %v18565_v20 = vld [vmem:[#allocation51 + $0x3c8] ss:$16 sps:$4 sm:$0xff]  }
 0xd4b   :  { %14761 = vmatprep.subr.bf16.mxu1 %v18513_v40  ;;  %v18570_v40 = vld [vmem:[#allocation51 + $0x3ac] ss:$16 sps:$4 sm:$0xff]  }
 0xd4e   :  { %14762 = vmatpush1.bf16.msra.mxu1 %v18511_v30  ;;  %v18568_v30 = vld [vmem:[#allocation51 + $0x3a8] ss:$16 sps:$4 sm:$0xff]  }
 0xd4f   :  { %14763 = vmatprep.subr.bf16.mxu1 %v18516_v22  ;;  %v18573_v22 = vld [vmem:[#allocation51 + $0x38c] ss:$16 sps:$4 sm:$0xff]  }
 0xd52   :  { %14764 = vmatpush2.bf16.msra.mxu1 %v18514_v29  ;;  %v18571_v29 = vld [vmem:[#allocation51 + $0x388] ss:$16 sps:$4 sm:$0xff]  }
 0xd53   :  { %14765 = vmatprep.subr.bf16.mxu1 %v18519_v10  ;;  %v18576_v10 = vld [vmem:[#allocation51 + $0x36c] ss:$16 sps:$4 sm:$0xff]  }
 0xd56   :  { %14766 = vmatpush2.bf16.msra.mxu1 %v18517_v48  ;;  %v18574_v48 = vld [vmem:[#allocation51 + $0x368] ss:$16 sps:$4 sm:$0xff]  }
 0xd57   :  { %14767 = vmatprep.subr.bf16.mxu1 %v18522_v57  ;;  %v18579_v57 = vld [vmem:[#allocation51 + $0x34c] ss:$16 sps:$4 sm:$0xff]  }
 0xd5a   :  { %14768 = vmatpush2.bf16.msra.mxu1 %v18520_v13  ;;  %v18577_v13 = vld [vmem:[#allocation51 + $0x348] ss:$16 sps:$4 sm:$0xff]  }
 0xd5b   :  { %14769 = vmatprep.subr.bf16.mxu1 %v18525_v63  ;;  %v18582_v63 = vld [vmem:[#allocation51 + $0x32c] ss:$16 sps:$4 sm:$0xff]  }
 0xd5e   :  { %14770 = vmatpush2.bf16.msra.mxu1 %v18523_v18  ;;  %v18580_v18 = vld [vmem:[#allocation51 + $0x328] ss:$16 sps:$4 sm:$0xff]  }
 0xd5f   :  { %14771 = vmatprep.subr.bf16.mxu1 %v18528_v58  ;;  %v18585_v58 = vld [vmem:[#allocation51 + $0x30c] ss:$16 sps:$4 sm:$0xff]  }
 0xd62   :  { %14772 = vmatpush2.bf16.msra.mxu1 %v18526_v28  ;;  %v18583_v28 = vld [vmem:[#allocation51 + $0x308] ss:$16 sps:$4 sm:$0xff]  }
 0xd63   :  { %14773 = vmatprep.subr.bf16.mxu1 %v18531_v2  ;;  %v18586_v2 = vld [vmem:[#allocation54 + $0x78] sm:$0xff]  }
 0xd64   :  { %17370 = vmatprep.subr.bf16.mxu0 %v18586_v2 }
 0xd66   :  { %14774 = vmatpush2.bf16.msra.mxu1 %v18529_v3  ;;  %v18587_v3 = vld [vmem:[#allocation54 + $0x38] sm:$0xff]  }
 0xd67   :  { %14775 = vmatprep.subr.bf16.mxu1 %v18534_v15  ;;  %17371 = vmatpush3.bf16.msra.mxu0 %v18587_v3  ;;  %v18588_v15 = vld [vmem:[#allocation54 + $0x70] sm:$0xff]  }
 0xd68   :  { %17372 = vmatprep.subr.bf16.mxu0 %v18588_v15 }
 0xd6a   :  { %14776 = vmatpush2.bf16.msra.mxu1 %v18532_v55  ;;  %v18589_v55 = vld [vmem:[#allocation54 + $0x30] sm:$0xff]  }
 0xd6b   :  { %14777 = vmatprep.subr.bf16.mxu1 %v18537_v47  ;;  %17373 = vmatpush3.bf16.msra.mxu0 %v18589_v55  ;;  %v18595_v47 = vld [vmem:[#allocation54 + $0x18] sm:$0xff]  }
 0xd6c   :  { %17374 = vmatprep.subr.bf16.mxu0 %v18590_v7 }
 0xd6e   :  { %v17353_v32 = vpop.f32.mrf.mxu1  ;;  %14778 = vmatpush2.bf16.msra.mxu1 %v18535_v37  ;;  %v18597_v37 = vld [vmem:[#allocation54 + $0x10] sm:$0xff]  }
 0xd6f   :  { %14829 = vmatprep.subr.bf16.mxu1 %v18540_v53  ;;  %v18600_v53 = vld [vmem:[#allocation54 + $0x40] sm:$0xff]  }
 0xd70   :  { %v17354_v9 = vpop.f32.mrf.mxu1 }
 0xd71   :  { %v17355_v61 = vadd.f32 %v17354_v9, %v17353_v32  ;;  %v18591_v32 = vld [vmem:[#allocation54 + $0x28] sm:$0xff]   ;;  %v18592_v9 = vld [vmem:[#allocation54 + $0x60] sm:$0xff]  }
 0xd72   :  { %v17356_v31 = vpop.f32.mrf.mxu1  ;;  %17375 = vmatpush3.bf16.msra.mxu0 %v18591_v32 }
 0xd73   :  { %v13717_v11 = vadd.f32 %v17355_v61, %v13677_v25  ;;  %v18593_v25 = vld [vmem:[#allocation54 + $0x20] sm:$0xff]   ;;  %17376 = vmatprep.subr.bf16.mxu0 %v18592_v9  ;;  %v18594_v61 = vld [vmem:[#allocation54 + $0x58] sm:$0xff]   ;;  %v18596_v31 = vld [vmem:[#allocation54 + $0x50] sm:$0xff]  }
 0xd74   :  { %v17357_v8 = vpop.f32.mrf.mxu1 }
 0xd75   :  { %15299 = vst [vmem:[#allocation57 + $0x10] sm:$0xff] %v13717_v11  ;;  %v20302_v60 = vpack.c.bf16 %v13717_v11, %v13717_v11  ;;  %v18598_v11 = vld [vmem:[#allocation54 + $0x48] sm:$0xff]  }
 0xd76   :  { %17377 = vmatpush3.bf16.msra.mxu0 %v18593_v25  ;;  %v18599_v8 = vld [vmem:[#allocation54 + $0x8] sm:$0xff]  }
 0xd77   :  { %17378 = vmatprep.subr.bf16.mxu0 %v18594_v61 }
 0xd78   :  { %v20298_v50 = vpop.f32.mrf.mxu0 }
 0xd7a   :  { %v20300_v24 = vpop.f32.mrf.mxu0  ;;  %17379 = vmatpush3.bf16.msra.mxu0 %v18595_v47 }
 0xd7b   :  { %17380 = vmatprep.subr.bf16.mxu0 %v18596_v31 }
 0xd7c   :  { %v14826_v42 = vpop.f32.mrf.mxu0 }
 0xd7d   :  { %v18601_v42 = vld [vmem:[#allocation54] sm:$0xff]  }
 0xd7e   :  { %v14827_v41 = vpop.f32.mrf.mxu0  ;;  %17381 = vmatpush3.bf16.msra.mxu0 %v18597_v37 }
 0xd7f   :  { %17382 = vmatprep.subr.bf16.mxu0 %v18598_v11  ;;  %v18602_v41 = vld [vmem:[#allocation54 + $0xf8] sm:$0xff]  }
 0xd82   :  { %17383 = vmatpush3.bf16.msra.mxu0 %v18599_v8 }
 0xd83   :  { %17384 = vmatprep.subr.bf16.mxu0 %v18600_v53 }
 0xd86   :  { %17385 = vmatpush3.bf16.msra.mxu0 %v18601_v42 }
 0xdf1   :  { %v13906_v56 = vpop.f32.mrf.mxu1 }
 0xdf2   :  { %v13907_v4 = vadd.f32 %v17035_v46, %v13906_v56  ;;  %v18603_v46 = vld [vmem:[#allocation54 + $0xb8] sm:$0xff]   ;;  %v18604_v56 = vld [vmem:[#allocation54 + $0xf0] sm:$0xff]  }
 0xdf3   :  { %v17438_v52 = vpop.f32.mrf.mxu1 }
 0xdf4   :  { %v13915_v44 = vpack.c.bf16 %v13907_v4, %v13907_v4  ;;  %15300 = vst [vmem:[#allocation57 + $0x18] sm:$0xff] %v13907_v4  ;;  %v18605_v4 = vld [vmem:[#allocation54 + $0xb0] sm:$0xff]   ;;  %v18606_v52 = vld [vmem:[#allocation54 + $0xe8] sm:$0xff]  }
 0xdf5   :  { %v13909_v23 = vpop.f32.mrf.mxu1 }
 0xdf6   :  { %14779 = vmatprep.mubr.bf16.mxu1 %v13915_v44  ;;  %v18610_v23 = vld [vmem:[#allocation54 + $0xd8] sm:$0xff]  }
 0xdf7   :  { %v17439_v34 = vpop.f32.mrf.mxu1  ;;  %14780 = vmatmul.mubr.bf16.vlgmr.msra.gmra.mxu1 %v20302_v60 }
 0xdf8   :  { %14830 = vmatpush1.bf16.msra.mxu1 %v18538_v1  ;;  %14861 = vmatprep.mubr.bf16.mxu1 %v13915_v44  ;;  %v18607_v44 = vld [vmem:[#allocation54 + $0xa8] sm:$0xff]   ;;  %v18608_v1 = vld [vmem:[#allocation54 + $0xe0] sm:$0xff]   ;;  %v18612_v34 = vld [vmem:[#allocation54 + $0xd0] sm:$0xff]  }
 0xdf9   :  { %14831 = vmatprep.subr.bf16.mxu1 %v18543_v5  ;;  %v18611_v5 = vld [vmem:[#allocation54 + $0x98] sm:$0xff]  }
 0xdfc   :  { %14832 = vmatpush1.bf16.msra.mxu1 %v18541_v6  ;;  %v18613_v6 = vld [vmem:[#allocation54 + $0x90] sm:$0xff]  }
 0xdfd   :  { %14833 = vmatprep.subr.bf16.mxu1 %v18546_v49  ;;  %v18614_v49 = vld [vmem:[#allocation54 + $0xc8] sm:$0xff]  }
 0xe00   :  { %14834 = vmatpush1.bf16.msra.mxu1 %v18544_v14  ;;  %v18615_v14 = vld [vmem:[#allocation54 + $0x88] sm:$0xff]  }
 0xe01   :  { %14835 = vmatprep.subr.bf16.mxu1 %v18549_v17  ;;  %v18616_v17 = vld [vmem:[#allocation54 + $0xc0] sm:$0xff]  }
 0xe04   :  { %14836 = vmatpush1.bf16.msra.mxu1 %v18547_v33  ;;  %v18617_v33 = vld [vmem:[#allocation54 + $0x80] sm:$0xff]  }
 0xe05   :  { %14837 = vmatprep.subr.bf16.mxu1 %v18552_v12  ;;  %v20306_v12 = vld [vmem:[#allocation53] sm:$0xf] }
 0xe08   :  { %14838 = vmatpush1.bf16.msra.mxu1 %v18550_v19  ;;  %v14049_v19 = vrot.slane %v20306_v12, %v19861_v36 }
 0xe09   :  { %14839 = vmatprep.subr.bf16.mxu1 %v18555_v35  ;;  %v14053_v35 = vrot.slane %v20306_v12, %v19864_v51 }
 0xe0c   :  { %14840 = vmatpush1.bf16.msra.mxu1 %v18553_v62  ;;  %v14741_v62 = vadd.f32 %v20293_v21, %v14049_v19 }
 0xe0d   :  { %14841 = vmatprep.subr.bf16.mxu1 %v18558_v43 }
 0xe10   :  { %14842 = vmatpush1.bf16.msra.mxu1 %v18556_v39  ;;  %v14743_v39 = vadd.f32 %v20295_v54, %v14053_v35 }
 0xe11   :  { %14843 = vmatprep.subr.bf16.mxu1 %v18561_v59 }
 0xe14   :  { %14844 = vmatpush1.bf16.msra.mxu1 %v18559_v0 }
 0xe15   :  { %14845 = vmatprep.subr.bf16.mxu1 %v18564_v38 }
 0xe18   :  { %14846 = vmatpush2.bf16.msra.mxu1 %v18562_v26 }
 0xe19   :  { %14847 = vmatprep.subr.bf16.mxu1 %v18567_v45 }
 0xe1c   :  { %14848 = vmatpush2.bf16.msra.mxu1 %v18565_v20 }
 0xe1d   :  { %14849 = vmatprep.subr.bf16.mxu1 %v18570_v40 }
 0xe20   :  { %14850 = vmatpush2.bf16.msra.mxu1 %v18568_v30 }
 0xe21   :  { %14851 = vmatprep.subr.bf16.mxu1 %v18573_v22 }
 0xe24   :  { %14852 = vmatpush2.bf16.msra.mxu1 %v18571_v29 }
 0xe25   :  { %14853 = vmatprep.subr.bf16.mxu1 %v18576_v10 }
 0xe28   :  { %14854 = vmatpush2.bf16.msra.mxu1 %v18574_v48 }
 0xe29   :  { %14855 = vmatprep.subr.bf16.mxu1 %v18579_v57 }
 0xe2c   :  { %14856 = vmatpush2.bf16.msra.mxu1 %v18577_v13 }
 0xe2d   :  { %14857 = vmatprep.subr.bf16.mxu1 %v18582_v63 }
 0xe30   :  { %14858 = vmatpush2.bf16.msra.mxu1 %v18580_v18 }
 0xe31   :  { %14859 = vmatprep.subr.bf16.mxu1 %v18585_v58 }
 0xe34   :  { %14860 = vmatpush2.bf16.msra.mxu1 %v18583_v28 }
 0xe35   :  { %17392 = vmatprep.subr.bf16.mxu1 %v18602_v41 }
 0xe37   :  { %14862 = vmatmul.mubr.bf16.vlgmr.msra.gmra.mxu1 %v20302_v60  ;;  %v18609_v60 = vld [vmem:[#allocation54 + $0xa0] sm:$0xff]  }
 0xe38   :  { %17393 = vmatpush3.bf16.msra.mxu1 %v18603_v46 }
 0xe39   :  { %17394 = vmatprep.subr.bf16.mxu1 %v18604_v56 }
 0xe3c   :  { %17395 = vmatpush3.bf16.msra.mxu1 %v18605_v4 }
 0xe3d   :  { %17396 = vmatprep.subr.bf16.mxu1 %v18606_v52 }
 0xe40   :  { %17397 = vmatpush3.bf16.msra.mxu1 %v18607_v44 }
 0xe41   :  { %17398 = vmatprep.subr.bf16.mxu1 %v18608_v1 }
 0xe44   :  { %17399 = vmatpush3.bf16.msra.mxu1 %v18609_v60 }
 0xe45   :  { %17400 = vmatprep.subr.bf16.mxu1 %v18610_v23 }
 0xe48   :  { %17401 = vmatpush3.bf16.msra.mxu1 %v18611_v5  ;;  %v14057_v5 = vrot.slane %v20306_v12, %v19911_v16 }
 0xe49   :  { %17402 = vmatprep.subr.bf16.mxu1 %v18612_v34  ;;  %v14061_v34 = vrot.slane %v20306_v12, %v19914_v27 }
 0xe4c   :  { %17403 = vmatpush3.bf16.msra.mxu1 %v18613_v6  ;;  %v14823_v6 = vadd.f32 %v20298_v50, %v14057_v5 }
 0xe4d   :  { %17404 = vmatprep.subr.bf16.mxu1 %v18614_v49 }
 0xe50   :  { %17405 = vmatpush3.bf16.msra.mxu1 %v18615_v14  ;;  %v14825_v14 = vadd.f32 %v20300_v24, %v14061_v34 }
 0xe51   :  { %17406 = vmatprep.subr.bf16.mxu1 %v18616_v17 }
 0xe54   :  { %17407 = vmatpush3.bf16.msra.mxu1 %v18617_v33 }
 0xeb7   :  { %v14781_v43 = vpop.f32.mrf.mxu1 }
 0xeb8   :  { %v14782_v59 = vadd.f32 %v14781_v43, %v14741_v62 }
 0xeb9   :  { %v14783_v0 = vpop.f32.mrf.mxu1 }
 0xeba   :  { %v14870_v38 = vrot.slane %v14782_v59, 4  ;;  %v14784_v26 = vadd.f32 %v14783_v0, %v14743_v39 }
 0xebb   :  { %v14785_v45 = vpop.f32.mrf.mxu1 }
 0xebc   :  { %v14871_v20 = vadd.f32 %v14870_v38, %v14782_v59  ;;  %v14876_v40 = vrot.slane %v14784_v26, 4 }
 0xebd   :  { %v14786_v30 = vpop.f32.mrf.mxu1 }
 0xebe   :  { %v14872_v22 = vrot.slane %v14871_v20, 2  ;;  %v14877_v29 = vadd.f32 %v14876_v40, %v14784_v26 }
 0xec0   :  { %v14873_v10 = vadd.f32 %v14872_v22, %v14871_v20  ;;  %v14878_v36 = vrot.slane %v14877_v29, 2 }
 0xec2   :  { %v14874_v48 = vrot.slane %v14873_v10, 1  ;;  %v14879_v57 = vadd.f32 %v14878_v36, %v14877_v29 }
 0xec4   :  { %v14875_v51 = vadd.f32 %v14874_v48, %v14873_v10  ;;  %v14880_v13 = vrot.slane %v14879_v57, 1 }
 0xec6   :  { %v14894_v21 = vmul.f32 0.125, %v14875_v51  ;;  %v14881_v63 = vadd.f32 %v14880_v13, %v14879_v57 }
 0xec8   :  { %v14898_v18 = vsub.f32 %v14782_v59, %v14894_v21  ;;  %v14895_v54 = vmul.f32 0.125, %v14881_v63 }
 0xeca   :  { %v14902_v58 = vmul.f32 %v14898_v18, %v14898_v18  ;;  %v14899_v28 = vsub.f32 %v14784_v26, %v14895_v54 }
 0xecc   :  { %v14906_v2 = vrot.slane %v14902_v58, 4  ;;  %v14903_v3 = vmul.f32 %v14899_v28, %v14899_v28 }
 0xece   :  { %v14907_v15 = vadd.f32 %v14906_v2, %v14902_v58  ;;  %v14912_v55 = vrot.slane %v14903_v3, 4 }
 0xed0   :  { %v14908_v7 = vrot.slane %v14907_v15, 2  ;;  %v14913_v32 = vadd.f32 %v14912_v55, %v14903_v3 }
 0xed2   :  { %v14909_v9 = vadd.f32 %v14908_v7, %v14907_v15  ;;  %v14914_v25 = vrot.slane %v14913_v32, 2 }
 0xed4   :  { %v14910_v61 = vrot.slane %v14909_v9, 1  ;;  %v14915_v47 = vadd.f32 %v14914_v25, %v14913_v32 }
 0xed6   :  { %v14911_v31 = vadd.f32 %v14910_v61, %v14909_v9  ;;  %v14916_v37 = vrot.slane %v14915_v47, 1 }
 0xed8   :  { %v14930_v11 = vmul.f32 0.125, %v14911_v31  ;;  %v14917_v8 = vadd.f32 %v14916_v37, %v14915_v47 }
 0xeda   :  { %v14934_v53 = vadd.f32 1e-05, %v14930_v11  ;;  %v14931_v42 = vmul.f32 0.125, %v14917_v8 }
 0xedc   :  { %18664 = vrsqrt.f32 %v14934_v53  ;;  %v14935_v41 = vadd.f32 1e-05, %v14931_v42 }
 0xede   :  { %18666 = vrsqrt.f32 %v14935_v41 }
 0xee9   :  { %v18665_v46 = vpop.eup %18664 }
 0xeea   :  { %v14942_v56 = vmul.f32 %v18665_v46, %v14898_v18 }
 0xeeb   :  { %v18667_v4 = vpop.eup %18666 }
 0xeec   :  { %v14943_v52 = vmul.f32 %v18667_v4, %v14899_v28  ;;  %v14946_v44 = vmax.f32 %v14942_v56, 0.0 }
 0xeee   :  { %v14947_v1 = vmax.f32 %v14943_v52, 0.0  ;;  %v14950_v23 = vpack.c.bf16 %v14946_v44, %v14946_v44 }
 0xef0   :  { %v14951_v60 = vpack.c.bf16 %v14947_v1, %v14947_v1 }
 0xef2   :  { %15249 = vmatprep.mubr.bf16.mxu0 %v14951_v60 }
 0xef3   :  { %15250 = vmatmul.mubr.bf16.vlgmr.msra.gmra.mxu0 %v14950_v23 }
 0xef7   :  { %v14863_v49 = vpop.f32.mrf.mxu1 }
 0xef8   :  { %v14864_v17 = vadd.f32 %v14863_v49, %v14823_v6 }
 0xef9   :  { %v14865_v33 = vpop.f32.mrf.mxu1 }
 0xefa   :  { %v14882_v19 = vrot.slane %v14864_v17, 4  ;;  %v14866_v35 = vadd.f32 %v14865_v33, %v14825_v14 }
 0xefb   :  { %v14867_v62 = vpop.f32.mrf.mxu1 }
 0xefc   :  { %v14883_v43 = vadd.f32 %v14882_v19, %v14864_v17  ;;  %v14888_v39 = vrot.slane %v14866_v35, 4 }
 0xefd   :  { %v14868_v59 = vpop.f32.mrf.mxu1 }
 0xefe   :  { %v14884_v0 = vrot.slane %v14883_v43, 2  ;;  %v14889_v16 = vadd.f32 %v14888_v39, %v14866_v35 }
 0xf00   :  { %v14885_v38 = vadd.f32 %v14884_v0, %v14883_v43  ;;  %v14890_v26 = vrot.slane %v14889_v16, 2 }
 0xf02   :  { %v14886_v45 = vrot.slane %v14885_v38, 1  ;;  %v14891_v20 = vadd.f32 %v14890_v26, %v14889_v16 }
 0xf04   :  { %v14887_v27 = vadd.f32 %v14886_v45, %v14885_v38  ;;  %v14892_v12 = vrot.slane %v14891_v20, 1 }
 0xf06   :  { %v14896_v50 = vmul.f32 0.125, %v14887_v27  ;;  %v14893_v40 = vadd.f32 %v14892_v12, %v14891_v20 }
 0xf08   :  { %v14900_v30 = vsub.f32 %v14864_v17, %v14896_v50  ;;  %v14897_v24 = vmul.f32 0.125, %v14893_v40 }
 0xf0a   :  { %v14904_v22 = vmul.f32 %v14900_v30, %v14900_v30  ;;  %v14901_v29 = vsub.f32 %v14866_v35, %v14897_v24 }
 0xf0c   :  { %v14918_v10 = vrot.slane %v14904_v22, 4  ;;  %v14905_v36 = vmul.f32 %v14901_v29, %v14901_v29 }
 0xf0e   :  { %v14919_v48 = vadd.f32 %v14918_v10, %v14904_v22  ;;  %v14924_v57 = vrot.slane %v14905_v36, 4 }
 0xf10   :  { %v14920_v51 = vrot.slane %v14919_v48, 2  ;;  %v14925_v13 = vadd.f32 %v14924_v57, %v14905_v36 }
 0xf12   :  { %v14921_v21 = vadd.f32 %v14920_v51, %v14919_v48  ;;  %v14926_v63 = vrot.slane %v14925_v13, 2 }
 0xf14   :  { %v14922_v18 = vrot.slane %v14921_v21, 1  ;;  %v14927_v54 = vadd.f32 %v14926_v63, %v14925_v13 }
 0xf16   :  { %v14923_v58 = vadd.f32 %v14922_v18, %v14921_v21  ;;  %v14928_v28 = vrot.slane %v14927_v54, 1 }
 0xf18   :  { %v14932_v2 = vmul.f32 0.125, %v14923_v58  ;;  %v14929_v3 = vadd.f32 %v14928_v28, %v14927_v54 }
 0xf1a   :  { %v14936_v15 = vadd.f32 1e-05, %v14932_v2  ;;  %v14933_v55 = vmul.f32 0.125, %v14929_v3 }
 0xf1c   :  { %18668 = vrsqrt.f32 %v14936_v15  ;;  %v14937_v7 = vadd.f32 1e-05, %v14933_v55 }
 0xf1e   :  { %18670 = vrsqrt.f32 %v14937_v7 }
 0xf29   :  { %v18669_v32 = vpop.eup %18668 }
 0xf2a   :  { %v14944_v9 = vmul.f32 %v18669_v32, %v14900_v30 }
 0xf2b   :  { %v18671_v25 = vpop.eup %18670 }
 0xf2c   :  { %v14945_v61 = vmul.f32 %v18671_v25, %v14901_v29  ;;  %v14948_v47 = vmax.f32 %v14944_v9, 0.0 }
 0xf2e   :  { %v14949_v31 = vmax.f32 %v14945_v61, 0.0  ;;  %v14952_v11 = vpack.c.bf16 %v14948_v47, %v14948_v47 }
 0xf30   :  { %v14953_v37 = vpack.c.bf16 %v14949_v31, %v14949_v31 }
 0xf32   :  { %15289 = vmatprep.mubr.bf16.mxu1 %v14953_v37 }
 0xf33   :  { %15290 = vmatmul.mubr.bf16.vlgmr.msra.gmra.mxu1 %v14952_v11 }
 0xf34   :  { %19387 = shalt.err (!%p19384_p11)
}
 0xf35   :  { %15311 = dma.vmem_to_hbm [thread:$0]  %s15309_s13, 512, %s19735_s10, [#allocation5]   ;;  %v17172_v56 = vld [vmem:[#allocation56] ss:$0 sm:$0xff] }
 0xf36   :  { %s19543_s5 = smov [#allocation58]  }
 0xf37   :  { %s15318_s6 = sshll.u32 %s19543_s5, 4  ;;  %s15319_s6 = int_to_ptr.vmem [resolvable:$true] %s15318_s6 }
 0xf38   :  { %s19396_s20 = scalar_lea.vmem %s15319_s6, 128  ;;  %p19401_p13 = scmp.lt.s32.totalorder %s15319_s6, %s15319_s6 }
 0xf39   :  { %p19397_p12 = scmp.ne.s32.totalorder %s15319_s6, %s19396_s20  ;;  %p19402_p0 = scmp.lt.s32.totalorder %s19396_s20, %s19396_s20 }
 0xf3b   :  { %p19403_p1 = por %p19402_p0, %p19401_p13 }
 0xf3d   :  { %p19404_p2 = pnand %p19403_p1, %p19397_p12 }
 0xfb3   :  { %v17386_v8 = vpop.f32.mrf.mxu0 }
 0xfb5   :  { %v17387_v53 = vpop.f32.mrf.mxu0 }
 0xfb6   :  { %v17388_v46 = vadd.f32 %v17387_v53, %v17386_v8 }
 0xfb7   :  { %v17389_v42 = vpop.f32.mrf.mxu0 }
 0xfb8   :  { %v15252_v44 = vadd.f32 %v17388_v46, %v17172_v56 }
 0xfb9   :  { %v17390_v41 = vpop.f32.mrf.mxu0 }
 0xff3   :  { %v17408_v4 = vpop.f32.mrf.mxu1 }
 0xff5   :  { %v17409_v52 = vpop.f32.mrf.mxu1 }
 0xff6   :  { %v17410_v1 = vadd.f32 %v17409_v52, %v17408_v4 }
 0xff7   :  { %v17411_v60 = vpop.f32.mrf.mxu1 }
 0xff8   :  { %v15292_v23 = vadd.f32 %v17410_v1, %v15252_v44 }
 0xff9   :  { %v17412_v5 = vpop.f32.mrf.mxu1 }
 0xffa   :  { %15301 = vst [vmem:[#allocation58] sm:$0xff] %v15292_v23 }
 0xffb   :  { %19407 = shalt.err (!%p19404_p2)
}
 0xffc   :  { %15321 = dma.vmem_to_hbm [thread:$0]  %s15319_s6, 128, %s19740_s15, [#allocation59]  }
 0xffd   :  { %19452 = dma.done.wait [#allocation5], 512  }
 0xffe   :  { %19453 = vsyncadd [#allocation5], 4294966784 }
 0xfff   :  { %19454 = dma.done.wait [#allocation59], 128  }
0x1000   :  { %19455 = vsyncadd [#allocation59], 4294967168 }
0x1001   :  { %15328 = vsyncpa [#allocation4], 1 }
0x1002   :  { %15329 = vsyncpa [#allocation7], 1 }
0x1003   :  { %15330 = vsyncpa [#allocation10], 1 }
0x1004   :  { %15331 = vsyncpa [#allocation13], 1 }
0x1005   :  { %15332 = vsyncpa [#allocation16], 1 }
0x1006   :  { %15333 = vsyncpa [#allocation19], 1 }
0x1007   :  { %15334 = vsyncpa [#allocation22], 1 }
0x1008   :  { %15335 = vsyncpa [#allocation25], 1 }
0x1009   :  { %15336 = vsyncpa [#allocation28], 1 }
0x100a   :  { %15337 = vsyncpa [#allocation31], 1 }
0x100b   :  { %15338 = vsyncpa [#allocation34], 1 }
0x100c   :  { %15339 = vsyncpa [#allocation37], 1 }
0x100d   :  { %15340 = vsyncpa [#allocation40], 1 }
0x100e   :  { %15341 = vsyncpa [#allocation43], 1 }
0x100f   :  { %15342 = vsyncpa [#allocation46], 1 }
0x1010   :  { %15343 = vsyncpa [#allocation49], 1 }
0x1011   :  { %15344 = vsyncpa [#allocation52], 1 }
0x1012   :  { %15345 = vsyncpa [#allocation55], 1 }
0x1013   :  { %15346 = vsyncpa [#allocation5], 1 }
0x1014   :  { %15347 = vsyncpa [#allocation59], 1 }

</bundles_post_ra>
